<compile_context>
chip_gen: v7x
topology: tpu7x:2x2x1
jax: 0.10.0
libtpu: 0.0.40
codegen_flags: <defaults>
</compile_context>

<pallas_src>
import functools

import jax
import jax.numpy as jnp
import numpy as np
from jax.experimental import pallas as pl
from jax.experimental.pallas import tpu as pltpu


# ----------------------------------------------------------------------------
# Tile choosers
# ----------------------------------------------------------------------------
def _choose_tile_m(M):
    for tm in (1024, 512, 256, 128, 64, 32, 16, 8):
        if M % tm == 0:
            return tm
    return M


def _choose_tile_k(K):
    # Prefer big K tiles (per-grid-step overhead dominates the ~20 ns of
    # per-step compute here) while keeping >= 2 steps so the weight-tile DMA
    # can double-buffer against the matmul.
    for tk in (2048, 1024, 512, 256, 128):
        if K % tk == 0 and K // tk >= 2:
            return tk
    return K


# ----------------------------------------------------------------------------
# Pallas kernels
# ----------------------------------------------------------------------------
def _conv_lrelu_kernel(x_ref, w_ref, o_ref):
    """Layer-1 conv as a plain im2col matmul tile + fused LeakyReLU(0.2)."""
    y = jnp.dot(x_ref[...], w_ref[...], preferred_element_type=jnp.float32)
    o_ref[...] = jnp.where(y >= 0.0, y, 0.2 * y).astype(o_ref.dtype)


def _conv_bn_lrelu_kernel(x_ref, w_ref, g_ref, b_ref, o_ref, acc_ref, *,
                          inv_m, eps):
    """Conv (im2col matmul, fp32 K-accumulation over the grid) with a fused
    BatchNorm(batch stats) + LeakyReLU(0.2) epilogue on the last K step.

    The whole M dimension lives in one block, so mean/var are computed from
    the resident fp32 accumulator with a two-pass (subtract-mean) variance.

    NOTE: pl.program_id / pl.num_programs are only called at the TOP LEVEL of
    the kernel body (calling them inside a @pl.when body breaks interpret-mode
    lowering).
    """
    k = pl.program_id(0)
    nk = pl.num_programs(0)

    @pl.when(k == 0)
    def _():
        acc_ref[...] = jnp.zeros_like(acc_ref)

    acc_ref[...] += jnp.dot(x_ref[...], w_ref[...],
                            preferred_element_type=jnp.float32)

    @pl.when(k == nk - 1)
    def _():
        y = acc_ref[...]                                       # (M, Nc) fp32
        mean = jnp.sum(y, axis=0, keepdims=True) * inv_m
        c = y - mean
        var = jnp.sum(c * c, axis=0, keepdims=True) * inv_m    # biased var
        scale = g_ref[...] * jax.lax.rsqrt(var + eps)
        yn = c * scale + b_ref[...]
        o_ref[...] = jnp.where(yn >= 0.0, yn, 0.2 * yn).astype(o_ref.dtype)


# ----------------------------------------------------------------------------
# Pallas wrappers
# ----------------------------------------------------------------------------
def conv_lrelu(x_mat, w_mat, *, out_dtype=jnp.bfloat16):
    """(M,K)@(K,Cout) + LeakyReLU, tiled over M only (K is tiny for layer 1)."""
    M, K = x_mat.shape
    K2, Nc = w_mat.shape
    assert K == K2
    tm = _choose_tile_m(M)
    return pl.pallas_call(
        _conv_lrelu_kernel,
        out_shape=jax.ShapeDtypeStruct((M, Nc), out_dtype),
        grid_spec=pltpu.PrefetchScalarGridSpec(
            num_scalar_prefetch=0,
            grid=(M // tm,),
            in_specs=[
                pl.BlockSpec((tm, K), lambda i: (i, 0)),
                pl.BlockSpec((K, Nc), lambda i: (0, 0)),
            ],
            out_specs=pl.BlockSpec((tm, Nc), lambda i: (i, 0)),
        ),
        compiler_params=pltpu.CompilerParams(
            dimension_semantics=("parallel",)),
    )(x_mat, w_mat)


def conv_bn_lrelu(x_mat, w_mat, gamma, beta, *, eps=1e-5,
                  out_dtype=jnp.bfloat16):
    """(M,K)@(K,Cout) with fused training-mode BatchNorm + LeakyReLU(0.2).

    Grid is over K only; the (M, Cout) fp32 accumulator stays resident in
    VMEM scratch across K steps and the bf16 result is written once.
    """
    M, K = x_mat.shape
    K2, Nc = w_mat.shape
    assert K == K2
    tk = _choose_tile_k(K)
    nk = K // tk

    kernel = functools.partial(_conv_bn_lrelu_kernel,
                               inv_m=1.0 / float(M), eps=eps)
    chan_spec = pl.BlockSpec((1, Nc), lambda k: (0, 0))

    return pl.pallas_call(
        kernel,
        out_shape=jax.ShapeDtypeStruct((M, Nc), out_dtype),
        grid_spec=pltpu.PrefetchScalarGridSpec(
            num_scalar_prefetch=0,
            grid=(nk,),
            in_specs=[
                pl.BlockSpec((M, tk), lambda k: (0, k)),
                pl.BlockSpec((tk, Nc), lambda k: (k, 0)),
                chan_spec, chan_spec,
            ],
            out_specs=pl.BlockSpec((M, Nc), lambda k: (0, 0)),
            scratch_shapes=[pltpu.VMEM((M, Nc), jnp.float32)],
        ),
        compiler_params=pltpu.CompilerParams(
            dimension_semantics=("arbitrary",)),
    )(x_mat, w_mat, gamma, beta)


# ----------------------------------------------------------------------------
# JAX glue: NHWC im2col (static python loop over the 4x4 window)
# ----------------------------------------------------------------------------
def im2col_nhwc(x, k, stride, pad):
    """x: (N, H, W, C) -> patches (N*Ho*Wo, k*k*C), K ordered (kh, kw, cin)
    to match the pre-transposed (kh*kw*Cin, Cout) weight layout."""
    N, H, W, C = x.shape
    if pad:
        x = jnp.pad(x, ((0, 0), (pad, pad), (pad, pad), (0, 0)))
    Ho = (H + 2 * pad - k) // stride + 1
    Wo = (W + 2 * pad - k) // stride + 1
    cols = []
    for di in range(k):
        for dj in range(k):
            cols.append(x[:, di:di + stride * Ho:stride,
                          dj:dj + stride * Wo:stride, :])
    p = jnp.stack(cols, axis=3)                  # (N, Ho, Wo, k*k, C)
    p = p.reshape(N * Ho * Wo, k * k * C)
    return p, Ho, Wo


# ----------------------------------------------------------------------------
# One-time parameter preparation (hoisted out of the forward pass)
# ----------------------------------------------------------------------------
def prepare_params(params):
    """OIHW fp32 conv weights -> (kh*kw*Cin, Cout) bf16 matmul weights;
    BN gamma/beta -> (1, C) fp32 rows."""
    prep = {}
    for i in range(1, 6):
        w = params[f"w{i}"]                                   # (Cout,Cin,kh,kw)
        w = jnp.transpose(w, (2, 3, 1, 0)).reshape(-1, w.shape[0])
        prep[f"w{i}"] = w.astype(jnp.bfloat16)
    for i in (2, 3, 4):
        prep[f"g{i}"] = params[f"g{i}"].reshape(1, -1).astype(jnp.float32)
        prep[f"b{i}"] = params[f"b{i}"].reshape(1, -1).astype(jnp.float32)
    return prep


# ----------------------------------------------------------------------------
# Discriminator forward pass
# ----------------------------------------------------------------------------
def discriminator_forward(x, prep):
    """x: (N, C, H, W) fp32; prep: output of prepare_params."""
    N = x.shape[0]

    # NCHW -> NHWC once; bf16 activations for the MXU.
    h = jnp.transpose(x, (0, 2, 3, 1)).astype(jnp.bfloat16)

    # layer 1: conv(3 -> 64, k4 s2 p1) + LeakyReLU(0.2)   (no BN)
    p, Ho, Wo = im2col_nhwc(h, 4, 2, 1)
    y = conv_lrelu(p, prep["w1"])
    h = y.reshape(N, Ho, Wo, -1)

    # layers 2-4: conv + fused BatchNorm2d(batch stats) + LeakyReLU, bf16 out
    for idx in (2, 3, 4):
        p, Ho, Wo = im2col_nhwc(h, 4, 2, 1)
        y = conv_bn_lrelu(p, prep[f"w{idx}"], prep[f"g{idx}"], prep[f"b{idx}"],
                          eps=1e-5)
        h = y.reshape(N, Ho, Wo, -1)

    # layer 5: conv(512 -> 1, k4 s1 p0) + Sigmoid.
    # (M=2, K=8192, Cout=1) is too skinny for the MXU / pallas_call overhead,
    # so it stays in plain JAX per the performance review.
    p, Ho, Wo = im2col_nhwc(h, 4, 1, 0)
    logits = jnp.dot(p, prep["w5"], preferred_element_type=jnp.float32)
    out = jax.nn.sigmoid(logits)
    return out.reshape(N, -1)                    # view(N, -1) => (N, 1)


# ----------------------------------------------------------------------------
# Pure-JAX reference (for correctness check)
# ----------------------------------------------------------------------------
def reference_forward(x, params):
    def conv(x, w, stride, pad):
        return jax.lax.conv_general_dilated(
            x, w, window_strides=(stride, stride),
            padding=[(pad, pad), (pad, pad)],
            dimension_numbers=("NCHW", "OIHW", "NCHW"),
            precision=jax.lax.Precision.HIGHEST)

    def bn(x, gamma, beta):
        mean = x.mean(axis=(0, 2, 3), keepdims=True)
        var = x.var(axis=(0, 2, 3), keepdims=True)
        return ((x - mean) / jnp.sqrt(var + 1e-5)
                * gamma[None, :, None, None] + beta[None, :, None, None])

    def lrelu(v):
        return jnp.where(v >= 0, v, 0.2 * v)

    y = lrelu(conv(x, params["w1"], 2, 1))
    for i in (2, 3, 4):
        y = lrelu(bn(conv(y, params[f"w{i}"], 2, 1),
                     params[f"g{i}"], params[f"b{i}"]))
    y = jax.nn.sigmoid(conv(y, params["w5"], 1, 0))
    return y.reshape(y.shape[0], -1)


# ----------------------------------------------------------------------------
if __name__ == "__main__":
    key = jax.random.PRNGKey(0)
    keys = jax.random.split(key, 9)

    in_size = (3, 64, 64)   # smallest spatial size compatible with the stack
    N = 2

    # Deterministic init matching the module's __init__:
    #   conv weights ~ N(0, 0.02); BN gamma ~ N(1, 0.02); BN beta = 0.
    params = {
        "w1": 0.02 * jax.random.normal(keys[0], (64, 3, 4, 4), jnp.float32),
        "w2": 0.02 * jax.random.normal(keys[1], (128, 64, 4, 4), jnp.float32),
        "w3": 0.02 * jax.random.normal(keys[2], (256, 128, 4, 4), jnp.float32),
        "w4": 0.02 * jax.random.normal(keys[3], (512, 256, 4, 4), jnp.float32),
        "w5": 0.02 * jax.random.normal(keys[4], (1, 512, 4, 4), jnp.float32),
        "g2": 1.0 + 0.02 * jax.random.normal(keys[5], (128,), jnp.float32),
        "g3": 1.0 + 0.02 * jax.random.normal(keys[6], (256,), jnp.float32),
        "g4": 1.0 + 0.02 * jax.random.normal(keys[7], (512,), jnp.float32),
        "b2": jnp.zeros((128,), jnp.float32),
        "b3": jnp.zeros((256,), jnp.float32),
        "b4": jnp.zeros((512,), jnp.float32),
    }

    x = jax.random.normal(keys[8], (N,) + in_size, jnp.float32)

    prep = prepare_params(params)           # one-time weight repack (hoisted)
    fwd = jax.jit(discriminator_forward)

    out = jax.block_until_ready(fwd(x, prep))
    assert out.shape == (N, 1), out.shape

    ref = jax.block_until_ready(reference_forward(x, params))
    np.testing.assert_allclose(np.asarray(out, dtype=np.float32),
                               np.asarray(ref, dtype=np.float32),
                               atol=3e-2, rtol=3e-2)

    print("KERNEL_OK")
</pallas_src>

<mosaic_0001>
module attributes {stable_mosaic.version = 11 : i64} {
  func.func @_conv_lrelu_kernel(%arg0: i32, %arg1: memref<1024x48xbf16, #tpu.memory_space<vmem>>, %arg2: memref<48x64xbf16, #tpu.memory_space<vmem>>, %arg3: memref<1024x64xbf16, #tpu.memory_space<vmem>>) attributes {dimension_semantics = [#tpu.dimension_semantics<parallel>], iteration_bounds = array<i64: 2>, scalar_prefetch = 0 : i64, scratch_operands = 0 : i64, tpu.core_type = #tpu.core_type<tc>, window_params = [{transform_indices = @transform_0, window_bounds = array<i64: 1024, 48>}, {pipeline_mode = #tpu.pipeline_mode<synchronous>, transform_indices = @transform_1, window_bounds = array<i64: 48, 64>}, {transform_indices = @transform_2, window_bounds = array<i64: 1024, 64>}]} {
    %c0 = arith.constant 0 : index
    %c0_0 = arith.constant 0 : index
    %0 = vector.load %arg1[%c0, %c0_0] : memref<1024x48xbf16, #tpu.memory_space<vmem>>, vector<1024x48xbf16>
    %c0_1 = arith.constant 0 : index
    %c0_2 = arith.constant 0 : index
    %1 = vector.load %arg2[%c0_1, %c0_2] : memref<48x64xbf16, #tpu.memory_space<vmem>>, vector<48x64xbf16>
    %cst = arith.constant dense<0.000000e+00> : vector<1024x64xf32>
    %2 = tpu.matmul %0, %1, %cst {dimension_numbers = #tpu.dot_dimension_numbers<[1], [0], [0], [1], [0, 0, 1, 1], [], []>} : vector<1024x48xbf16>, vector<48x64xbf16>, vector<1024x64xf32> -> vector<1024x64xf32>
    %cst_3 = arith.constant 0.000000e+00 : f32
    %3 = vector.broadcast %cst_3 : f32 to vector<1024x64xf32>
    %4 = arith.cmpf oge, %2, %3 : vector<1024x64xf32>
    %cst_4 = arith.constant 2.000000e-01 : f32
    %5 = vector.broadcast %cst_4 : f32 to vector<1024x64xf32>
    %6 = arith.mulf %5, %2 : vector<1024x64xf32>
    %7 = arith.select %4, %2, %6 : vector<1024x64xi1>, vector<1024x64xf32>
    %8 = arith.truncf %7 : vector<1024x64xf32> to vector<1024x64xbf16>
    %c0_5 = arith.constant 0 : index
    %c0_6 = arith.constant 0 : index
    %9 = vector.load %arg3[%c0_5, %c0_6] : memref<1024x64xbf16, #tpu.memory_space<vmem>>, vector<1024x64xbf16>
    tpu.vector_store %arg3[%c0_5, %c0_6], %8 {strides = array<i32>} : memref<1024x64xbf16, #tpu.memory_space<vmem>>, vector<1024x64xbf16>,
    return
  }
  func.func @transform_0(%arg0: i32) -> (i32, i32) {
    %c0_i32 = arith.constant 0 : i32
    %c0_i32_0 = arith.constant 0 : i32
    return %arg0, %c0_i32 : i32, i32
  }
  func.func @transform_1(%arg0: i32) -> (i32, i32) {
    %c0_i32 = arith.constant 0 : i32
    %c0_i32_0 = arith.constant 0 : i32
    %c0_i32_1 = arith.constant 0 : i32
    return %c0_i32, %c0_i32_0 : i32, i32
  }
  func.func @transform_2(%arg0: i32) -> (i32, i32) {
    %c0_i32 = arith.constant 0 : i32
    %c0_i32_0 = arith.constant 0 : i32
    return %arg0, %c0_i32 : i32, i32
  }
}

module attributes {stable_mosaic.version = 11 : i64} {
  func.func @_conv_bn_lrelu_kernel(%arg0: i32, %arg1: memref<512x512xbf16, #tpu.memory_space<vmem>>, %arg2: memref<512x128xbf16, #tpu.memory_space<vmem>>, %arg3: memref<1x128xf32, #tpu.memory_space<vmem>>, %arg4: memref<1x128xf32, #tpu.memory_space<vmem>>, %arg5: memref<512x128xbf16, #tpu.memory_space<vmem>>, %arg6: memref<512x128xf32, #tpu.memory_space<vmem>>) attributes {dimension_semantics = [#tpu.dimension_semantics<arbitrary>], iteration_bounds = array<i64: 2>, scalar_prefetch = 0 : i64, scratch_operands = 1 : i64, tpu.core_type = #tpu.core_type<tc>, window_params = [{transform_indices = @transform_0, window_bounds = array<i64: 512, 512>}, {transform_indices = @transform_1, window_bounds = array<i64: 512, 128>}, {pipeline_mode = #tpu.pipeline_mode<synchronous>, transform_indices = @transform_2, window_bounds = array<i64: 1, 128>}, {pipeline_mode = #tpu.pipeline_mode<synchronous>, transform_indices = @transform_3, window_bounds = array<i64: 1, 128>}, {pipeline_mode = #tpu.pipeline_mode<synchronous>, transform_indices = @transform_4, window_bounds = array<i64: 512, 128>}]} {
    %c0_i32 = arith.constant 0 : i32
    %0 = arith.cmpi eq, %arg0, %c0_i32 : i32
    %1 = arith.extui %0 : i1 to i32
    %c0_i32_0 = arith.constant 0 : i32
    %2 = arith.cmpi ne, %1, %c0_i32_0 : i32
    scf.if %2 {
      %cst_9 = arith.constant 0.000000e+00 : f32
      %12 = vector.broadcast %cst_9 : f32 to vector<512x128xf32>
      %c0_10 = arith.constant 0 : index
      %c0_11 = arith.constant 0 : index
      %13 = vector.load %arg6[%c0_10, %c0_11] : memref<512x128xf32, #tpu.memory_space<vmem>>, vector<512x128xf32>
      tpu.vector_store %arg6[%c0_10, %c0_11], %12 {strides = array<i32>} : memref<512x128xf32, #tpu.memory_space<vmem>>, vector<512x128xf32>,
    } else {
    }
    %c0 = arith.constant 0 : index
    %c0_1 = arith.constant 0 : index
    %3 = vector.load %arg6[%c0, %c0_1] : memref<512x128xf32, #tpu.memory_space<vmem>>, vector<512x128xf32>
    %c0_2 = arith.constant 0 : index
    %c0_3 = arith.constant 0 : index
    %4 = vector.load %arg1[%c0_2, %c0_3] : memref<512x512xbf16, #tpu.memory_space<vmem>>, vector<512x512xbf16>
    %c0_4 = arith.constant 0 : index
    %c0_5 = arith.constant 0 : index
    %5 = vector.load %arg2[%c0_4, %c0_5] : memref<512x128xbf16, #tpu.memory_space<vmem>>, vector<512x128xbf16>
    %cst = arith.constant dense<0.000000e+00> : vector<512x128xf32>
    %6 = tpu.matmul %4, %5, %cst {dimension_numbers = #tpu.dot_dimension_numbers<[1], [0], [0], [1], [0, 0, 1, 1], [], []>} : vector<512x512xbf16>, vector<512x128xbf16>, vector<512x128xf32> -> vector<512x128xf32>
    %7 = arith.addf %3, %6 : vector<512x128xf32>
    %c0_6 = arith.constant 0 : index
    %c0_7 = arith.constant 0 : index
    %8 = vector.load %arg6[%c0_6, %c0_7] : memref<512x128xf32, #tpu.memory_space<vmem>>, vector<512x128xf32>
    tpu.vector_store %arg6[%c0_6, %c0_7], %7 {strides = array<i32>} : memref<512x128xf32, #tpu.memory_space<vmem>>, vector<512x128xf32>,
    %c1_i32 = arith.constant 1 : i32
    %9 = arith.cmpi eq, %arg0, %c1_i32 : i32
    %10 = arith.extui %9 : i1 to i32
    %c0_i32_8 = arith.constant 0 : i32
    %11 = arith.cmpi ne, %10, %c0_i32_8 : i32
    scf.if %11 {
      %c0_9 = arith.constant 0 : index
      %c0_10 = arith.constant 0 : index
      %12 = vector.load %arg6[%c0_9, %c0_10] : memref<512x128xf32, #tpu.memory_space<vmem>>, vector<512x128xf32>
      %cst_11 = arith.constant dense<0.000000e+00> : vector<128xf32>
      %13 = vector.multi_reduction <add>, %12, %cst_11 [0] : vector<512x128xf32> to vector<128xf32>
      %14 = vector.shape_cast %13 : vector<128xf32> to vector<1x128xf32>
      %cst_12 = arith.constant 0.001953125 : f32
      %15 = vector.broadcast %cst_12 : f32 to vector<1x128xf32>
      %16 = arith.mulf %14, %15 : vector<1x128xf32>
      %17 = vector.broadcast %16 : vector<1x128xf32> to vector<512x128xf32>
      %18 = arith.subf %12, %17 : vector<512x128xf32>
      %19 = arith.mulf %18, %18 : vector<512x128xf32>
      %cst_13 = arith.constant dense<0.000000e+00> : vector<128xf32>
      %20 = vector.multi_reduction <add>, %19, %cst_13 [0] : vector<512x128xf32> to vector<128xf32>
      %21 = vector.shape_cast %20 : vector<128xf32> to vector<1x128xf32>
      %cst_14 = arith.constant 0.001953125 : f32
      %22 = vector.broadcast %cst_14 : f32 to vector<1x128xf32>
      %23 = arith.mulf %21, %22 : vector<1x128xf32>
      %c0_15 = arith.constant 0 : index
      %c0_16 = arith.constant 0 : index
      %24 = vector.load %arg3[%c0_15, %c0_16] : memref<1x128xf32, #tpu.memory_space<vmem>>, vector<1x128xf32>
      %cst_17 = arith.constant 9.99999974E-6 : f32
      %25 = vector.broadcast %cst_17 : f32 to vector<1x128xf32>
      %26 = arith.addf %23, %25 : vector<1x128xf32>
      %27 = math.rsqrt %26 : vector<1x128xf32>
      %28 = arith.mulf %24, %27 : vector<1x128xf32>
      %29 = vector.broadcast %28 : vector<1x128xf32> to vector<512x128xf32>
      %30 = arith.mulf %18, %29 : vector<512x128xf32>
      %c0_18 = arith.constant 0 : index
      %c0_19 = arith.constant 0 : index
      %31 = vector.load %arg4[%c0_18, %c0_19] : memref<1x128xf32, #tpu.memory_space<vmem>>, vector<1x128xf32>
      %32 = vector.broadcast %31 : vector<1x128xf32> to vector<512x128xf32>
      %33 = arith.addf %30, %32 : vector<512x128xf32>
      %cst_20 = arith.constant 0.000000e+00 : f32
      %34 = vector.broadcast %cst_20 : f32 to vector<512x128xf32>
      %35 = arith.cmpf oge, %33, %34 : vector<512x128xf32>
      %cst_21 = arith.constant 2.000000e-01 : f32
      %36 = vector.broadcast %cst_21 : f32 to vector<512x128xf32>
      %37 = arith.mulf %36, %33 : vector<512x128xf32>
      %38 = arith.select %35, %33, %37 : vector<512x128xi1>, vector<512x128xf32>
      %39 = arith.truncf %38 : vector<512x128xf32> to vector<512x128xbf16>
      %c0_22 = arith.constant 0 : index
      %c0_23 = arith.constant 0 : index
      %40 = vector.load %arg5[%c0_22, %c0_23] : memref<512x128xbf16, #tpu.memory_space<vmem>>, vector<512x128xbf16>
      tpu.vector_store %arg5[%c0_22, %c0_23], %39 {strides = array<i32>} : memref<512x128xbf16, #tpu.memory_space<vmem>>, vector<512x128xbf16>,
    } else {
    }
    return
  }
  func.func @transform_0(%arg0: i32) -> (i32, i32) {
    %c0_i32 = arith.constant 0 : i32
    %c0_i32_0 = arith.constant 0 : i32
    return %c0_i32, %arg0 : i32, i32
  }
  func.func @transform_1(%arg0: i32) -> (i32, i32) {
    %c0_i32 = arith.constant 0 : i32
    %c0_i32_0 = arith.constant 0 : i32
    return %arg0, %c0_i32 : i32, i32
  }
  func.func @transform_2(%arg0: i32) -> (i32, i32) {
    %c0_i32 = arith.constant 0 : i32
    %c0_i32_0 = arith.constant 0 : i32
    %c0_i32_1 = arith.constant 0 : i32
    return %c0_i32, %c0_i32_0 : i32, i32
  }
  func.func @transform_3(%arg0: i32) -> (i32, i32) {
    %c0_i32 = arith.constant 0 : i32
    %c0_i32_0 = arith.constant 0 : i32
    %c0_i32_1 = arith.constant 0 : i32
    return %c0_i32, %c0_i32_0 : i32, i32
  }
  func.func @transform_4(%arg0: i32) -> (i32, i32) {
    %c0_i32 = arith.constant 0 : i32
    %c0_i32_0 = arith.constant 0 : i32
    %c0_i32_1 = arith.constant 0 : i32
    return %c0_i32, %c0_i32_0 : i32, i32
  }
}

module attributes {stable_mosaic.version = 11 : i64} {
  func.func @_conv_bn_lrelu_kernel(%arg0: i32, %arg1: memref<128x1024xbf16, #tpu.memory_space<vmem>>, %arg2: memref<1024x256xbf16, #tpu.memory_space<vmem>>, %arg3: memref<1x256xf32, #tpu.memory_space<vmem>>, %arg4: memref<1x256xf32, #tpu.memory_space<vmem>>, %arg5: memref<128x256xbf16, #tpu.memory_space<vmem>>, %arg6: memref<128x256xf32, #tpu.memory_space<vmem>>) attributes {dimension_semantics = [#tpu.dimension_semantics<arbitrary>], iteration_bounds = array<i64: 2>, scalar_prefetch = 0 : i64, scratch_operands = 1 : i64, tpu.core_type = #tpu.core_type<tc>, window_params = [{transform_indices = @transform_0, window_bounds = array<i64: 128, 1024>}, {transform_indices = @transform_1, window_bounds = array<i64: 1024, 256>}, {pipeline_mode = #tpu.pipeline_mode<synchronous>, transform_indices = @transform_2, window_bounds = array<i64: 1, 256>}, {pipeline_mode = #tpu.pipeline_mode<synchronous>, transform_indices = @transform_3, window_bounds = array<i64: 1, 256>}, {pipeline_mode = #tpu.pipeline_mode<synchronous>, transform_indices = @transform_4, window_bounds = array<i64: 128, 256>}]} {
    %c0_i32 = arith.constant 0 : i32
    %0 = arith.cmpi eq, %arg0, %c0_i32 : i32
    %1 = arith.extui %0 : i1 to i32
    %c0_i32_0 = arith.constant 0 : i32
    %2 = arith.cmpi ne, %1, %c0_i32_0 : i32
    scf.if %2 {
      %cst_9 = arith.constant 0.000000e+00 : f32
      %12 = vector.broadcast %cst_9 : f32 to vector<128x256xf32>
      %c0_10 = arith.constant 0 : index
      %c0_11 = arith.constant 0 : index
      %13 = vector.load %arg6[%c0_10, %c0_11] : memref<128x256xf32, #tpu.memory_space<vmem>>, vector<128x256xf32>
      tpu.vector_store %arg6[%c0_10, %c0_11], %12 {strides = array<i32>} : memref<128x256xf32, #tpu.memory_space<vmem>>, vector<128x256xf32>,
    } else {
    }
    %c0 = arith.constant 0 : index
    %c0_1 = arith.constant 0 : index
    %3 = vector.load %arg6[%c0, %c0_1] : memref<128x256xf32, #tpu.memory_space<vmem>>, vector<128x256xf32>
    %c0_2 = arith.constant 0 : index
    %c0_3 = arith.constant 0 : index
    %4 = vector.load %arg1[%c0_2, %c0_3] : memref<128x1024xbf16, #tpu.memory_space<vmem>>, vector<128x1024xbf16>
    %c0_4 = arith.constant 0 : index
    %c0_5 = arith.constant 0 : index
    %5 = vector.load %arg2[%c0_4, %c0_5] : memref<1024x256xbf16, #tpu.memory_space<vmem>>, vector<1024x256xbf16>
    %cst = arith.constant dense<0.000000e+00> : vector<128x256xf32>
    %6 = tpu.matmul %4, %5, %cst {dimension_numbers = #tpu.dot_dimension_numbers<[1], [0], [0], [1], [0, 0, 1, 1], [], []>} : vector<128x1024xbf16>, vector<1024x256xbf16>, vector<128x256xf32> -> vector<128x256xf32>
    %7 = arith.addf %3, %6 : vector<128x256xf32>
    %c0_6 = arith.constant 0 : index
    %c0_7 = arith.constant 0 : index
    %8 = vector.load %arg6[%c0_6, %c0_7] : memref<128x256xf32, #tpu.memory_space<vmem>>, vector<128x256xf32>
    tpu.vector_store %arg6[%c0_6, %c0_7], %7 {strides = array<i32>} : memref<128x256xf32, #tpu.memory_space<vmem>>, vector<128x256xf32>,
    %c1_i32 = arith.constant 1 : i32
    %9 = arith.cmpi eq, %arg0, %c1_i32 : i32
    %10 = arith.extui %9 : i1 to i32
    %c0_i32_8 = arith.constant 0 : i32
    %11 = arith.cmpi ne, %10, %c0_i32_8 : i32
    scf.if %11 {
      %c0_9 = arith.constant 0 : index
      %c0_10 = arith.constant 0 : index
      %12 = vector.load %arg6[%c0_9, %c0_10] : memref<128x256xf32, #tpu.memory_space<vmem>>, vector<128x256xf32>
      %cst_11 = arith.constant dense<0.000000e+00> : vector<256xf32>
      %13 = vector.multi_reduction <add>, %12, %cst_11 [0] : vector<128x256xf32> to vector<256xf32>
      %14 = vector.shape_cast %13 : vector<256xf32> to vector<1x256xf32>
      %cst_12 = arith.constant 7.812500e-03 : f32
      %15 = vector.broadcast %cst_12 : f32 to vector<1x256xf32>
      %16 = arith.mulf %14, %15 : vector<1x256xf32>
      %17 = vector.broadcast %16 : vector<1x256xf32> to vector<128x256xf32>
      %18 = arith.subf %12, %17 : vector<128x256xf32>
      %19 = arith.mulf %18, %18 : vector<128x256xf32>
      %cst_13 = arith.constant dense<0.000000e+00> : vector<256xf32>
      %20 = vector.multi_reduction <add>, %19, %cst_13 [0] : vector<128x256xf32> to vector<256xf32>
      %21 = vector.shape_cast %20 : vector<256xf32> to vector<1x256xf32>
      %cst_14 = arith.constant 7.812500e-03 : f32
      %22 = vector.broadcast %cst_14 : f32 to vector<1x256xf32>
      %23 = arith.mulf %21, %22 : vector<1x256xf32>
      %c0_15 = arith.constant 0 : index
      %c0_16 = arith.constant 0 : index
      %24 = vector.load %arg3[%c0_15, %c0_16] : memref<1x256xf32, #tpu.memory_space<vmem>>, vector<1x256xf32>
      %cst_17 = arith.constant 9.99999974E-6 : f32
      %25 = vector.broadcast %cst_17 : f32 to vector<1x256xf32>
      %26 = arith.addf %23, %25 : vector<1x256xf32>
      %27 = math.rsqrt %26 : vector<1x256xf32>
      %28 = arith.mulf %24, %27 : vector<1x256xf32>
      %29 = vector.broadcast %28 : vector<1x256xf32> to vector<128x256xf32>
      %30 = arith.mulf %18, %29 : vector<128x256xf32>
      %c0_18 = arith.constant 0 : index
      %c0_19 = arith.constant 0 : index
      %31 = vector.load %arg4[%c0_18, %c0_19] : memref<1x256xf32, #tpu.memory_space<vmem>>, vector<1x256xf32>
      %32 = vector.broadcast %31 : vector<1x256xf32> to vector<128x256xf32>
      %33 = arith.addf %30, %32 : vector<128x256xf32>
      %cst_20 = arith.constant 0.000000e+00 : f32
      %34 = vector.broadcast %cst_20 : f32 to vector<128x256xf32>
      %35 = arith.cmpf oge, %33, %34 : vector<128x256xf32>
      %cst_21 = arith.constant 2.000000e-01 : f32
      %36 = vector.broadcast %cst_21 : f32 to vector<128x256xf32>
      %37 = arith.mulf %36, %33 : vector<128x256xf32>
      %38 = arith.select %35, %33, %37 : vector<128x256xi1>, vector<128x256xf32>
      %39 = arith.truncf %38 : vector<128x256xf32> to vector<128x256xbf16>
      %c0_22 = arith.constant 0 : index
      %c0_23 = arith.constant 0 : index
      %40 = vector.load %arg5[%c0_22, %c0_23] : memref<128x256xbf16, #tpu.memory_space<vmem>>, vector<128x256xbf16>
      tpu.vector_store %arg5[%c0_22, %c0_23], %39 {strides = array<i32>} : memref<128x256xbf16, #tpu.memory_space<vmem>>, vector<128x256xbf16>,
    } else {
    }
    return
  }
  func.func @transform_0(%arg0: i32) -> (i32, i32) {
    %c0_i32 = arith.constant 0 : i32
    %c0_i32_0 = arith.constant 0 : i32
    return %c0_i32, %arg0 : i32, i32
  }
  func.func @transform_1(%arg0: i32) -> (i32, i32) {
    %c0_i32 = arith.constant 0 : i32
    %c0_i32_0 = arith.constant 0 : i32
    return %arg0, %c0_i32 : i32, i32
  }
  func.func @transform_2(%arg0: i32) -> (i32, i32) {
    %c0_i32 = arith.constant 0 : i32
    %c0_i32_0 = arith.constant 0 : i32
    %c0_i32_1 = arith.constant 0 : i32
    return %c0_i32, %c0_i32_0 : i32, i32
  }
  func.func @transform_3(%arg0: i32) -> (i32, i32) {
    %c0_i32 = arith.constant 0 : i32
    %c0_i32_0 = arith.constant 0 : i32
    %c0_i32_1 = arith.constant 0 : i32
    return %c0_i32, %c0_i32_0 : i32, i32
  }
  func.func @transform_4(%arg0: i32) -> (i32, i32) {
    %c0_i32 = arith.constant 0 : i32
    %c0_i32_0 = arith.constant 0 : i32
    %c0_i32_1 = arith.constant 0 : i32
    return %c0_i32, %c0_i32_0 : i32, i32
  }
}

module attributes {stable_mosaic.version = 11 : i64} {
  func.func @_conv_bn_lrelu_kernel(%arg0: i32, %arg1: memref<32x2048xbf16, #tpu.memory_space<vmem>>, %arg2: memref<2048x512xbf16, #tpu.memory_space<vmem>>, %arg3: memref<1x512xf32, #tpu.memory_space<vmem>>, %arg4: memref<1x512xf32, #tpu.memory_space<vmem>>, %arg5: memref<32x512xbf16, #tpu.memory_space<vmem>>, %arg6: memref<32x512xf32, #tpu.memory_space<vmem>>) attributes {dimension_semantics = [#tpu.dimension_semantics<arbitrary>], iteration_bounds = array<i64: 2>, scalar_prefetch = 0 : i64, scratch_operands = 1 : i64, tpu.core_type = #tpu.core_type<tc>, window_params = [{transform_indices = @transform_0, window_bounds = array<i64: 32, 2048>}, {transform_indices = @transform_1, window_bounds = array<i64: 2048, 512>}, {pipeline_mode = #tpu.pipeline_mode<synchronous>, transform_indices = @transform_2, window_bounds = array<i64: 1, 512>}, {pipeline_mode = #tpu.pipeline_mode<synchronous>, transform_indices = @transform_3, window_bounds = array<i64: 1, 512>}, {pipeline_mode = #tpu.pipeline_mode<synchronous>, transform_indices = @transform_4, window_bounds = array<i64: 32, 512>}]} {
    %c0_i32 = arith.constant 0 : i32
    %0 = arith.cmpi eq, %arg0, %c0_i32 : i32
    %1 = arith.extui %0 : i1 to i32
    %c0_i32_0 = arith.constant 0 : i32
    %2 = arith.cmpi ne, %1, %c0_i32_0 : i32
    scf.if %2 {
      %cst_9 = arith.constant 0.000000e+00 : f32
      %12 = vector.broadcast %cst_9 : f32 to vector<32x512xf32>
      %c0_10 = arith.constant 0 : index
      %c0_11 = arith.constant 0 : index
      %13 = vector.load %arg6[%c0_10, %c0_11] : memref<32x512xf32, #tpu.memory_space<vmem>>, vector<32x512xf32>
      tpu.vector_store %arg6[%c0_10, %c0_11], %12 {strides = array<i32>} : memref<32x512xf32, #tpu.memory_space<vmem>>, vector<32x512xf32>,
    } else {
    }
    %c0 = arith.constant 0 : index
    %c0_1 = arith.constant 0 : index
    %3 = vector.load %arg6[%c0, %c0_1] : memref<32x512xf32, #tpu.memory_space<vmem>>, vector<32x512xf32>
    %c0_2 = arith.constant 0 : index
    %c0_3 = arith.constant 0 : index
    %4 = vector.load %arg1[%c0_2, %c0_3] : memref<32x2048xbf16, #tpu.memory_space<vmem>>, vector<32x2048xbf16>
    %c0_4 = arith.constant 0 : index
    %c0_5 = arith.constant 0 : index
    %5 = vector.load %arg2[%c0_4, %c0_5] : memref<2048x512xbf16, #tpu.memory_space<vmem>>, vector<2048x512xbf16>
    %cst = arith.constant dense<0.000000e+00> : vector<32x512xf32>
    %6 = tpu.matmul %4, %5, %cst {dimension_numbers = #tpu.dot_dimension_numbers<[1], [0], [0], [1], [0, 0, 1, 1], [], []>} : vector<32x2048xbf16>, vector<2048x512xbf16>, vector<32x512xf32> -> vector<32x512xf32>
    %7 = arith.addf %3, %6 : vector<32x512xf32>
    %c0_6 = arith.constant 0 : index
    %c0_7 = arith.constant 0 : index
    %8 = vector.load %arg6[%c0_6, %c0_7] : memref<32x512xf32, #tpu.memory_space<vmem>>, vector<32x512xf32>
    tpu.vector_store %arg6[%c0_6, %c0_7], %7 {strides = array<i32>} : memref<32x512xf32, #tpu.memory_space<vmem>>, vector<32x512xf32>,
    %c1_i32 = arith.constant 1 : i32
    %9 = arith.cmpi eq, %arg0, %c1_i32 : i32
    %10 = arith.extui %9 : i1 to i32
    %c0_i32_8 = arith.constant 0 : i32
    %11 = arith.cmpi ne, %10, %c0_i32_8 : i32
    scf.if %11 {
      %c0_9 = arith.constant 0 : index
      %c0_10 = arith.constant 0 : index
      %12 = vector.load %arg6[%c0_9, %c0_10] : memref<32x512xf32, #tpu.memory_space<vmem>>, vector<32x512xf32>
      %cst_11 = arith.constant dense<0.000000e+00> : vector<512xf32>
      %13 = vector.multi_reduction <add>, %12, %cst_11 [0] : vector<32x512xf32> to vector<512xf32>
      %14 = vector.shape_cast %13 : vector<512xf32> to vector<1x512xf32>
      %cst_12 = arith.constant 3.125000e-02 : f32
      %15 = vector.broadcast %cst_12 : f32 to vector<1x512xf32>
      %16 = arith.mulf %14, %15 : vector<1x512xf32>
      %17 = vector.broadcast %16 : vector<1x512xf32> to vector<32x512xf32>
      %18 = arith.subf %12, %17 : vector<32x512xf32>
      %19 = arith.mulf %18, %18 : vector<32x512xf32>
      %cst_13 = arith.constant dense<0.000000e+00> : vector<512xf32>
      %20 = vector.multi_reduction <add>, %19, %cst_13 [0] : vector<32x512xf32> to vector<512xf32>
      %21 = vector.shape_cast %20 : vector<512xf32> to vector<1x512xf32>
      %cst_14 = arith.constant 3.125000e-02 : f32
      %22 = vector.broadcast %cst_14 : f32 to vector<1x512xf32>
      %23 = arith.mulf %21, %22 : vector<1x512xf32>
      %c0_15 = arith.constant 0 : index
      %c0_16 = arith.constant 0 : index
      %24 = vector.load %arg3[%c0_15, %c0_16] : memref<1x512xf32, #tpu.memory_space<vmem>>, vector<1x512xf32>
      %cst_17 = arith.constant 9.99999974E-6 : f32
      %25 = vector.broadcast %cst_17 : f32 to vector<1x512xf32>
      %26 = arith.addf %23, %25 : vector<1x512xf32>
      %27 = math.rsqrt %26 : vector<1x512xf32>
      %28 = arith.mulf %24, %27 : vector<1x512xf32>
      %29 = vector.broadcast %28 : vector<1x512xf32> to vector<32x512xf32>
      %30 = arith.mulf %18, %29 : vector<32x512xf32>
      %c0_18 = arith.constant 0 : index
      %c0_19 = arith.constant 0 : index
      %31 = vector.load %arg4[%c0_18, %c0_19] : memref<1x512xf32, #tpu.memory_space<vmem>>, vector<1x512xf32>
      %32 = vector.broadcast %31 : vector<1x512xf32> to vector<32x512xf32>
      %33 = arith.addf %30, %32 : vector<32x512xf32>
      %cst_20 = arith.constant 0.000000e+00 : f32
      %34 = vector.broadcast %cst_20 : f32 to vector<32x512xf32>
      %35 = arith.cmpf oge, %33, %34 : vector<32x512xf32>
      %cst_21 = arith.constant 2.000000e-01 : f32
      %36 = vector.broadcast %cst_21 : f32 to vector<32x512xf32>
      %37 = arith.mulf %36, %33 : vector<32x512xf32>
      %38 = arith.select %35, %33, %37 : vector<32x512xi1>, vector<32x512xf32>
      %39 = arith.truncf %38 : vector<32x512xf32> to vector<32x512xbf16>
      %c0_22 = arith.constant 0 : index
      %c0_23 = arith.constant 0 : index
      %40 = vector.load %arg5[%c0_22, %c0_23] : memref<32x512xbf16, #tpu.memory_space<vmem>>, vector<32x512xbf16>
      tpu.vector_store %arg5[%c0_22, %c0_23], %39 {strides = array<i32>} : memref<32x512xbf16, #tpu.memory_space<vmem>>, vector<32x512xbf16>,
    } else {
    }
    return
  }
  func.func @transform_0(%arg0: i32) -> (i32, i32) {
    %c0_i32 = arith.constant 0 : i32
    %c0_i32_0 = arith.constant 0 : i32
    return %c0_i32, %arg0 : i32, i32
  }
  func.func @transform_1(%arg0: i32) -> (i32, i32) {
    %c0_i32 = arith.constant 0 : i32
    %c0_i32_0 = arith.constant 0 : i32
    return %arg0, %c0_i32 : i32, i32
  }
  func.func @transform_2(%arg0: i32) -> (i32, i32) {
    %c0_i32 = arith.constant 0 : i32
    %c0_i32_0 = arith.constant 0 : i32
    %c0_i32_1 = arith.constant 0 : i32
    return %c0_i32, %c0_i32_0 : i32, i32
  }
  func.func @transform_3(%arg0: i32) -> (i32, i32) {
    %c0_i32 = arith.constant 0 : i32
    %c0_i32_0 = arith.constant 0 : i32
    %c0_i32_1 = arith.constant 0 : i32
    return %c0_i32, %c0_i32_0 : i32, i32
  }
  func.func @transform_4(%arg0: i32) -> (i32, i32) {
    %c0_i32 = arith.constant 0 : i32
    %c0_i32_0 = arith.constant 0 : i32
    %c0_i32_1 = arith.constant 0 : i32
    return %c0_i32, %c0_i32_0 : i32, i32
  }
}

</mosaic_0001>

<bundles_post_ra>
// kernel: discriminator_forward.4
= control target key start
LH: loop header
LB: loop body
LE: loop exit
PB: predicated region body
PF: predicated region fallthrough
CT: control target
= control target key end

     0   :  { %s3142_s9 = smov 0   ;;  %s3564_s0 = inlined_call_operand.vmem [shape: bf16[2048,48], index: 0, kind: input, shape index: {}]   ;;  %s3565_s1 = inlined_call_operand.vmem [shape: bf16[48,64], index: 1, kind: input, shape index: {}]   ;;  %s3566_s2 = inlined_call_operand.vmem [shape: bf16[2048,64], index: 2, kind: output, shape index: {}]  }
   0x1 LB: > { %s2439_s10 = sadd.s32 4294967295, %s3125_s9   ;;  %p2443_p0 = scmp.ge.s32.totalorder %s3125_s9, 1  ;;  %s3125_s9 = sphi %s3142_s9, %s12_s9  }
   0x2   : > { %p113_p1 = scmp.lt.s32.totalorder %s3125_s9, 3 }
   0x4   : > { %p114_p2 = pnand %p2443_p0, %p113_p1 }
   0x5   : > { %v3052_v0 = vld [vmem:[%s3565_s1] sm:$0xff] (!%p114_p2)   ;;  %s2444_s13 = sshll.u32 (!%p114_p2), %s2439_s10, 7  ;;  %v3053_v1 = vld [vmem:[%s3565_s1 + $0x8] sm:$0xff] (!%p114_p2)   ;;  %v3054_v2 = vld [vmem:[%s3565_s1 + $0x10] sm:$0xff] (!%p114_p2)   ;;  %vm620_vm0 = vcmask (!%p114_p2), 392192   ;;  %vm2254_vm3 = vcmask (!%p114_p2), 519168  }
   0x6   : > { %117 = sbr.rel (%p114_p2) target bundleno = 366 (0x16e), region = 28  ;;  %p136_p3 = scmp.lt.s32.totalorder (!%p114_p2), %s2444_s13, 255  ;;  %2904 = vmatprep.subr.bf16.mxu0 (!%p114_p2), %v3052_v0  ;;  %3038 = vmatprep.subr.bf16.mxu1 (!%p114_p2), %v3052_v0 }
   0x7   : > { %2905 = vmatpush3.bf16.msra.mxu0 (!%p114_p2), %v3052_v0  ;;  %3041 = vmatpush3.bf16.msra.mxu1 (!%p114_p2), %v3052_v0 }
   0x8   : > { %2906 = vmatprep.subr.bf16.mxu0 (!%p114_p2), %v3053_v1  ;;  %3039 = vmatprep.subr.bf16.mxu1 (!%p114_p2), %v3053_v1 }
   0xb   : > { %2907 = vmatpush3.bf16.msra.mxu0 (!%p114_p2), %v3053_v1  ;;  %3042 = vmatpush3.bf16.msra.mxu1 (!%p114_p2), %v3053_v1 }
   0xc   : > { %2908 = vmatprep.subr.bf16.mxu0 (!%p114_p2), %v3054_v2  ;;  %3040 = vmatprep.subr.bf16.mxu1 (!%p114_p2), %v3054_v2 }
   0xd   : > { %s3568_s13 = smov (!%p136_p3, %s2444_s13), 255 }
   0xe   : > { %s2445_s18 = sshll.u32 %s3568_s13, 2 }
   0xf   : > { %s3167_s21 = scalar_lea.vmem %s3564_s0, %s2445_s18  ;;  %2909 = vmatpush3.bf16.msra.mxu0 %v3054_v2  ;;  %3043 = vmatpush3.bf16.msra.mxu1 %v3054_v2  ;;  %s3302_s24 = scalar_lea.vmem %s3566_s2, %s2445_s18 }
  0x10   : > { %v3055_v3 = vld [vmem:[%s3167_s21] sm:$0xff]   ;;  %v3057_v5 = vld [vmem:[%s3167_s21 + $0x8] sm:$0xff]   ;;  %v3059_v7 = vld [vmem:[%s3167_s21 + $0x10] sm:$0xff]  }
  0x11   : > { %v3056_v4 = vld [vmem:[%s3167_s21 + $0x100] sm:$0xff]   ;;  %2910 = vmatprep.mubr.msk.bf16.mxu0 %vm620_vm0, %v3055_v3  ;;  %v3058_v6 = vld [vmem:[%s3167_s21 + $0x108] sm:$0xff]   ;;  %v3060_v8 = vld [vmem:[%s3167_s21 + $0x110] sm:$0xff]  }
  0x12   : > { %2974 = vmatprep.mubr.msk.bf16.mxu1 %vm620_vm0, %v3056_v4  ;;  %2911 = vmatmul.mubr.msk.bf16.vlgmr.msra.gmra.mrb[0].mxu0 %vm620_vm0, %v3057_v5  ;;  %v3061_v9 = vld [vmem:[%s3167_s21 + $0x18] sm:$0xff]   ;;  %v3063_v11 = vld [vmem:[%s3167_s21 + $0x20] sm:$0xff]   ;;  %v3065_v13 = vld [vmem:[%s3167_s21 + $0x28] sm:$0xff]  }
  0x13   : > { %2975 = vmatmul.mubr.msk.bf16.vlgmr.msra.gmra.mrb[0].mxu1 %vm620_vm0, %v3058_v6  ;;  %2914 = vmatprep.mubr.msk.bf16.mxu0 %vm620_vm0, %v3059_v7  ;;  %v3062_v10 = vld [vmem:[%s3167_s21 + $0x118] sm:$0xff]   ;;  %v3064_v12 = vld [vmem:[%s3167_s21 + $0x120] sm:$0xff]   ;;  %v3066_v14 = vld [vmem:[%s3167_s21 + $0x128] sm:$0xff]  }
  0x14   : > { %2978 = vmatprep.mubr.msk.bf16.mxu1 %vm620_vm0, %v3060_v8  ;;  %v3067_v15 = vld [vmem:[%s3167_s21 + $0x30] sm:$0xff]   ;;  %v3069_v17 = vld [vmem:[%s3167_s21 + $0x38] sm:$0xff]   ;;  %v3071_v19 = vld [vmem:[%s3167_s21 + $0x40] sm:$0xff]  }
  0x15   : > { %v3068_v16 = vld [vmem:[%s3167_s21 + $0x130] sm:$0xff]   ;;  %v3070_v18 = vld [vmem:[%s3167_s21 + $0x138] sm:$0xff]   ;;  %v3072_v20 = vld [vmem:[%s3167_s21 + $0x140] sm:$0xff]  }
  0x16   : > { %v3073_v21 = vld [vmem:[%s3167_s21 + $0x48] sm:$0xff]   ;;  %v3075_v23 = vld [vmem:[%s3167_s21 + $0x50] sm:$0xff]   ;;  %v3077_v25 = vld [vmem:[%s3167_s21 + $0x58] sm:$0xff]  }
  0x17   : > { %v3074_v22 = vld [vmem:[%s3167_s21 + $0x148] sm:$0xff]   ;;  %v3076_v24 = vld [vmem:[%s3167_s21 + $0x150] sm:$0xff]   ;;  %v3078_v26 = vld [vmem:[%s3167_s21 + $0x158] sm:$0xff]  }
  0x18   : > { %v3079_v27 = vld [vmem:[%s3167_s21 + $0x60] sm:$0xff]   ;;  %v3081_v29 = vld [vmem:[%s3167_s21 + $0x68] sm:$0xff]   ;;  %v3083_v31 = vld [vmem:[%s3167_s21 + $0x70] sm:$0xff]  }
  0x19   : > { %v3080_v28 = vld [vmem:[%s3167_s21 + $0x160] sm:$0xff]   ;;  %v3082_v30 = vld [vmem:[%s3167_s21 + $0x168] sm:$0xff]   ;;  %v3084_v32 = vld [vmem:[%s3167_s21 + $0x170] sm:$0xff]  }
  0x1a   : > { %2915 = vmatmul.mubr.msk.bf16.gmra.mrb[4].mxu0 %vm620_vm0, %v3061_v9  ;;  %v3085_v33 = vld [vmem:[%s3167_s21 + $0x78] sm:$0xff]   ;;  %v3087_v35 = vld [vmem:[%s3167_s21 + $0x80] sm:$0xff]   ;;  %v3089_v37 = vld [vmem:[%s3167_s21 + $0x88] sm:$0xff]  }
  0x1b   : > { %2979 = vmatmul.mubr.msk.bf16.gmra.mrb[4].mxu1 %vm620_vm0, %v3062_v10  ;;  %2918 = vmatprep.mubr.msk.bf16.mxu0 %vm620_vm0, %v3063_v11  ;;  %v3086_v34 = vld [vmem:[%s3167_s21 + $0x178] sm:$0xff]   ;;  %v3088_v36 = vld [vmem:[%s3167_s21 + $0x180] sm:$0xff]   ;;  %v3090_v38 = vld [vmem:[%s3167_s21 + $0x188] sm:$0xff]  }
  0x1c   : > { %2982 = vmatprep.mubr.msk.bf16.mxu1 %vm620_vm0, %v3064_v12  ;;  %v3091_v39 = vld [vmem:[%s3167_s21 + $0x90] sm:$0xff]   ;;  %v3093_v41 = vld [vmem:[%s3167_s21 + $0x98] sm:$0xff]   ;;  %v3095_v43 = vld [vmem:[%s3167_s21 + $0xa0] sm:$0xff]  }
  0x1d   : > { %v3092_v40 = vld [vmem:[%s3167_s21 + $0x190] sm:$0xff]   ;;  %v3094_v42 = vld [vmem:[%s3167_s21 + $0x198] sm:$0xff]   ;;  %v3096_v44 = vld [vmem:[%s3167_s21 + $0x1a0] sm:$0xff]  }
  0x1e   : > { %v3097_v45 = vld [vmem:[%s3167_s21 + $0xa8] sm:$0xff]   ;;  %v3099_v47 = vld [vmem:[%s3167_s21 + $0xb0] sm:$0xff]   ;;  %v3101_v49 = vld [vmem:[%s3167_s21 + $0xb8] sm:$0xff]  }
  0x1f   : > { %v3098_v46 = vld [vmem:[%s3167_s21 + $0x1a8] sm:$0xff]   ;;  %v3100_v48 = vld [vmem:[%s3167_s21 + $0x1b0] sm:$0xff]   ;;  %v3102_v50 = vld [vmem:[%s3167_s21 + $0x1b8] sm:$0xff]  }
  0x20   : > { %v3103_v51 = vld [vmem:[%s3167_s21 + $0xc0] sm:$0xff]   ;;  %v3105_v53 = vld [vmem:[%s3167_s21 + $0xc8] sm:$0xff]   ;;  %v3107_v55 = vld [vmem:[%s3167_s21 + $0xd0] sm:$0xff]  }
  0x21   : > { %v3104_v52 = vld [vmem:[%s3167_s21 + $0x1c0] sm:$0xff]   ;;  %v3106_v54 = vld [vmem:[%s3167_s21 + $0x1c8] sm:$0xff]   ;;  %v3108_v56 = vld [vmem:[%s3167_s21 + $0x1d0] sm:$0xff]  }
  0x22   : > { %2919 = vmatmul.mubr.msk.bf16.gmra.mrb[8].mxu0 %vm620_vm0, %v3065_v13  ;;  %v3109_v57 = vld [vmem:[%s3167_s21 + $0xd8] sm:$0xff]   ;;  %v3111_v59 = vld [vmem:[%s3167_s21 + $0xe0] sm:$0xff]   ;;  %v3113_v61 = vld [vmem:[%s3167_s21 + $0xe8] sm:$0xff]  }
  0x23   : > { %2983 = vmatmul.mubr.msk.bf16.gmra.mrb[8].mxu1 %vm620_vm0, %v3066_v14  ;;  %2922 = vmatprep.mubr.msk.bf16.mxu0 %vm620_vm0, %v3067_v15  ;;  %v3110_v58 = vld [vmem:[%s3167_s21 + $0x1d8] sm:$0xff]   ;;  %v3112_v60 = vld [vmem:[%s3167_s21 + $0x1e0] sm:$0xff]   ;;  %v3114_v62 = vld [vmem:[%s3167_s21 + $0x1e8] sm:$0xff]  }
  0x24   : > { %2986 = vmatprep.mubr.msk.bf16.mxu1 %vm620_vm0, %v3068_v16  ;;  %v3115_v63 = vld [vmem:[%s3167_s21 + $0xf0] sm:$0xff]   ;;  %v3117_v1 = vld [vmem:[%s3167_s21 + $0xf8] sm:$0xff]  }
  0x25   : > { %v3116_v0 = vld [vmem:[%s3167_s21 + $0x1f0] sm:$0xff]   ;;  %v3118_v2 = vld [vmem:[%s3167_s21 + $0x1f8] sm:$0xff]  }
  0x2a   : > { %2923 = vmatmul.mubr.msk.bf16.gmra.mrb[12].mxu0 %vm620_vm0, %v3069_v17 }
  0x2b   : > { %2987 = vmatmul.mubr.msk.bf16.gmra.mrb[12].mxu1 %vm620_vm0, %v3070_v18  ;;  %2926 = vmatprep.mubr.msk.bf16.mxu0 %vm620_vm0, %v3071_v19 }
  0x2c   : > { %2990 = vmatprep.mubr.msk.bf16.mxu1 %vm620_vm0, %v3072_v20 }
  0x32   : > { %2927 = vmatmul.mubr.msk.bf16.gmra.mrb[16].mxu0 %vm620_vm0, %v3073_v21 }
  0x33   : > { %2991 = vmatmul.mubr.msk.bf16.gmra.mrb[16].mxu1 %vm620_vm0, %v3074_v22  ;;  %2930 = vmatprep.mubr.msk.bf16.mxu0 %vm620_vm0, %v3075_v23 }
  0x34   : > { %2994 = vmatprep.mubr.msk.bf16.mxu1 %vm620_vm0, %v3076_v24 }
  0x3a   : > { %2931 = vmatmul.mubr.msk.bf16.gmra.mrb[20].mxu0 %vm620_vm0, %v3077_v25 }
  0x3b   : > { %2995 = vmatmul.mubr.msk.bf16.gmra.mrb[20].mxu1 %vm620_vm0, %v3078_v26  ;;  %2934 = vmatprep.mubr.msk.bf16.mxu0 %vm620_vm0, %v3079_v27 }
  0x3c   : > { %2998 = vmatprep.mubr.msk.bf16.mxu1 %vm620_vm0, %v3080_v28 }
  0x42   : > { %2935 = vmatmul.mubr.msk.bf16.gmra.mrb[24].mxu0 %vm620_vm0, %v3081_v29 }
  0x43   : > { %2999 = vmatmul.mubr.msk.bf16.gmra.mrb[24].mxu1 %vm620_vm0, %v3082_v30  ;;  %2938 = vmatprep.mubr.msk.bf16.mxu0 %vm620_vm0, %v3083_v31 }
  0x44   : > { %3002 = vmatprep.mubr.msk.bf16.mxu1 %vm620_vm0, %v3084_v32 }
  0x4a   : > { %2939 = vmatmul.mubr.msk.bf16.gmra.mrb[28].mxu0 %vm620_vm0, %v3085_v33 }
  0x4b   : > { %3003 = vmatmul.mubr.msk.bf16.gmra.mrb[28].mxu1 %vm620_vm0, %v3086_v34  ;;  %2942 = vmatprep.mubr.msk.bf16.mxu0 %vm620_vm0, %v3087_v35 }
  0x4c   : > { %3006 = vmatprep.mubr.msk.bf16.mxu1 %vm620_vm0, %v3088_v36 }
  0x52   : > { %2943 = vmatmul.mubr.msk.bf16.gmra.mrb[32].mxu0 %vm620_vm0, %v3089_v37 }
  0x53   : > { %3007 = vmatmul.mubr.msk.bf16.gmra.mrb[32].mxu1 %vm620_vm0, %v3090_v38  ;;  %2946 = vmatprep.mubr.msk.bf16.mxu0 %vm620_vm0, %v3091_v39 }
  0x54   : > { %3010 = vmatprep.mubr.msk.bf16.mxu1 %vm620_vm0, %v3092_v40 }
  0x5a   : > { %2947 = vmatmul.mubr.msk.bf16.gmra.mrb[36].mxu0 %vm620_vm0, %v3093_v41 }
  0x5b   : > { %3011 = vmatmul.mubr.msk.bf16.gmra.mrb[36].mxu1 %vm620_vm0, %v3094_v42  ;;  %2950 = vmatprep.mubr.msk.bf16.mxu0 %vm620_vm0, %v3095_v43 }
  0x5c   : > { %3014 = vmatprep.mubr.msk.bf16.mxu1 %vm620_vm0, %v3096_v44 }
  0x62   : > { %2951 = vmatmul.mubr.msk.bf16.gmra.mrb[40].mxu0 %vm620_vm0, %v3097_v45 }
  0x63   : > { %3015 = vmatmul.mubr.msk.bf16.gmra.mrb[40].mxu1 %vm620_vm0, %v3098_v46  ;;  %2954 = vmatprep.mubr.msk.bf16.mxu0 %vm620_vm0, %v3099_v47 }
  0x64   : > { %3018 = vmatprep.mubr.msk.bf16.mxu1 %vm620_vm0, %v3100_v48 }
  0x6a   : > { %2955 = vmatmul.mubr.msk.bf16.gmra.mrb[44].mxu0 %vm620_vm0, %v3101_v49 }
  0x6b   : > { %3019 = vmatmul.mubr.msk.bf16.gmra.mrb[44].mxu1 %vm620_vm0, %v3102_v50  ;;  %2958 = vmatprep.mubr.msk.bf16.mxu0 %vm620_vm0, %v3103_v51 }
  0x6c   : > { %3022 = vmatprep.mubr.msk.bf16.mxu1 %vm620_vm0, %v3104_v52 }
  0x72   : > { %2959 = vmatmul.mubr.msk.bf16.gmra.mrb[48].mxu0 %vm620_vm0, %v3105_v53 }
  0x73   : > { %3023 = vmatmul.mubr.msk.bf16.gmra.mrb[48].mxu1 %vm620_vm0, %v3106_v54  ;;  %2962 = vmatprep.mubr.msk.bf16.mxu0 %vm620_vm0, %v3107_v55 }
  0x74   : > { %3026 = vmatprep.mubr.msk.bf16.mxu1 %vm620_vm0, %v3108_v56 }
  0x7a   : > { %2963 = vmatmul.mubr.msk.bf16.gmra.mrb[52].mxu0 %vm620_vm0, %v3109_v57 }
  0x7b   : > { %3027 = vmatmul.mubr.msk.bf16.gmra.mrb[52].mxu1 %vm620_vm0, %v3110_v58  ;;  %2966 = vmatprep.mubr.msk.bf16.mxu0 %vm620_vm0, %v3111_v59 }
  0x7c   : > { %3030 = vmatprep.mubr.msk.bf16.mxu1 %vm620_vm0, %v3112_v60 }
  0x82   : > { %2967 = vmatmul.mubr.msk.bf16.gmra.mrb[56].mxu0 %vm620_vm0, %v3113_v61 }
  0x83   : > { %3031 = vmatmul.mubr.msk.bf16.gmra.mrb[56].mxu1 %vm620_vm0, %v3114_v62  ;;  %2970 = vmatprep.mubr.msk.bf16.mxu0 %vm620_vm0, %v3115_v63 }
  0x84   : > { %3034 = vmatprep.mubr.msk.bf16.mxu1 %vm620_vm0, %v3116_v0 }
  0x8a   : > { %2971 = vmatmul.mubr.msk.bf16.gmra.mrb[60].mxu0 %vm620_vm0, %v3117_v1 }
  0x8b   : > { %3035 = vmatmul.mubr.msk.bf16.gmra.mrb[60].mxu1 %vm620_vm0, %v3118_v2 }
  0xe5   : > { %v2912_v3 = vpop.f32.mrb[0].mxu0 }
  0xe6   : > { %v2976_v4 = vpop.f32.mrb[0].mxu1  ;;  %vm1360_vm1 = vcmp.ge.f32.partialorder %v2912_v3, 0.0  ;;  %v1488_v5 = vmul.f32 0.2, %v2912_v3  ;;  %v847_v7 = vpop.f32.mrb[1].mxu0 }
  0xe7   : > { %vm1424_vm2 = vcmp.ge.f32.partialorder %v2976_v4, 0.0  ;;  %v1552_v6 = vmul.f32 0.2, %v2976_v4  ;;  %v1103_v8 = vpop.f32.mrb[1].mxu1  ;;  %vm1358_vm4 = vcmp.ge.f32.partialorder %v847_v7, 0.0  ;;  %v2913_v12 = vpop.f32.mrb[2].mxu0 }
  0xe8   : > { %v1616_v9 = vsel %vm1360_vm1, %v2912_v3, %v1488_v5  ;;  %v1486_v11 = vmul.f32 0.2, %v847_v7  ;;  %v2977_v13 = vpop.f32.mrb[2].mxu1  ;;  %vm1422_vm5 = vcmp.ge.f32.partialorder %v1103_v8, 0.0  ;;  %v1550_v16 = vmul.f32 0.2, %v1103_v8 }
  0xe9   : > { %v1680_v10 = vsel %vm1424_vm2, %v2976_v4, %v1552_v6  ;;  %v2711_v14 = vpack.c.bf16 %v1616_v9, %v1616_v9  ;;  %v850_v17 = vpop.f32.mrb[3].mxu0  ;;  %v1106_v18 = vpop.f32.mrb[3].mxu1  ;;  %vm1361_vm6 = vcmp.ge.f32.partialorder %v2913_v12, 0.0  ;;  %v1489_v20 = vmul.f32 0.2, %v2913_v12 }
  0xea   : > { %v2775_v15 = vpack.c.bf16 %v1680_v10, %v1680_v10  ;;  %v1614_v19 = vsel %vm1358_vm4, %v847_v7, %v1486_v11  ;;  %vm1425_vm7 = vcmp.ge.f32.partialorder %v2977_v13, 0.0  ;;  %v1678_v22 = vsel %vm1422_vm5, %v1103_v8, %v1550_v16 }
  0xeb   : > { %2257 = vst.msk [vmem:[%s3302_s24 + $0x8] sm:$0xf] %vm2254_vm3, %v2711_v14  ;;  %v2709_v21 = vpack.c.bf16 %v1614_v19, %v1614_v19  ;;  %v1553_v23 = vmul.f32 0.2, %v2977_v13  ;;  %vm1359_vm8 = vcmp.ge.f32.partialorder %v850_v17, 0.0  ;;  %v2773_v24 = vpack.c.bf16 %v1678_v22, %v1678_v22 }
  0xec   : > { %2321 = vst.msk [vmem:[%s3302_s24 + $0x108] sm:$0xf] %vm2254_vm3, %v2775_v15  ;;  %v1617_v25 = vsel %vm1361_vm6, %v2913_v12, %v1489_v20  ;;  %v1487_v26 = vmul.f32 0.2, %v850_v17  ;;  %vm1423_vm9 = vcmp.ge.f32.partialorder %v1106_v18, 0.0 }
  0xed   : > { %2255 = vst.msk [vmem:[%s3302_s24] sm:$0xf] %vm2254_vm3, %v2709_v21  ;;  %v2712_v27 = vpack.c.bf16 %v1617_v25, %v1617_v25  ;;  %v1681_v28 = vsel %vm1425_vm7, %v2977_v13, %v1553_v23  ;;  %v1551_v29 = vmul.f32 0.2, %v1106_v18  ;;  %v2916_v30 = vpop.f32.mrb[4].mxu0 }
  0xee   : > { %v2980_v31 = vpop.f32.mrb[4].mxu1  ;;  %2319 = vst.msk [vmem:[%s3302_s24 + $0x100] sm:$0xf] %vm2254_vm3, %v2773_v24  ;;  %v2776_v32 = vpack.c.bf16 %v1681_v28, %v1681_v28  ;;  %v1615_v33 = vsel %vm1359_vm8, %v850_v17, %v1487_v26  ;;  %vm1364_vm10 = vcmp.ge.f32.partialorder %v2916_v30, 0.0  ;;  %v1492_v34 = vmul.f32 0.2, %v2916_v30 }
  0xef   : > { %v863_v35 = vpop.f32.mrb[5].mxu0  ;;  %v1119_v36 = vpop.f32.mrb[5].mxu1  ;;  %2258 = vst.msk [vmem:[%s3302_s24 + $0xc] sm:$0xf] %vm2254_vm3, %v2712_v27  ;;  %v2710_v37 = vpack.c.bf16 %v1615_v33, %v1615_v33  ;;  %v1679_v38 = vsel %vm1423_vm9, %v1106_v18, %v1551_v29  ;;  %vm1428_vm11 = vcmp.ge.f32.partialorder %v2980_v31, 0.0 }
  0xf0   : > { %v1556_v39 = vmul.f32 0.2, %v2980_v31  ;;  %v2917_v40 = vpop.f32.mrb[6].mxu0  ;;  %v2981_v41 = vpop.f32.mrb[6].mxu1  ;;  %2322 = vst.msk [vmem:[%s3302_s24 + $0x10c] sm:$0xf] %vm2254_vm3, %v2776_v32  ;;  %v2774_v42 = vpack.c.bf16 %v1679_v38, %v1679_v38  ;;  %v1620_v43 = vsel %vm1364_vm10, %v2916_v30, %v1492_v34 }
  0xf1   : > { %vm1362_vm12 = vcmp.ge.f32.partialorder %v863_v35, 0.0  ;;  %v1490_v44 = vmul.f32 0.2, %v863_v35  ;;  %v866_v45 = vpop.f32.mrb[7].mxu0  ;;  %v1122_v46 = vpop.f32.mrb[7].mxu1  ;;  %v2715_v47 = vpack.c.bf16 %v1620_v43, %v1620_v43  ;;  %vm1426_vm13 = vcmp.ge.f32.partialorder %v1119_v36, 0.0 }
  0xf2   : > { %2256 = vst.msk [vmem:[%s3302_s24 + $0x4] sm:$0xf] %vm2254_vm3, %v2710_v37  ;;  %v1684_v48 = vsel %vm1428_vm11, %v2980_v31, %v1556_v39  ;;  %v1554_v49 = vmul.f32 0.2, %v1119_v36  ;;  %2320 = vst.msk [vmem:[%s3302_s24 + $0x104] sm:$0xf] %vm2254_vm3, %v2774_v42 }
  0xf3   : > { %v2779_v50 = vpack.c.bf16 %v1684_v48, %v1684_v48  ;;  %v1618_v51 = vsel %vm1362_vm12, %v863_v35, %v1490_v44  ;;  %vm1365_vm14 = vcmp.ge.f32.partialorder %v2917_v40, 0.0  ;;  %v1493_v52 = vmul.f32 0.2, %v2917_v40  ;;  %2261 = vst.msk [vmem:[%s3302_s24 + $0x18] sm:$0xf] %vm2254_vm3, %v2715_v47 }
  0xf4   : > { %v2713_v53 = vpack.c.bf16 %v1618_v51, %v1618_v51  ;;  %v1682_v54 = vsel %vm1426_vm13, %v1119_v36, %v1554_v49  ;;  %vm1429_vm15 = vcmp.ge.f32.partialorder %v2981_v41, 0.0  ;;  %v1557_v55 = vmul.f32 0.2, %v2981_v41 }
  0xf5   : > { %2325 = vst.msk [vmem:[%s3302_s24 + $0x118] sm:$0xf] %vm2254_vm3, %v2779_v50  ;;  %v2777_v56 = vpack.c.bf16 %v1682_v54, %v1682_v54  ;;  %v1621_v57 = vsel %vm1365_vm14, %v2917_v40, %v1493_v52  ;;  %vm1363_vm0 = vcmp.ge.f32.partialorder %v866_v45, 0.0  ;;  %v1491_v58 = vmul.f32 0.2, %v866_v45  ;;  %v2920_v62 = vpop.f32.mrb[8].mxu0 }
  0xf6   : > { %2259 = vst.msk [vmem:[%s3302_s24 + $0x10] sm:$0xf] %vm2254_vm3, %v2713_v53  ;;  %v2716_v59 = vpack.c.bf16 %v1621_v57, %v1621_v57  ;;  %v1685_v60 = vsel %vm1429_vm15, %v2981_v41, %v1557_v55  ;;  %vm1427_vm1 = vcmp.ge.f32.partialorder %v1122_v46, 0.0  ;;  %v1555_v61 = vmul.f32 0.2, %v1122_v46  ;;  %v2984_v63 = vpop.f32.mrb[8].mxu1 }
  0xf7   : > { %2323 = vst.msk [vmem:[%s3302_s24 + $0x110] sm:$0xf] %vm2254_vm3, %v2777_v56  ;;  %v2780_v0 = vpack.c.bf16 %v1685_v60, %v1685_v60  ;;  %v1619_v1 = vsel %vm1363_vm0, %v866_v45, %v1491_v58  ;;  %vm1368_vm2 = vcmp.ge.f32.partialorder %v2920_v62, 0.0  ;;  %v1496_v2 = vmul.f32 0.2, %v2920_v62  ;;  %v879_v3 = vpop.f32.mrb[9].mxu0 }
  0xf8   : > { %v1135_v4 = vpop.f32.mrb[9].mxu1  ;;  %2262 = vst.msk [vmem:[%s3302_s24 + $0x1c] sm:$0xf] %vm2254_vm3, %v2716_v59  ;;  %v2714_v5 = vpack.c.bf16 %v1619_v1, %v1619_v1  ;;  %v1683_v6 = vsel %vm1427_vm1, %v1122_v46, %v1555_v61  ;;  %vm1432_vm4 = vcmp.ge.f32.partialorder %v2984_v63, 0.0  ;;  %v1560_v7 = vmul.f32 0.2, %v2984_v63 }
  0xf9   : > { %v2921_v8 = vpop.f32.mrb[10].mxu0  ;;  %v2985_v9 = vpop.f32.mrb[10].mxu1  ;;  %2326 = vst.msk [vmem:[%s3302_s24 + $0x11c] sm:$0xf] %vm2254_vm3, %v2780_v0  ;;  %v2778_v10 = vpack.c.bf16 %v1683_v6, %v1683_v6  ;;  %v1624_v11 = vsel %vm1368_vm2, %v2920_v62, %v1496_v2  ;;  %vm1366_vm5 = vcmp.ge.f32.partialorder %v879_v3, 0.0  ;;  %vm1430_vm6 = vcmp.ge.f32.partialorder %v1135_v4, 0.0 }
  0xfa   : > { %v1494_v12 = vmul.f32 0.2, %v879_v3  ;;  %v882_v13 = vpop.f32.mrb[11].mxu0  ;;  %v1138_v14 = vpop.f32.mrb[11].mxu1  ;;  %2260 = vst.msk [vmem:[%s3302_s24 + $0x14] sm:$0xf] %vm2254_vm3, %v2714_v5  ;;  %v2719_v15 = vpack.c.bf16 %v1624_v11, %v1624_v11  ;;  %v1688_v16 = vsel %vm1432_vm4, %v2984_v63, %v1560_v7 }
  0xfb   : > { %v1558_v17 = vmul.f32 0.2, %v1135_v4  ;;  %2324 = vst.msk [vmem:[%s3302_s24 + $0x114] sm:$0xf] %vm2254_vm3, %v2778_v10  ;;  %v2783_v18 = vpack.c.bf16 %v1688_v16, %v1688_v16  ;;  %vm1369_vm7 = vcmp.ge.f32.partialorder %v2921_v8, 0.0  ;;  %vm1433_vm8 = vcmp.ge.f32.partialorder %v2985_v9, 0.0 }
  0xfc   : > { %v1622_v19 = vsel %vm1366_vm5, %v879_v3, %v1494_v12  ;;  %v1497_v20 = vmul.f32 0.2, %v2921_v8  ;;  %2265 = vst.msk [vmem:[%s3302_s24 + $0x28] sm:$0xf] %vm2254_vm3, %v2719_v15  ;;  %v1561_v23 = vmul.f32 0.2, %v2985_v9 }
  0xfd   : > { %v2717_v21 = vpack.c.bf16 %v1622_v19, %v1622_v19  ;;  %v1686_v22 = vsel %vm1430_vm6, %v1135_v4, %v1558_v17  ;;  %2329 = vst.msk [vmem:[%s3302_s24 + $0x128] sm:$0xf] %vm2254_vm3, %v2783_v18  ;;  %vm1367_vm9 = vcmp.ge.f32.partialorder %v882_v13, 0.0  ;;  %v1495_v26 = vmul.f32 0.2, %v882_v13  ;;  %v2924_v30 = vpop.f32.mrb[12].mxu0 }
  0xfe   : > { %v2781_v24 = vpack.c.bf16 %v1686_v22, %v1686_v22  ;;  %v1625_v25 = vsel %vm1369_vm7, %v2921_v8, %v1497_v20  ;;  %v1689_v28 = vsel %vm1433_vm8, %v2985_v9, %v1561_v23  ;;  %vm1431_vm10 = vcmp.ge.f32.partialorder %v1138_v14, 0.0  ;;  %v2988_v31 = vpop.f32.mrb[12].mxu1  ;;  %v895_v35 = vpop.f32.mrb[13].mxu0 }
  0xff   : > { %2263 = vst.msk [vmem:[%s3302_s24 + $0x20] sm:$0xf] %vm2254_vm3, %v2717_v21  ;;  %v2720_v27 = vpack.c.bf16 %v1625_v25, %v1625_v25  ;;  %v1559_v29 = vmul.f32 0.2, %v1138_v14  ;;  %v2784_v32 = vpack.c.bf16 %v1689_v28, %v1689_v28  ;;  %v1623_v33 = vsel %vm1367_vm9, %v882_v13, %v1495_v26  ;;  %v1151_v36 = vpop.f32.mrb[13].mxu1  ;;  %v2925_v40 = vpop.f32.mrb[14].mxu0 }
 0x100   : > { %2327 = vst.msk [vmem:[%s3302_s24 + $0x120] sm:$0xf] %vm2254_vm3, %v2781_v24  ;;  %vm1372_vm11 = vcmp.ge.f32.partialorder %v2924_v30, 0.0  ;;  %v1500_v34 = vmul.f32 0.2, %v2924_v30  ;;  %v2718_v37 = vpack.c.bf16 %v1623_v33, %v1623_v33  ;;  %vm1436_vm12 = vcmp.ge.f32.partialorder %v2988_v31, 0.0 }
 0x101   : > { %2266 = vst.msk [vmem:[%s3302_s24 + $0x2c] sm:$0xf] %vm2254_vm3, %v2720_v27  ;;  %v1687_v38 = vsel %vm1431_vm10, %v1138_v14, %v1559_v29  ;;  %v1564_v39 = vmul.f32 0.2, %v2988_v31  ;;  %v2989_v41 = vpop.f32.mrb[14].mxu1  ;;  %vm1370_vm13 = vcmp.ge.f32.partialorder %v895_v35, 0.0 }
 0x102   : > { %2330 = vst.msk [vmem:[%s3302_s24 + $0x12c] sm:$0xf] %vm2254_vm3, %v2784_v32  ;;  %v2782_v42 = vpack.c.bf16 %v1687_v38, %v1687_v38  ;;  %v1628_v43 = vsel %vm1372_vm11, %v2924_v30, %v1500_v34  ;;  %v1498_v44 = vmul.f32 0.2, %v895_v35  ;;  %v898_v45 = vpop.f32.mrb[15].mxu0  ;;  %v1154_v46 = vpop.f32.mrb[15].mxu1 }
 0x103   : > { %2264 = vst.msk [vmem:[%s3302_s24 + $0x24] sm:$0xf] %vm2254_vm3, %v2718_v37  ;;  %v2723_v47 = vpack.c.bf16 %v1628_v43, %v1628_v43  ;;  %v1692_v48 = vsel %vm1436_vm12, %v2988_v31, %v1564_v39  ;;  %vm1434_vm14 = vcmp.ge.f32.partialorder %v1151_v36, 0.0  ;;  %v1562_v49 = vmul.f32 0.2, %v1151_v36 }
 0x104   : > { %2328 = vst.msk [vmem:[%s3302_s24 + $0x124] sm:$0xf] %vm2254_vm3, %v2782_v42  ;;  %v2787_v50 = vpack.c.bf16 %v1692_v48, %v1692_v48  ;;  %v1626_v51 = vsel %vm1370_vm13, %v895_v35, %v1498_v44  ;;  %vm1373_vm15 = vcmp.ge.f32.partialorder %v2925_v40, 0.0  ;;  %v1501_v52 = vmul.f32 0.2, %v2925_v40 }
 0x105   : > { %2269 = vst.msk [vmem:[%s3302_s24 + $0x38] sm:$0xf] %vm2254_vm3, %v2723_v47  ;;  %v2721_v53 = vpack.c.bf16 %v1626_v51, %v1626_v51  ;;  %v1690_v54 = vsel %vm1434_vm14, %v1151_v36, %v1562_v49  ;;  %vm1437_vm0 = vcmp.ge.f32.partialorder %v2989_v41, 0.0  ;;  %v1565_v55 = vmul.f32 0.2, %v2989_v41  ;;  %v2928_v62 = vpop.f32.mrb[16].mxu0 }
 0x106   : > { %2333 = vst.msk [vmem:[%s3302_s24 + $0x138] sm:$0xf] %vm2254_vm3, %v2787_v50  ;;  %v2785_v56 = vpack.c.bf16 %v1690_v54, %v1690_v54  ;;  %v1629_v57 = vsel %vm1373_vm15, %v2925_v40, %v1501_v52  ;;  %vm1371_vm1 = vcmp.ge.f32.partialorder %v898_v45, 0.0  ;;  %v1499_v58 = vmul.f32 0.2, %v898_v45  ;;  %v2992_v63 = vpop.f32.mrb[16].mxu1 }
 0x107   : > { %2267 = vst.msk [vmem:[%s3302_s24 + $0x30] sm:$0xf] %vm2254_vm3, %v2721_v53  ;;  %v2724_v59 = vpack.c.bf16 %v1629_v57, %v1629_v57  ;;  %v1693_v60 = vsel %vm1437_vm0, %v2989_v41, %v1565_v55  ;;  %vm1435_vm2 = vcmp.ge.f32.partialorder %v1154_v46, 0.0  ;;  %v1563_v61 = vmul.f32 0.2, %v1154_v46  ;;  %v911_v3 = vpop.f32.mrb[17].mxu0 }
 0x108   : > { %2331 = vst.msk [vmem:[%s3302_s24 + $0x130] sm:$0xf] %vm2254_vm3, %v2785_v56  ;;  %v2788_v0 = vpack.c.bf16 %v1693_v60, %v1693_v60  ;;  %v1627_v1 = vsel %vm1371_vm1, %v898_v45, %v1499_v58  ;;  %vm1376_vm4 = vcmp.ge.f32.partialorder %v2928_v62, 0.0  ;;  %v1504_v2 = vmul.f32 0.2, %v2928_v62  ;;  %v1167_v4 = vpop.f32.mrb[17].mxu1 }
 0x109   : > { %2270 = vst.msk [vmem:[%s3302_s24 + $0x3c] sm:$0xf] %vm2254_vm3, %v2724_v59  ;;  %v2722_v5 = vpack.c.bf16 %v1627_v1, %v1627_v1  ;;  %v1691_v6 = vsel %vm1435_vm2, %v1154_v46, %v1563_v61  ;;  %vm1440_vm5 = vcmp.ge.f32.partialorder %v2992_v63, 0.0  ;;  %v1568_v7 = vmul.f32 0.2, %v2992_v63  ;;  %v2929_v8 = vpop.f32.mrb[18].mxu0 }
 0x10a   : > { %v2993_v9 = vpop.f32.mrb[18].mxu1  ;;  %2334 = vst.msk [vmem:[%s3302_s24 + $0x13c] sm:$0xf] %vm2254_vm3, %v2788_v0  ;;  %v2786_v10 = vpack.c.bf16 %v1691_v6, %v1691_v6  ;;  %v1632_v11 = vsel %vm1376_vm4, %v2928_v62, %v1504_v2  ;;  %vm1374_vm6 = vcmp.ge.f32.partialorder %v911_v3, 0.0  ;;  %v1502_v12 = vmul.f32 0.2, %v911_v3 }
 0x10b   : > { %v914_v13 = vpop.f32.mrb[19].mxu0  ;;  %v1170_v14 = vpop.f32.mrb[19].mxu1  ;;  %2268 = vst.msk [vmem:[%s3302_s24 + $0x34] sm:$0xf] %vm2254_vm3, %v2722_v5  ;;  %v2727_v15 = vpack.c.bf16 %v1632_v11, %v1632_v11  ;;  %v1696_v16 = vsel %vm1440_vm5, %v2992_v63, %v1568_v7  ;;  %vm1438_vm7 = vcmp.ge.f32.partialorder %v1167_v4, 0.0  ;;  %vm1377_vm8 = vcmp.ge.f32.partialorder %v2929_v8, 0.0 }
 0x10c   : > { %v1566_v17 = vmul.f32 0.2, %v1167_v4  ;;  %2332 = vst.msk [vmem:[%s3302_s24 + $0x134] sm:$0xf] %vm2254_vm3, %v2786_v10  ;;  %v2791_v18 = vpack.c.bf16 %v1696_v16, %v1696_v16  ;;  %v1630_v19 = vsel %vm1374_vm6, %v911_v3, %v1502_v12  ;;  %v1505_v20 = vmul.f32 0.2, %v2929_v8 }
 0x10d   : > { %2273 = vst.msk [vmem:[%s3302_s24 + $0x48] sm:$0xf] %vm2254_vm3, %v2727_v15  ;;  %v2725_v21 = vpack.c.bf16 %v1630_v19, %v1630_v19  ;;  %vm1441_vm9 = vcmp.ge.f32.partialorder %v2993_v9, 0.0  ;;  %v1569_v23 = vmul.f32 0.2, %v2993_v9  ;;  %vm1375_vm10 = vcmp.ge.f32.partialorder %v914_v13, 0.0 }
 0x10e   : > { %v1694_v22 = vsel %vm1438_vm7, %v1167_v4, %v1566_v17  ;;  %2337 = vst.msk [vmem:[%s3302_s24 + $0x148] sm:$0xf] %vm2254_vm3, %v2791_v18  ;;  %v1633_v25 = vsel %vm1377_vm8, %v2929_v8, %v1505_v20  ;;  %v1503_v26 = vmul.f32 0.2, %v914_v13  ;;  %vm1439_vm11 = vcmp.ge.f32.partialorder %v1170_v14, 0.0  ;;  %v2932_v30 = vpop.f32.mrb[20].mxu0 }
 0x10f   : > { %v2789_v24 = vpack.c.bf16 %v1694_v22, %v1694_v22  ;;  %2271 = vst.msk [vmem:[%s3302_s24 + $0x40] sm:$0xf] %vm2254_vm3, %v2725_v21  ;;  %v2728_v27 = vpack.c.bf16 %v1633_v25, %v1633_v25  ;;  %v1697_v28 = vsel %vm1441_vm9, %v2993_v9, %v1569_v23  ;;  %v1567_v29 = vmul.f32 0.2, %v1170_v14  ;;  %v2996_v31 = vpop.f32.mrb[20].mxu1  ;;  %v927_v35 = vpop.f32.mrb[21].mxu0 }
 0x110   : > { %v2792_v32 = vpack.c.bf16 %v1697_v28, %v1697_v28  ;;  %v1631_v33 = vsel %vm1375_vm10, %v914_v13, %v1503_v26  ;;  %vm1380_vm12 = vcmp.ge.f32.partialorder %v2932_v30, 0.0  ;;  %v1508_v34 = vmul.f32 0.2, %v2932_v30  ;;  %v1183_v36 = vpop.f32.mrb[21].mxu1  ;;  %v2933_v40 = vpop.f32.mrb[22].mxu0 }
 0x111   : > { %2335 = vst.msk [vmem:[%s3302_s24 + $0x140] sm:$0xf] %vm2254_vm3, %v2789_v24  ;;  %2274 = vst.msk [vmem:[%s3302_s24 + $0x4c] sm:$0xf] %vm2254_vm3, %v2728_v27  ;;  %v2726_v37 = vpack.c.bf16 %v1631_v33, %v1631_v33  ;;  %v1695_v38 = vsel %vm1439_vm11, %v1170_v14, %v1567_v29  ;;  %vm1444_vm13 = vcmp.ge.f32.partialorder %v2996_v31, 0.0  ;;  %v2997_v41 = vpop.f32.mrb[22].mxu1 }
 0x112   : > { %v1572_v39 = vmul.f32 0.2, %v2996_v31  ;;  %2338 = vst.msk [vmem:[%s3302_s24 + $0x14c] sm:$0xf] %vm2254_vm3, %v2792_v32  ;;  %v2790_v42 = vpack.c.bf16 %v1695_v38, %v1695_v38  ;;  %v1636_v43 = vsel %vm1380_vm12, %v2932_v30, %v1508_v34  ;;  %vm1378_vm14 = vcmp.ge.f32.partialorder %v927_v35, 0.0  ;;  %v930_v45 = vpop.f32.mrb[23].mxu0 }
 0x113   : > { %v1506_v44 = vmul.f32 0.2, %v927_v35  ;;  %v1186_v46 = vpop.f32.mrb[23].mxu1  ;;  %2272 = vst.msk [vmem:[%s3302_s24 + $0x44] sm:$0xf] %vm2254_vm3, %v2726_v37  ;;  %v2731_v47 = vpack.c.bf16 %v1636_v43, %v1636_v43  ;;  %vm1442_vm15 = vcmp.ge.f32.partialorder %v1183_v36, 0.0 }
 0x114   : > { %v1700_v48 = vsel %vm1444_vm13, %v2996_v31, %v1572_v39  ;;  %v1570_v49 = vmul.f32 0.2, %v1183_v36  ;;  %2336 = vst.msk [vmem:[%s3302_s24 + $0x144] sm:$0xf] %vm2254_vm3, %v2790_v42  ;;  %vm1381_vm0 = vcmp.ge.f32.partialorder %v2933_v40, 0.0  ;;  %vm1445_vm1 = vcmp.ge.f32.partialorder %v2997_v41, 0.0 }
 0x115   : > { %v2795_v50 = vpack.c.bf16 %v1700_v48, %v1700_v48  ;;  %v1634_v51 = vsel %vm1378_vm14, %v927_v35, %v1506_v44  ;;  %v1509_v52 = vmul.f32 0.2, %v2933_v40  ;;  %2277 = vst.msk [vmem:[%s3302_s24 + $0x58] sm:$0xf] %vm2254_vm3, %v2731_v47  ;;  %v1573_v55 = vmul.f32 0.2, %v2997_v41 }
 0x116   : > { %v2729_v53 = vpack.c.bf16 %v1634_v51, %v1634_v51  ;;  %v1698_v54 = vsel %vm1442_vm15, %v1183_v36, %v1570_v49  ;;  %vm1379_vm2 = vcmp.ge.f32.partialorder %v930_v45, 0.0  ;;  %v1507_v58 = vmul.f32 0.2, %v930_v45  ;;  %v2936_v62 = vpop.f32.mrb[24].mxu0  ;;  %v3000_v63 = vpop.f32.mrb[24].mxu1 }
 0x117   : > { %2341 = vst.msk [vmem:[%s3302_s24 + $0x158] sm:$0xf] %vm2254_vm3, %v2795_v50  ;;  %v2793_v56 = vpack.c.bf16 %v1698_v54, %v1698_v54  ;;  %v1637_v57 = vsel %vm1381_vm0, %v2933_v40, %v1509_v52  ;;  %v1701_v60 = vsel %vm1445_vm1, %v2997_v41, %v1573_v55  ;;  %vm1443_vm4 = vcmp.ge.f32.partialorder %v1186_v46, 0.0  ;;  %v943_v3 = vpop.f32.mrb[25].mxu0  ;;  %v1199_v4 = vpop.f32.mrb[25].mxu1 }
 0x118   : > { %2275 = vst.msk [vmem:[%s3302_s24 + $0x50] sm:$0xf] %vm2254_vm3, %v2729_v53  ;;  %v2732_v59 = vpack.c.bf16 %v1637_v57, %v1637_v57  ;;  %v1571_v61 = vmul.f32 0.2, %v1186_v46  ;;  %v2796_v0 = vpack.c.bf16 %v1701_v60, %v1701_v60  ;;  %v1635_v1 = vsel %vm1379_vm2, %v930_v45, %v1507_v58  ;;  %v2937_v8 = vpop.f32.mrb[26].mxu0  ;;  %v3001_v9 = vpop.f32.mrb[26].mxu1 }
 0x119   : > { %2339 = vst.msk [vmem:[%s3302_s24 + $0x150] sm:$0xf] %vm2254_vm3, %v2793_v56  ;;  %vm1384_vm5 = vcmp.ge.f32.partialorder %v2936_v62, 0.0  ;;  %v1512_v2 = vmul.f32 0.2, %v2936_v62  ;;  %v2730_v5 = vpack.c.bf16 %v1635_v1, %v1635_v1  ;;  %vm1448_vm6 = vcmp.ge.f32.partialorder %v3000_v63, 0.0 }
 0x11a   : > { %2278 = vst.msk [vmem:[%s3302_s24 + $0x5c] sm:$0xf] %vm2254_vm3, %v2732_v59  ;;  %v1699_v6 = vsel %vm1443_vm4, %v1186_v46, %v1571_v61  ;;  %v1576_v7 = vmul.f32 0.2, %v3000_v63  ;;  %2342 = vst.msk [vmem:[%s3302_s24 + $0x15c] sm:$0xf] %vm2254_vm3, %v2796_v0 }
 0x11b   : > { %v2794_v10 = vpack.c.bf16 %v1699_v6, %v1699_v6  ;;  %v1640_v11 = vsel %vm1384_vm5, %v2936_v62, %v1512_v2  ;;  %vm1382_vm7 = vcmp.ge.f32.partialorder %v943_v3, 0.0  ;;  %v1510_v12 = vmul.f32 0.2, %v943_v3  ;;  %v946_v13 = vpop.f32.mrb[27].mxu0  ;;  %v1202_v14 = vpop.f32.mrb[27].mxu1 }
 0x11c   : > { %2276 = vst.msk [vmem:[%s3302_s24 + $0x54] sm:$0xf] %vm2254_vm3, %v2730_v5  ;;  %v2735_v15 = vpack.c.bf16 %v1640_v11, %v1640_v11  ;;  %v1704_v16 = vsel %vm1448_vm6, %v3000_v63, %v1576_v7  ;;  %vm1446_vm8 = vcmp.ge.f32.partialorder %v1199_v4, 0.0  ;;  %v1574_v17 = vmul.f32 0.2, %v1199_v4 }
 0x11d   : > { %2340 = vst.msk [vmem:[%s3302_s24 + $0x154] sm:$0xf] %vm2254_vm3, %v2794_v10  ;;  %v2799_v18 = vpack.c.bf16 %v1704_v16, %v1704_v16  ;;  %v1638_v19 = vsel %vm1382_vm7, %v943_v3, %v1510_v12  ;;  %vm1385_vm9 = vcmp.ge.f32.partialorder %v2937_v8, 0.0  ;;  %v1513_v20 = vmul.f32 0.2, %v2937_v8  ;;  %v2940_v30 = vpop.f32.mrb[28].mxu0 }
 0x11e   : > { %2281 = vst.msk [vmem:[%s3302_s24 + $0x68] sm:$0xf] %vm2254_vm3, %v2735_v15  ;;  %v2733_v21 = vpack.c.bf16 %v1638_v19, %v1638_v19  ;;  %v1702_v22 = vsel %vm1446_vm8, %v1199_v4, %v1574_v17  ;;  %vm1449_vm10 = vcmp.ge.f32.partialorder %v3001_v9, 0.0  ;;  %v1577_v23 = vmul.f32 0.2, %v3001_v9  ;;  %v3004_v31 = vpop.f32.mrb[28].mxu1 }
 0x11f   : > { %2345 = vst.msk [vmem:[%s3302_s24 + $0x168] sm:$0xf] %vm2254_vm3, %v2799_v18  ;;  %v2797_v24 = vpack.c.bf16 %v1702_v22, %v1702_v22  ;;  %v1641_v25 = vsel %vm1385_vm9, %v2937_v8, %v1513_v20  ;;  %vm1383_vm11 = vcmp.ge.f32.partialorder %v946_v13, 0.0  ;;  %v1511_v26 = vmul.f32 0.2, %v946_v13  ;;  %v959_v35 = vpop.f32.mrb[29].mxu0 }
 0x120   : > { %2279 = vst.msk [vmem:[%s3302_s24 + $0x60] sm:$0xf] %vm2254_vm3, %v2733_v21  ;;  %v2736_v27 = vpack.c.bf16 %v1641_v25, %v1641_v25  ;;  %v1705_v28 = vsel %vm1449_vm10, %v3001_v9, %v1577_v23  ;;  %vm1447_vm12 = vcmp.ge.f32.partialorder %v1202_v14, 0.0  ;;  %v1575_v29 = vmul.f32 0.2, %v1202_v14  ;;  %v1215_v36 = vpop.f32.mrb[29].mxu1 }
 0x121   : > { %2343 = vst.msk [vmem:[%s3302_s24 + $0x160] sm:$0xf] %vm2254_vm3, %v2797_v24  ;;  %v2800_v32 = vpack.c.bf16 %v1705_v28, %v1705_v28  ;;  %v1639_v33 = vsel %vm1383_vm11, %v946_v13, %v1511_v26  ;;  %vm1388_vm13 = vcmp.ge.f32.partialorder %v2940_v30, 0.0  ;;  %v1516_v34 = vmul.f32 0.2, %v2940_v30  ;;  %v2941_v40 = vpop.f32.mrb[30].mxu0 }
 0x122   : > { %2282 = vst.msk [vmem:[%s3302_s24 + $0x6c] sm:$0xf] %vm2254_vm3, %v2736_v27  ;;  %v2734_v37 = vpack.c.bf16 %v1639_v33, %v1639_v33  ;;  %v1703_v38 = vsel %vm1447_vm12, %v1202_v14, %v1575_v29  ;;  %vm1452_vm14 = vcmp.ge.f32.partialorder %v3004_v31, 0.0  ;;  %v1580_v39 = vmul.f32 0.2, %v3004_v31  ;;  %v3005_v41 = vpop.f32.mrb[30].mxu1 }
 0x123   : > { %2346 = vst.msk [vmem:[%s3302_s24 + $0x16c] sm:$0xf] %vm2254_vm3, %v2800_v32  ;;  %v2798_v42 = vpack.c.bf16 %v1703_v38, %v1703_v38  ;;  %v1644_v43 = vsel %vm1388_vm13, %v2940_v30, %v1516_v34  ;;  %vm1386_vm15 = vcmp.ge.f32.partialorder %v959_v35, 0.0  ;;  %v1514_v44 = vmul.f32 0.2, %v959_v35  ;;  %v962_v45 = vpop.f32.mrb[31].mxu0 }
 0x124   : > { %v1218_v46 = vpop.f32.mrb[31].mxu1  ;;  %2280 = vst.msk [vmem:[%s3302_s24 + $0x64] sm:$0xf] %vm2254_vm3, %v2734_v37  ;;  %v2739_v47 = vpack.c.bf16 %v1644_v43, %v1644_v43  ;;  %v1708_v48 = vsel %vm1452_vm14, %v3004_v31, %v1580_v39  ;;  %vm1450_vm0 = vcmp.ge.f32.partialorder %v1215_v36, 0.0  ;;  %v1578_v49 = vmul.f32 0.2, %v1215_v36 }
 0x125   : > { %2344 = vst.msk [vmem:[%s3302_s24 + $0x164] sm:$0xf] %vm2254_vm3, %v2798_v42  ;;  %v2803_v50 = vpack.c.bf16 %v1708_v48, %v1708_v48  ;;  %v1642_v51 = vsel %vm1386_vm15, %v959_v35, %v1514_v44  ;;  %vm1389_vm1 = vcmp.ge.f32.partialorder %v2941_v40, 0.0  ;;  %v1517_v52 = vmul.f32 0.2, %v2941_v40  ;;  %v2944_v62 = vpop.f32.mrb[32].mxu0 }
 0x126   : > { %2285 = vst.msk [vmem:[%s3302_s24 + $0x78] sm:$0xf] %vm2254_vm3, %v2739_v47  ;;  %v2737_v53 = vpack.c.bf16 %v1642_v51, %v1642_v51  ;;  %v1706_v54 = vsel %vm1450_vm0, %v1215_v36, %v1578_v49  ;;  %vm1453_vm2 = vcmp.ge.f32.partialorder %v3005_v41, 0.0  ;;  %v1581_v55 = vmul.f32 0.2, %v3005_v41  ;;  %v3008_v63 = vpop.f32.mrb[32].mxu1 }
 0x127   : > { %2349 = vst.msk [vmem:[%s3302_s24 + $0x178] sm:$0xf] %vm2254_vm3, %v2803_v50  ;;  %v2801_v56 = vpack.c.bf16 %v1706_v54, %v1706_v54  ;;  %v1645_v57 = vsel %vm1389_vm1, %v2941_v40, %v1517_v52  ;;  %vm1387_vm4 = vcmp.ge.f32.partialorder %v962_v45, 0.0  ;;  %v1515_v58 = vmul.f32 0.2, %v962_v45  ;;  %v975_v3 = vpop.f32.mrb[33].mxu0 }
 0x128   : > { %2283 = vst.msk [vmem:[%s3302_s24 + $0x70] sm:$0xf] %vm2254_vm3, %v2737_v53  ;;  %v2740_v59 = vpack.c.bf16 %v1645_v57, %v1645_v57  ;;  %v1709_v60 = vsel %vm1453_vm2, %v3005_v41, %v1581_v55  ;;  %vm1451_vm5 = vcmp.ge.f32.partialorder %v1218_v46, 0.0  ;;  %v1579_v61 = vmul.f32 0.2, %v1218_v46  ;;  %v1231_v4 = vpop.f32.mrb[33].mxu1 }
 0x129   : > { %2347 = vst.msk [vmem:[%s3302_s24 + $0x170] sm:$0xf] %vm2254_vm3, %v2801_v56  ;;  %v2804_v0 = vpack.c.bf16 %v1709_v60, %v1709_v60  ;;  %v1643_v1 = vsel %vm1387_vm4, %v962_v45, %v1515_v58  ;;  %vm1392_vm6 = vcmp.ge.f32.partialorder %v2944_v62, 0.0  ;;  %v1520_v2 = vmul.f32 0.2, %v2944_v62  ;;  %v2945_v8 = vpop.f32.mrb[34].mxu0 }
 0x12a   : > { %2286 = vst.msk [vmem:[%s3302_s24 + $0x7c] sm:$0xf] %vm2254_vm3, %v2740_v59  ;;  %v2738_v5 = vpack.c.bf16 %v1643_v1, %v1643_v1  ;;  %v1707_v6 = vsel %vm1451_vm5, %v1218_v46, %v1579_v61  ;;  %vm1456_vm7 = vcmp.ge.f32.partialorder %v3008_v63, 0.0  ;;  %v1584_v7 = vmul.f32 0.2, %v3008_v63  ;;  %v3009_v9 = vpop.f32.mrb[34].mxu1 }
 0x12b   : > { %2350 = vst.msk [vmem:[%s3302_s24 + $0x17c] sm:$0xf] %vm2254_vm3, %v2804_v0  ;;  %v2802_v10 = vpack.c.bf16 %v1707_v6, %v1707_v6  ;;  %v1648_v11 = vsel %vm1392_vm6, %v2944_v62, %v1520_v2  ;;  %vm1390_vm8 = vcmp.ge.f32.partialorder %v975_v3, 0.0  ;;  %v1518_v12 = vmul.f32 0.2, %v975_v3  ;;  %v978_v13 = vpop.f32.mrb[35].mxu0 }
 0x12c   : > { %v1234_v14 = vpop.f32.mrb[35].mxu1  ;;  %2284 = vst.msk [vmem:[%s3302_s24 + $0x74] sm:$0xf] %vm2254_vm3, %v2738_v5  ;;  %v2743_v15 = vpack.c.bf16 %v1648_v11, %v1648_v11  ;;  %v1712_v16 = vsel %vm1456_vm7, %v3008_v63, %v1584_v7  ;;  %vm1454_vm9 = vcmp.ge.f32.partialorder %v1231_v4, 0.0  ;;  %v1582_v17 = vmul.f32 0.2, %v1231_v4 }
 0x12d   : > { %2348 = vst.msk [vmem:[%s3302_s24 + $0x174] sm:$0xf] %vm2254_vm3, %v2802_v10  ;;  %v2807_v18 = vpack.c.bf16 %v1712_v16, %v1712_v16  ;;  %v1646_v19 = vsel %vm1390_vm8, %v975_v3, %v1518_v12  ;;  %vm1393_vm10 = vcmp.ge.f32.partialorder %v2945_v8, 0.0  ;;  %v1521_v20 = vmul.f32 0.2, %v2945_v8  ;;  %v2948_v30 = vpop.f32.mrb[36].mxu0 }
 0x12e   : > { %2289 = vst.msk [vmem:[%s3302_s24 + $0x88] sm:$0xf] %vm2254_vm3, %v2743_v15  ;;  %v2741_v21 = vpack.c.bf16 %v1646_v19, %v1646_v19  ;;  %v1710_v22 = vsel %vm1454_vm9, %v1231_v4, %v1582_v17  ;;  %vm1457_vm11 = vcmp.ge.f32.partialorder %v3009_v9, 0.0  ;;  %v1585_v23 = vmul.f32 0.2, %v3009_v9  ;;  %v3012_v31 = vpop.f32.mrb[36].mxu1 }
 0x12f   : > { %2353 = vst.msk [vmem:[%s3302_s24 + $0x188] sm:$0xf] %vm2254_vm3, %v2807_v18  ;;  %v2805_v24 = vpack.c.bf16 %v1710_v22, %v1710_v22  ;;  %v1649_v25 = vsel %vm1393_vm10, %v2945_v8, %v1521_v20  ;;  %vm1391_vm12 = vcmp.ge.f32.partialorder %v978_v13, 0.0  ;;  %v1519_v26 = vmul.f32 0.2, %v978_v13  ;;  %v991_v35 = vpop.f32.mrb[37].mxu0 }
 0x130   : > { %2287 = vst.msk [vmem:[%s3302_s24 + $0x80] sm:$0xf] %vm2254_vm3, %v2741_v21  ;;  %v2744_v27 = vpack.c.bf16 %v1649_v25, %v1649_v25  ;;  %v1713_v28 = vsel %vm1457_vm11, %v3009_v9, %v1585_v23  ;;  %vm1455_vm13 = vcmp.ge.f32.partialorder %v1234_v14, 0.0  ;;  %v1583_v29 = vmul.f32 0.2, %v1234_v14  ;;  %v1247_v36 = vpop.f32.mrb[37].mxu1 }
 0x131   : > { %2351 = vst.msk [vmem:[%s3302_s24 + $0x180] sm:$0xf] %vm2254_vm3, %v2805_v24  ;;  %v2808_v32 = vpack.c.bf16 %v1713_v28, %v1713_v28  ;;  %v1647_v33 = vsel %vm1391_vm12, %v978_v13, %v1519_v26  ;;  %vm1396_vm14 = vcmp.ge.f32.partialorder %v2948_v30, 0.0  ;;  %v1524_v34 = vmul.f32 0.2, %v2948_v30  ;;  %v2949_v40 = vpop.f32.mrb[38].mxu0 }
 0x132   : > { %2290 = vst.msk [vmem:[%s3302_s24 + $0x8c] sm:$0xf] %vm2254_vm3, %v2744_v27  ;;  %v2742_v37 = vpack.c.bf16 %v1647_v33, %v1647_v33  ;;  %v1711_v38 = vsel %vm1455_vm13, %v1234_v14, %v1583_v29  ;;  %vm1460_vm15 = vcmp.ge.f32.partialorder %v3012_v31, 0.0  ;;  %v1588_v39 = vmul.f32 0.2, %v3012_v31  ;;  %v3013_v41 = vpop.f32.mrb[38].mxu1 }
 0x133   : > { %2354 = vst.msk [vmem:[%s3302_s24 + $0x18c] sm:$0xf] %vm2254_vm3, %v2808_v32  ;;  %v2806_v42 = vpack.c.bf16 %v1711_v38, %v1711_v38  ;;  %v1652_v43 = vsel %vm1396_vm14, %v2948_v30, %v1524_v34  ;;  %vm1394_vm0 = vcmp.ge.f32.partialorder %v991_v35, 0.0  ;;  %v1522_v44 = vmul.f32 0.2, %v991_v35  ;;  %v994_v45 = vpop.f32.mrb[39].mxu0 }
 0x134   : > { %v1250_v46 = vpop.f32.mrb[39].mxu1  ;;  %2288 = vst.msk [vmem:[%s3302_s24 + $0x84] sm:$0xf] %vm2254_vm3, %v2742_v37  ;;  %v2747_v47 = vpack.c.bf16 %v1652_v43, %v1652_v43  ;;  %v1716_v48 = vsel %vm1460_vm15, %v3012_v31, %v1588_v39  ;;  %vm1458_vm1 = vcmp.ge.f32.partialorder %v1247_v36, 0.0  ;;  %v1586_v49 = vmul.f32 0.2, %v1247_v36 }
 0x135   : > { %2352 = vst.msk [vmem:[%s3302_s24 + $0x184] sm:$0xf] %vm2254_vm3, %v2806_v42  ;;  %v2811_v50 = vpack.c.bf16 %v1716_v48, %v1716_v48  ;;  %v1650_v51 = vsel %vm1394_vm0, %v991_v35, %v1522_v44  ;;  %vm1397_vm2 = vcmp.ge.f32.partialorder %v2949_v40, 0.0  ;;  %v1525_v52 = vmul.f32 0.2, %v2949_v40  ;;  %v2952_v62 = vpop.f32.mrb[40].mxu0 }
 0x136   : > { %2293 = vst.msk [vmem:[%s3302_s24 + $0x98] sm:$0xf] %vm2254_vm3, %v2747_v47  ;;  %v2745_v53 = vpack.c.bf16 %v1650_v51, %v1650_v51  ;;  %v1714_v54 = vsel %vm1458_vm1, %v1247_v36, %v1586_v49  ;;  %vm1461_vm4 = vcmp.ge.f32.partialorder %v3013_v41, 0.0  ;;  %v1589_v55 = vmul.f32 0.2, %v3013_v41  ;;  %v3016_v63 = vpop.f32.mrb[40].mxu1 }
 0x137   : > { %2357 = vst.msk [vmem:[%s3302_s24 + $0x198] sm:$0xf] %vm2254_vm3, %v2811_v50  ;;  %v2809_v56 = vpack.c.bf16 %v1714_v54, %v1714_v54  ;;  %v1653_v57 = vsel %vm1397_vm2, %v2949_v40, %v1525_v52  ;;  %vm1395_vm5 = vcmp.ge.f32.partialorder %v994_v45, 0.0  ;;  %v1523_v58 = vmul.f32 0.2, %v994_v45  ;;  %v1007_v3 = vpop.f32.mrb[41].mxu0 }
 0x138   : > { %2291 = vst.msk [vmem:[%s3302_s24 + $0x90] sm:$0xf] %vm2254_vm3, %v2745_v53  ;;  %v2748_v59 = vpack.c.bf16 %v1653_v57, %v1653_v57  ;;  %v1717_v60 = vsel %vm1461_vm4, %v3013_v41, %v1589_v55  ;;  %vm1459_vm6 = vcmp.ge.f32.partialorder %v1250_v46, 0.0  ;;  %v1587_v61 = vmul.f32 0.2, %v1250_v46  ;;  %v1263_v4 = vpop.f32.mrb[41].mxu1 }
 0x139   : > { %2355 = vst.msk [vmem:[%s3302_s24 + $0x190] sm:$0xf] %vm2254_vm3, %v2809_v56  ;;  %v2812_v0 = vpack.c.bf16 %v1717_v60, %v1717_v60  ;;  %v1651_v1 = vsel %vm1395_vm5, %v994_v45, %v1523_v58  ;;  %vm1400_vm7 = vcmp.ge.f32.partialorder %v2952_v62, 0.0  ;;  %v1528_v2 = vmul.f32 0.2, %v2952_v62  ;;  %v2953_v8 = vpop.f32.mrb[42].mxu0 }
 0x13a   : > { %2294 = vst.msk [vmem:[%s3302_s24 + $0x9c] sm:$0xf] %vm2254_vm3, %v2748_v59  ;;  %v2746_v5 = vpack.c.bf16 %v1651_v1, %v1651_v1  ;;  %v1715_v6 = vsel %vm1459_vm6, %v1250_v46, %v1587_v61  ;;  %vm1464_vm8 = vcmp.ge.f32.partialorder %v3016_v63, 0.0  ;;  %v1592_v7 = vmul.f32 0.2, %v3016_v63  ;;  %v3017_v9 = vpop.f32.mrb[42].mxu1 }
 0x13b   : > { %2358 = vst.msk [vmem:[%s3302_s24 + $0x19c] sm:$0xf] %vm2254_vm3, %v2812_v0  ;;  %v2810_v10 = vpack.c.bf16 %v1715_v6, %v1715_v6  ;;  %v1656_v11 = vsel %vm1400_vm7, %v2952_v62, %v1528_v2  ;;  %vm1398_vm9 = vcmp.ge.f32.partialorder %v1007_v3, 0.0  ;;  %v1526_v12 = vmul.f32 0.2, %v1007_v3  ;;  %v1010_v13 = vpop.f32.mrb[43].mxu0 }
 0x13c   : > { %v1266_v14 = vpop.f32.mrb[43].mxu1  ;;  %2292 = vst.msk [vmem:[%s3302_s24 + $0x94] sm:$0xf] %vm2254_vm3, %v2746_v5  ;;  %v2751_v15 = vpack.c.bf16 %v1656_v11, %v1656_v11  ;;  %v1720_v16 = vsel %vm1464_vm8, %v3016_v63, %v1592_v7  ;;  %vm1462_vm10 = vcmp.ge.f32.partialorder %v1263_v4, 0.0  ;;  %v1590_v17 = vmul.f32 0.2, %v1263_v4 }
 0x13d   : > { %2356 = vst.msk [vmem:[%s3302_s24 + $0x194] sm:$0xf] %vm2254_vm3, %v2810_v10  ;;  %v2815_v18 = vpack.c.bf16 %v1720_v16, %v1720_v16  ;;  %v1654_v19 = vsel %vm1398_vm9, %v1007_v3, %v1526_v12  ;;  %vm1401_vm11 = vcmp.ge.f32.partialorder %v2953_v8, 0.0  ;;  %v1529_v20 = vmul.f32 0.2, %v2953_v8  ;;  %v2956_v30 = vpop.f32.mrb[44].mxu0 }
 0x13e   : > { %2297 = vst.msk [vmem:[%s3302_s24 + $0xa8] sm:$0xf] %vm2254_vm3, %v2751_v15  ;;  %v2749_v21 = vpack.c.bf16 %v1654_v19, %v1654_v19  ;;  %v1718_v22 = vsel %vm1462_vm10, %v1263_v4, %v1590_v17  ;;  %vm1465_vm12 = vcmp.ge.f32.partialorder %v3017_v9, 0.0  ;;  %v1593_v23 = vmul.f32 0.2, %v3017_v9  ;;  %v3020_v31 = vpop.f32.mrb[44].mxu1 }
 0x13f   : > { %2361 = vst.msk [vmem:[%s3302_s24 + $0x1a8] sm:$0xf] %vm2254_vm3, %v2815_v18  ;;  %v2813_v24 = vpack.c.bf16 %v1718_v22, %v1718_v22  ;;  %v1657_v25 = vsel %vm1401_vm11, %v2953_v8, %v1529_v20  ;;  %vm1399_vm13 = vcmp.ge.f32.partialorder %v1010_v13, 0.0  ;;  %v1527_v26 = vmul.f32 0.2, %v1010_v13  ;;  %v1023_v35 = vpop.f32.mrb[45].mxu0 }
 0x140   : > { %2295 = vst.msk [vmem:[%s3302_s24 + $0xa0] sm:$0xf] %vm2254_vm3, %v2749_v21  ;;  %v2752_v27 = vpack.c.bf16 %v1657_v25, %v1657_v25  ;;  %v1721_v28 = vsel %vm1465_vm12, %v3017_v9, %v1593_v23  ;;  %vm1463_vm14 = vcmp.ge.f32.partialorder %v1266_v14, 0.0  ;;  %v1591_v29 = vmul.f32 0.2, %v1266_v14  ;;  %v1279_v36 = vpop.f32.mrb[45].mxu1 }
 0x141   : > { %2359 = vst.msk [vmem:[%s3302_s24 + $0x1a0] sm:$0xf] %vm2254_vm3, %v2813_v24  ;;  %v2816_v32 = vpack.c.bf16 %v1721_v28, %v1721_v28  ;;  %v1655_v33 = vsel %vm1399_vm13, %v1010_v13, %v1527_v26  ;;  %vm1404_vm15 = vcmp.ge.f32.partialorder %v2956_v30, 0.0  ;;  %v1532_v34 = vmul.f32 0.2, %v2956_v30  ;;  %v2957_v40 = vpop.f32.mrb[46].mxu0 }
 0x142   : > { %2298 = vst.msk [vmem:[%s3302_s24 + $0xac] sm:$0xf] %vm2254_vm3, %v2752_v27  ;;  %v2750_v37 = vpack.c.bf16 %v1655_v33, %v1655_v33  ;;  %v1719_v38 = vsel %vm1463_vm14, %v1266_v14, %v1591_v29  ;;  %vm1468_vm0 = vcmp.ge.f32.partialorder %v3020_v31, 0.0  ;;  %v1596_v39 = vmul.f32 0.2, %v3020_v31  ;;  %v3021_v41 = vpop.f32.mrb[46].mxu1 }
 0x143   : > { %2362 = vst.msk [vmem:[%s3302_s24 + $0x1ac] sm:$0xf] %vm2254_vm3, %v2816_v32  ;;  %v2814_v42 = vpack.c.bf16 %v1719_v38, %v1719_v38  ;;  %v1660_v43 = vsel %vm1404_vm15, %v2956_v30, %v1532_v34  ;;  %vm1402_vm1 = vcmp.ge.f32.partialorder %v1023_v35, 0.0  ;;  %v1530_v44 = vmul.f32 0.2, %v1023_v35  ;;  %v1026_v45 = vpop.f32.mrb[47].mxu0 }
 0x144   : > { %v1282_v46 = vpop.f32.mrb[47].mxu1  ;;  %2296 = vst.msk [vmem:[%s3302_s24 + $0xa4] sm:$0xf] %vm2254_vm3, %v2750_v37  ;;  %v2755_v47 = vpack.c.bf16 %v1660_v43, %v1660_v43  ;;  %v1724_v48 = vsel %vm1468_vm0, %v3020_v31, %v1596_v39  ;;  %vm1466_vm2 = vcmp.ge.f32.partialorder %v1279_v36, 0.0  ;;  %v1594_v49 = vmul.f32 0.2, %v1279_v36 }
 0x145   : > { %2360 = vst.msk [vmem:[%s3302_s24 + $0x1a4] sm:$0xf] %vm2254_vm3, %v2814_v42  ;;  %v2819_v50 = vpack.c.bf16 %v1724_v48, %v1724_v48  ;;  %v1658_v51 = vsel %vm1402_vm1, %v1023_v35, %v1530_v44  ;;  %vm1405_vm4 = vcmp.ge.f32.partialorder %v2957_v40, 0.0  ;;  %v1533_v52 = vmul.f32 0.2, %v2957_v40  ;;  %v2960_v62 = vpop.f32.mrb[48].mxu0 }
 0x146   : > { %2301 = vst.msk [vmem:[%s3302_s24 + $0xb8] sm:$0xf] %vm2254_vm3, %v2755_v47  ;;  %v2753_v53 = vpack.c.bf16 %v1658_v51, %v1658_v51  ;;  %v1722_v54 = vsel %vm1466_vm2, %v1279_v36, %v1594_v49  ;;  %vm1469_vm5 = vcmp.ge.f32.partialorder %v3021_v41, 0.0  ;;  %v1597_v55 = vmul.f32 0.2, %v3021_v41  ;;  %v3024_v63 = vpop.f32.mrb[48].mxu1 }
 0x147   : > { %2365 = vst.msk [vmem:[%s3302_s24 + $0x1b8] sm:$0xf] %vm2254_vm3, %v2819_v50  ;;  %v2817_v56 = vpack.c.bf16 %v1722_v54, %v1722_v54  ;;  %v1661_v57 = vsel %vm1405_vm4, %v2957_v40, %v1533_v52  ;;  %vm1403_vm6 = vcmp.ge.f32.partialorder %v1026_v45, 0.0  ;;  %v1531_v58 = vmul.f32 0.2, %v1026_v45  ;;  %v1039_v3 = vpop.f32.mrb[49].mxu0 }
 0x148   : > { %2299 = vst.msk [vmem:[%s3302_s24 + $0xb0] sm:$0xf] %vm2254_vm3, %v2753_v53  ;;  %v2756_v59 = vpack.c.bf16 %v1661_v57, %v1661_v57  ;;  %v1725_v60 = vsel %vm1469_vm5, %v3021_v41, %v1597_v55  ;;  %vm1467_vm7 = vcmp.ge.f32.partialorder %v1282_v46, 0.0  ;;  %v1595_v61 = vmul.f32 0.2, %v1282_v46  ;;  %v1295_v4 = vpop.f32.mrb[49].mxu1 }
 0x149   : > { %2363 = vst.msk [vmem:[%s3302_s24 + $0x1b0] sm:$0xf] %vm2254_vm3, %v2817_v56  ;;  %v2820_v0 = vpack.c.bf16 %v1725_v60, %v1725_v60  ;;  %v1659_v1 = vsel %vm1403_vm6, %v1026_v45, %v1531_v58  ;;  %vm1408_vm8 = vcmp.ge.f32.partialorder %v2960_v62, 0.0  ;;  %v1536_v2 = vmul.f32 0.2, %v2960_v62  ;;  %v2961_v8 = vpop.f32.mrb[50].mxu0 }
 0x14a   : > { %2302 = vst.msk [vmem:[%s3302_s24 + $0xbc] sm:$0xf] %vm2254_vm3, %v2756_v59  ;;  %v2754_v5 = vpack.c.bf16 %v1659_v1, %v1659_v1  ;;  %v1723_v6 = vsel %vm1467_vm7, %v1282_v46, %v1595_v61  ;;  %vm1472_vm9 = vcmp.ge.f32.partialorder %v3024_v63, 0.0  ;;  %v1600_v7 = vmul.f32 0.2, %v3024_v63  ;;  %v3025_v9 = vpop.f32.mrb[50].mxu1 }
 0x14b   : > { %2366 = vst.msk [vmem:[%s3302_s24 + $0x1bc] sm:$0xf] %vm2254_vm3, %v2820_v0  ;;  %v2818_v10 = vpack.c.bf16 %v1723_v6, %v1723_v6  ;;  %v1664_v11 = vsel %vm1408_vm8, %v2960_v62, %v1536_v2  ;;  %vm1406_vm10 = vcmp.ge.f32.partialorder %v1039_v3, 0.0  ;;  %v1534_v12 = vmul.f32 0.2, %v1039_v3  ;;  %v1042_v13 = vpop.f32.mrb[51].mxu0 }
 0x14c   : > { %v1298_v14 = vpop.f32.mrb[51].mxu1  ;;  %2300 = vst.msk [vmem:[%s3302_s24 + $0xb4] sm:$0xf] %vm2254_vm3, %v2754_v5  ;;  %v2759_v15 = vpack.c.bf16 %v1664_v11, %v1664_v11  ;;  %v1728_v16 = vsel %vm1472_vm9, %v3024_v63, %v1600_v7  ;;  %vm1470_vm11 = vcmp.ge.f32.partialorder %v1295_v4, 0.0  ;;  %v1598_v17 = vmul.f32 0.2, %v1295_v4 }
 0x14d   : > { %2364 = vst.msk [vmem:[%s3302_s24 + $0x1b4] sm:$0xf] %vm2254_vm3, %v2818_v10  ;;  %v2823_v18 = vpack.c.bf16 %v1728_v16, %v1728_v16  ;;  %v1662_v19 = vsel %vm1406_vm10, %v1039_v3, %v1534_v12  ;;  %vm1409_vm12 = vcmp.ge.f32.partialorder %v2961_v8, 0.0  ;;  %v1537_v20 = vmul.f32 0.2, %v2961_v8  ;;  %v2964_v30 = vpop.f32.mrb[52].mxu0 }
 0x14e   : > { %2305 = vst.msk [vmem:[%s3302_s24 + $0xc8] sm:$0xf] %vm2254_vm3, %v2759_v15  ;;  %v2757_v21 = vpack.c.bf16 %v1662_v19, %v1662_v19  ;;  %v1726_v22 = vsel %vm1470_vm11, %v1295_v4, %v1598_v17  ;;  %vm1473_vm13 = vcmp.ge.f32.partialorder %v3025_v9, 0.0  ;;  %v1601_v23 = vmul.f32 0.2, %v3025_v9  ;;  %v3028_v31 = vpop.f32.mrb[52].mxu1 }
 0x14f   : > { %2369 = vst.msk [vmem:[%s3302_s24 + $0x1c8] sm:$0xf] %vm2254_vm3, %v2823_v18  ;;  %v2821_v24 = vpack.c.bf16 %v1726_v22, %v1726_v22  ;;  %v1665_v25 = vsel %vm1409_vm12, %v2961_v8, %v1537_v20  ;;  %vm1407_vm14 = vcmp.ge.f32.partialorder %v1042_v13, 0.0  ;;  %v1535_v26 = vmul.f32 0.2, %v1042_v13  ;;  %v1055_v35 = vpop.f32.mrb[53].mxu0 }
 0x150   : > { %2303 = vst.msk [vmem:[%s3302_s24 + $0xc0] sm:$0xf] %vm2254_vm3, %v2757_v21  ;;  %v2760_v27 = vpack.c.bf16 %v1665_v25, %v1665_v25  ;;  %v1729_v28 = vsel %vm1473_vm13, %v3025_v9, %v1601_v23  ;;  %vm1471_vm15 = vcmp.ge.f32.partialorder %v1298_v14, 0.0  ;;  %v1599_v29 = vmul.f32 0.2, %v1298_v14  ;;  %v1311_v36 = vpop.f32.mrb[53].mxu1 }
 0x151   : > { %2367 = vst.msk [vmem:[%s3302_s24 + $0x1c0] sm:$0xf] %vm2254_vm3, %v2821_v24  ;;  %v2824_v32 = vpack.c.bf16 %v1729_v28, %v1729_v28  ;;  %v1663_v33 = vsel %vm1407_vm14, %v1042_v13, %v1535_v26  ;;  %vm1412_vm0 = vcmp.ge.f32.partialorder %v2964_v30, 0.0  ;;  %v1540_v34 = vmul.f32 0.2, %v2964_v30  ;;  %v2965_v40 = vpop.f32.mrb[54].mxu0 }
 0x152   : > { %2306 = vst.msk [vmem:[%s3302_s24 + $0xcc] sm:$0xf] %vm2254_vm3, %v2760_v27  ;;  %v2758_v37 = vpack.c.bf16 %v1663_v33, %v1663_v33  ;;  %v1727_v38 = vsel %vm1471_vm15, %v1298_v14, %v1599_v29  ;;  %vm1476_vm1 = vcmp.ge.f32.partialorder %v3028_v31, 0.0  ;;  %v1604_v39 = vmul.f32 0.2, %v3028_v31  ;;  %v3029_v41 = vpop.f32.mrb[54].mxu1 }
 0x153   : > { %2370 = vst.msk [vmem:[%s3302_s24 + $0x1cc] sm:$0xf] %vm2254_vm3, %v2824_v32  ;;  %v2822_v42 = vpack.c.bf16 %v1727_v38, %v1727_v38  ;;  %v1668_v43 = vsel %vm1412_vm0, %v2964_v30, %v1540_v34  ;;  %vm1410_vm2 = vcmp.ge.f32.partialorder %v1055_v35, 0.0  ;;  %v1538_v44 = vmul.f32 0.2, %v1055_v35  ;;  %v1058_v45 = vpop.f32.mrb[55].mxu0 }
 0x154   : > { %v1314_v46 = vpop.f32.mrb[55].mxu1  ;;  %2304 = vst.msk [vmem:[%s3302_s24 + $0xc4] sm:$0xf] %vm2254_vm3, %v2758_v37  ;;  %v2763_v47 = vpack.c.bf16 %v1668_v43, %v1668_v43  ;;  %v1732_v48 = vsel %vm1476_vm1, %v3028_v31, %v1604_v39  ;;  %vm1474_vm4 = vcmp.ge.f32.partialorder %v1311_v36, 0.0  ;;  %v1602_v49 = vmul.f32 0.2, %v1311_v36 }
 0x155   : > { %2368 = vst.msk [vmem:[%s3302_s24 + $0x1c4] sm:$0xf] %vm2254_vm3, %v2822_v42  ;;  %v2827_v50 = vpack.c.bf16 %v1732_v48, %v1732_v48  ;;  %v1666_v51 = vsel %vm1410_vm2, %v1055_v35, %v1538_v44  ;;  %vm1413_vm5 = vcmp.ge.f32.partialorder %v2965_v40, 0.0  ;;  %v1541_v52 = vmul.f32 0.2, %v2965_v40  ;;  %v2968_v62 = vpop.f32.mrb[56].mxu0 }
 0x156   : > { %2309 = vst.msk [vmem:[%s3302_s24 + $0xd8] sm:$0xf] %vm2254_vm3, %v2763_v47  ;;  %v2761_v53 = vpack.c.bf16 %v1666_v51, %v1666_v51  ;;  %v1730_v54 = vsel %vm1474_vm4, %v1311_v36, %v1602_v49  ;;  %vm1477_vm6 = vcmp.ge.f32.partialorder %v3029_v41, 0.0  ;;  %v1605_v55 = vmul.f32 0.2, %v3029_v41  ;;  %v3032_v63 = vpop.f32.mrb[56].mxu1 }
 0x157   : > { %2373 = vst.msk [vmem:[%s3302_s24 + $0x1d8] sm:$0xf] %vm2254_vm3, %v2827_v50  ;;  %v2825_v56 = vpack.c.bf16 %v1730_v54, %v1730_v54  ;;  %v1669_v57 = vsel %vm1413_vm5, %v2965_v40, %v1541_v52  ;;  %vm1411_vm7 = vcmp.ge.f32.partialorder %v1058_v45, 0.0  ;;  %v1539_v58 = vmul.f32 0.2, %v1058_v45  ;;  %v1071_v3 = vpop.f32.mrb[57].mxu0 }
 0x158   : > { %2307 = vst.msk [vmem:[%s3302_s24 + $0xd0] sm:$0xf] %vm2254_vm3, %v2761_v53  ;;  %v2764_v59 = vpack.c.bf16 %v1669_v57, %v1669_v57  ;;  %v1733_v60 = vsel %vm1477_vm6, %v3029_v41, %v1605_v55  ;;  %vm1475_vm8 = vcmp.ge.f32.partialorder %v1314_v46, 0.0  ;;  %v1603_v61 = vmul.f32 0.2, %v1314_v46  ;;  %v1327_v4 = vpop.f32.mrb[57].mxu1 }
 0x159   : > { %2371 = vst.msk [vmem:[%s3302_s24 + $0x1d0] sm:$0xf] %vm2254_vm3, %v2825_v56  ;;  %v2828_v0 = vpack.c.bf16 %v1733_v60, %v1733_v60  ;;  %v1667_v1 = vsel %vm1411_vm7, %v1058_v45, %v1539_v58  ;;  %vm1416_vm9 = vcmp.ge.f32.partialorder %v2968_v62, 0.0  ;;  %v1544_v2 = vmul.f32 0.2, %v2968_v62  ;;  %v2969_v8 = vpop.f32.mrb[58].mxu0 }
 0x15a   : > { %2310 = vst.msk [vmem:[%s3302_s24 + $0xdc] sm:$0xf] %vm2254_vm3, %v2764_v59  ;;  %v2762_v5 = vpack.c.bf16 %v1667_v1, %v1667_v1  ;;  %v1731_v6 = vsel %vm1475_vm8, %v1314_v46, %v1603_v61  ;;  %vm1480_vm10 = vcmp.ge.f32.partialorder %v3032_v63, 0.0  ;;  %v1608_v7 = vmul.f32 0.2, %v3032_v63  ;;  %v3033_v9 = vpop.f32.mrb[58].mxu1 }
 0x15b   : > { %2374 = vst.msk [vmem:[%s3302_s24 + $0x1dc] sm:$0xf] %vm2254_vm3, %v2828_v0  ;;  %v2826_v10 = vpack.c.bf16 %v1731_v6, %v1731_v6  ;;  %v1672_v11 = vsel %vm1416_vm9, %v2968_v62, %v1544_v2  ;;  %vm1414_vm11 = vcmp.ge.f32.partialorder %v1071_v3, 0.0  ;;  %v1542_v12 = vmul.f32 0.2, %v1071_v3  ;;  %v1074_v13 = vpop.f32.mrb[59].mxu0 }
 0x15c   : > { %v1330_v14 = vpop.f32.mrb[59].mxu1  ;;  %2308 = vst.msk [vmem:[%s3302_s24 + $0xd4] sm:$0xf] %vm2254_vm3, %v2762_v5  ;;  %v2767_v15 = vpack.c.bf16 %v1672_v11, %v1672_v11  ;;  %v1736_v16 = vsel %vm1480_vm10, %v3032_v63, %v1608_v7  ;;  %vm1478_vm12 = vcmp.ge.f32.partialorder %v1327_v4, 0.0  ;;  %v1606_v17 = vmul.f32 0.2, %v1327_v4 }
 0x15d   : > { %2372 = vst.msk [vmem:[%s3302_s24 + $0x1d4] sm:$0xf] %vm2254_vm3, %v2826_v10  ;;  %v2831_v18 = vpack.c.bf16 %v1736_v16, %v1736_v16  ;;  %v1670_v19 = vsel %vm1414_vm11, %v1071_v3, %v1542_v12  ;;  %vm1417_vm13 = vcmp.ge.f32.partialorder %v2969_v8, 0.0  ;;  %v1545_v20 = vmul.f32 0.2, %v2969_v8  ;;  %v2972_v30 = vpop.f32.mrb[60].mxu0 }
 0x15e   : > { %2313 = vst.msk [vmem:[%s3302_s24 + $0xe8] sm:$0xf] %vm2254_vm3, %v2767_v15  ;;  %v2765_v21 = vpack.c.bf16 %v1670_v19, %v1670_v19  ;;  %v1734_v22 = vsel %vm1478_vm12, %v1327_v4, %v1606_v17  ;;  %vm1481_vm14 = vcmp.ge.f32.partialorder %v3033_v9, 0.0  ;;  %v1609_v23 = vmul.f32 0.2, %v3033_v9  ;;  %v3036_v31 = vpop.f32.mrb[60].mxu1 }
 0x15f   : > { %2377 = vst.msk [vmem:[%s3302_s24 + $0x1e8] sm:$0xf] %vm2254_vm3, %v2831_v18  ;;  %v2829_v24 = vpack.c.bf16 %v1734_v22, %v1734_v22  ;;  %v1673_v25 = vsel %vm1417_vm13, %v2969_v8, %v1545_v20  ;;  %vm1415_vm15 = vcmp.ge.f32.partialorder %v1074_v13, 0.0  ;;  %v1543_v26 = vmul.f32 0.2, %v1074_v13  ;;  %v1087_v35 = vpop.f32.mrb[61].mxu0 }
 0x160   : > { %2311 = vst.msk [vmem:[%s3302_s24 + $0xe0] sm:$0xf] %vm2254_vm3, %v2765_v21  ;;  %v2768_v27 = vpack.c.bf16 %v1673_v25, %v1673_v25  ;;  %v1737_v28 = vsel %vm1481_vm14, %v3033_v9, %v1609_v23  ;;  %vm1479_vm0 = vcmp.ge.f32.partialorder %v1330_v14, 0.0  ;;  %v1607_v29 = vmul.f32 0.2, %v1330_v14  ;;  %v1343_v36 = vpop.f32.mrb[61].mxu1 }
 0x161   : > { %2375 = vst.msk [vmem:[%s3302_s24 + $0x1e0] sm:$0xf] %vm2254_vm3, %v2829_v24  ;;  %v2832_v32 = vpack.c.bf16 %v1737_v28, %v1737_v28  ;;  %v1671_v33 = vsel %vm1415_vm15, %v1074_v13, %v1543_v26  ;;  %vm1420_vm1 = vcmp.ge.f32.partialorder %v2972_v30, 0.0  ;;  %v1548_v34 = vmul.f32 0.2, %v2972_v30  ;;  %v2973_v40 = vpop.f32.mrb[62].mxu0 }
 0x162   : > { %2314 = vst.msk [vmem:[%s3302_s24 + $0xec] sm:$0xf] %vm2254_vm3, %v2768_v27  ;;  %v2766_v37 = vpack.c.bf16 %v1671_v33, %v1671_v33  ;;  %v1735_v38 = vsel %vm1479_vm0, %v1330_v14, %v1607_v29  ;;  %vm1484_vm2 = vcmp.ge.f32.partialorder %v3036_v31, 0.0  ;;  %v1612_v39 = vmul.f32 0.2, %v3036_v31  ;;  %v3037_v41 = vpop.f32.mrb[62].mxu1 }
 0x163   : > { %2378 = vst.msk [vmem:[%s3302_s24 + $0x1ec] sm:$0xf] %vm2254_vm3, %v2832_v32  ;;  %v2830_v42 = vpack.c.bf16 %v1735_v38, %v1735_v38  ;;  %v1676_v43 = vsel %vm1420_vm1, %v2972_v30, %v1548_v34  ;;  %vm1418_vm4 = vcmp.ge.f32.partialorder %v1087_v35, 0.0  ;;  %v1546_v44 = vmul.f32 0.2, %v1087_v35  ;;  %v1090_v45 = vpop.f32.mrb[63].mxu0 }
 0x164   : > { %v1346_v46 = vpop.f32.mrb[63].mxu1  ;;  %2312 = vst.msk [vmem:[%s3302_s24 + $0xe4] sm:$0xf] %vm2254_vm3, %v2766_v37  ;;  %v2771_v47 = vpack.c.bf16 %v1676_v43, %v1676_v43  ;;  %v1740_v48 = vsel %vm1484_vm2, %v3036_v31, %v1612_v39  ;;  %vm1482_vm5 = vcmp.ge.f32.partialorder %v1343_v36, 0.0  ;;  %v1610_v49 = vmul.f32 0.2, %v1343_v36 }
 0x165   : > { %2376 = vst.msk [vmem:[%s3302_s24 + $0x1e4] sm:$0xf] %vm2254_vm3, %v2830_v42  ;;  %v2835_v50 = vpack.c.bf16 %v1740_v48, %v1740_v48  ;;  %v1674_v51 = vsel %vm1418_vm4, %v1087_v35, %v1546_v44  ;;  %vm1421_vm6 = vcmp.ge.f32.partialorder %v2973_v40, 0.0  ;;  %v1549_v52 = vmul.f32 0.2, %v2973_v40 }
 0x166   : > { %2317 = vst.msk [vmem:[%s3302_s24 + $0xf8] sm:$0xf] %vm2254_vm3, %v2771_v47  ;;  %v2769_v53 = vpack.c.bf16 %v1674_v51, %v1674_v51  ;;  %v1738_v54 = vsel %vm1482_vm5, %v1343_v36, %v1610_v49  ;;  %vm1485_vm7 = vcmp.ge.f32.partialorder %v3037_v41, 0.0  ;;  %v1613_v55 = vmul.f32 0.2, %v3037_v41 }
 0x167   : > { %2381 = vst.msk [vmem:[%s3302_s24 + $0x1f8] sm:$0xf] %vm2254_vm3, %v2835_v50  ;;  %v2833_v56 = vpack.c.bf16 %v1738_v54, %v1738_v54  ;;  %v1677_v57 = vsel %vm1421_vm6, %v2973_v40, %v1549_v52  ;;  %vm1419_vm8 = vcmp.ge.f32.partialorder %v1090_v45, 0.0  ;;  %v1547_v58 = vmul.f32 0.2, %v1090_v45 }
 0x168   : > { %2315 = vst.msk [vmem:[%s3302_s24 + $0xf0] sm:$0xf] %vm2254_vm3, %v2769_v53  ;;  %v2772_v59 = vpack.c.bf16 %v1677_v57, %v1677_v57  ;;  %v1741_v60 = vsel %vm1485_vm7, %v3037_v41, %v1613_v55  ;;  %vm1483_vm9 = vcmp.ge.f32.partialorder %v1346_v46, 0.0  ;;  %v1611_v61 = vmul.f32 0.2, %v1346_v46 }
 0x169   : > { %2379 = vst.msk [vmem:[%s3302_s24 + $0x1f0] sm:$0xf] %vm2254_vm3, %v2833_v56  ;;  %v2836_v62 = vpack.c.bf16 %v1741_v60, %v1741_v60  ;;  %v1675_v63 = vsel %vm1419_vm8, %v1090_v45, %v1547_v58 }
 0x16a   : > { %2318 = vst.msk [vmem:[%s3302_s24 + $0xfc] sm:$0xf] %vm2254_vm3, %v2772_v59  ;;  %v2770_v0 = vpack.c.bf16 %v1675_v63, %v1675_v63  ;;  %v1739_v1 = vsel %vm1483_vm9, %v1346_v46, %v1611_v61 }
 0x16b   : > { %2382 = vst.msk [vmem:[%s3302_s24 + $0x1fc] sm:$0xf] %vm2254_vm3, %v2836_v62  ;;  %v2834_v2 = vpack.c.bf16 %v1739_v1, %v1739_v1 }
 0x16c   : > { %2316 = vst.msk [vmem:[%s3302_s24 + $0xf4] sm:$0xf] %vm2254_vm3, %v2770_v0 }
 0x16d   : > { %2380 = vst.msk [vmem:[%s3302_s24 + $0x1f4] sm:$0xf] %vm2254_vm3, %v2834_v2 }
 0x16e PF: > { %s12_s9 = sadd.s32 1, %s3125_s9  }
 0x16f   : > { %p9_p4 = scmp.ge.s32.totalorder %s12_s9, 4  }
 0x171   :  { %11 = sbr.rel (!%p9_p4) target bundleno = 1 (0x1), region = 58 }

// kernel: discriminator_forward.5
= control target key start
LH: loop header
LB: loop body
LE: loop exit
PB: predicated region body
PF: predicated region fallthrough
CT: control target
= control target key end

     0   :  { %s4180_s15 = smov 0   ;;  %s4182_s16 = smov 0   ;;  %s5555_s0 = inlined_call_operand.vmem [shape: bf16[512,1024], index: 0, kind: input, shape index: {}]   ;;  %s5556_s1 = inlined_call_operand.vmem [shape: bf16[1024,128], index: 1, kind: input, shape index: {}]   ;;  %s5557_s2 = inlined_call_operand.vmem [shape: f32[1,128], index: 2, kind: input, shape index: {}]   ;;  %s5558_s3 = inlined_call_operand.vmem [shape: f32[1,128], index: 3, kind: input, shape index: {}]   ;;  %s5559_s4 = inlined_call_operand.vmem [shape: bf16[512,128], index: 4, kind: output, shape index: {}]  }
   0x1   :  { %s4184_s17 = smov 0  }
   0x2 LB: > { %s4196_s18 = sadd.s32 4294967295, %s4151_s17   ;;  %s4199_s19 = sadd.s32 1, %s4151_s17   ;;  %s4151_s17 = sphi %s4184_s17, %s5667_s17   ;;  %s4147_s16 = sphi %s4182_s16, %s5666_s16   ;;  %s4143_s15 = sphi %s4180_s15, %s5665_s15  }
   0x3   : > { %s18_s20 = ssub.s32 %s4151_s17, %s4199_s19  ;;  %s21_s21 = sadd.s32 1, %s4147_s16 }
   0x4   : > { %p19_p0 = scmp.eq.s32.totalorder %s18_s20, 0  ;;  %p28_p1 = scmp.ne.s32.totalorder %s4147_s16, %s4143_s15 }
   0x5   : > { %p29_p2 = scmp.eq.s32.totalorder %s4151_s17, 0  ;;  %p3384_p4 = scmp.ge.s32.totalorder %s4151_s17, 2 }
   0x6   : > { %s4208_s22 = scalar_select %p19_p0, %s4147_s16, %s21_s21  }
   0x7   : > { %p30_p3 = por %p29_p2, %p28_p1  ;;  %149 = sbr.rel (%p3384_p4) target bundleno = 82 (0x52), region = 24 }
   0xe   : > { %152 = sbr.rel (!%p30_p3) target bundleno = 82 (0x52), region = 28  ;;  %s154_s23 = sand.u32 (%p30_p3), 1, %s4147_s16  }
   0xf   : > { %s3621_s24 = sshll.u32 (%p30_p3), %s4151_s17, 4  ;;  %s3385_s25 = sshll.u32 (%p30_p3), %s154_s23, 10 }
  0x10   : > { %s4216_s28 = scalar_lea.vmem (%p30_p3), %s5555_s0, %s3621_s24  ;;  %s4221_s29 = scalar_lea.vmem (%p30_p3), [#allocation3], %s3385_s25 }
  0x11   : > { %v172_v0 = vld [vmem:[%s4216_s28] sm:$0xff] (%p30_p3)  ;;  %v174_v1 = vld [vmem:[%s4216_s28 + $0x8] sm:$0xff] (%p30_p3) }
  0x12   : > { %v176_v2 = vld [vmem:[%s4216_s28 + $0x20] sm:$0xff] (%p30_p3)  ;;  %173 = vst [vmem:[%s4221_s29] sm:$0xff] (%p30_p3), %v172_v0  ;;  %175 = vst [vmem:[%s4221_s29 + $0x8] sm:$0xff] (%p30_p3), %v174_v1  ;;  %v178_v3 = vld [vmem:[%s4216_s28 + $0x28] sm:$0xff] (%p30_p3) }
  0x13   : > { %177 = vst [vmem:[%s4221_s29 + $0x10] sm:$0xff] (%p30_p3), %v176_v2  ;;  %v180_v4 = vld [vmem:[%s4216_s28 + $0x40] sm:$0xff] (%p30_p3)  ;;  %v182_v5 = vld [vmem:[%s4216_s28 + $0x48] sm:$0xff] (%p30_p3)  ;;  %179 = vst [vmem:[%s4221_s29 + $0x18] sm:$0xff] (%p30_p3), %v178_v3 }
  0x14   : > { %181 = vst [vmem:[%s4221_s29 + $0x20] sm:$0xff] (%p30_p3), %v180_v4  ;;  %183 = vst [vmem:[%s4221_s29 + $0x28] sm:$0xff] (%p30_p3), %v182_v5  ;;  %v184_v6 = vld [vmem:[%s4216_s28 + $0x60] sm:$0xff] (%p30_p3)  ;;  %v186_v7 = vld [vmem:[%s4216_s28 + $0x68] sm:$0xff] (%p30_p3) }
  0x15   : > { %v188_v8 = vld [vmem:[%s4216_s28 + $0x80] sm:$0xff]  ;;  %185 = vst [vmem:[%s4221_s29 + $0x30] sm:$0xff] %v184_v6  ;;  %187 = vst [vmem:[%s4221_s29 + $0x38] sm:$0xff] %v186_v7  ;;  %v190_v9 = vld [vmem:[%s4216_s28 + $0x88] sm:$0xff] }
  0x16   : > { %189 = vst [vmem:[%s4221_s29 + $0x40] sm:$0xff] %v188_v8  ;;  %v192_v10 = vld [vmem:[%s4216_s28 + $0xa0] sm:$0xff]  ;;  %v194_v11 = vld [vmem:[%s4216_s28 + $0xa8] sm:$0xff]  ;;  %191 = vst [vmem:[%s4221_s29 + $0x48] sm:$0xff] %v190_v9 }
  0x17   : > { %193 = vst [vmem:[%s4221_s29 + $0x50] sm:$0xff] %v192_v10  ;;  %195 = vst [vmem:[%s4221_s29 + $0x58] sm:$0xff] %v194_v11  ;;  %v196_v12 = vld [vmem:[%s4216_s28 + $0xc0] sm:$0xff]  ;;  %v198_v13 = vld [vmem:[%s4216_s28 + $0xc8] sm:$0xff] }
  0x18   : > { %v200_v14 = vld [vmem:[%s4216_s28 + $0xe0] sm:$0xff]  ;;  %197 = vst [vmem:[%s4221_s29 + $0x60] sm:$0xff] %v196_v12  ;;  %199 = vst [vmem:[%s4221_s29 + $0x68] sm:$0xff] %v198_v13  ;;  %v202_v15 = vld [vmem:[%s4216_s28 + $0xe8] sm:$0xff] }
  0x19   : > { %201 = vst [vmem:[%s4221_s29 + $0x70] sm:$0xff] %v200_v14  ;;  %v204_v16 = vld [vmem:[%s4216_s28 + $0x100] sm:$0xff]  ;;  %v206_v17 = vld [vmem:[%s4216_s28 + $0x108] sm:$0xff]  ;;  %203 = vst [vmem:[%s4221_s29 + $0x78] sm:$0xff] %v202_v15 }
  0x1a   : > { %205 = vst [vmem:[%s4221_s29 + $0x80] sm:$0xff] %v204_v16  ;;  %207 = vst [vmem:[%s4221_s29 + $0x88] sm:$0xff] %v206_v17  ;;  %v208_v18 = vld [vmem:[%s4216_s28 + $0x120] sm:$0xff]  ;;  %v210_v19 = vld [vmem:[%s4216_s28 + $0x128] sm:$0xff] }
  0x1b   : > { %v212_v20 = vld [vmem:[%s4216_s28 + $0x140] sm:$0xff]  ;;  %209 = vst [vmem:[%s4221_s29 + $0x90] sm:$0xff] %v208_v18  ;;  %211 = vst [vmem:[%s4221_s29 + $0x98] sm:$0xff] %v210_v19  ;;  %v214_v21 = vld [vmem:[%s4216_s28 + $0x148] sm:$0xff] }
  0x1c   : > { %213 = vst [vmem:[%s4221_s29 + $0xa0] sm:$0xff] %v212_v20  ;;  %v216_v22 = vld [vmem:[%s4216_s28 + $0x160] sm:$0xff]  ;;  %v218_v23 = vld [vmem:[%s4216_s28 + $0x168] sm:$0xff]  ;;  %215 = vst [vmem:[%s4221_s29 + $0xa8] sm:$0xff] %v214_v21 }
  0x1d   : > { %217 = vst [vmem:[%s4221_s29 + $0xb0] sm:$0xff] %v216_v22  ;;  %219 = vst [vmem:[%s4221_s29 + $0xb8] sm:$0xff] %v218_v23  ;;  %v220_v24 = vld [vmem:[%s4216_s28 + $0x180] sm:$0xff]  ;;  %v222_v25 = vld [vmem:[%s4216_s28 + $0x188] sm:$0xff] }
  0x1e   : > { %v224_v26 = vld [vmem:[%s4216_s28 + $0x1a0] sm:$0xff]  ;;  %221 = vst [vmem:[%s4221_s29 + $0xc0] sm:$0xff] %v220_v24  ;;  %223 = vst [vmem:[%s4221_s29 + $0xc8] sm:$0xff] %v222_v25  ;;  %v226_v27 = vld [vmem:[%s4216_s28 + $0x1a8] sm:$0xff] }
  0x1f   : > { %225 = vst [vmem:[%s4221_s29 + $0xd0] sm:$0xff] %v224_v26  ;;  %v228_v28 = vld [vmem:[%s4216_s28 + $0x1c0] sm:$0xff]  ;;  %v230_v29 = vld [vmem:[%s4216_s28 + $0x1c8] sm:$0xff]  ;;  %227 = vst [vmem:[%s4221_s29 + $0xd8] sm:$0xff] %v226_v27 }
  0x20   : > { %229 = vst [vmem:[%s4221_s29 + $0xe0] sm:$0xff] %v228_v28  ;;  %231 = vst [vmem:[%s4221_s29 + $0xe8] sm:$0xff] %v230_v29  ;;  %v232_v30 = vld [vmem:[%s4216_s28 + $0x1e0] sm:$0xff]  ;;  %v234_v31 = vld [vmem:[%s4216_s28 + $0x1e8] sm:$0xff] }
  0x21   : > { %v236_v32 = vld [vmem:[%s4216_s28 + $0x200] sm:$0xff]  ;;  %233 = vst [vmem:[%s4221_s29 + $0xf0] sm:$0xff] %v232_v30  ;;  %235 = vst [vmem:[%s4221_s29 + $0xf8] sm:$0xff] %v234_v31  ;;  %v238_v33 = vld [vmem:[%s4216_s28 + $0x208] sm:$0xff] }
  0x22   : > { %237 = vst [vmem:[%s4221_s29 + $0x100] sm:$0xff] %v236_v32  ;;  %v240_v34 = vld [vmem:[%s4216_s28 + $0x220] sm:$0xff]  ;;  %v242_v35 = vld [vmem:[%s4216_s28 + $0x228] sm:$0xff]  ;;  %239 = vst [vmem:[%s4221_s29 + $0x108] sm:$0xff] %v238_v33 }
  0x23   : > { %241 = vst [vmem:[%s4221_s29 + $0x110] sm:$0xff] %v240_v34  ;;  %243 = vst [vmem:[%s4221_s29 + $0x118] sm:$0xff] %v242_v35  ;;  %v244_v36 = vld [vmem:[%s4216_s28 + $0x240] sm:$0xff]  ;;  %v246_v37 = vld [vmem:[%s4216_s28 + $0x248] sm:$0xff] }
  0x24   : > { %v248_v38 = vld [vmem:[%s4216_s28 + $0x260] sm:$0xff]  ;;  %245 = vst [vmem:[%s4221_s29 + $0x120] sm:$0xff] %v244_v36  ;;  %247 = vst [vmem:[%s4221_s29 + $0x128] sm:$0xff] %v246_v37  ;;  %v250_v39 = vld [vmem:[%s4216_s28 + $0x268] sm:$0xff] }
  0x25   : > { %249 = vst [vmem:[%s4221_s29 + $0x130] sm:$0xff] %v248_v38  ;;  %v252_v40 = vld [vmem:[%s4216_s28 + $0x280] sm:$0xff]  ;;  %v254_v41 = vld [vmem:[%s4216_s28 + $0x288] sm:$0xff]  ;;  %251 = vst [vmem:[%s4221_s29 + $0x138] sm:$0xff] %v250_v39 }
  0x26   : > { %253 = vst [vmem:[%s4221_s29 + $0x140] sm:$0xff] %v252_v40  ;;  %255 = vst [vmem:[%s4221_s29 + $0x148] sm:$0xff] %v254_v41  ;;  %v256_v42 = vld [vmem:[%s4216_s28 + $0x2a0] sm:$0xff]  ;;  %v258_v43 = vld [vmem:[%s4216_s28 + $0x2a8] sm:$0xff] }
  0x27   : > { %v260_v44 = vld [vmem:[%s4216_s28 + $0x2c0] sm:$0xff]  ;;  %257 = vst [vmem:[%s4221_s29 + $0x150] sm:$0xff] %v256_v42  ;;  %259 = vst [vmem:[%s4221_s29 + $0x158] sm:$0xff] %v258_v43  ;;  %v262_v45 = vld [vmem:[%s4216_s28 + $0x2c8] sm:$0xff] }
  0x28   : > { %261 = vst [vmem:[%s4221_s29 + $0x160] sm:$0xff] %v260_v44  ;;  %v264_v46 = vld [vmem:[%s4216_s28 + $0x2e0] sm:$0xff]  ;;  %v266_v47 = vld [vmem:[%s4216_s28 + $0x2e8] sm:$0xff]  ;;  %263 = vst [vmem:[%s4221_s29 + $0x168] sm:$0xff] %v262_v45 }
  0x29   : > { %265 = vst [vmem:[%s4221_s29 + $0x170] sm:$0xff] %v264_v46  ;;  %267 = vst [vmem:[%s4221_s29 + $0x178] sm:$0xff] %v266_v47  ;;  %v268_v48 = vld [vmem:[%s4216_s28 + $0x300] sm:$0xff]  ;;  %v270_v49 = vld [vmem:[%s4216_s28 + $0x308] sm:$0xff] }
  0x2a   : > { %v272_v50 = vld [vmem:[%s4216_s28 + $0x320] sm:$0xff]  ;;  %269 = vst [vmem:[%s4221_s29 + $0x180] sm:$0xff] %v268_v48  ;;  %271 = vst [vmem:[%s4221_s29 + $0x188] sm:$0xff] %v270_v49  ;;  %v274_v51 = vld [vmem:[%s4216_s28 + $0x328] sm:$0xff] }
  0x2b   : > { %273 = vst [vmem:[%s4221_s29 + $0x190] sm:$0xff] %v272_v50  ;;  %v276_v52 = vld [vmem:[%s4216_s28 + $0x340] sm:$0xff]  ;;  %v278_v53 = vld [vmem:[%s4216_s28 + $0x348] sm:$0xff]  ;;  %275 = vst [vmem:[%s4221_s29 + $0x198] sm:$0xff] %v274_v51 }
  0x2c   : > { %277 = vst [vmem:[%s4221_s29 + $0x1a0] sm:$0xff] %v276_v52  ;;  %279 = vst [vmem:[%s4221_s29 + $0x1a8] sm:$0xff] %v278_v53  ;;  %v280_v54 = vld [vmem:[%s4216_s28 + $0x360] sm:$0xff]  ;;  %v282_v55 = vld [vmem:[%s4216_s28 + $0x368] sm:$0xff] }
  0x2d   : > { %v284_v56 = vld [vmem:[%s4216_s28 + $0x380] sm:$0xff]  ;;  %281 = vst [vmem:[%s4221_s29 + $0x1b0] sm:$0xff] %v280_v54  ;;  %283 = vst [vmem:[%s4221_s29 + $0x1b8] sm:$0xff] %v282_v55  ;;  %v286_v57 = vld [vmem:[%s4216_s28 + $0x388] sm:$0xff] }
  0x2e   : > { %285 = vst [vmem:[%s4221_s29 + $0x1c0] sm:$0xff] %v284_v56  ;;  %v288_v58 = vld [vmem:[%s4216_s28 + $0x3a0] sm:$0xff]  ;;  %v290_v59 = vld [vmem:[%s4216_s28 + $0x3a8] sm:$0xff]  ;;  %287 = vst [vmem:[%s4221_s29 + $0x1c8] sm:$0xff] %v286_v57 }
  0x2f   : > { %289 = vst [vmem:[%s4221_s29 + $0x1d0] sm:$0xff] %v288_v58  ;;  %291 = vst [vmem:[%s4221_s29 + $0x1d8] sm:$0xff] %v290_v59  ;;  %v292_v60 = vld [vmem:[%s4216_s28 + $0x3c0] sm:$0xff]  ;;  %v294_v61 = vld [vmem:[%s4216_s28 + $0x3c8] sm:$0xff] }
  0x30   : > { %v296_v62 = vld [vmem:[%s4216_s28 + $0x3e0] sm:$0xff]  ;;  %293 = vst [vmem:[%s4221_s29 + $0x1e0] sm:$0xff] %v292_v60  ;;  %295 = vst [vmem:[%s4221_s29 + $0x1e8] sm:$0xff] %v294_v61  ;;  %v298_v63 = vld [vmem:[%s4216_s28 + $0x3e8] sm:$0xff] }
  0x31   : > { %297 = vst [vmem:[%s4221_s29 + $0x1f0] sm:$0xff] %v296_v62  ;;  %v300_v0 = vld [vmem:[%s4216_s28 + $0x400] sm:$0xff]  ;;  %v302_v1 = vld [vmem:[%s4216_s28 + $0x408] sm:$0xff]  ;;  %299 = vst [vmem:[%s4221_s29 + $0x1f8] sm:$0xff] %v298_v63 }
  0x32   : > { %301 = vst [vmem:[%s4221_s29 + $0x200] sm:$0xff] %v300_v0  ;;  %303 = vst [vmem:[%s4221_s29 + $0x208] sm:$0xff] %v302_v1  ;;  %v304_v2 = vld [vmem:[%s4216_s28 + $0x420] sm:$0xff]  ;;  %v306_v3 = vld [vmem:[%s4216_s28 + $0x428] sm:$0xff] }
  0x33   : > { %v308_v4 = vld [vmem:[%s4216_s28 + $0x440] sm:$0xff]  ;;  %305 = vst [vmem:[%s4221_s29 + $0x210] sm:$0xff] %v304_v2  ;;  %307 = vst [vmem:[%s4221_s29 + $0x218] sm:$0xff] %v306_v3  ;;  %v310_v5 = vld [vmem:[%s4216_s28 + $0x448] sm:$0xff] }
  0x34   : > { %309 = vst [vmem:[%s4221_s29 + $0x220] sm:$0xff] %v308_v4  ;;  %v312_v6 = vld [vmem:[%s4216_s28 + $0x460] sm:$0xff]  ;;  %v314_v7 = vld [vmem:[%s4216_s28 + $0x468] sm:$0xff]  ;;  %311 = vst [vmem:[%s4221_s29 + $0x228] sm:$0xff] %v310_v5 }
  0x35   : > { %313 = vst [vmem:[%s4221_s29 + $0x230] sm:$0xff] %v312_v6  ;;  %315 = vst [vmem:[%s4221_s29 + $0x238] sm:$0xff] %v314_v7  ;;  %v316_v8 = vld [vmem:[%s4216_s28 + $0x480] sm:$0xff]  ;;  %v318_v9 = vld [vmem:[%s4216_s28 + $0x488] sm:$0xff] }
  0x36   : > { %v320_v10 = vld [vmem:[%s4216_s28 + $0x4a0] sm:$0xff]  ;;  %317 = vst [vmem:[%s4221_s29 + $0x240] sm:$0xff] %v316_v8  ;;  %319 = vst [vmem:[%s4221_s29 + $0x248] sm:$0xff] %v318_v9  ;;  %v322_v11 = vld [vmem:[%s4216_s28 + $0x4a8] sm:$0xff] }
  0x37   : > { %321 = vst [vmem:[%s4221_s29 + $0x250] sm:$0xff] %v320_v10  ;;  %v324_v12 = vld [vmem:[%s4216_s28 + $0x4c0] sm:$0xff]  ;;  %v326_v13 = vld [vmem:[%s4216_s28 + $0x4c8] sm:$0xff]  ;;  %323 = vst [vmem:[%s4221_s29 + $0x258] sm:$0xff] %v322_v11 }
  0x38   : > { %325 = vst [vmem:[%s4221_s29 + $0x260] sm:$0xff] %v324_v12  ;;  %327 = vst [vmem:[%s4221_s29 + $0x268] sm:$0xff] %v326_v13  ;;  %v328_v14 = vld [vmem:[%s4216_s28 + $0x4e0] sm:$0xff]  ;;  %v330_v15 = vld [vmem:[%s4216_s28 + $0x4e8] sm:$0xff] }
  0x39   : > { %v332_v16 = vld [vmem:[%s4216_s28 + $0x500] sm:$0xff]  ;;  %329 = vst [vmem:[%s4221_s29 + $0x270] sm:$0xff] %v328_v14  ;;  %331 = vst [vmem:[%s4221_s29 + $0x278] sm:$0xff] %v330_v15  ;;  %v334_v17 = vld [vmem:[%s4216_s28 + $0x508] sm:$0xff] }
  0x3a   : > { %333 = vst [vmem:[%s4221_s29 + $0x280] sm:$0xff] %v332_v16  ;;  %v336_v18 = vld [vmem:[%s4216_s28 + $0x520] sm:$0xff]  ;;  %v338_v19 = vld [vmem:[%s4216_s28 + $0x528] sm:$0xff]  ;;  %335 = vst [vmem:[%s4221_s29 + $0x288] sm:$0xff] %v334_v17 }
  0x3b   : > { %337 = vst [vmem:[%s4221_s29 + $0x290] sm:$0xff] %v336_v18  ;;  %339 = vst [vmem:[%s4221_s29 + $0x298] sm:$0xff] %v338_v19  ;;  %v340_v20 = vld [vmem:[%s4216_s28 + $0x540] sm:$0xff]  ;;  %v342_v21 = vld [vmem:[%s4216_s28 + $0x548] sm:$0xff] }
  0x3c   : > { %v344_v22 = vld [vmem:[%s4216_s28 + $0x560] sm:$0xff]  ;;  %341 = vst [vmem:[%s4221_s29 + $0x2a0] sm:$0xff] %v340_v20  ;;  %343 = vst [vmem:[%s4221_s29 + $0x2a8] sm:$0xff] %v342_v21  ;;  %v346_v23 = vld [vmem:[%s4216_s28 + $0x568] sm:$0xff] }
  0x3d   : > { %345 = vst [vmem:[%s4221_s29 + $0x2b0] sm:$0xff] %v344_v22  ;;  %v348_v24 = vld [vmem:[%s4216_s28 + $0x580] sm:$0xff]  ;;  %v350_v25 = vld [vmem:[%s4216_s28 + $0x588] sm:$0xff]  ;;  %347 = vst [vmem:[%s4221_s29 + $0x2b8] sm:$0xff] %v346_v23 }
  0x3e   : > { %349 = vst [vmem:[%s4221_s29 + $0x2c0] sm:$0xff] %v348_v24  ;;  %351 = vst [vmem:[%s4221_s29 + $0x2c8] sm:$0xff] %v350_v25  ;;  %v352_v26 = vld [vmem:[%s4216_s28 + $0x5a0] sm:$0xff]  ;;  %v354_v27 = vld [vmem:[%s4216_s28 + $0x5a8] sm:$0xff] }
  0x3f   : > { %v356_v28 = vld [vmem:[%s4216_s28 + $0x5c0] sm:$0xff]  ;;  %353 = vst [vmem:[%s4221_s29 + $0x2d0] sm:$0xff] %v352_v26  ;;  %355 = vst [vmem:[%s4221_s29 + $0x2d8] sm:$0xff] %v354_v27  ;;  %v358_v29 = vld [vmem:[%s4216_s28 + $0x5c8] sm:$0xff] }
  0x40   : > { %357 = vst [vmem:[%s4221_s29 + $0x2e0] sm:$0xff] %v356_v28  ;;  %v360_v30 = vld [vmem:[%s4216_s28 + $0x5e0] sm:$0xff]  ;;  %v362_v31 = vld [vmem:[%s4216_s28 + $0x5e8] sm:$0xff]  ;;  %359 = vst [vmem:[%s4221_s29 + $0x2e8] sm:$0xff] %v358_v29 }
  0x41   : > { %361 = vst [vmem:[%s4221_s29 + $0x2f0] sm:$0xff] %v360_v30  ;;  %363 = vst [vmem:[%s4221_s29 + $0x2f8] sm:$0xff] %v362_v31  ;;  %v364_v32 = vld [vmem:[%s4216_s28 + $0x600] sm:$0xff]  ;;  %v366_v33 = vld [vmem:[%s4216_s28 + $0x608] sm:$0xff] }
  0x42   : > { %v368_v34 = vld [vmem:[%s4216_s28 + $0x620] sm:$0xff]  ;;  %365 = vst [vmem:[%s4221_s29 + $0x300] sm:$0xff] %v364_v32  ;;  %367 = vst [vmem:[%s4221_s29 + $0x308] sm:$0xff] %v366_v33  ;;  %v370_v35 = vld [vmem:[%s4216_s28 + $0x628] sm:$0xff] }
  0x43   : > { %369 = vst [vmem:[%s4221_s29 + $0x310] sm:$0xff] %v368_v34  ;;  %v372_v36 = vld [vmem:[%s4216_s28 + $0x640] sm:$0xff]  ;;  %v374_v37 = vld [vmem:[%s4216_s28 + $0x648] sm:$0xff]  ;;  %371 = vst [vmem:[%s4221_s29 + $0x318] sm:$0xff] %v370_v35 }
  0x44   : > { %373 = vst [vmem:[%s4221_s29 + $0x320] sm:$0xff] %v372_v36  ;;  %375 = vst [vmem:[%s4221_s29 + $0x328] sm:$0xff] %v374_v37  ;;  %v376_v38 = vld [vmem:[%s4216_s28 + $0x660] sm:$0xff]  ;;  %v378_v39 = vld [vmem:[%s4216_s28 + $0x668] sm:$0xff] }
  0x45   : > { %v380_v40 = vld [vmem:[%s4216_s28 + $0x680] sm:$0xff]  ;;  %377 = vst [vmem:[%s4221_s29 + $0x330] sm:$0xff] %v376_v38  ;;  %379 = vst [vmem:[%s4221_s29 + $0x338] sm:$0xff] %v378_v39  ;;  %v382_v41 = vld [vmem:[%s4216_s28 + $0x688] sm:$0xff] }
  0x46   : > { %381 = vst [vmem:[%s4221_s29 + $0x340] sm:$0xff] %v380_v40  ;;  %v384_v42 = vld [vmem:[%s4216_s28 + $0x6a0] sm:$0xff]  ;;  %v386_v43 = vld [vmem:[%s4216_s28 + $0x6a8] sm:$0xff]  ;;  %383 = vst [vmem:[%s4221_s29 + $0x348] sm:$0xff] %v382_v41 }
  0x47   : > { %385 = vst [vmem:[%s4221_s29 + $0x350] sm:$0xff] %v384_v42  ;;  %387 = vst [vmem:[%s4221_s29 + $0x358] sm:$0xff] %v386_v43  ;;  %v388_v44 = vld [vmem:[%s4216_s28 + $0x6c0] sm:$0xff]  ;;  %v390_v45 = vld [vmem:[%s4216_s28 + $0x6c8] sm:$0xff] }
  0x48   : > { %v392_v46 = vld [vmem:[%s4216_s28 + $0x6e0] sm:$0xff]  ;;  %389 = vst [vmem:[%s4221_s29 + $0x360] sm:$0xff] %v388_v44  ;;  %391 = vst [vmem:[%s4221_s29 + $0x368] sm:$0xff] %v390_v45  ;;  %v394_v47 = vld [vmem:[%s4216_s28 + $0x6e8] sm:$0xff] }
  0x49   : > { %393 = vst [vmem:[%s4221_s29 + $0x370] sm:$0xff] %v392_v46  ;;  %v396_v48 = vld [vmem:[%s4216_s28 + $0x700] sm:$0xff]  ;;  %v398_v49 = vld [vmem:[%s4216_s28 + $0x708] sm:$0xff]  ;;  %395 = vst [vmem:[%s4221_s29 + $0x378] sm:$0xff] %v394_v47 }
  0x4a   : > { %397 = vst [vmem:[%s4221_s29 + $0x380] sm:$0xff] %v396_v48  ;;  %399 = vst [vmem:[%s4221_s29 + $0x388] sm:$0xff] %v398_v49  ;;  %v400_v50 = vld [vmem:[%s4216_s28 + $0x720] sm:$0xff]  ;;  %v402_v51 = vld [vmem:[%s4216_s28 + $0x728] sm:$0xff] }
  0x4b   : > { %v404_v52 = vld [vmem:[%s4216_s28 + $0x740] sm:$0xff]  ;;  %401 = vst [vmem:[%s4221_s29 + $0x390] sm:$0xff] %v400_v50  ;;  %403 = vst [vmem:[%s4221_s29 + $0x398] sm:$0xff] %v402_v51  ;;  %v406_v53 = vld [vmem:[%s4216_s28 + $0x748] sm:$0xff] }
  0x4c   : > { %405 = vst [vmem:[%s4221_s29 + $0x3a0] sm:$0xff] %v404_v52  ;;  %v408_v54 = vld [vmem:[%s4216_s28 + $0x760] sm:$0xff]  ;;  %v410_v55 = vld [vmem:[%s4216_s28 + $0x768] sm:$0xff]  ;;  %407 = vst [vmem:[%s4221_s29 + $0x3a8] sm:$0xff] %v406_v53 }
  0x4d   : > { %409 = vst [vmem:[%s4221_s29 + $0x3b0] sm:$0xff] %v408_v54  ;;  %411 = vst [vmem:[%s4221_s29 + $0x3b8] sm:$0xff] %v410_v55  ;;  %v412_v56 = vld [vmem:[%s4216_s28 + $0x780] sm:$0xff]  ;;  %v414_v57 = vld [vmem:[%s4216_s28 + $0x788] sm:$0xff] }
  0x4e   : > { %v416_v58 = vld [vmem:[%s4216_s28 + $0x7a0] sm:$0xff]  ;;  %413 = vst [vmem:[%s4221_s29 + $0x3c0] sm:$0xff] %v412_v56  ;;  %415 = vst [vmem:[%s4221_s29 + $0x3c8] sm:$0xff] %v414_v57  ;;  %v418_v59 = vld [vmem:[%s4216_s28 + $0x7a8] sm:$0xff] }
  0x4f   : > { %417 = vst [vmem:[%s4221_s29 + $0x3d0] sm:$0xff] %v416_v58  ;;  %v420_v60 = vld [vmem:[%s4216_s28 + $0x7c0] sm:$0xff]  ;;  %v422_v61 = vld [vmem:[%s4216_s28 + $0x7c8] sm:$0xff]  ;;  %419 = vst [vmem:[%s4221_s29 + $0x3d8] sm:$0xff] %v418_v59 }
  0x50   : > { %421 = vst [vmem:[%s4221_s29 + $0x3e0] sm:$0xff] %v420_v60  ;;  %423 = vst [vmem:[%s4221_s29 + $0x3e8] sm:$0xff] %v422_v61  ;;  %v424_v62 = vld [vmem:[%s4216_s28 + $0x7e0] sm:$0xff]  ;;  %v426_v63 = vld [vmem:[%s4216_s28 + $0x7e8] sm:$0xff] }
  0x51   : > { %425 = vst [vmem:[%s4221_s29 + $0x3f0] sm:$0xff] %v424_v62  ;;  %427 = vst [vmem:[%s4221_s29 + $0x3f8] sm:$0xff] %v426_v63 }
  0x52 PF: > { %p3388_p5 = scmp.ge.s32.totalorder %s4151_s17, 1  ;;  %p441_p6 = scmp.lt.s32.totalorder %s4151_s17, 3 }
  0x54   : > { %p442_p7 = pnand %p3388_p5, %p441_p6 }
  0x55   : > { %s448_s30 = sand.u32 (!%p442_p7), 1, %s4143_s15   ;;  %s3390_s5 = sshll.u32 (!%p442_p7), %s4196_s18, 6 }
  0x56   : > { %445 = sbr.rel (%p442_p7) target bundleno = 1060 (0x424), region = 55  ;;  %s3389_s6 = sshll.u32 (!%p442_p7), %s448_s30, 10 }
  0x57   : > { %p475_p8 = scmp.lt.s32.totalorder (!%p442_p7), %s3390_s5, 127  ;;  %s4485_s11 = scalar_lea.vmem (!%p442_p7), [#allocation3], %s3389_s6 }
  0x58   : > { %p3392_p9 = scmp.ne.s32.totalorder (!%p442_p7), %s4196_s18, 0 }
  0x5d   : > { %s5669_s5 = smov (!%p475_p8, %s3390_s5), 127  ;;  %484 = sbr.rel (%p3392_p9) target bundleno = 127 (0x7f), region = 63 }
  0x5e   : > { %s3391_s7 = sshll.u32 %s5669_s5, 2  ;;  %v4153_v0 = vmov (!%p3392_p9), 0.0  }
  0x5f   : > { %s4483_s10 = scalar_lea.vmem %s5556_s1, %s3391_s7  ;;  %485 = vst [vmem:[#allocation2] sm:$0xff] (!%p3392_p9), %v4153_v0  ;;  %486 = vst [vmem:[#allocation2 + $0x8] sm:$0xff] (!%p3392_p9), %v4153_v0 }
  0x60   : > { %487 = vst [vmem:[#allocation2 + $0x10] sm:$0xff] (!%p3392_p9), %v4153_v0  ;;  %488 = vst [vmem:[#allocation2 + $0x18] sm:$0xff] (!%p3392_p9), %v4153_v0 }
  0x61   : > { %489 = vst [vmem:[#allocation2 + $0x20] sm:$0xff] (!%p3392_p9), %v4153_v0  ;;  %490 = vst [vmem:[#allocation2 + $0x28] sm:$0xff] (!%p3392_p9), %v4153_v0 }
  0x62   : > { %491 = vst [vmem:[#allocation2 + $0x30] sm:$0xff] (!%p3392_p9), %v4153_v0  ;;  %492 = vst [vmem:[#allocation2 + $0x38] sm:$0xff] (!%p3392_p9), %v4153_v0 }
  0x63   : > { %493 = vst [vmem:[#allocation2 + $0x40] sm:$0xff] (!%p3392_p9), %v4153_v0  ;;  %494 = vst [vmem:[#allocation2 + $0x48] sm:$0xff] (!%p3392_p9), %v4153_v0 }
  0x64   : > { %495 = vst [vmem:[#allocation2 + $0x50] sm:$0xff] %v4153_v0  ;;  %496 = vst [vmem:[#allocation2 + $0x58] sm:$0xff] %v4153_v0 }
  0x65   : > { %497 = vst [vmem:[#allocation2 + $0x60] sm:$0xff] %v4153_v0  ;;  %498 = vst [vmem:[#allocation2 + $0x68] sm:$0xff] %v4153_v0 }
  0x66   : > { %499 = vst [vmem:[#allocation2 + $0x70] sm:$0xff] %v4153_v0  ;;  %500 = vst [vmem:[#allocation2 + $0x78] sm:$0xff] %v4153_v0 }
  0x67   : > { %501 = vst [vmem:[#allocation2 + $0x80] sm:$0xff] %v4153_v0  ;;  %502 = vst [vmem:[#allocation2 + $0x88] sm:$0xff] %v4153_v0 }
  0x68   : > { %503 = vst [vmem:[#allocation2 + $0x90] sm:$0xff] %v4153_v0  ;;  %504 = vst [vmem:[#allocation2 + $0x98] sm:$0xff] %v4153_v0 }
  0x69   : > { %505 = vst [vmem:[#allocation2 + $0xa0] sm:$0xff] %v4153_v0  ;;  %506 = vst [vmem:[#allocation2 + $0xa8] sm:$0xff] %v4153_v0 }
  0x6a   : > { %507 = vst [vmem:[#allocation2 + $0xb0] sm:$0xff] %v4153_v0  ;;  %508 = vst [vmem:[#allocation2 + $0xb8] sm:$0xff] %v4153_v0 }
  0x6b   : > { %509 = vst [vmem:[#allocation2 + $0xc0] sm:$0xff] %v4153_v0  ;;  %510 = vst [vmem:[#allocation2 + $0xc8] sm:$0xff] %v4153_v0 }
  0x6c   : > { %511 = vst [vmem:[#allocation2 + $0xd0] sm:$0xff] %v4153_v0  ;;  %512 = vst [vmem:[#allocation2 + $0xd8] sm:$0xff] %v4153_v0 }
  0x6d   : > { %513 = vst [vmem:[#allocation2 + $0xe0] sm:$0xff] %v4153_v0  ;;  %514 = vst [vmem:[#allocation2 + $0xe8] sm:$0xff] %v4153_v0 }
  0x6e   : > { %515 = vst [vmem:[#allocation2 + $0xf0] sm:$0xff] %v4153_v0  ;;  %516 = vst [vmem:[#allocation2 + $0xf8] sm:$0xff] %v4153_v0 }
  0x6f   : > { %517 = vst [vmem:[#allocation2 + $0x100] sm:$0xff] %v4153_v0  ;;  %518 = vst [vmem:[#allocation2 + $0x108] sm:$0xff] %v4153_v0 }
  0x70   : > { %519 = vst [vmem:[#allocation2 + $0x110] sm:$0xff] %v4153_v0  ;;  %520 = vst [vmem:[#allocation2 + $0x118] sm:$0xff] %v4153_v0 }
  0x71   : > { %521 = vst [vmem:[#allocation2 + $0x120] sm:$0xff] %v4153_v0  ;;  %522 = vst [vmem:[#allocation2 + $0x128] sm:$0xff] %v4153_v0 }
  0x72   : > { %523 = vst [vmem:[#allocation2 + $0x130] sm:$0xff] %v4153_v0  ;;  %524 = vst [vmem:[#allocation2 + $0x138] sm:$0xff] %v4153_v0 }
  0x73   : > { %525 = vst [vmem:[#allocation2 + $0x140] sm:$0xff] %v4153_v0  ;;  %526 = vst [vmem:[#allocation2 + $0x148] sm:$0xff] %v4153_v0 }
  0x74   : > { %527 = vst [vmem:[#allocation2 + $0x150] sm:$0xff] %v4153_v0  ;;  %528 = vst [vmem:[#allocation2 + $0x158] sm:$0xff] %v4153_v0 }
  0x75   : > { %529 = vst [vmem:[#allocation2 + $0x160] sm:$0xff] %v4153_v0  ;;  %530 = vst [vmem:[#allocation2 + $0x168] sm:$0xff] %v4153_v0 }
  0x76   : > { %531 = vst [vmem:[#allocation2 + $0x170] sm:$0xff] %v4153_v0  ;;  %532 = vst [vmem:[#allocation2 + $0x178] sm:$0xff] %v4153_v0 }
  0x77   : > { %533 = vst [vmem:[#allocation2 + $0x180] sm:$0xff] %v4153_v0  ;;  %534 = vst [vmem:[#allocation2 + $0x188] sm:$0xff] %v4153_v0 }
  0x78   : > { %535 = vst [vmem:[#allocation2 + $0x190] sm:$0xff] %v4153_v0  ;;  %536 = vst [vmem:[#allocation2 + $0x198] sm:$0xff] %v4153_v0 }
  0x79   : > { %537 = vst [vmem:[#allocation2 + $0x1a0] sm:$0xff] %v4153_v0  ;;  %538 = vst [vmem:[#allocation2 + $0x1a8] sm:$0xff] %v4153_v0 }
  0x7a   : > { %539 = vst [vmem:[#allocation2 + $0x1b0] sm:$0xff] %v4153_v0  ;;  %540 = vst [vmem:[#allocation2 + $0x1b8] sm:$0xff] %v4153_v0 }
  0x7b   : > { %541 = vst [vmem:[#allocation2 + $0x1c0] sm:$0xff] %v4153_v0  ;;  %542 = vst [vmem:[#allocation2 + $0x1c8] sm:$0xff] %v4153_v0 }
  0x7c   : > { %543 = vst [vmem:[#allocation2 + $0x1d0] sm:$0xff] %v4153_v0  ;;  %544 = vst [vmem:[#allocation2 + $0x1d8] sm:$0xff] %v4153_v0 }
  0x7d   : > { %545 = vst [vmem:[#allocation2 + $0x1e0] sm:$0xff] %v4153_v0  ;;  %546 = vst [vmem:[#allocation2 + $0x1e8] sm:$0xff] %v4153_v0 }
  0x7e   : > { %547 = vst [vmem:[#allocation2 + $0x1f0] sm:$0xff] %v4153_v0  ;;  %548 = vst [vmem:[#allocation2 + $0x1f8] sm:$0xff] %v4153_v0 }
  0x7f PF: > { %v3903_v1 = vld [vmem:[%s4483_s10] sm:$0xff]   ;;  %v4154_v2 = vmov 0   ;;  %v3905_v4 = vld [vmem:[%s4483_s10 + $0x8] sm:$0xff]   ;;  %v3907_v6 = vld [vmem:[%s4483_s10 + $0x10] sm:$0xff]   ;;  %p3553_p10 = scmp.ne.s32.totalorder %s4196_s18, 1 }
  0x80   : > { %1637 = vmatprep.subr.bf16.mxu0 %v4154_v2  ;;  %1926 = vmatprep.subr.bf16.mxu1 %v4154_v2  ;;  %v3904_v3 = vld [vmem:[%s4483_s10 + $0x80] sm:$0xff]   ;;  %v3906_v5 = vld [vmem:[%s4483_s10 + $0x88] sm:$0xff]   ;;  %v3908_v7 = vld [vmem:[%s4483_s10 + $0x90] sm:$0xff]  }
  0x81   : > { %1638 = vmatpush1.bf16.msra.mxu0 %v3903_v1  ;;  %1927 = vmatpush1.bf16.msra.mxu1 %v3904_v3  ;;  %v3909_v8 = vld [vmem:[%s4483_s10 + $0x18] sm:$0xff]   ;;  %v3911_v10 = vld [vmem:[%s4483_s10 + $0x20] sm:$0xff]   ;;  %v3913_v12 = vld [vmem:[%s4483_s10 + $0x28] sm:$0xff]  }
  0x82   : > { %1639 = vmatprep.subr.bf16.mxu0 %v4154_v2  ;;  %1928 = vmatprep.subr.bf16.mxu1 %v4154_v2  ;;  %v3910_v9 = vld [vmem:[%s4483_s10 + $0x98] sm:$0xff]   ;;  %v3912_v11 = vld [vmem:[%s4483_s10 + $0xa0] sm:$0xff]   ;;  %v3914_v13 = vld [vmem:[%s4483_s10 + $0xa8] sm:$0xff]  }
  0x83   : > { %v3915_v14 = vld [vmem:[%s4483_s10 + $0x30] sm:$0xff]   ;;  %v3917_v16 = vld [vmem:[%s4483_s10 + $0x38] sm:$0xff]   ;;  %v3919_v18 = vld [vmem:[%s4483_s10 + $0x40] sm:$0xff]  }
  0x84   : > { %v3916_v15 = vld [vmem:[%s4483_s10 + $0xb0] sm:$0xff]   ;;  %v3918_v17 = vld [vmem:[%s4483_s10 + $0xb8] sm:$0xff]   ;;  %v3920_v19 = vld [vmem:[%s4483_s10 + $0xc0] sm:$0xff]  }
  0x85   : > { %1640 = vmatpush1.bf16.msra.mxu0 %v3905_v4  ;;  %1929 = vmatpush1.bf16.msra.mxu1 %v3906_v5  ;;  %v3937_v20 = vld [vmem:[%s4485_s11 + $0x4] ss:$16 sps:$4 sm:$0xff]   ;;  %v3921_v21 = vld [vmem:[%s4483_s10 + $0x48] sm:$0xff]   ;;  %v3925_v26 = vld [vmem:[%s4483_s10 + $0x58] sm:$0xff]  }
  0x86   : > { %1641 = vmatprep.subr.bf16.mxu0 %v4154_v2  ;;  %1930 = vmatprep.subr.bf16.mxu1 %v4154_v2  ;;  %v3940_v22 = vld [vmem:[%s4485_s11 + $0xc] ss:$16 sps:$4 sm:$0xff]   ;;  %v3923_v24 = vld [vmem:[%s4483_s10 + $0x50] sm:$0xff]   ;;  %v3927_v28 = vld [vmem:[%s4483_s10 + $0x60] sm:$0xff]  }
  0x87   : > { %v3922_v23 = vld [vmem:[%s4483_s10 + $0xc8] sm:$0xff]   ;;  %1669 = vmatprep.mubr.bf16.mxu0 %v3937_v20  ;;  %1958 = vmatprep.mubr.bf16.mxu1 %v3940_v22  ;;  %v3924_v25 = vld [vmem:[%s4483_s10 + $0xd0] sm:$0xff]   ;;  %v3926_v27 = vld [vmem:[%s4483_s10 + $0xd8] sm:$0xff]  }
  0x88   : > { %v3928_v29 = vld [vmem:[%s4483_s10 + $0xe0] sm:$0xff]   ;;  %v3929_v30 = vld [vmem:[%s4483_s10 + $0x68] sm:$0xff]   ;;  %v3931_v32 = vld [vmem:[%s4483_s10 + $0x70] sm:$0xff]  }
  0x89   : > { %1642 = vmatpush1.bf16.msra.mxu0 %v3907_v6  ;;  %1931 = vmatpush1.bf16.msra.mxu1 %v3908_v7  ;;  %v3930_v31 = vld [vmem:[%s4483_s10 + $0xe8] sm:$0xff]   ;;  %v3932_v33 = vld [vmem:[%s4483_s10 + $0xf0] sm:$0xff]   ;;  %v3933_v34 = vld [vmem:[%s4483_s10 + $0x78] sm:$0xff]  }
  0x8a   : > { %1643 = vmatprep.subr.bf16.mxu0 %v4154_v2  ;;  %1932 = vmatprep.subr.bf16.mxu1 %v4154_v2  ;;  %v3934_v35 = vld [vmem:[%s4483_s10 + $0xf8] sm:$0xff]   ;;  %v3935_v36 = vld [vmem:[%s4485_s11] ss:$16 sps:$4 sm:$0xff]   ;;  %v3941_v38 = vld [vmem:[%s4485_s11 + $0x24] ss:$16 sps:$4 sm:$0xff]  }
  0x8b   : > { %v3938_v37 = vld [vmem:[%s4485_s11 + $0x8] ss:$16 sps:$4 sm:$0xff]   ;;  %v3943_v39 = vld [vmem:[%s4485_s11 + $0x2c] ss:$16 sps:$4 sm:$0xff]   ;;  %v3945_v40 = vld [vmem:[%s4485_s11 + $0x20] ss:$16 sps:$4 sm:$0xff]  }
  0x8c   : > { %v3946_v41 = vld [vmem:[%s4485_s11 + $0x28] ss:$16 sps:$4 sm:$0xff]   ;;  %v3947_v42 = vld [vmem:[%s4485_s11 + $0x44] ss:$16 sps:$4 sm:$0xff]   ;;  %v3949_v43 = vld [vmem:[%s4485_s11 + $0x4c] ss:$16 sps:$4 sm:$0xff]  }
  0x8d   : > { %1644 = vmatpush1.bf16.msra.mxu0 %v3909_v8  ;;  %1933 = vmatpush1.bf16.msra.mxu1 %v3910_v9  ;;  %v3951_v44 = vld [vmem:[%s4485_s11 + $0x40] ss:$16 sps:$4 sm:$0xff]   ;;  %v3952_v45 = vld [vmem:[%s4485_s11 + $0x48] ss:$16 sps:$4 sm:$0xff]   ;;  %v3953_v46 = vld [vmem:[%s4485_s11 + $0x64] ss:$16 sps:$4 sm:$0xff]  }
  0x8e   : > { %1645 = vmatprep.subr.bf16.mxu0 %v4154_v2  ;;  %1934 = vmatprep.subr.bf16.mxu1 %v4154_v2  ;;  %v3955_v47 = vld [vmem:[%s4485_s11 + $0x6c] ss:$16 sps:$4 sm:$0xff]   ;;  %v3957_v48 = vld [vmem:[%s4485_s11 + $0x60] ss:$16 sps:$4 sm:$0xff]   ;;  %v3958_v49 = vld [vmem:[%s4485_s11 + $0x68] ss:$16 sps:$4 sm:$0xff]  }
  0x8f   : > { %v3959_v50 = vld [vmem:[%s4485_s11 + $0x84] ss:$16 sps:$4 sm:$0xff]   ;;  %v3961_v51 = vld [vmem:[%s4485_s11 + $0x8c] ss:$16 sps:$4 sm:$0xff]   ;;  %v3963_v52 = vld [vmem:[%s4485_s11 + $0x80] ss:$16 sps:$4 sm:$0xff]  }
  0x90   : > { %v3964_v53 = vld [vmem:[%s4485_s11 + $0x88] ss:$16 sps:$4 sm:$0xff]   ;;  %v3965_v54 = vld [vmem:[%s4485_s11 + $0xa4] ss:$16 sps:$4 sm:$0xff]   ;;  %v3967_v55 = vld [vmem:[%s4485_s11 + $0xac] ss:$16 sps:$4 sm:$0xff]  }
  0x91   : > { %1646 = vmatpush1.bf16.msra.mxu0 %v3911_v10  ;;  %1935 = vmatpush1.bf16.msra.mxu1 %v3912_v11  ;;  %v3969_v56 = vld [vmem:[%s4485_s11 + $0xa0] ss:$16 sps:$4 sm:$0xff]   ;;  %v3970_v57 = vld [vmem:[%s4485_s11 + $0xa8] ss:$16 sps:$4 sm:$0xff]   ;;  %v3971_v58 = vld [vmem:[%s4485_s11 + $0xc4] ss:$16 sps:$4 sm:$0xff]  }
  0x92   : > { %1647 = vmatprep.subr.bf16.mxu0 %v4154_v2  ;;  %1936 = vmatprep.subr.bf16.mxu1 %v4154_v2  ;;  %v3973_v59 = vld [vmem:[%s4485_s11 + $0xcc] ss:$16 sps:$4 sm:$0xff]   ;;  %v3975_v60 = vld [vmem:[%s4485_s11 + $0xc0] ss:$16 sps:$4 sm:$0xff]   ;;  %v3976_v61 = vld [vmem:[%s4485_s11 + $0xc8] ss:$16 sps:$4 sm:$0xff]  }
  0x93   : > { %v3977_v62 = vld [vmem:[%s4485_s11 + $0xe4] ss:$16 sps:$4 sm:$0xff]   ;;  %v3979_v63 = vld [vmem:[%s4485_s11 + $0xec] ss:$16 sps:$4 sm:$0xff]   ;;  %v3981_v0 = vld [vmem:[%s4485_s11 + $0xe0] ss:$16 sps:$4 sm:$0xff]  }
  0x94   : > { %v3982_v1 = vld [vmem:[%s4485_s11 + $0xe8] ss:$16 sps:$4 sm:$0xff]   ;;  %v3985_v3 = vld [vmem:[%s4485_s11 + $0x10c] ss:$16 sps:$4 sm:$0xff]   ;;  %v3987_v4 = vld [vmem:[%s4485_s11 + $0x100] ss:$16 sps:$4 sm:$0xff]  }
  0x95   : > { %1648 = vmatpush1.bf16.msra.mxu0 %v3913_v12  ;;  %1937 = vmatpush1.bf16.msra.mxu1 %v3914_v13  ;;  %v3988_v5 = vld [vmem:[%s4485_s11 + $0x108] ss:$16 sps:$4 sm:$0xff]   ;;  %v3989_v6 = vld [vmem:[%s4485_s11 + $0x124] ss:$16 sps:$4 sm:$0xff]   ;;  %v3991_v7 = vld [vmem:[%s4485_s11 + $0x12c] ss:$16 sps:$4 sm:$0xff]  }
  0x96   : > { %1649 = vmatprep.subr.bf16.mxu0 %v4154_v2  ;;  %1938 = vmatprep.subr.bf16.mxu1 %v4154_v2  ;;  %v3993_v8 = vld [vmem:[%s4485_s11 + $0x120] ss:$16 sps:$4 sm:$0xff]   ;;  %v3994_v9 = vld [vmem:[%s4485_s11 + $0x128] ss:$16 sps:$4 sm:$0xff]   ;;  %v3995_v10 = vld [vmem:[%s4485_s11 + $0x144] ss:$16 sps:$4 sm:$0xff]  }
  0x97   : > { %v3997_v11 = vld [vmem:[%s4485_s11 + $0x14c] ss:$16 sps:$4 sm:$0xff]   ;;  %v3999_v12 = vld [vmem:[%s4485_s11 + $0x140] ss:$16 sps:$4 sm:$0xff]   ;;  %v4000_v13 = vld [vmem:[%s4485_s11 + $0x148] ss:$16 sps:$4 sm:$0xff]  }
  0x98   : > { %v4011_v20 = vld [vmem:[%s4485_s11 + $0x180] ss:$16 sps:$4 sm:$0xff]   ;;  %v4013_v22 = vld [vmem:[%s4485_s11 + $0x1a4] ss:$16 sps:$4 sm:$0xff]  }
  0x99   : > { %1650 = vmatpush1.bf16.msra.mxu0 %v3915_v14  ;;  %1939 = vmatpush1.bf16.msra.mxu1 %v3916_v15  ;;  %v4001_v14 = vld [vmem:[%s4485_s11 + $0x164] ss:$16 sps:$4 sm:$0xff]   ;;  %v4003_v15 = vld [vmem:[%s4485_s11 + $0x16c] ss:$16 sps:$4 sm:$0xff]  }
  0x9a   : > { %1651 = vmatprep.subr.bf16.mxu0 %v4154_v2  ;;  %1940 = vmatprep.subr.bf16.mxu1 %v4154_v2 }
  0x9d   : > { %1652 = vmatpush1.bf16.msra.mxu0 %v3917_v16  ;;  %1941 = vmatpush1.bf16.msra.mxu1 %v3918_v17  ;;  %v4005_v16 = vld [vmem:[%s4485_s11 + $0x160] ss:$16 sps:$4 sm:$0xff]   ;;  %v4006_v17 = vld [vmem:[%s4485_s11 + $0x168] ss:$16 sps:$4 sm:$0xff]  }
  0x9e   : > { %1653 = vmatprep.subr.bf16.mxu0 %v4154_v2  ;;  %1942 = vmatprep.subr.bf16.mxu1 %v4154_v2 }
  0xa1   : > { %1654 = vmatpush1.bf16.msra.mxu0 %v3919_v18  ;;  %1943 = vmatpush1.bf16.msra.mxu1 %v3920_v19  ;;  %v4007_v18 = vld [vmem:[%s4485_s11 + $0x184] ss:$16 sps:$4 sm:$0xff]   ;;  %v4009_v19 = vld [vmem:[%s4485_s11 + $0x18c] ss:$16 sps:$4 sm:$0xff]  }
  0xa2   : > { %1655 = vmatprep.subr.bf16.mxu0 %v4154_v2  ;;  %1944 = vmatprep.subr.bf16.mxu1 %v4154_v2 }
  0xa5   : > { %1656 = vmatpush1.bf16.msra.mxu0 %v3921_v21  ;;  %1945 = vmatpush1.bf16.msra.mxu1 %v3922_v23  ;;  %v4012_v21 = vld [vmem:[%s4485_s11 + $0x188] ss:$16 sps:$4 sm:$0xff]   ;;  %v4015_v23 = vld [vmem:[%s4485_s11 + $0x1ac] ss:$16 sps:$4 sm:$0xff]  }
  0xa6   : > { %1657 = vmatprep.subr.bf16.mxu0 %v4154_v2  ;;  %1946 = vmatprep.subr.bf16.mxu1 %v4154_v2 }
  0xa9   : > { %1658 = vmatpush1.bf16.msra.mxu0 %v3923_v24  ;;  %1947 = vmatpush1.bf16.msra.mxu1 %v3924_v25  ;;  %v4017_v24 = vld [vmem:[%s4485_s11 + $0x1a0] ss:$16 sps:$4 sm:$0xff]   ;;  %v4018_v25 = vld [vmem:[%s4485_s11 + $0x1a8] ss:$16 sps:$4 sm:$0xff]  }
  0xaa   : > { %1659 = vmatprep.subr.bf16.mxu0 %v4154_v2  ;;  %1948 = vmatprep.subr.bf16.mxu1 %v4154_v2 }
  0xad   : > { %1660 = vmatpush1.bf16.msra.mxu0 %v3925_v26  ;;  %1949 = vmatpush1.bf16.msra.mxu1 %v3926_v27  ;;  %v4019_v26 = vld [vmem:[%s4485_s11 + $0x1c4] ss:$16 sps:$4 sm:$0xff]   ;;  %v4021_v27 = vld [vmem:[%s4485_s11 + $0x1cc] ss:$16 sps:$4 sm:$0xff]  }
  0xae   : > { %1661 = vmatprep.subr.bf16.mxu0 %v4154_v2  ;;  %1950 = vmatprep.subr.bf16.mxu1 %v4154_v2 }
  0xb1   : > { %1662 = vmatpush1.bf16.msra.mxu0 %v3927_v28  ;;  %1951 = vmatpush1.bf16.msra.mxu1 %v3928_v29  ;;  %v4023_v28 = vld [vmem:[%s4485_s11 + $0x1c0] ss:$16 sps:$4 sm:$0xff]   ;;  %v4024_v29 = vld [vmem:[%s4485_s11 + $0x1c8] ss:$16 sps:$4 sm:$0xff]  }
  0xb2   : > { %1663 = vmatprep.subr.bf16.mxu0 %v4154_v2  ;;  %1952 = vmatprep.subr.bf16.mxu1 %v4154_v2 }
  0xb5   : > { %1664 = vmatpush1.bf16.msra.mxu0 %v3929_v30  ;;  %1953 = vmatpush1.bf16.msra.mxu1 %v3930_v31  ;;  %v4025_v30 = vld [vmem:[%s4485_s11 + $0x1e4] ss:$16 sps:$4 sm:$0xff]   ;;  %v4027_v31 = vld [vmem:[%s4485_s11 + $0x1ec] ss:$16 sps:$4 sm:$0xff]  }
  0xb6   : > { %1665 = vmatprep.subr.bf16.mxu0 %v4154_v2  ;;  %1954 = vmatprep.subr.bf16.mxu1 %v4154_v2 }
  0xb9   : > { %1666 = vmatpush1.bf16.msra.mxu0 %v3931_v32  ;;  %1955 = vmatpush1.bf16.msra.mxu1 %v3932_v33  ;;  %v4029_v32 = vld [vmem:[%s4485_s11 + $0x1e0] ss:$16 sps:$4 sm:$0xff]   ;;  %v4030_v33 = vld [vmem:[%s4485_s11 + $0x1e8] ss:$16 sps:$4 sm:$0xff]  }
  0xba   : > { %1667 = vmatprep.subr.bf16.mxu0 %v4154_v2  ;;  %1956 = vmatprep.subr.bf16.mxu1 %v4154_v2  ;;  %v3983_v2 = vld [vmem:[%s4485_s11 + $0x104] ss:$16 sps:$4 sm:$0xff]  }
  0xbd   : > { %1668 = vmatpush1.bf16.msra.mxu0 %v3933_v34  ;;  %1957 = vmatpush1.bf16.msra.mxu1 %v3934_v35  ;;  %v4031_v34 = vld [vmem:[%s4485_s11 + $0x204] ss:$16 sps:$4 sm:$0xff]   ;;  %v4033_v35 = vld [vmem:[%s4485_s11 + $0x20c] ss:$16 sps:$4 sm:$0xff]  }
  0xc0   : > { %1670 = vmatmul.mubr.bf16.vlgmr.msra.gmra.mrb[0].mxu0 %v3935_v36  ;;  %1959 = vmatmul.mubr.bf16.vlgmr.msra.gmra.mrb[0].mxu1 %v3938_v37  ;;  %v4035_v36 = vld [vmem:[%s4485_s11 + $0x200] ss:$16 sps:$4 sm:$0xff]   ;;  %v4036_v37 = vld [vmem:[%s4485_s11 + $0x208] ss:$16 sps:$4 sm:$0xff]  }
  0xc1   : > { %1677 = vmatprep.mubr.bf16.mxu0 %v3941_v38  ;;  %1966 = vmatprep.mubr.bf16.mxu1 %v3943_v39  ;;  %v4037_v38 = vld [vmem:[%s4485_s11 + $0x224] ss:$16 sps:$4 sm:$0xff]   ;;  %v4039_v39 = vld [vmem:[%s4485_s11 + $0x22c] ss:$16 sps:$4 sm:$0xff]  }
  0xc8   : > { %1678 = vmatmul.mubr.bf16.gmra.mrb[4].mxu0 %v3945_v40  ;;  %1967 = vmatmul.mubr.bf16.gmra.mrb[4].mxu1 %v3946_v41  ;;  %v4041_v40 = vld [vmem:[%s4485_s11 + $0x220] ss:$16 sps:$4 sm:$0xff]   ;;  %v4042_v41 = vld [vmem:[%s4485_s11 + $0x228] ss:$16 sps:$4 sm:$0xff]  }
  0xc9   : > { %1685 = vmatprep.mubr.bf16.mxu0 %v3947_v42  ;;  %1974 = vmatprep.mubr.bf16.mxu1 %v3949_v43  ;;  %v4043_v42 = vld [vmem:[%s4485_s11 + $0x244] ss:$16 sps:$4 sm:$0xff]   ;;  %v4045_v43 = vld [vmem:[%s4485_s11 + $0x24c] ss:$16 sps:$4 sm:$0xff]  }
  0xd0   : > { %1686 = vmatmul.mubr.bf16.gmra.mrb[8].mxu0 %v3951_v44  ;;  %1975 = vmatmul.mubr.bf16.gmra.mrb[8].mxu1 %v3952_v45  ;;  %v4047_v44 = vld [vmem:[%s4485_s11 + $0x240] ss:$16 sps:$4 sm:$0xff]   ;;  %v4048_v45 = vld [vmem:[%s4485_s11 + $0x248] ss:$16 sps:$4 sm:$0xff]  }
  0xd1   : > { %1693 = vmatprep.mubr.bf16.mxu0 %v3953_v46  ;;  %1982 = vmatprep.mubr.bf16.mxu1 %v3955_v47  ;;  %v4049_v46 = vld [vmem:[%s4485_s11 + $0x264] ss:$16 sps:$4 sm:$0xff]   ;;  %v4051_v47 = vld [vmem:[%s4485_s11 + $0x26c] ss:$16 sps:$4 sm:$0xff]  }
  0xd8   : > { %1694 = vmatmul.mubr.bf16.gmra.mrb[12].mxu0 %v3957_v48  ;;  %1983 = vmatmul.mubr.bf16.gmra.mrb[12].mxu1 %v3958_v49  ;;  %v4053_v48 = vld [vmem:[%s4485_s11 + $0x260] ss:$16 sps:$4 sm:$0xff]   ;;  %v4054_v49 = vld [vmem:[%s4485_s11 + $0x268] ss:$16 sps:$4 sm:$0xff]  }
  0xd9   : > { %1701 = vmatprep.mubr.bf16.mxu0 %v3959_v50  ;;  %1990 = vmatprep.mubr.bf16.mxu1 %v3961_v51  ;;  %v4055_v50 = vld [vmem:[%s4485_s11 + $0x284] ss:$16 sps:$4 sm:$0xff]   ;;  %v4057_v51 = vld [vmem:[%s4485_s11 + $0x28c] ss:$16 sps:$4 sm:$0xff]  }
  0xe0   : > { %1702 = vmatmul.mubr.bf16.gmra.mrb[16].mxu0 %v3963_v52  ;;  %1991 = vmatmul.mubr.bf16.gmra.mrb[16].mxu1 %v3964_v53  ;;  %v4059_v52 = vld [vmem:[%s4485_s11 + $0x280] ss:$16 sps:$4 sm:$0xff]   ;;  %v4060_v53 = vld [vmem:[%s4485_s11 + $0x288] ss:$16 sps:$4 sm:$0xff]  }
  0xe1   : > { %1709 = vmatprep.mubr.bf16.mxu0 %v3965_v54  ;;  %1998 = vmatprep.mubr.bf16.mxu1 %v3967_v55  ;;  %v4061_v54 = vld [vmem:[%s4485_s11 + $0x2a4] ss:$16 sps:$4 sm:$0xff]   ;;  %v4063_v55 = vld [vmem:[%s4485_s11 + $0x2ac] ss:$16 sps:$4 sm:$0xff]  }
  0xe8   : > { %1710 = vmatmul.mubr.bf16.gmra.mrb[20].mxu0 %v3969_v56  ;;  %1999 = vmatmul.mubr.bf16.gmra.mrb[20].mxu1 %v3970_v57  ;;  %v4065_v56 = vld [vmem:[%s4485_s11 + $0x2a0] ss:$16 sps:$4 sm:$0xff]   ;;  %v4066_v57 = vld [vmem:[%s4485_s11 + $0x2a8] ss:$16 sps:$4 sm:$0xff]  }
  0xe9   : > { %1717 = vmatprep.mubr.bf16.mxu0 %v3971_v58  ;;  %2006 = vmatprep.mubr.bf16.mxu1 %v3973_v59  ;;  %v4067_v58 = vld [vmem:[%s4485_s11 + $0x2c4] ss:$16 sps:$4 sm:$0xff]   ;;  %v4069_v59 = vld [vmem:[%s4485_s11 + $0x2cc] ss:$16 sps:$4 sm:$0xff]  }
  0xf0   : > { %1718 = vmatmul.mubr.bf16.gmra.mrb[24].mxu0 %v3975_v60  ;;  %2007 = vmatmul.mubr.bf16.gmra.mrb[24].mxu1 %v3976_v61  ;;  %v4071_v60 = vld [vmem:[%s4485_s11 + $0x2c0] ss:$16 sps:$4 sm:$0xff]   ;;  %v4072_v61 = vld [vmem:[%s4485_s11 + $0x2c8] ss:$16 sps:$4 sm:$0xff]  }
  0xf1   : > { %1725 = vmatprep.mubr.bf16.mxu0 %v3977_v62  ;;  %2014 = vmatprep.mubr.bf16.mxu1 %v3979_v63  ;;  %v4073_v62 = vld [vmem:[%s4485_s11 + $0x2e4] ss:$16 sps:$4 sm:$0xff]   ;;  %v4075_v63 = vld [vmem:[%s4485_s11 + $0x2ec] ss:$16 sps:$4 sm:$0xff]  }
  0xf8   : > { %1726 = vmatmul.mubr.bf16.gmra.mrb[28].mxu0 %v3981_v0  ;;  %2015 = vmatmul.mubr.bf16.gmra.mrb[28].mxu1 %v3982_v1  ;;  %v4077_v0 = vld [vmem:[%s4485_s11 + $0x2e0] ss:$16 sps:$4 sm:$0xff]   ;;  %v4078_v1 = vld [vmem:[%s4485_s11 + $0x2e8] ss:$16 sps:$4 sm:$0xff]  }
  0xf9   : > { %1733 = vmatprep.mubr.bf16.mxu0 %v3983_v2  ;;  %2022 = vmatprep.mubr.bf16.mxu1 %v3985_v3  ;;  %v4079_v2 = vld [vmem:[%s4485_s11 + $0x304] ss:$16 sps:$4 sm:$0xff]   ;;  %v4081_v3 = vld [vmem:[%s4485_s11 + $0x30c] ss:$16 sps:$4 sm:$0xff]  }
 0x100   : > { %1734 = vmatmul.mubr.bf16.gmra.mrb[32].mxu0 %v3987_v4  ;;  %2023 = vmatmul.mubr.bf16.gmra.mrb[32].mxu1 %v3988_v5  ;;  %v4083_v4 = vld [vmem:[%s4485_s11 + $0x300] ss:$16 sps:$4 sm:$0xff]   ;;  %v4084_v5 = vld [vmem:[%s4485_s11 + $0x308] ss:$16 sps:$4 sm:$0xff]  }
 0x101   : > { %1741 = vmatprep.mubr.bf16.mxu0 %v3989_v6  ;;  %2030 = vmatprep.mubr.bf16.mxu1 %v3991_v7  ;;  %v4085_v6 = vld [vmem:[%s4485_s11 + $0x324] ss:$16 sps:$4 sm:$0xff]   ;;  %v4087_v7 = vld [vmem:[%s4485_s11 + $0x32c] ss:$16 sps:$4 sm:$0xff]  }
 0x108   : > { %1742 = vmatmul.mubr.bf16.gmra.mrb[36].mxu0 %v3993_v8  ;;  %2031 = vmatmul.mubr.bf16.gmra.mrb[36].mxu1 %v3994_v9  ;;  %v4089_v8 = vld [vmem:[%s4485_s11 + $0x320] ss:$16 sps:$4 sm:$0xff]   ;;  %v4090_v9 = vld [vmem:[%s4485_s11 + $0x328] ss:$16 sps:$4 sm:$0xff]  }
 0x109   : > { %1749 = vmatprep.mubr.bf16.mxu0 %v3995_v10  ;;  %2038 = vmatprep.mubr.bf16.mxu1 %v3997_v11  ;;  %v4091_v10 = vld [vmem:[%s4485_s11 + $0x344] ss:$16 sps:$4 sm:$0xff]   ;;  %v4093_v11 = vld [vmem:[%s4485_s11 + $0x34c] ss:$16 sps:$4 sm:$0xff]  }
 0x110   : > { %1750 = vmatmul.mubr.bf16.gmra.mrb[40].mxu0 %v3999_v12  ;;  %2039 = vmatmul.mubr.bf16.gmra.mrb[40].mxu1 %v4000_v13  ;;  %v4095_v12 = vld [vmem:[%s4485_s11 + $0x340] ss:$16 sps:$4 sm:$0xff]   ;;  %v4096_v13 = vld [vmem:[%s4485_s11 + $0x348] ss:$16 sps:$4 sm:$0xff]  }
 0x111   : > { %1757 = vmatprep.mubr.bf16.mxu0 %v4001_v14  ;;  %2046 = vmatprep.mubr.bf16.mxu1 %v4003_v15  ;;  %v4097_v14 = vld [vmem:[%s4485_s11 + $0x364] ss:$16 sps:$4 sm:$0xff]   ;;  %v4099_v15 = vld [vmem:[%s4485_s11 + $0x36c] ss:$16 sps:$4 sm:$0xff]  }
 0x118   : > { %1758 = vmatmul.mubr.bf16.gmra.mrb[44].mxu0 %v4005_v16  ;;  %2047 = vmatmul.mubr.bf16.gmra.mrb[44].mxu1 %v4006_v17  ;;  %v549_v17 = vld [vmem:[#allocation2] sm:$0xff] }
 0x119   : > { %1765 = vmatprep.mubr.bf16.mxu0 %v4007_v18  ;;  %2054 = vmatprep.mubr.bf16.mxu1 %v4009_v19 }
 0x120   : > { %1766 = vmatmul.mubr.bf16.gmra.mrb[48].mxu0 %v4011_v20  ;;  %2055 = vmatmul.mubr.bf16.gmra.mrb[48].mxu1 %v4012_v21  ;;  %v4101_v20 = vld [vmem:[%s4485_s11 + $0x360] ss:$16 sps:$4 sm:$0xff]  }
 0x121   : > { %1773 = vmatprep.mubr.bf16.mxu0 %v4013_v22  ;;  %2062 = vmatprep.mubr.bf16.mxu1 %v4015_v23 }
 0x128   : > { %1774 = vmatmul.mubr.bf16.gmra.mrb[52].mxu0 %v4017_v24  ;;  %2063 = vmatmul.mubr.bf16.gmra.mrb[52].mxu1 %v4018_v25  ;;  %v4102_v24 = vld [vmem:[%s4485_s11 + $0x368] ss:$16 sps:$4 sm:$0xff]   ;;  %v4103_v25 = vld [vmem:[%s4485_s11 + $0x384] ss:$16 sps:$4 sm:$0xff]  }
 0x129   : > { %1781 = vmatprep.mubr.bf16.mxu0 %v4019_v26  ;;  %2070 = vmatprep.mubr.bf16.mxu1 %v4021_v27  ;;  %v550_v26 = vld [vmem:[#allocation2 + $0x8] sm:$0xff] }
 0x130   : > { %1782 = vmatmul.mubr.bf16.gmra.mrb[56].mxu0 %v4023_v28  ;;  %2071 = vmatmul.mubr.bf16.gmra.mrb[56].mxu1 %v4024_v29  ;;  %v4105_v29 = vld [vmem:[%s4485_s11 + $0x38c] ss:$16 sps:$4 sm:$0xff]  }
 0x131   : > { %1789 = vmatprep.mubr.bf16.mxu0 %v4025_v30  ;;  %2078 = vmatprep.mubr.bf16.mxu1 %v4027_v31 }
 0x138   : > { %1790 = vmatmul.mubr.bf16.gmra.mrb[60].mxu0 %v4029_v32  ;;  %2079 = vmatmul.mubr.bf16.gmra.mrb[60].mxu1 %v4030_v33 }
 0x139   : > { %1797 = vmatprep.mubr.bf16.mxu0 %v4031_v34  ;;  %2086 = vmatprep.mubr.bf16.mxu1 %v4033_v35  ;;  %v551_v35 = vld [vmem:[#allocation2 + $0x10] sm:$0xff] }
 0x140   : > { %1798 = vmatmul.mubr.bf16.gmra.mrb[64].mxu0 %v4035_v36  ;;  %2087 = vmatmul.mubr.bf16.gmra.mrb[64].mxu1 %v4036_v37 }
 0x141   : > { %1805 = vmatprep.mubr.bf16.mxu0 %v4037_v38  ;;  %2094 = vmatprep.mubr.bf16.mxu1 %v4039_v39  ;;  %v4107_v38 = vld [vmem:[%s4485_s11 + $0x380] ss:$16 sps:$4 sm:$0xff]  }
 0x148   : > { %1806 = vmatmul.mubr.bf16.gmra.mrb[68].mxu0 %v4041_v40  ;;  %2095 = vmatmul.mubr.bf16.gmra.mrb[68].mxu1 %v4042_v41 }
 0x149   : > { %1813 = vmatprep.mubr.bf16.mxu0 %v4043_v42  ;;  %2102 = vmatprep.mubr.bf16.mxu1 %v4045_v43  ;;  %v4108_v42 = vld [vmem:[%s4485_s11 + $0x388] ss:$16 sps:$4 sm:$0xff]   ;;  %v4109_v43 = vld [vmem:[%s4485_s11 + $0x3a4] ss:$16 sps:$4 sm:$0xff]  }
 0x150   : > { %1814 = vmatmul.mubr.bf16.gmra.mrb[72].mxu0 %v4047_v44  ;;  %2103 = vmatmul.mubr.bf16.gmra.mrb[72].mxu1 %v4048_v45  ;;  %v552_v44 = vld [vmem:[#allocation2 + $0x18] sm:$0xff] }
 0x151   : > { %1821 = vmatprep.mubr.bf16.mxu0 %v4049_v46  ;;  %2110 = vmatprep.mubr.bf16.mxu1 %v4051_v47  ;;  %v4111_v47 = vld [vmem:[%s4485_s11 + $0x3ac] ss:$16 sps:$4 sm:$0xff]  }
 0x158   : > { %1822 = vmatmul.mubr.bf16.gmra.mrb[76].mxu0 %v4053_v48  ;;  %2111 = vmatmul.mubr.bf16.gmra.mrb[76].mxu1 %v4054_v49 }
 0x159   : > { %1829 = vmatprep.mubr.bf16.mxu0 %v4055_v50  ;;  %2118 = vmatprep.mubr.bf16.mxu1 %v4057_v51 }
 0x160   : > { %1830 = vmatmul.mubr.bf16.gmra.mrb[80].mxu0 %v4059_v52  ;;  %2119 = vmatmul.mubr.bf16.gmra.mrb[80].mxu1 %v4060_v53  ;;  %v553_v53 = vld [vmem:[#allocation2 + $0x20] sm:$0xff] }
 0x161   : > { %1837 = vmatprep.mubr.bf16.mxu0 %v4061_v54  ;;  %2126 = vmatprep.mubr.bf16.mxu1 %v4063_v55 }
 0x168   : > { %1838 = vmatmul.mubr.bf16.gmra.mrb[84].mxu0 %v4065_v56  ;;  %2127 = vmatmul.mubr.bf16.gmra.mrb[84].mxu1 %v4066_v57  ;;  %v4113_v56 = vld [vmem:[%s4485_s11 + $0x3a0] ss:$16 sps:$4 sm:$0xff]  }
 0x169   : > { %1845 = vmatprep.mubr.bf16.mxu0 %v4067_v58  ;;  %2134 = vmatprep.mubr.bf16.mxu1 %v4069_v59 }
 0x170   : > { %1846 = vmatmul.mubr.bf16.gmra.mrb[88].mxu0 %v4071_v60  ;;  %2135 = vmatmul.mubr.bf16.gmra.mrb[88].mxu1 %v4072_v61  ;;  %v4114_v60 = vld [vmem:[%s4485_s11 + $0x3a8] ss:$16 sps:$4 sm:$0xff]   ;;  %v4115_v61 = vld [vmem:[%s4485_s11 + $0x3c4] ss:$16 sps:$4 sm:$0xff]  }
 0x171   : > { %1853 = vmatprep.mubr.bf16.mxu0 %v4073_v62  ;;  %2142 = vmatprep.mubr.bf16.mxu1 %v4075_v63  ;;  %v554_v62 = vld [vmem:[#allocation2 + $0x28] sm:$0xff] }
 0x178   : > { %1854 = vmatmul.mubr.bf16.gmra.mrb[92].mxu0 %v4077_v0  ;;  %2143 = vmatmul.mubr.bf16.gmra.mrb[92].mxu1 %v4078_v1  ;;  %v4117_v1 = vld [vmem:[%s4485_s11 + $0x3cc] ss:$16 sps:$4 sm:$0xff]  }
 0x179   : > { %1861 = vmatprep.mubr.bf16.mxu0 %v4079_v2  ;;  %2150 = vmatprep.mubr.bf16.mxu1 %v4081_v3 }
 0x180   : > { %1862 = vmatmul.mubr.bf16.gmra.mrb[96].mxu0 %v4083_v4  ;;  %2151 = vmatmul.mubr.bf16.gmra.mrb[96].mxu1 %v4084_v5 }
 0x181   : > { %1869 = vmatprep.mubr.bf16.mxu0 %v4085_v6  ;;  %2158 = vmatprep.mubr.bf16.mxu1 %v4087_v7  ;;  %v555_v7 = vld [vmem:[#allocation2 + $0x30] sm:$0xff] }
 0x188   : > { %1870 = vmatmul.mubr.bf16.gmra.mrb[100].mxu0 %v4089_v8  ;;  %2159 = vmatmul.mubr.bf16.gmra.mrb[100].mxu1 %v4090_v9 }
 0x189   : > { %1877 = vmatprep.mubr.bf16.mxu0 %v4091_v10  ;;  %2166 = vmatprep.mubr.bf16.mxu1 %v4093_v11  ;;  %v4119_v10 = vld [vmem:[%s4485_s11 + $0x3c0] ss:$16 sps:$4 sm:$0xff]  }
 0x190   : > { %1878 = vmatmul.mubr.bf16.gmra.mrb[104].mxu0 %v4095_v12  ;;  %2167 = vmatmul.mubr.bf16.gmra.mrb[104].mxu1 %v4096_v13 }
 0x191   : > { %1885 = vmatprep.mubr.bf16.mxu0 %v4097_v14  ;;  %2174 = vmatprep.mubr.bf16.mxu1 %v4099_v15  ;;  %v4120_v14 = vld [vmem:[%s4485_s11 + $0x3c8] ss:$16 sps:$4 sm:$0xff]   ;;  %v4121_v15 = vld [vmem:[%s4485_s11 + $0x3e4] ss:$16 sps:$4 sm:$0xff]  }
 0x193   : > { %v1671_v16 = vpop.f32.mrb[0].mxu0  ;;  %v1960_v18 = vpop.f32.mrb[0].mxu1 }
 0x194   : > { %v1673_v19 = vpop.f32.mrb[1].mxu0  ;;  %v1961_v21 = vadd.f32 %v1960_v18, %v1671_v16  ;;  %v1962_v22 = vpop.f32.mrb[1].mxu1  ;;  %v556_v16 = vld [vmem:[#allocation2 + $0x38] sm:$0xff] }
 0x195   : > { %v1674_v23 = vpop.f32.mrb[2].mxu0  ;;  %v1963_v27 = vpop.f32.mrb[2].mxu1  ;;  %v4123_v19 = vld [vmem:[%s4485_s11 + $0x3ec] ss:$16 sps:$4 sm:$0xff]  }
 0x196   : > { %v1676_v28 = vpop.f32.mrb[3].mxu0  ;;  %v2215_v30 = vadd.f32 %v1961_v21, %v549_v17  ;;  %v1964_v31 = vadd.f32 %v1963_v27, %v1674_v23  ;;  %v1965_v32 = vpop.f32.mrb[3].mxu1 }
 0x197   : > { %v4125_v28 = vld [vmem:[%s4485_s11 + $0x3e0] ss:$16 sps:$4 sm:$0xff]   ;;  %v4126_v32 = vld [vmem:[%s4485_s11 + $0x3e8] ss:$16 sps:$4 sm:$0xff]  }
 0x198   : > { %1886 = vmatmul.mubr.bf16.gmra.mrb[108].mxu0 %v4101_v20  ;;  %2279 = vst [vmem:[#allocation2] sm:$0xff] %v2215_v30  ;;  %v2216_v33 = vadd.f32 %v1964_v31, %v550_v26  ;;  %2175 = vmatmul.mubr.bf16.gmra.mrb[108].mxu1 %v4102_v24 }
 0x199   : > { %1893 = vmatprep.mubr.bf16.mxu0 %v4103_v25  ;;  %2182 = vmatprep.mubr.bf16.mxu1 %v4105_v29  ;;  %v557_v25 = vld [vmem:[#allocation2 + $0x40] sm:$0xff] }
 0x19a   : > { %2280 = vst [vmem:[#allocation2 + $0x8] sm:$0xff] %v2216_v33  ;;  %v558_v33 = vld [vmem:[#allocation2 + $0x48] sm:$0xff] }
 0x19b   : > { %v1679_v34 = vpop.f32.mrb[4].mxu0  ;;  %v1968_v36 = vpop.f32.mrb[4].mxu1 }
 0x19c   : > { %v1681_v37 = vpop.f32.mrb[5].mxu0  ;;  %v1969_v39 = vadd.f32 %v1968_v36, %v1679_v34  ;;  %v1970_v40 = vpop.f32.mrb[5].mxu1 }
 0x19d   : > { %v1682_v41 = vpop.f32.mrb[6].mxu0  ;;  %v1971_v45 = vpop.f32.mrb[6].mxu1 }
 0x19e   : > { %v1684_v46 = vpop.f32.mrb[7].mxu0  ;;  %v2217_v48 = vadd.f32 %v1969_v39, %v551_v35  ;;  %v1972_v49 = vadd.f32 %v1971_v45, %v1682_v41  ;;  %v1973_v50 = vpop.f32.mrb[7].mxu1  ;;  %v559_v41 = vld [vmem:[#allocation2 + $0x50] sm:$0xff] }
 0x1a0   : > { %1894 = vmatmul.mubr.bf16.gmra.mrb[112].mxu0 %v4107_v38  ;;  %2281 = vst [vmem:[#allocation2 + $0x10] sm:$0xff] %v2217_v48  ;;  %v2218_v51 = vadd.f32 %v1972_v49, %v552_v44  ;;  %2183 = vmatmul.mubr.bf16.gmra.mrb[112].mxu1 %v4108_v42 }
 0x1a1   : > { %1901 = vmatprep.mubr.bf16.mxu0 %v4109_v43  ;;  %2190 = vmatprep.mubr.bf16.mxu1 %v4111_v47  ;;  %v560_v47 = vld [vmem:[#allocation2 + $0x58] sm:$0xff] }
 0x1a2   : > { %2282 = vst [vmem:[#allocation2 + $0x18] sm:$0xff] %v2218_v51 }
 0x1a3   : > { %v1687_v52 = vpop.f32.mrb[8].mxu0  ;;  %v1976_v54 = vpop.f32.mrb[8].mxu1 }
 0x1a4   : > { %v1689_v55 = vpop.f32.mrb[9].mxu0  ;;  %v1977_v57 = vadd.f32 %v1976_v54, %v1687_v52  ;;  %v1978_v58 = vpop.f32.mrb[9].mxu1 }
 0x1a5   : > { %v1690_v59 = vpop.f32.mrb[10].mxu0  ;;  %v1979_v63 = vpop.f32.mrb[10].mxu1  ;;  %v561_v55 = vld [vmem:[#allocation2 + $0x60] sm:$0xff] }
 0x1a6   : > { %v1692_v0 = vpop.f32.mrb[11].mxu0  ;;  %v2219_v2 = vadd.f32 %v1977_v57, %v553_v53  ;;  %v1980_v3 = vadd.f32 %v1979_v63, %v1690_v59  ;;  %v1981_v4 = vpop.f32.mrb[11].mxu1 }
 0x1a8   : > { %1902 = vmatmul.mubr.bf16.gmra.mrb[116].mxu0 %v4113_v56  ;;  %2283 = vst [vmem:[#allocation2 + $0x20] sm:$0xff] %v2219_v2  ;;  %v2220_v5 = vadd.f32 %v1980_v3, %v554_v62  ;;  %2191 = vmatmul.mubr.bf16.gmra.mrb[116].mxu1 %v4114_v60 }
 0x1a9   : > { %1909 = vmatprep.mubr.bf16.mxu0 %v4115_v61  ;;  %2198 = vmatprep.mubr.bf16.mxu1 %v4117_v1  ;;  %v562_v61 = vld [vmem:[#allocation2 + $0x68] sm:$0xff] }
 0x1aa   : > { %2284 = vst [vmem:[#allocation2 + $0x28] sm:$0xff] %v2220_v5  ;;  %v563_v5 = vld [vmem:[#allocation2 + $0x70] sm:$0xff] }
 0x1ab   : > { %v1695_v6 = vpop.f32.mrb[12].mxu0  ;;  %v1984_v8 = vpop.f32.mrb[12].mxu1 }
 0x1ac   : > { %v1697_v9 = vpop.f32.mrb[13].mxu0  ;;  %v1985_v11 = vadd.f32 %v1984_v8, %v1695_v6  ;;  %v1986_v12 = vpop.f32.mrb[13].mxu1 }
 0x1ad   : > { %v1698_v13 = vpop.f32.mrb[14].mxu0  ;;  %v1987_v17 = vpop.f32.mrb[14].mxu1 }
 0x1ae   : > { %v1700_v18 = vpop.f32.mrb[15].mxu0  ;;  %v2221_v20 = vadd.f32 %v1985_v11, %v555_v7  ;;  %v1988_v21 = vadd.f32 %v1987_v17, %v1698_v13  ;;  %v1989_v22 = vpop.f32.mrb[15].mxu1  ;;  %v564_v11 = vld [vmem:[#allocation2 + $0x78] sm:$0xff] }
 0x1b0   : > { %1910 = vmatmul.mubr.bf16.gmra.mrb[120].mxu0 %v4119_v10  ;;  %2285 = vst [vmem:[#allocation2 + $0x30] sm:$0xff] %v2221_v20  ;;  %v2222_v23 = vadd.f32 %v1988_v21, %v556_v16  ;;  %2199 = vmatmul.mubr.bf16.gmra.mrb[120].mxu1 %v4120_v14 }
 0x1b1   : > { %1917 = vmatprep.mubr.bf16.mxu0 %v4121_v15  ;;  %2206 = vmatprep.mubr.bf16.mxu1 %v4123_v19  ;;  %v565_v19 = vld [vmem:[#allocation2 + $0x80] sm:$0xff] }
 0x1b2   : > { %2286 = vst [vmem:[#allocation2 + $0x38] sm:$0xff] %v2222_v23 }
 0x1b3   : > { %v1703_v24 = vpop.f32.mrb[16].mxu0  ;;  %v1992_v26 = vpop.f32.mrb[16].mxu1 }
 0x1b4   : > { %v1705_v27 = vpop.f32.mrb[17].mxu0  ;;  %v1993_v29 = vadd.f32 %v1992_v26, %v1703_v24  ;;  %v1994_v30 = vpop.f32.mrb[17].mxu1 }
 0x1b5   : > { %v1706_v31 = vpop.f32.mrb[18].mxu0  ;;  %v1995_v34 = vpop.f32.mrb[18].mxu1 }
 0x1b6   : > { %v1708_v35 = vpop.f32.mrb[19].mxu0  ;;  %v2223_v36 = vadd.f32 %v1993_v29, %v557_v25  ;;  %v1996_v37 = vadd.f32 %v1995_v34, %v1706_v31  ;;  %v1997_v38 = vpop.f32.mrb[19].mxu1  ;;  %v566_v25 = vld [vmem:[#allocation2 + $0x88] sm:$0xff] }
 0x1b8   : > { %1918 = vmatmul.mubr.bf16.gmra.mrb[124].mxu0 %v4125_v28  ;;  %2287 = vst [vmem:[#allocation2 + $0x40] sm:$0xff] %v2223_v36  ;;  %v2224_v39 = vadd.f32 %v1996_v37, %v558_v33  ;;  %2207 = vmatmul.mubr.bf16.gmra.mrb[124].mxu1 %v4126_v32  ;;  %v567_v33 = vld [vmem:[#allocation2 + $0x90] sm:$0xff] }
 0x1ba   : > { %2288 = vst [vmem:[#allocation2 + $0x48] sm:$0xff] %v2224_v39  ;;  %v568_v39 = vld [vmem:[#allocation2 + $0x98] sm:$0xff] }
 0x1bb   : > { %v1711_v40 = vpop.f32.mrb[20].mxu0  ;;  %v2000_v42 = vpop.f32.mrb[20].mxu1 }
 0x1bc   : > { %v1713_v43 = vpop.f32.mrb[21].mxu0  ;;  %v2001_v44 = vadd.f32 %v2000_v42, %v1711_v40  ;;  %v2002_v45 = vpop.f32.mrb[21].mxu1 }
 0x1bd   : > { %v1714_v46 = vpop.f32.mrb[22].mxu0  ;;  %v2003_v48 = vpop.f32.mrb[22].mxu1 }
 0x1be   : > { %v1716_v49 = vpop.f32.mrb[23].mxu0  ;;  %v2225_v50 = vadd.f32 %v2001_v44, %v559_v41  ;;  %v2004_v51 = vadd.f32 %v2003_v48, %v1714_v46  ;;  %v2005_v52 = vpop.f32.mrb[23].mxu1 }
 0x1c0   : > { %2289 = vst [vmem:[#allocation2 + $0x50] sm:$0xff] %v2225_v50  ;;  %v2226_v53 = vadd.f32 %v2004_v51, %v560_v47  ;;  %v569_v47 = vld [vmem:[#allocation2 + $0xa0] sm:$0xff] }
 0x1c2   : > { %2290 = vst [vmem:[#allocation2 + $0x58] sm:$0xff] %v2226_v53  ;;  %v570_v53 = vld [vmem:[#allocation2 + $0xa8] sm:$0xff] }
 0x1c3   : > { %v1719_v54 = vpop.f32.mrb[24].mxu0  ;;  %v2008_v56 = vpop.f32.mrb[24].mxu1 }
 0x1c4   : > { %v1721_v57 = vpop.f32.mrb[25].mxu0  ;;  %v2009_v58 = vadd.f32 %v2008_v56, %v1719_v54  ;;  %v2010_v59 = vpop.f32.mrb[25].mxu1 }
 0x1c5   : > { %v1722_v60 = vpop.f32.mrb[26].mxu0  ;;  %v2011_v62 = vpop.f32.mrb[26].mxu1 }
 0x1c6   : > { %v1724_v63 = vpop.f32.mrb[27].mxu0  ;;  %v2227_v0 = vadd.f32 %v2009_v58, %v561_v55  ;;  %v2012_v1 = vadd.f32 %v2011_v62, %v1722_v60  ;;  %v2013_v2 = vpop.f32.mrb[27].mxu1 }
 0x1c8   : > { %2291 = vst [vmem:[#allocation2 + $0x60] sm:$0xff] %v2227_v0  ;;  %v2228_v3 = vadd.f32 %v2012_v1, %v562_v61  ;;  %v571_v61 = vld [vmem:[#allocation2 + $0xb0] sm:$0xff] }
 0x1ca   : > { %2292 = vst [vmem:[#allocation2 + $0x68] sm:$0xff] %v2228_v3  ;;  %v572_v3 = vld [vmem:[#allocation2 + $0xb8] sm:$0xff] }
 0x1cb   : > { %v1727_v4 = vpop.f32.mrb[28].mxu0  ;;  %v2016_v6 = vpop.f32.mrb[28].mxu1 }
 0x1cc   : > { %v1729_v7 = vpop.f32.mrb[29].mxu0  ;;  %v2017_v8 = vadd.f32 %v2016_v6, %v1727_v4  ;;  %v2018_v9 = vpop.f32.mrb[29].mxu1 }
 0x1cd   : > { %v1730_v10 = vpop.f32.mrb[30].mxu0  ;;  %v2019_v12 = vpop.f32.mrb[30].mxu1 }
 0x1ce   : > { %v1732_v13 = vpop.f32.mrb[31].mxu0  ;;  %v2229_v14 = vadd.f32 %v2017_v8, %v563_v5  ;;  %v2020_v15 = vadd.f32 %v2019_v12, %v1730_v10  ;;  %v2021_v16 = vpop.f32.mrb[31].mxu1 }
 0x1d0   : > { %2293 = vst [vmem:[#allocation2 + $0x70] sm:$0xff] %v2229_v14  ;;  %v2230_v17 = vadd.f32 %v2020_v15, %v564_v11  ;;  %v573_v11 = vld [vmem:[#allocation2 + $0xc0] sm:$0xff] }
 0x1d2   : > { %2294 = vst [vmem:[#allocation2 + $0x78] sm:$0xff] %v2230_v17  ;;  %v574_v17 = vld [vmem:[#allocation2 + $0xc8] sm:$0xff] }
 0x1d3   : > { %v1735_v18 = vpop.f32.mrb[32].mxu0  ;;  %v2024_v20 = vpop.f32.mrb[32].mxu1 }
 0x1d4   : > { %v1737_v21 = vpop.f32.mrb[33].mxu0  ;;  %v2025_v22 = vadd.f32 %v2024_v20, %v1735_v18  ;;  %v2026_v23 = vpop.f32.mrb[33].mxu1 }
 0x1d5   : > { %v1738_v24 = vpop.f32.mrb[34].mxu0  ;;  %v2027_v26 = vpop.f32.mrb[34].mxu1 }
 0x1d6   : > { %v1740_v27 = vpop.f32.mrb[35].mxu0  ;;  %v2231_v28 = vadd.f32 %v2025_v22, %v565_v19  ;;  %v2028_v29 = vadd.f32 %v2027_v26, %v1738_v24  ;;  %v2029_v30 = vpop.f32.mrb[35].mxu1 }
 0x1d8   : > { %2295 = vst [vmem:[#allocation2 + $0x80] sm:$0xff] %v2231_v28  ;;  %v2232_v31 = vadd.f32 %v2028_v29, %v566_v25  ;;  %v575_v25 = vld [vmem:[#allocation2 + $0xd0] sm:$0xff] }
 0x1da   : > { %2296 = vst [vmem:[#allocation2 + $0x88] sm:$0xff] %v2232_v31  ;;  %v576_v31 = vld [vmem:[#allocation2 + $0xd8] sm:$0xff] }
 0x1db   : > { %v1743_v32 = vpop.f32.mrb[36].mxu0  ;;  %v2032_v34 = vpop.f32.mrb[36].mxu1 }
 0x1dc   : > { %v1745_v35 = vpop.f32.mrb[37].mxu0  ;;  %v2033_v36 = vadd.f32 %v2032_v34, %v1743_v32  ;;  %v2034_v37 = vpop.f32.mrb[37].mxu1 }
 0x1dd   : > { %v1746_v38 = vpop.f32.mrb[38].mxu0  ;;  %v2035_v40 = vpop.f32.mrb[38].mxu1 }
 0x1de   : > { %v1748_v41 = vpop.f32.mrb[39].mxu0  ;;  %v2233_v42 = vadd.f32 %v2033_v36, %v567_v33  ;;  %v2036_v43 = vadd.f32 %v2035_v40, %v1746_v38  ;;  %v2037_v44 = vpop.f32.mrb[39].mxu1 }
 0x1e0   : > { %2297 = vst [vmem:[#allocation2 + $0x90] sm:$0xff] %v2233_v42  ;;  %v2234_v45 = vadd.f32 %v2036_v43, %v568_v39  ;;  %v577_v39 = vld [vmem:[#allocation2 + $0xe0] sm:$0xff] }
 0x1e2   : > { %2298 = vst [vmem:[#allocation2 + $0x98] sm:$0xff] %v2234_v45  ;;  %v578_v45 = vld [vmem:[#allocation2 + $0xe8] sm:$0xff] }
 0x1e3   : > { %v1751_v46 = vpop.f32.mrb[40].mxu0  ;;  %v2040_v48 = vpop.f32.mrb[40].mxu1 }
 0x1e4   : > { %v1753_v49 = vpop.f32.mrb[41].mxu0  ;;  %v2041_v50 = vadd.f32 %v2040_v48, %v1751_v46  ;;  %v2042_v51 = vpop.f32.mrb[41].mxu1 }
 0x1e5   : > { %v1754_v52 = vpop.f32.mrb[42].mxu0  ;;  %v2043_v54 = vpop.f32.mrb[42].mxu1 }
 0x1e6   : > { %v1756_v55 = vpop.f32.mrb[43].mxu0  ;;  %v2235_v56 = vadd.f32 %v2041_v50, %v569_v47  ;;  %v2044_v57 = vadd.f32 %v2043_v54, %v1754_v52  ;;  %v2045_v58 = vpop.f32.mrb[43].mxu1 }
 0x1e8   : > { %2299 = vst [vmem:[#allocation2 + $0xa0] sm:$0xff] %v2235_v56  ;;  %v2236_v59 = vadd.f32 %v2044_v57, %v570_v53  ;;  %v579_v53 = vld [vmem:[#allocation2 + $0xf0] sm:$0xff] }
 0x1ea   : > { %2300 = vst [vmem:[#allocation2 + $0xa8] sm:$0xff] %v2236_v59  ;;  %v580_v59 = vld [vmem:[#allocation2 + $0xf8] sm:$0xff] }
 0x1eb   : > { %v1759_v60 = vpop.f32.mrb[44].mxu0  ;;  %v2048_v62 = vpop.f32.mrb[44].mxu1 }
 0x1ec   : > { %v1761_v63 = vpop.f32.mrb[45].mxu0  ;;  %v2049_v0 = vadd.f32 %v2048_v62, %v1759_v60  ;;  %v2050_v1 = vpop.f32.mrb[45].mxu1 }
 0x1ed   : > { %v1762_v2 = vpop.f32.mrb[46].mxu0  ;;  %v2051_v4 = vpop.f32.mrb[46].mxu1 }
 0x1ee   : > { %v1764_v5 = vpop.f32.mrb[47].mxu0  ;;  %v2237_v6 = vadd.f32 %v2049_v0, %v571_v61  ;;  %v2052_v7 = vadd.f32 %v2051_v4, %v1762_v2  ;;  %v2053_v8 = vpop.f32.mrb[47].mxu1 }
 0x1f0   : > { %2301 = vst [vmem:[#allocation2 + $0xb0] sm:$0xff] %v2237_v6  ;;  %v2238_v9 = vadd.f32 %v2052_v7, %v572_v3  ;;  %v581_v3 = vld [vmem:[#allocation2 + $0x100] sm:$0xff] }
 0x1f2   : > { %2302 = vst [vmem:[#allocation2 + $0xb8] sm:$0xff] %v2238_v9  ;;  %v582_v9 = vld [vmem:[#allocation2 + $0x108] sm:$0xff] }
 0x1f3   : > { %v1767_v10 = vpop.f32.mrb[48].mxu0  ;;  %v2056_v12 = vpop.f32.mrb[48].mxu1 }
 0x1f4   : > { %v1769_v13 = vpop.f32.mrb[49].mxu0  ;;  %v2057_v14 = vadd.f32 %v2056_v12, %v1767_v10  ;;  %v2058_v15 = vpop.f32.mrb[49].mxu1 }
 0x1f5   : > { %v1770_v16 = vpop.f32.mrb[50].mxu0  ;;  %v2059_v18 = vpop.f32.mrb[50].mxu1 }
 0x1f6   : > { %v1772_v19 = vpop.f32.mrb[51].mxu0  ;;  %v2239_v20 = vadd.f32 %v2057_v14, %v573_v11  ;;  %v2060_v21 = vadd.f32 %v2059_v18, %v1770_v16  ;;  %v2061_v22 = vpop.f32.mrb[51].mxu1 }
 0x1f8   : > { %2303 = vst [vmem:[#allocation2 + $0xc0] sm:$0xff] %v2239_v20  ;;  %v2240_v23 = vadd.f32 %v2060_v21, %v574_v17  ;;  %v583_v17 = vld [vmem:[#allocation2 + $0x110] sm:$0xff] }
 0x1fa   : > { %2304 = vst [vmem:[#allocation2 + $0xc8] sm:$0xff] %v2240_v23  ;;  %v584_v23 = vld [vmem:[#allocation2 + $0x118] sm:$0xff] }
 0x1fb   : > { %v1775_v24 = vpop.f32.mrb[52].mxu0  ;;  %v2064_v26 = vpop.f32.mrb[52].mxu1 }
 0x1fc   : > { %v1777_v27 = vpop.f32.mrb[53].mxu0  ;;  %v2065_v28 = vadd.f32 %v2064_v26, %v1775_v24  ;;  %v2066_v29 = vpop.f32.mrb[53].mxu1 }
 0x1fd   : > { %v1778_v30 = vpop.f32.mrb[54].mxu0  ;;  %v2067_v32 = vpop.f32.mrb[54].mxu1 }
 0x1fe   : > { %v1780_v33 = vpop.f32.mrb[55].mxu0  ;;  %v2241_v34 = vadd.f32 %v2065_v28, %v575_v25  ;;  %v2068_v35 = vadd.f32 %v2067_v32, %v1778_v30  ;;  %v2069_v36 = vpop.f32.mrb[55].mxu1 }
 0x200   : > { %2305 = vst [vmem:[#allocation2 + $0xd0] sm:$0xff] %v2241_v34  ;;  %v2242_v37 = vadd.f32 %v2068_v35, %v576_v31  ;;  %v585_v31 = vld [vmem:[#allocation2 + $0x120] sm:$0xff] }
 0x202   : > { %2306 = vst [vmem:[#allocation2 + $0xd8] sm:$0xff] %v2242_v37  ;;  %v586_v37 = vld [vmem:[#allocation2 + $0x128] sm:$0xff] }
 0x203   : > { %v1783_v38 = vpop.f32.mrb[56].mxu0  ;;  %v2072_v40 = vpop.f32.mrb[56].mxu1 }
 0x204   : > { %v1785_v41 = vpop.f32.mrb[57].mxu0  ;;  %v2073_v42 = vadd.f32 %v2072_v40, %v1783_v38  ;;  %v2074_v43 = vpop.f32.mrb[57].mxu1 }
 0x205   : > { %v1786_v44 = vpop.f32.mrb[58].mxu0  ;;  %v2075_v46 = vpop.f32.mrb[58].mxu1 }
 0x206   : > { %v1788_v47 = vpop.f32.mrb[59].mxu0  ;;  %v2243_v48 = vadd.f32 %v2073_v42, %v577_v39  ;;  %v2076_v49 = vadd.f32 %v2075_v46, %v1786_v44  ;;  %v2077_v50 = vpop.f32.mrb[59].mxu1 }
 0x208   : > { %2307 = vst [vmem:[#allocation2 + $0xe0] sm:$0xff] %v2243_v48  ;;  %v2244_v51 = vadd.f32 %v2076_v49, %v578_v45  ;;  %v587_v45 = vld [vmem:[#allocation2 + $0x130] sm:$0xff] }
 0x20a   : > { %2308 = vst [vmem:[#allocation2 + $0xe8] sm:$0xff] %v2244_v51  ;;  %v588_v51 = vld [vmem:[#allocation2 + $0x138] sm:$0xff] }
 0x20b   : > { %v1791_v52 = vpop.f32.mrb[60].mxu0  ;;  %v2080_v54 = vpop.f32.mrb[60].mxu1 }
 0x20c   : > { %v1793_v55 = vpop.f32.mrb[61].mxu0  ;;  %v2081_v56 = vadd.f32 %v2080_v54, %v1791_v52  ;;  %v2082_v57 = vpop.f32.mrb[61].mxu1 }
 0x20d   : > { %v1794_v58 = vpop.f32.mrb[62].mxu0  ;;  %v2083_v60 = vpop.f32.mrb[62].mxu1 }
 0x20e   : > { %v1796_v61 = vpop.f32.mrb[63].mxu0  ;;  %v2245_v62 = vadd.f32 %v2081_v56, %v579_v53  ;;  %v2084_v63 = vadd.f32 %v2083_v60, %v1794_v58  ;;  %v2085_v0 = vpop.f32.mrb[63].mxu1 }
 0x210   : > { %2309 = vst [vmem:[#allocation2 + $0xf0] sm:$0xff] %v2245_v62  ;;  %v2246_v1 = vadd.f32 %v2084_v63, %v580_v59  ;;  %v589_v59 = vld [vmem:[#allocation2 + $0x140] sm:$0xff] }
 0x212   : > { %2310 = vst [vmem:[#allocation2 + $0xf8] sm:$0xff] %v2246_v1  ;;  %v590_v1 = vld [vmem:[#allocation2 + $0x148] sm:$0xff] }
 0x213   : > { %v1799_v2 = vpop.f32.mrb[64].mxu0  ;;  %v2088_v4 = vpop.f32.mrb[64].mxu1 }
 0x214   : > { %v1801_v5 = vpop.f32.mrb[65].mxu0  ;;  %v2089_v6 = vadd.f32 %v2088_v4, %v1799_v2  ;;  %v2090_v7 = vpop.f32.mrb[65].mxu1 }
 0x215   : > { %v1802_v8 = vpop.f32.mrb[66].mxu0  ;;  %v2091_v10 = vpop.f32.mrb[66].mxu1 }
 0x216   : > { %v1804_v11 = vpop.f32.mrb[67].mxu0  ;;  %v2247_v12 = vadd.f32 %v2089_v6, %v581_v3  ;;  %v2092_v13 = vadd.f32 %v2091_v10, %v1802_v8  ;;  %v2093_v14 = vpop.f32.mrb[67].mxu1 }
 0x218   : > { %2311 = vst [vmem:[#allocation2 + $0x100] sm:$0xff] %v2247_v12  ;;  %v2248_v15 = vadd.f32 %v2092_v13, %v582_v9  ;;  %v591_v9 = vld [vmem:[#allocation2 + $0x150] sm:$0xff] }
 0x21a   : > { %2312 = vst [vmem:[#allocation2 + $0x108] sm:$0xff] %v2248_v15  ;;  %v592_v15 = vld [vmem:[#allocation2 + $0x158] sm:$0xff] }
 0x21b   : > { %v1807_v16 = vpop.f32.mrb[68].mxu0  ;;  %v2096_v18 = vpop.f32.mrb[68].mxu1 }
 0x21c   : > { %v1809_v19 = vpop.f32.mrb[69].mxu0  ;;  %v2097_v20 = vadd.f32 %v2096_v18, %v1807_v16  ;;  %v2098_v21 = vpop.f32.mrb[69].mxu1 }
 0x21d   : > { %v1810_v22 = vpop.f32.mrb[70].mxu0  ;;  %v2099_v24 = vpop.f32.mrb[70].mxu1 }
 0x21e   : > { %v1812_v25 = vpop.f32.mrb[71].mxu0  ;;  %v2249_v26 = vadd.f32 %v2097_v20, %v583_v17  ;;  %v2100_v27 = vadd.f32 %v2099_v24, %v1810_v22  ;;  %v2101_v28 = vpop.f32.mrb[71].mxu1 }
 0x220   : > { %2313 = vst [vmem:[#allocation2 + $0x110] sm:$0xff] %v2249_v26  ;;  %v2250_v29 = vadd.f32 %v2100_v27, %v584_v23  ;;  %v593_v23 = vld [vmem:[#allocation2 + $0x160] sm:$0xff] }
 0x222   : > { %2314 = vst [vmem:[#allocation2 + $0x118] sm:$0xff] %v2250_v29  ;;  %v594_v29 = vld [vmem:[#allocation2 + $0x168] sm:$0xff] }
 0x223   : > { %v1815_v30 = vpop.f32.mrb[72].mxu0  ;;  %v2104_v32 = vpop.f32.mrb[72].mxu1 }
 0x224   : > { %v1817_v33 = vpop.f32.mrb[73].mxu0  ;;  %v2105_v34 = vadd.f32 %v2104_v32, %v1815_v30  ;;  %v2106_v35 = vpop.f32.mrb[73].mxu1 }
 0x225   : > { %v1818_v36 = vpop.f32.mrb[74].mxu0  ;;  %v2107_v38 = vpop.f32.mrb[74].mxu1 }
 0x226   : > { %v1820_v39 = vpop.f32.mrb[75].mxu0  ;;  %v2251_v40 = vadd.f32 %v2105_v34, %v585_v31  ;;  %v2108_v41 = vadd.f32 %v2107_v38, %v1818_v36  ;;  %v2109_v42 = vpop.f32.mrb[75].mxu1 }
 0x228   : > { %2315 = vst [vmem:[#allocation2 + $0x120] sm:$0xff] %v2251_v40  ;;  %v2252_v43 = vadd.f32 %v2108_v41, %v586_v37  ;;  %v595_v37 = vld [vmem:[#allocation2 + $0x170] sm:$0xff] }
 0x22a   : > { %2316 = vst [vmem:[#allocation2 + $0x128] sm:$0xff] %v2252_v43  ;;  %v596_v43 = vld [vmem:[#allocation2 + $0x178] sm:$0xff] }
 0x22b   : > { %v1823_v44 = vpop.f32.mrb[76].mxu0  ;;  %v2112_v46 = vpop.f32.mrb[76].mxu1 }
 0x22c   : > { %v1825_v47 = vpop.f32.mrb[77].mxu0  ;;  %v2113_v48 = vadd.f32 %v2112_v46, %v1823_v44  ;;  %v2114_v49 = vpop.f32.mrb[77].mxu1 }
 0x22d   : > { %v1826_v50 = vpop.f32.mrb[78].mxu0  ;;  %v2115_v52 = vpop.f32.mrb[78].mxu1 }
 0x22e   : > { %v1828_v53 = vpop.f32.mrb[79].mxu0  ;;  %v2253_v54 = vadd.f32 %v2113_v48, %v587_v45  ;;  %v2116_v55 = vadd.f32 %v2115_v52, %v1826_v50  ;;  %v2117_v56 = vpop.f32.mrb[79].mxu1 }
 0x230   : > { %2317 = vst [vmem:[#allocation2 + $0x130] sm:$0xff] %v2253_v54  ;;  %v2254_v57 = vadd.f32 %v2116_v55, %v588_v51  ;;  %v597_v51 = vld [vmem:[#allocation2 + $0x180] sm:$0xff] }
 0x232   : > { %2318 = vst [vmem:[#allocation2 + $0x138] sm:$0xff] %v2254_v57  ;;  %v598_v57 = vld [vmem:[#allocation2 + $0x188] sm:$0xff] }
 0x233   : > { %v1831_v58 = vpop.f32.mrb[80].mxu0  ;;  %v2120_v60 = vpop.f32.mrb[80].mxu1 }
 0x234   : > { %v1833_v61 = vpop.f32.mrb[81].mxu0  ;;  %v2121_v62 = vadd.f32 %v2120_v60, %v1831_v58  ;;  %v2122_v63 = vpop.f32.mrb[81].mxu1 }
 0x235   : > { %v1834_v0 = vpop.f32.mrb[82].mxu0  ;;  %v2123_v2 = vpop.f32.mrb[82].mxu1 }
 0x236   : > { %v1836_v3 = vpop.f32.mrb[83].mxu0  ;;  %v2255_v4 = vadd.f32 %v2121_v62, %v589_v59  ;;  %v2124_v5 = vadd.f32 %v2123_v2, %v1834_v0  ;;  %v2125_v6 = vpop.f32.mrb[83].mxu1 }
 0x238   : > { %2319 = vst [vmem:[#allocation2 + $0x140] sm:$0xff] %v2255_v4  ;;  %v2256_v7 = vadd.f32 %v2124_v5, %v590_v1  ;;  %v599_v1 = vld [vmem:[#allocation2 + $0x190] sm:$0xff] }
 0x23a   : > { %2320 = vst [vmem:[#allocation2 + $0x148] sm:$0xff] %v2256_v7  ;;  %v600_v7 = vld [vmem:[#allocation2 + $0x198] sm:$0xff] }
 0x23b   : > { %v1839_v8 = vpop.f32.mrb[84].mxu0  ;;  %v2128_v10 = vpop.f32.mrb[84].mxu1 }
 0x23c   : > { %v1841_v11 = vpop.f32.mrb[85].mxu0  ;;  %v2129_v12 = vadd.f32 %v2128_v10, %v1839_v8  ;;  %v2130_v13 = vpop.f32.mrb[85].mxu1 }
 0x23d   : > { %v1842_v14 = vpop.f32.mrb[86].mxu0  ;;  %v2131_v16 = vpop.f32.mrb[86].mxu1 }
 0x23e   : > { %v1844_v17 = vpop.f32.mrb[87].mxu0  ;;  %v2257_v18 = vadd.f32 %v2129_v12, %v591_v9  ;;  %v2132_v19 = vadd.f32 %v2131_v16, %v1842_v14  ;;  %v2133_v20 = vpop.f32.mrb[87].mxu1 }
 0x240   : > { %2321 = vst [vmem:[#allocation2 + $0x150] sm:$0xff] %v2257_v18  ;;  %v2258_v21 = vadd.f32 %v2132_v19, %v592_v15  ;;  %v601_v15 = vld [vmem:[#allocation2 + $0x1a0] sm:$0xff] }
 0x242   : > { %2322 = vst [vmem:[#allocation2 + $0x158] sm:$0xff] %v2258_v21  ;;  %v602_v21 = vld [vmem:[#allocation2 + $0x1a8] sm:$0xff] }
 0x243   : > { %v1847_v22 = vpop.f32.mrb[88].mxu0  ;;  %v2136_v24 = vpop.f32.mrb[88].mxu1 }
 0x244   : > { %v1849_v25 = vpop.f32.mrb[89].mxu0  ;;  %v2137_v26 = vadd.f32 %v2136_v24, %v1847_v22  ;;  %v2138_v27 = vpop.f32.mrb[89].mxu1 }
 0x245   : > { %v1850_v28 = vpop.f32.mrb[90].mxu0  ;;  %v2139_v30 = vpop.f32.mrb[90].mxu1 }
 0x246   : > { %v1852_v31 = vpop.f32.mrb[91].mxu0  ;;  %v2259_v32 = vadd.f32 %v2137_v26, %v593_v23  ;;  %v2140_v33 = vadd.f32 %v2139_v30, %v1850_v28  ;;  %v2141_v34 = vpop.f32.mrb[91].mxu1 }
 0x248   : > { %2323 = vst [vmem:[#allocation2 + $0x160] sm:$0xff] %v2259_v32  ;;  %v2260_v35 = vadd.f32 %v2140_v33, %v594_v29  ;;  %v603_v29 = vld [vmem:[#allocation2 + $0x1b0] sm:$0xff] }
 0x24a   : > { %2324 = vst [vmem:[#allocation2 + $0x168] sm:$0xff] %v2260_v35  ;;  %v604_v35 = vld [vmem:[#allocation2 + $0x1b8] sm:$0xff] }
 0x24b   : > { %v1855_v36 = vpop.f32.mrb[92].mxu0  ;;  %v2144_v38 = vpop.f32.mrb[92].mxu1 }
 0x24c   : > { %v1857_v39 = vpop.f32.mrb[93].mxu0  ;;  %v2145_v40 = vadd.f32 %v2144_v38, %v1855_v36  ;;  %v2146_v41 = vpop.f32.mrb[93].mxu1 }
 0x24d   : > { %v1858_v42 = vpop.f32.mrb[94].mxu0  ;;  %v2147_v44 = vpop.f32.mrb[94].mxu1 }
 0x24e   : > { %v1860_v45 = vpop.f32.mrb[95].mxu0  ;;  %v2261_v46 = vadd.f32 %v2145_v40, %v595_v37  ;;  %v2148_v47 = vadd.f32 %v2147_v44, %v1858_v42  ;;  %v2149_v48 = vpop.f32.mrb[95].mxu1 }
 0x250   : > { %2325 = vst [vmem:[#allocation2 + $0x170] sm:$0xff] %v2261_v46  ;;  %v2262_v49 = vadd.f32 %v2148_v47, %v596_v43  ;;  %v605_v43 = vld [vmem:[#allocation2 + $0x1c0] sm:$0xff] }
 0x252   : > { %2326 = vst [vmem:[#allocation2 + $0x178] sm:$0xff] %v2262_v49  ;;  %v606_v49 = vld [vmem:[#allocation2 + $0x1c8] sm:$0xff] }
 0x253   : > { %v1863_v50 = vpop.f32.mrb[96].mxu0  ;;  %v2152_v52 = vpop.f32.mrb[96].mxu1 }
 0x254   : > { %v1865_v53 = vpop.f32.mrb[97].mxu0  ;;  %v2153_v54 = vadd.f32 %v2152_v52, %v1863_v50  ;;  %v2154_v55 = vpop.f32.mrb[97].mxu1 }
 0x255   : > { %v1866_v56 = vpop.f32.mrb[98].mxu0  ;;  %v2155_v58 = vpop.f32.mrb[98].mxu1 }
 0x256   : > { %v1868_v59 = vpop.f32.mrb[99].mxu0  ;;  %v2263_v60 = vadd.f32 %v2153_v54, %v597_v51  ;;  %v2156_v61 = vadd.f32 %v2155_v58, %v1866_v56  ;;  %v2157_v62 = vpop.f32.mrb[99].mxu1 }
 0x258   : > { %2327 = vst [vmem:[#allocation2 + $0x180] sm:$0xff] %v2263_v60  ;;  %v2264_v63 = vadd.f32 %v2156_v61, %v598_v57  ;;  %v607_v57 = vld [vmem:[#allocation2 + $0x1d0] sm:$0xff] }
 0x25a   : > { %2328 = vst [vmem:[#allocation2 + $0x188] sm:$0xff] %v2264_v63  ;;  %v608_v63 = vld [vmem:[#allocation2 + $0x1d8] sm:$0xff] }
 0x25b   : > { %v1871_v0 = vpop.f32.mrb[100].mxu0  ;;  %v2160_v2 = vpop.f32.mrb[100].mxu1 }
 0x25c   : > { %v1873_v3 = vpop.f32.mrb[101].mxu0  ;;  %v2161_v4 = vadd.f32 %v2160_v2, %v1871_v0  ;;  %v2162_v5 = vpop.f32.mrb[101].mxu1 }
 0x25d   : > { %v1874_v6 = vpop.f32.mrb[102].mxu0  ;;  %v2163_v8 = vpop.f32.mrb[102].mxu1 }
 0x25e   : > { %v1876_v9 = vpop.f32.mrb[103].mxu0  ;;  %v2265_v10 = vadd.f32 %v2161_v4, %v599_v1  ;;  %v2164_v11 = vadd.f32 %v2163_v8, %v1874_v6  ;;  %v2165_v12 = vpop.f32.mrb[103].mxu1 }
 0x260   : > { %2329 = vst [vmem:[#allocation2 + $0x190] sm:$0xff] %v2265_v10  ;;  %v2266_v13 = vadd.f32 %v2164_v11, %v600_v7  ;;  %v609_v7 = vld [vmem:[#allocation2 + $0x1e0] sm:$0xff] }
 0x262   : > { %2330 = vst [vmem:[#allocation2 + $0x198] sm:$0xff] %v2266_v13  ;;  %v610_v13 = vld [vmem:[#allocation2 + $0x1e8] sm:$0xff] }
 0x263   : > { %v1879_v14 = vpop.f32.mrb[104].mxu0  ;;  %v2168_v16 = vpop.f32.mrb[104].mxu1 }
 0x264   : > { %v1881_v17 = vpop.f32.mrb[105].mxu0  ;;  %v2169_v18 = vadd.f32 %v2168_v16, %v1879_v14  ;;  %v2170_v19 = vpop.f32.mrb[105].mxu1 }
 0x265   : > { %v1882_v20 = vpop.f32.mrb[106].mxu0  ;;  %v2171_v22 = vpop.f32.mrb[106].mxu1 }
 0x266   : > { %v1884_v23 = vpop.f32.mrb[107].mxu0  ;;  %v2267_v24 = vadd.f32 %v2169_v18, %v601_v15  ;;  %v2172_v25 = vadd.f32 %v2171_v22, %v1882_v20  ;;  %v2173_v26 = vpop.f32.mrb[107].mxu1 }
 0x268   : > { %2331 = vst [vmem:[#allocation2 + $0x1a0] sm:$0xff] %v2267_v24  ;;  %v2268_v27 = vadd.f32 %v2172_v25, %v602_v21  ;;  %v611_v21 = vld [vmem:[#allocation2 + $0x1f0] sm:$0xff] }
 0x26a   : > { %2332 = vst [vmem:[#allocation2 + $0x1a8] sm:$0xff] %v2268_v27  ;;  %v612_v27 = vld [vmem:[#allocation2 + $0x1f8] sm:$0xff] }
 0x26b   : > { %v1887_v28 = vpop.f32.mrb[108].mxu0  ;;  %v2176_v30 = vpop.f32.mrb[108].mxu1 }
 0x26c   : > { %v1889_v31 = vpop.f32.mrb[109].mxu0  ;;  %v2177_v32 = vadd.f32 %v2176_v30, %v1887_v28  ;;  %v2178_v33 = vpop.f32.mrb[109].mxu1 }
 0x26d   : > { %v1890_v34 = vpop.f32.mrb[110].mxu0  ;;  %v2179_v36 = vpop.f32.mrb[110].mxu1 }
 0x26e   : > { %v1892_v37 = vpop.f32.mrb[111].mxu0  ;;  %v2269_v38 = vadd.f32 %v2177_v32, %v603_v29  ;;  %v2180_v39 = vadd.f32 %v2179_v36, %v1890_v34  ;;  %v2181_v40 = vpop.f32.mrb[111].mxu1 }
 0x270   : > { %2333 = vst [vmem:[#allocation2 + $0x1b0] sm:$0xff] %v2269_v38  ;;  %v2270_v41 = vadd.f32 %v2180_v39, %v604_v35 }
 0x272   : > { %2334 = vst [vmem:[#allocation2 + $0x1b8] sm:$0xff] %v2270_v41 }
 0x273   : > { %v1895_v42 = vpop.f32.mrb[112].mxu0  ;;  %v2184_v44 = vpop.f32.mrb[112].mxu1 }
 0x274   : > { %v1897_v45 = vpop.f32.mrb[113].mxu0  ;;  %v2185_v46 = vadd.f32 %v2184_v44, %v1895_v42  ;;  %v2186_v47 = vpop.f32.mrb[113].mxu1 }
 0x275   : > { %v1898_v48 = vpop.f32.mrb[114].mxu0  ;;  %v2187_v50 = vpop.f32.mrb[114].mxu1 }
 0x276   : > { %v1900_v51 = vpop.f32.mrb[115].mxu0  ;;  %v2271_v52 = vadd.f32 %v2185_v46, %v605_v43  ;;  %v2188_v53 = vadd.f32 %v2187_v50, %v1898_v48  ;;  %v2189_v54 = vpop.f32.mrb[115].mxu1 }
 0x278   : > { %2335 = vst [vmem:[#allocation2 + $0x1c0] sm:$0xff] %v2271_v52  ;;  %v2272_v55 = vadd.f32 %v2188_v53, %v606_v49 }
 0x27a   : > { %2336 = vst [vmem:[#allocation2 + $0x1c8] sm:$0xff] %v2272_v55 }
 0x27b   : > { %v1903_v56 = vpop.f32.mrb[116].mxu0  ;;  %v2192_v58 = vpop.f32.mrb[116].mxu1 }
 0x27c   : > { %v1905_v59 = vpop.f32.mrb[117].mxu0  ;;  %v2193_v60 = vadd.f32 %v2192_v58, %v1903_v56  ;;  %v2194_v61 = vpop.f32.mrb[117].mxu1 }
 0x27d   : > { %v1906_v62 = vpop.f32.mrb[118].mxu0  ;;  %v2195_v0 = vpop.f32.mrb[118].mxu1 }
 0x27e   : > { %v1908_v1 = vpop.f32.mrb[119].mxu0  ;;  %v2273_v2 = vadd.f32 %v2193_v60, %v607_v57  ;;  %v2196_v3 = vadd.f32 %v2195_v0, %v1906_v62  ;;  %v2197_v4 = vpop.f32.mrb[119].mxu1 }
 0x280   : > { %2337 = vst [vmem:[#allocation2 + $0x1d0] sm:$0xff] %v2273_v2  ;;  %v2274_v5 = vadd.f32 %v2196_v3, %v608_v63 }
 0x282   : > { %2338 = vst [vmem:[#allocation2 + $0x1d8] sm:$0xff] %v2274_v5 }
 0x283   : > { %v1911_v6 = vpop.f32.mrb[120].mxu0  ;;  %v2200_v8 = vpop.f32.mrb[120].mxu1 }
 0x284   : > { %v1913_v9 = vpop.f32.mrb[121].mxu0  ;;  %v2201_v10 = vadd.f32 %v2200_v8, %v1911_v6  ;;  %v2202_v11 = vpop.f32.mrb[121].mxu1 }
 0x285   : > { %v1914_v12 = vpop.f32.mrb[122].mxu0  ;;  %v2203_v14 = vpop.f32.mrb[122].mxu1 }
 0x286   : > { %v1916_v15 = vpop.f32.mrb[123].mxu0  ;;  %v2275_v16 = vadd.f32 %v2201_v10, %v609_v7  ;;  %v2204_v17 = vadd.f32 %v2203_v14, %v1914_v12  ;;  %v2205_v18 = vpop.f32.mrb[123].mxu1 }
 0x288   : > { %2339 = vst [vmem:[#allocation2 + $0x1e0] sm:$0xff] %v2275_v16  ;;  %v2276_v19 = vadd.f32 %v2204_v17, %v610_v13 }
 0x28a   : > { %2340 = vst [vmem:[#allocation2 + $0x1e8] sm:$0xff] %v2276_v19 }
 0x28b   : > { %v1919_v20 = vpop.f32.mrb[124].mxu0  ;;  %v2208_v22 = vpop.f32.mrb[124].mxu1 }
 0x28c   : > { %v1921_v23 = vpop.f32.mrb[125].mxu0  ;;  %v2209_v24 = vadd.f32 %v2208_v22, %v1919_v20  ;;  %v2210_v25 = vpop.f32.mrb[125].mxu1  ;;  %2346 = sbr.rel (%p3553_p10) target bundleno = 1060 (0x424), region = 67 }
 0x28d   : > { %v1922_v26 = vpop.f32.mrb[126].mxu0  ;;  %v2211_v28 = vpop.f32.mrb[126].mxu1 }
 0x28e   : > { %v1924_v29 = vpop.f32.mrb[127].mxu0  ;;  %v2277_v30 = vadd.f32 %v2209_v24, %v611_v21  ;;  %v2212_v31 = vadd.f32 %v2211_v28, %v1922_v26  ;;  %v2213_v32 = vpop.f32.mrb[127].mxu1 }
 0x290   : > { %2341 = vst [vmem:[#allocation2 + $0x1f0] sm:$0xff] %v2277_v30  ;;  %v2278_v33 = vadd.f32 %v2212_v31, %v612_v27 }
 0x292   : > { %2342 = vst [vmem:[#allocation2 + $0x1f8] sm:$0xff] %v2278_v33 }
 0x293   : > { %v4745_v34 = vld [vmem:[#allocation2] sm:$0xff]  ;;  %v4747_v35 = vld [vmem:[#allocation2 + $0x8] sm:$0xff]  ;;  %v4749_v36 = vld [vmem:[#allocation2 + $0x10] sm:$0xff] }
 0x294   : > { %v2411_v37 = vadd.f32 %v4747_v35, %v4745_v34  ;;  %v4753_v38 = vld [vmem:[#allocation2 + $0x18] sm:$0xff]  ;;  %v4756_v40 = vld [vmem:[#allocation2 + $0x20] sm:$0xff]  ;;  %v4759_v42 = vld [vmem:[#allocation2 + $0x28] sm:$0xff] }
 0x295   : > { %v4762_v44 = vld [vmem:[#allocation2 + $0x30] sm:$0xff]  ;;  %v4765_v46 = vld [vmem:[#allocation2 + $0x38] sm:$0xff]  ;;  %v4768_v48 = vld [vmem:[#allocation2 + $0x40] sm:$0xff] }
 0x296   : > { %v2412_v39 = vadd.f32 %v2411_v37, %v4749_v36  ;;  %v4771_v50 = vld [vmem:[#allocation2 + $0x48] sm:$0xff]  ;;  %v4774_v52 = vld [vmem:[#allocation2 + $0x50] sm:$0xff]  ;;  %v4777_v54 = vld [vmem:[#allocation2 + $0x58] sm:$0xff] }
 0x297   : > { %v4780_v56 = vld [vmem:[#allocation2 + $0x60] sm:$0xff]  ;;  %v4783_v58 = vld [vmem:[#allocation2 + $0x68] sm:$0xff]  ;;  %v4786_v60 = vld [vmem:[#allocation2 + $0x70] sm:$0xff] }
 0x298   : > { %v2413_v41 = vadd.f32 %v2412_v39, %v4753_v38  ;;  %v4789_v62 = vld [vmem:[#allocation2 + $0x78] sm:$0xff]  ;;  %v4792_v0 = vld [vmem:[#allocation2 + $0x80] sm:$0xff]  ;;  %v4795_v2 = vld [vmem:[#allocation2 + $0x88] sm:$0xff] }
 0x299   : > { %v4798_v4 = vld [vmem:[#allocation2 + $0x90] sm:$0xff]  ;;  %v4801_v6 = vld [vmem:[#allocation2 + $0x98] sm:$0xff]  ;;  %v4804_v8 = vld [vmem:[#allocation2 + $0xa0] sm:$0xff] }
 0x29a   : > { %v2414_v43 = vadd.f32 %v2413_v41, %v4756_v40  ;;  %v4807_v10 = vld [vmem:[#allocation2 + $0xa8] sm:$0xff]  ;;  %v4810_v12 = vld [vmem:[#allocation2 + $0xb0] sm:$0xff]  ;;  %v4813_v14 = vld [vmem:[#allocation2 + $0xb8] sm:$0xff] }
 0x29b   : > { %v4816_v16 = vld [vmem:[#allocation2 + $0xc0] sm:$0xff]  ;;  %v4819_v18 = vld [vmem:[#allocation2 + $0xc8] sm:$0xff]  ;;  %v4822_v20 = vld [vmem:[#allocation2 + $0xd0] sm:$0xff] }
 0x29c   : > { %v2415_v45 = vadd.f32 %v2414_v43, %v4759_v42  ;;  %v4825_v22 = vld [vmem:[#allocation2 + $0xd8] sm:$0xff]  ;;  %v4828_v24 = vld [vmem:[#allocation2 + $0xe0] sm:$0xff]  ;;  %v4831_v26 = vld [vmem:[#allocation2 + $0xe8] sm:$0xff] }
 0x29d   : > { %v4834_v28 = vld [vmem:[#allocation2 + $0xf0] sm:$0xff]  ;;  %v4837_v30 = vld [vmem:[#allocation2 + $0xf8] sm:$0xff]  ;;  %v4840_v32 = vld [vmem:[#allocation2 + $0x100] sm:$0xff] }
 0x29e   : > { %v2416_v47 = vadd.f32 %v2415_v45, %v4762_v44  ;;  %5595 = vst [vmem:[#allocation4_spill] sm:$0xff] %v4834_v28  ;;  %5596 = vst [vmem:[#allocation5_spill] sm:$0xff] %v4837_v30  ;;  %v4843_v37 = vld [vmem:[#allocation2 + $0x108] sm:$0xff]  ;;  %v4846_v41 = vld [vmem:[#allocation2 + $0x110] sm:$0xff] }
 0x29f   : > { %5597 = vst [vmem:[#allocation6_spill] sm:$0xff] %v4840_v32  ;;  %5598 = vst [vmem:[#allocation7_spill] sm:$0xff] %v4843_v37  ;;  %v4849_v45 = vld [vmem:[#allocation2 + $0x118] sm:$0xff] }
 0x2a0   : > { %v2417_v49 = vadd.f32 %v2416_v47, %v4765_v46  ;;  %5599 = vst [vmem:[#allocation8_spill] sm:$0xff] %v4846_v41  ;;  %5600 = vst [vmem:[#allocation9_spill] sm:$0xff] %v4849_v45 }
 0x2a2   : > { %v2418_v51 = vadd.f32 %v2417_v49, %v4768_v48  ;;  %v4852_v49 = vld [vmem:[#allocation2 + $0x120] sm:$0xff] }
 0x2a3   : > { %5601 = vst [vmem:[#allocation10_spill] sm:$0xff] %v4852_v49 }
 0x2a4   : > { %v2419_v53 = vadd.f32 %v2418_v51, %v4771_v50 }
 0x2a6   : > { %v2420_v55 = vadd.f32 %v2419_v53, %v4774_v52  ;;  %v4855_v53 = vld [vmem:[#allocation2 + $0x128] sm:$0xff] }
 0x2a7   : > { %5602 = vst [vmem:[#allocation11_spill] sm:$0xff] %v4855_v53 }
 0x2a8   : > { %v2421_v57 = vadd.f32 %v2420_v55, %v4777_v54 }
 0x2aa   : > { %v2422_v59 = vadd.f32 %v2421_v57, %v4780_v56  ;;  %v4858_v57 = vld [vmem:[#allocation2 + $0x130] sm:$0xff] }
 0x2ab   : > { %5603 = vst [vmem:[#allocation12_spill] sm:$0xff] %v4858_v57 }
 0x2ac   : > { %v2423_v61 = vadd.f32 %v2422_v59, %v4783_v58 }
 0x2ae   : > { %v2424_v63 = vadd.f32 %v2423_v61, %v4786_v60  ;;  %v4861_v61 = vld [vmem:[#allocation2 + $0x138] sm:$0xff] }
 0x2af   : > { %5604 = vst [vmem:[#allocation13_spill] sm:$0xff] %v4861_v61 }
 0x2b0   : > { %v2425_v1 = vadd.f32 %v2424_v63, %v4789_v62 }
 0x2b2   : > { %v2426_v3 = vadd.f32 %v2425_v1, %v4792_v0  ;;  %v4864_v1 = vld [vmem:[#allocation2 + $0x140] sm:$0xff] }
 0x2b3   : > { %5605 = vst [vmem:[#allocation14_spill] sm:$0xff] %v4864_v1 }
 0x2b4   : > { %v2427_v5 = vadd.f32 %v2426_v3, %v4795_v2 }
 0x2b6   : > { %v2428_v7 = vadd.f32 %v2427_v5, %v4798_v4  ;;  %v4867_v5 = vld [vmem:[#allocation2 + $0x148] sm:$0xff] }
 0x2b7   : > { %5606 = vst [vmem:[#allocation15_spill] sm:$0xff] %v4867_v5 }
 0x2b8   : > { %v2429_v9 = vadd.f32 %v2428_v7, %v4801_v6 }
 0x2ba   : > { %v2430_v11 = vadd.f32 %v2429_v9, %v4804_v8  ;;  %v4870_v9 = vld [vmem:[#allocation2 + $0x150] sm:$0xff] }
 0x2bb   : > { %5607 = vst [vmem:[#allocation16_spill] sm:$0xff] %v4870_v9 }
 0x2bc   : > { %v2431_v13 = vadd.f32 %v2430_v11, %v4807_v10 }
 0x2be   : > { %v2432_v15 = vadd.f32 %v2431_v13, %v4810_v12  ;;  %v4873_v13 = vld [vmem:[#allocation2 + $0x158] sm:$0xff] }
 0x2bf   : > { %5608 = vst [vmem:[#allocation17_spill] sm:$0xff] %v4873_v13 }
 0x2c0   : > { %v2433_v17 = vadd.f32 %v2432_v15, %v4813_v14 }
 0x2c2   : > { %v2434_v19 = vadd.f32 %v2433_v17, %v4816_v16  ;;  %v4876_v17 = vld [vmem:[#allocation2 + $0x160] sm:$0xff] }
 0x2c3   : > { %5609 = vst [vmem:[#allocation18_spill] sm:$0xff] %v4876_v17 }
 0x2c4   : > { %v2435_v21 = vadd.f32 %v2434_v19, %v4819_v18 }
 0x2c6   : > { %v2436_v23 = vadd.f32 %v2435_v21, %v4822_v20  ;;  %v2392_v21 = vld [vmem:[#allocation2 + $0x168] sm:$0xff] }
 0x2c8   : > { %v2437_v25 = vadd.f32 %v2436_v23, %v4825_v22 }
 0x2ca   : > { %v2438_v27 = vadd.f32 %v2437_v25, %v4828_v24  ;;  %v2393_v25 = vld [vmem:[#allocation2 + $0x170] sm:$0xff] }
 0x2cc   : > { %v2439_v29 = vadd.f32 %v2438_v27, %v4831_v26 }
 0x2ce   : > { %v2440_v31 = vadd.f32 %v2439_v29, %v4834_v28  ;;  %v2394_v29 = vld [vmem:[#allocation2 + $0x178] sm:$0xff] }
 0x2d0   : > { %v2441_v33 = vadd.f32 %v2440_v31, %v4837_v30 }
 0x2d2   : > { %v2442_v39 = vadd.f32 %v2441_v33, %v4840_v32  ;;  %v2395_v33 = vld [vmem:[#allocation2 + $0x180] sm:$0xff] }
 0x2d4   : > { %v2443_v43 = vadd.f32 %v2442_v39, %v4843_v37 }
 0x2d6   : > { %v2444_v47 = vadd.f32 %v2443_v43, %v4846_v41  ;;  %v2396_v43 = vld [vmem:[#allocation2 + $0x188] sm:$0xff]  ;;  %v2410_v41 = vld [vmem:[#allocation2 + $0x1f8] sm:$0xff] }
 0x2d8   : > { %v2445_v51 = vadd.f32 %v2444_v47, %v4849_v45  ;;  %v2409_v45 = vld [vmem:[#allocation2 + $0x1f0] sm:$0xff] }
 0x2da   : > { %v2446_v55 = vadd.f32 %v2445_v51, %v4852_v49  ;;  %v2397_v51 = vld [vmem:[#allocation2 + $0x190] sm:$0xff]  ;;  %v2408_v49 = vld [vmem:[#allocation2 + $0x1e8] sm:$0xff] }
 0x2dc   : > { %v2447_v59 = vadd.f32 %v2446_v55, %v4855_v53  ;;  %v2407_v53 = vld [vmem:[#allocation2 + $0x1e0] sm:$0xff] }
 0x2de   : > { %v2448_v63 = vadd.f32 %v2447_v59, %v4858_v57  ;;  %v2398_v59 = vld [vmem:[#allocation2 + $0x198] sm:$0xff] }
 0x2df   : > { %v2406_v57 = vld [vmem:[#allocation2 + $0x1d8] sm:$0xff] }
 0x2e0   : > { %v2449_v3 = vadd.f32 %v2448_v63, %v4861_v61  ;;  %v2405_v61 = vld [vmem:[#allocation2 + $0x1d0] sm:$0xff] }
 0x2e2   : > { %v2450_v7 = vadd.f32 %v2449_v3, %v4864_v1  ;;  %v2399_v3 = vld [vmem:[#allocation2 + $0x1a0] sm:$0xff]  ;;  %v2404_v1 = vld [vmem:[#allocation2 + $0x1c8] sm:$0xff] }
 0x2e4   : > { %v2451_v11 = vadd.f32 %v2450_v7, %v4867_v5  ;;  %v2402_v5 = vld [vmem:[#allocation2 + $0x1b8] sm:$0xff] }
 0x2e6   : > { %v2452_v15 = vadd.f32 %v2451_v11, %v4870_v9  ;;  %v2400_v11 = vld [vmem:[#allocation2 + $0x1a8] sm:$0xff] }
 0x2e8   : > { %v2453_v19 = vadd.f32 %v2452_v15, %v4873_v13  ;;  %v2401_v15 = vld [vmem:[#allocation2 + $0x1b0] sm:$0xff] }
 0x2ea   : > { %v2454_v23 = vadd.f32 %v2453_v19, %v4876_v17  ;;  %v2403_v17 = vld [vmem:[#allocation2 + $0x1c0] sm:$0xff] }
 0x2ec   : > { %v2455_v27 = vadd.f32 %v2454_v23, %v2392_v21 }
 0x2ee   : > { %v2456_v31 = vadd.f32 %v2455_v27, %v2393_v25 }
 0x2f0   : > { %v2457_v39 = vadd.f32 %v2456_v31, %v2394_v29 }
 0x2f2   : > { %v2458_v47 = vadd.f32 %v2457_v39, %v2395_v33 }
 0x2f4   : > { %v2459_v55 = vadd.f32 %v2458_v47, %v2396_v43 }
 0x2f6   : > { %v2460_v63 = vadd.f32 %v2459_v55, %v2397_v51 }
 0x2f8   : > { %v2461_v7 = vadd.f32 %v2460_v63, %v2398_v59 }
 0x2fa   : > { %v2462_v9 = vadd.f32 %v2461_v7, %v2399_v3 }
 0x2fc   : > { %v2463_v13 = vadd.f32 %v2462_v9, %v2400_v11 }
 0x2fe   : > { %v2464_v19 = vadd.f32 %v2463_v13, %v2401_v15 }
 0x300   : > { %v2465_v23 = vadd.f32 %v2464_v19, %v2402_v5 }
 0x302   : > { %v2466_v27 = vadd.f32 %v2465_v23, %v2403_v17 }
 0x304   : > { %v2467_v31 = vadd.f32 %v2466_v27, %v2404_v1 }
 0x306   : > { %v2468_v39 = vadd.f32 %v2467_v31, %v2405_v61 }
 0x308   : > { %v2469_v47 = vadd.f32 %v2468_v39, %v2406_v57 }
 0x30a   : > { %v2470_v55 = vadd.f32 %v2469_v47, %v2407_v53 }
 0x30c   : > { %v2471_v63 = vadd.f32 %v2470_v55, %v2408_v49 }
 0x30e   : > { %v2472_v7 = vadd.f32 %v2471_v63, %v2409_v45 }
 0x310   : > { %v2473_v37 = vadd.f32 %v2472_v7, %v2410_v41 }
 0x312   : > { %v2474_v9 = vrot.slane %v2473_v37, 4 }
 0x314   : > { %v2475_v32 = vadd.f32 %v2474_v9, %v2473_v37 }
 0x316   : > { %v2476_v13 = vrot.slane %v2475_v32, 2 }
 0x318   : > { %v2477_v30 = vadd.f32 %v2476_v13, %v2475_v32 }
 0x31a   : > { %v2478_v19 = vrot.slane %v2477_v30, 1 }
 0x31c   : > { %v2479_v28 = vadd.f32 %v2478_v19, %v2477_v30 }
 0x31e   : > { %v4880_v23 = vmul.f32 0.001953125, %v2479_v28 }
 0x320   : > { %v4883_v27 = vsub.f32 %v2392_v21, %v4880_v23  ;;  %v4886_v31 = vsub.f32 %v2393_v25, %v4880_v23  ;;  %v4889_v39 = vsub.f32 %v2394_v29, %v4880_v23  ;;  %v4892_v47 = vsub.f32 %v2395_v33, %v4880_v23 }
 0x321   : > { %v4895_v37 = vsub.f32 %v2396_v43, %v4880_v23  ;;  %v4898_v32 = vsub.f32 %v2397_v51, %v4880_v23  ;;  %v4901_v28 = vsub.f32 %v2398_v59, %v4880_v23  ;;  %v4904_v30 = vsub.f32 %v2399_v3, %v4880_v23 }
 0x322   : > { %v4907_v21 = vsub.f32 %v2400_v11, %v4880_v23  ;;  %v4910_v25 = vsub.f32 %v2401_v15, %v4880_v23  ;;  %v4913_v29 = vsub.f32 %v2402_v5, %v4880_v23  ;;  %v4916_v33 = vsub.f32 %v2403_v17, %v4880_v23 }
 0x323   : > { %v4919_v43 = vsub.f32 %v2404_v1, %v4880_v23  ;;  %v4922_v51 = vsub.f32 %v2405_v61, %v4880_v23  ;;  %v4925_v59 = vsub.f32 %v2406_v57, %v4880_v23  ;;  %v4928_v3 = vsub.f32 %v2407_v53, %v4880_v23 }
 0x324   : > { %5610 = vst [vmem:[#allocation19_spill] sm:$0xff] %v4916_v33  ;;  %v4931_v11 = vsub.f32 %v2408_v49, %v4880_v23  ;;  %v4934_v5 = vsub.f32 %v2409_v45, %v4880_v23  ;;  %v4937_v17 = vsub.f32 %v2410_v41, %v4880_v23  ;;  %v4941_v1 = vsub.f32 %v4745_v34, %v4880_v23 }
 0x325   : > { %5611 = vst [vmem:[#allocation20_spill] sm:$0xff] %v4919_v43  ;;  %5612 = vst [vmem:[#allocation21_spill] sm:$0xff] %v4922_v51  ;;  %v4945_v57 = vsub.f32 %v4747_v35, %v4880_v23  ;;  %v4949_v53 = vsub.f32 %v4749_v36, %v4880_v23  ;;  %v4953_v49 = vsub.f32 %v4753_v38, %v4880_v23 }
 0x326   : > { %5613 = vst [vmem:[#allocation22_spill] sm:$0xff] %v4925_v59  ;;  %5614 = vst [vmem:[#allocation23_spill] sm:$0xff] %v4928_v3  ;;  %v2545_v41 = vmul.f32 %v4941_v1, %v4941_v1  ;;  %v4961_v34 = vsub.f32 %v4756_v40, %v4880_v23  ;;  %v4967_v36 = vsub.f32 %v4759_v42, %v4880_v23 }
 0x327   : > { %5615 = vst [vmem:[#allocation24_spill] sm:$0xff] %v4937_v17  ;;  %v2546_v45 = vmul.f32 %v4945_v57, %v4945_v57  ;;  %v2547_v35 = vmul.f32 %v4949_v53, %v4949_v53  ;;  %v2548_v38 = vmul.f32 %v4953_v49, %v4953_v49  ;;  %v4973_v15 = vsub.f32 %v4762_v44, %v4880_v23 }
 0x328   : > { %v2549_v55 = vmul.f32 %v4961_v34, %v4961_v34  ;;  %v4979_v63 = vsub.f32 %v4765_v46, %v4880_v23  ;;  %v2550_v42 = vmul.f32 %v4967_v36, %v4967_v36  ;;  %v4985_v9 = vsub.f32 %v4768_v48, %v4880_v23 }
 0x329   : > { %v2609_v61 = vadd.f32 %v2546_v45, %v2545_v41  ;;  %v2551_v44 = vmul.f32 %v4973_v15, %v4973_v15  ;;  %v4991_v19 = vsub.f32 %v4771_v50, %v4880_v23  ;;  %v4997_v45 = vsub.f32 %v4774_v52, %v4880_v23 }
 0x32a   : > { %v2552_v46 = vmul.f32 %v4979_v63, %v4979_v63  ;;  %v2553_v48 = vmul.f32 %v4985_v9, %v4985_v9 }
 0x32b   : > { %v2610_v40 = vadd.f32 %v2609_v61, %v2547_v35  ;;  %v2554_v50 = vmul.f32 %v4991_v19, %v4991_v19  ;;  %v2555_v52 = vmul.f32 %v4997_v45, %v4997_v45 }
 0x32d   : > { %v2611_v7 = vadd.f32 %v2610_v40, %v2548_v38  ;;  %v5003_v38 = vsub.f32 %v4777_v54, %v4880_v23 }
 0x32f   : > { %v2612_v13 = vadd.f32 %v2611_v7, %v2549_v55  ;;  %v5009_v55 = vsub.f32 %v4780_v56, %v4880_v23  ;;  %v2556_v54 = vmul.f32 %v5003_v38, %v5003_v38 }
 0x331   : > { %v2613_v41 = vadd.f32 %v2612_v13, %v2550_v42  ;;  %v5015_v42 = vsub.f32 %v4783_v58, %v4880_v23  ;;  %v2557_v56 = vmul.f32 %v5009_v55, %v5009_v55 }
 0x333   : > { %v2614_v35 = vadd.f32 %v2613_v41, %v2551_v44  ;;  %v5021_v44 = vsub.f32 %v4786_v60, %v4880_v23  ;;  %v2558_v58 = vmul.f32 %v5015_v42, %v5015_v42 }
 0x335   : > { %v2615_v61 = vadd.f32 %v2614_v35, %v2552_v46  ;;  %v5027_v46 = vsub.f32 %v4789_v62, %v4880_v23  ;;  %v2559_v60 = vmul.f32 %v5021_v44, %v5021_v44 }
 0x337   : > { %v2616_v40 = vadd.f32 %v2615_v61, %v2553_v48  ;;  %v5033_v48 = vsub.f32 %v4792_v0, %v4880_v23  ;;  %v2560_v62 = vmul.f32 %v5027_v46, %v5027_v46 }
 0x339   : > { %v2617_v7 = vadd.f32 %v2616_v40, %v2554_v50  ;;  %v5039_v50 = vsub.f32 %v4795_v2, %v4880_v23  ;;  %v2561_v0 = vmul.f32 %v5033_v48, %v5033_v48 }
 0x33b   : > { %v2618_v13 = vadd.f32 %v2617_v7, %v2555_v52  ;;  %v5045_v52 = vsub.f32 %v4798_v4, %v4880_v23  ;;  %v2562_v2 = vmul.f32 %v5039_v50, %v5039_v50 }
 0x33d   : > { %v2619_v41 = vadd.f32 %v2618_v13, %v2556_v54  ;;  %v5051_v54 = vsub.f32 %v4801_v6, %v4880_v23  ;;  %v2563_v4 = vmul.f32 %v5045_v52, %v5045_v52 }
 0x33f   : > { %v2620_v35 = vadd.f32 %v2619_v41, %v2557_v56  ;;  %v5057_v56 = vsub.f32 %v4804_v8, %v4880_v23  ;;  %v2564_v6 = vmul.f32 %v5051_v54, %v5051_v54 }
 0x341   : > { %v2621_v61 = vadd.f32 %v2620_v35, %v2558_v58  ;;  %v5063_v58 = vsub.f32 %v4807_v10, %v4880_v23  ;;  %v2565_v8 = vmul.f32 %v5057_v56, %v5057_v56 }
 0x343   : > { %v2622_v40 = vadd.f32 %v2621_v61, %v2559_v60  ;;  %v5069_v60 = vsub.f32 %v4810_v12, %v4880_v23  ;;  %v2566_v10 = vmul.f32 %v5063_v58, %v5063_v58 }
 0x345   : > { %v2623_v7 = vadd.f32 %v2622_v40, %v2560_v62  ;;  %v5075_v62 = vsub.f32 %v4813_v14, %v4880_v23  ;;  %v2567_v12 = vmul.f32 %v5069_v60, %v5069_v60 }
 0x347   : > { %v2624_v13 = vadd.f32 %v2623_v7, %v2561_v0  ;;  %v5081_v0 = vsub.f32 %v4816_v16, %v4880_v23  ;;  %v2568_v14 = vmul.f32 %v5075_v62, %v5075_v62 }
 0x349   : > { %v2625_v41 = vadd.f32 %v2624_v13, %v2562_v2  ;;  %v5087_v2 = vsub.f32 %v4819_v18, %v4880_v23  ;;  %v2569_v16 = vmul.f32 %v5081_v0, %v5081_v0 }
 0x34b   : > { %v2626_v35 = vadd.f32 %v2625_v41, %v2563_v4  ;;  %v5093_v4 = vsub.f32 %v4822_v20, %v4880_v23  ;;  %v2570_v18 = vmul.f32 %v5087_v2, %v5087_v2 }
 0x34d   : > { %v2627_v61 = vadd.f32 %v2626_v35, %v2564_v6  ;;  %v5099_v6 = vsub.f32 %v4825_v22, %v4880_v23  ;;  %v2571_v20 = vmul.f32 %v5093_v4, %v5093_v4 }
 0x34f   : > { %v2628_v40 = vadd.f32 %v2627_v61, %v2565_v8  ;;  %5616 = vst [vmem:[#allocation25_spill] sm:$0xff] %v5099_v6  ;;  %v5105_v8 = vsub.f32 %v4828_v24, %v4880_v23  ;;  %v2572_v22 = vmul.f32 %v5099_v6, %v5099_v6 }
 0x351   : > { %v2629_v7 = vadd.f32 %v2628_v40, %v2566_v10  ;;  %5617 = vst [vmem:[#allocation26_spill] sm:$0xff] %v5105_v8  ;;  %v5111_v10 = vsub.f32 %v4831_v26, %v4880_v23  ;;  %v2573_v24 = vmul.f32 %v5105_v8, %v5105_v8 }
 0x353   : > { %v2630_v13 = vadd.f32 %v2629_v7, %v2567_v12  ;;  %5618 = vst [vmem:[#allocation27_spill] sm:$0xff] %v5111_v10  ;;  %v5619_v12 = vld [vmem:[#allocation4_spill] sm:$0xff]  ;;  %v5621_v7 = vld [vmem:[#allocation5_spill] sm:$0xff]  ;;  %v2574_v26 = vmul.f32 %v5111_v10, %v5111_v10 }
 0x354   : > { %v5117_v40 = vsub.f32 %v5619_v12, %v4880_v23  ;;  %v5625_v12 = vld [vmem:[#allocation7_spill] sm:$0xff] }
 0x355   : > { %v2631_v41 = vadd.f32 %v2630_v13, %v2568_v14  ;;  %v5123_v13 = vsub.f32 %v5621_v7, %v4880_v23  ;;  %v5135_v8 = vsub.f32 %v5625_v12, %v4880_v23  ;;  %v5627_v7 = vld [vmem:[#allocation8_spill] sm:$0xff]  ;;  %v5631_v12 = vld [vmem:[#allocation10_spill] sm:$0xff] }
 0x356   : > { %5620 = vst [vmem:[#allocation4_spill] sm:$0xff] %v5117_v40  ;;  %v5141_v10 = vsub.f32 %v5627_v7, %v4880_v23  ;;  %v5633_v7 = vld [vmem:[#allocation11_spill] sm:$0xff] }
 0x357   : > { %v2632_v35 = vadd.f32 %v2631_v41, %v2569_v16  ;;  %5622 = vst [vmem:[#allocation5_spill] sm:$0xff] %v5123_v13  ;;  %v5623_v41 = vld [vmem:[#allocation6_spill] sm:$0xff]  ;;  %5626 = vst [vmem:[#allocation7_spill] sm:$0xff] %v5135_v8 }
 0x358   : > { %v5129_v6 = vsub.f32 %v5623_v41, %v4880_v23  ;;  %5628 = vst [vmem:[#allocation8_spill] sm:$0xff] %v5141_v10  ;;  %v5629_v41 = vld [vmem:[#allocation9_spill] sm:$0xff] }
 0x359   : > { %v2633_v61 = vadd.f32 %v2632_v35, %v2570_v18  ;;  %v2575_v18 = vmul.f32 %v5117_v40, %v5117_v40  ;;  %v5147_v40 = vsub.f32 %v5629_v41, %v4880_v23  ;;  %v5635_v41 = vld [vmem:[#allocation12_spill] sm:$0xff] }
 0x35a   : > { %5624 = vst [vmem:[#allocation6_spill] sm:$0xff] %v5129_v6 }
 0x35b   : > { %v2634_v14 = vadd.f32 %v2633_v61, %v2571_v20  ;;  %v2576_v20 = vmul.f32 %v5123_v13, %v5123_v13  ;;  %5630 = vst [vmem:[#allocation9_spill] sm:$0xff] %v5147_v40  ;;  %v5153_v13 = vsub.f32 %v5631_v12, %v4880_v23  ;;  %v5637_v12 = vld [vmem:[#allocation13_spill] sm:$0xff] }
 0x35d   : > { %v2635_v16 = vadd.f32 %v2634_v14, %v2572_v22  ;;  %v2577_v22 = vmul.f32 %v5129_v6, %v5129_v6  ;;  %5632 = vst [vmem:[#allocation10_spill] sm:$0xff] %v5153_v13  ;;  %v5159_v6 = vsub.f32 %v5633_v7, %v4880_v23  ;;  %v5639_v7 = vld [vmem:[#allocation14_spill] sm:$0xff] }
 0x35f   : > { %v2636_v35 = vadd.f32 %v2635_v16, %v2573_v24  ;;  %v2578_v24 = vmul.f32 %v5135_v8, %v5135_v8  ;;  %5634 = vst [vmem:[#allocation11_spill] sm:$0xff] %v5159_v6  ;;  %v5165_v8 = vsub.f32 %v5635_v41, %v4880_v23  ;;  %v5640_v41 = vld [vmem:[#allocation15_spill] sm:$0xff] }
 0x361   : > { %v2637_v61 = vadd.f32 %v2636_v35, %v2574_v26  ;;  %v2579_v26 = vmul.f32 %v5141_v10, %v5141_v10  ;;  %5636 = vst [vmem:[#allocation12_spill] sm:$0xff] %v5165_v8  ;;  %v5171_v10 = vsub.f32 %v5637_v12, %v4880_v23  ;;  %v5642_v12 = vld [vmem:[#allocation16_spill] sm:$0xff] }
 0x363   : > { %v2638_v14 = vadd.f32 %v2637_v61, %v2575_v18  ;;  %v2580_v18 = vmul.f32 %v5147_v40, %v5147_v40  ;;  %5638 = vst [vmem:[#allocation13_spill] sm:$0xff] %v5171_v10  ;;  %v5177_v40 = vsub.f32 %v5639_v7, %v4880_v23  ;;  %v5643_v7 = vld [vmem:[#allocation17_spill] sm:$0xff] }
 0x365   : > { %v2639_v16 = vadd.f32 %v2638_v14, %v2576_v20  ;;  %v2581_v20 = vmul.f32 %v5153_v13, %v5153_v13  ;;  %v5183_v13 = vsub.f32 %v5640_v41, %v4880_v23  ;;  %v5644_v41 = vld [vmem:[#allocation18_spill] sm:$0xff] }
 0x367   : > { %v2640_v35 = vadd.f32 %v2639_v16, %v2577_v22  ;;  %v2582_v22 = vmul.f32 %v5159_v6, %v5159_v6  ;;  %5641 = vst [vmem:[#allocation14_spill] sm:$0xff] %v5183_v13  ;;  %v5189_v6 = vsub.f32 %v5642_v12, %v4880_v23 }
 0x369   : > { %v2641_v61 = vadd.f32 %v2640_v35, %v2578_v24  ;;  %v2583_v24 = vmul.f32 %v5165_v8, %v5165_v8  ;;  %v5195_v8 = vsub.f32 %v5643_v7, %v4880_v23 }
 0x36b   : > { %v2642_v14 = vadd.f32 %v2641_v61, %v2579_v26  ;;  %v2584_v26 = vmul.f32 %v5171_v10, %v5171_v10  ;;  %v5201_v10 = vsub.f32 %v5644_v41, %v4880_v23  ;;  %v2588_v12 = vmul.f32 %v5195_v8, %v5195_v8 }
 0x36c   : > { %v2591_v23 = vmul.f32 %v4886_v31, %v4886_v31  ;;  %v2592_v41 = vmul.f32 %v4889_v39, %v4889_v39 }
 0x36d   : > { %v2643_v16 = vadd.f32 %v2642_v14, %v2580_v18  ;;  %v2585_v18 = vmul.f32 %v5177_v40, %v5177_v40 }
 0x36f   : > { %v2644_v35 = vadd.f32 %v2643_v16, %v2581_v20  ;;  %v2586_v20 = vmul.f32 %v5183_v13, %v5183_v13  ;;  %v2590_v13 = vmul.f32 %v4883_v27, %v4883_v27 }
 0x371   : > { %v2645_v61 = vadd.f32 %v2644_v35, %v2582_v22  ;;  %v2587_v22 = vmul.f32 %v5189_v6, %v5189_v6 }
 0x373   : > { %v2646_v14 = vadd.f32 %v2645_v61, %v2583_v24  ;;  %v2589_v61 = vmul.f32 %v5201_v10, %v5201_v10 }
 0x375   : > { %v2647_v16 = vadd.f32 %v2646_v14, %v2584_v26 }
 0x377   : > { %v2648_v35 = vadd.f32 %v2647_v16, %v2585_v18  ;;  %v2593_v16 = vmul.f32 %v4892_v47, %v4892_v47 }
 0x379   : > { %v2649_v24 = vadd.f32 %v2648_v35, %v2586_v20  ;;  %v2594_v35 = vmul.f32 %v4895_v37, %v4895_v37 }
 0x37b   : > { %v2650_v7 = vadd.f32 %v2649_v24, %v2587_v22  ;;  %v2595_v24 = vmul.f32 %v4898_v32, %v4898_v32 }
 0x37d   : > { %v2651_v26 = vadd.f32 %v2650_v7, %v2588_v12  ;;  %v2596_v7 = vmul.f32 %v4901_v28, %v4901_v28 }
 0x37f   : > { %v2652_v14 = vadd.f32 %v2651_v26, %v2589_v61  ;;  %v2597_v26 = vmul.f32 %v4904_v30, %v4904_v30 }
 0x381   : > { %v2653_v18 = vadd.f32 %v2652_v14, %v2590_v13  ;;  %v2598_v14 = vmul.f32 %v4907_v21, %v4907_v21 }
 0x383   : > { %v2654_v20 = vadd.f32 %v2653_v18, %v2591_v23  ;;  %v2599_v18 = vmul.f32 %v4910_v25, %v4910_v25 }
 0x385   : > { %v2655_v22 = vadd.f32 %v2654_v20, %v2592_v41  ;;  %v2600_v20 = vmul.f32 %v4913_v29, %v4913_v29 }
 0x387   : > { %v2656_v12 = vadd.f32 %v2655_v22, %v2593_v16  ;;  %v2601_v22 = vmul.f32 %v4916_v33, %v4916_v33 }
 0x389   : > { %v2657_v61 = vadd.f32 %v2656_v12, %v2594_v35  ;;  %v2602_v12 = vmul.f32 %v4919_v43, %v4919_v43 }
 0x38b   : > { %v2658_v13 = vadd.f32 %v2657_v61, %v2595_v24  ;;  %v2603_v61 = vmul.f32 %v4922_v51, %v4922_v51 }
 0x38d   : > { %v2659_v23 = vadd.f32 %v2658_v13, %v2596_v7  ;;  %v2604_v13 = vmul.f32 %v4925_v59, %v4925_v59 }
 0x38f   : > { %v2660_v41 = vadd.f32 %v2659_v23, %v2597_v26  ;;  %v2605_v23 = vmul.f32 %v4928_v3, %v4928_v3 }
 0x391   : > { %v2661_v16 = vadd.f32 %v2660_v41, %v2598_v14  ;;  %v2606_v41 = vmul.f32 %v4931_v11, %v4931_v11 }
 0x393   : > { %v2662_v35 = vadd.f32 %v2661_v16, %v2599_v18  ;;  %v2607_v16 = vmul.f32 %v4934_v5, %v4934_v5 }
 0x395   : > { %v2663_v24 = vadd.f32 %v2662_v35, %v2600_v20  ;;  %v2608_v35 = vmul.f32 %v4937_v17, %v4937_v17 }
 0x397   : > { %v2664_v7 = vadd.f32 %v2663_v24, %v2601_v22 }
 0x399   : > { %v2665_v26 = vadd.f32 %v2664_v7, %v2602_v12 }
 0x39b   : > { %v2666_v14 = vadd.f32 %v2665_v26, %v2603_v61 }
 0x39d   : > { %v2667_v18 = vadd.f32 %v2666_v14, %v2604_v13  ;;  %v2684_v13 = vlaneseq }
 0x39f   : > { %v2668_v20 = vadd.f32 %v2667_v18, %v2605_v23  ;;  %v2685_v14 = vshrl.u32 %v2684_v13, 7  ;;  %v2679_v23 = vld [vmem:[%s5557_s2] sm:$0x1] }
 0x3a1   : > { %v2669_v22 = vadd.f32 %v2668_v20, %v2606_v41  ;;  %v2686_v18 = vsub.s32 0, %v2685_v14 }
 0x3a3   : > { %v2670_v24 = vadd.f32 %v2669_v22, %v2607_v16 }
 0x3a5   : > { %v2671_v51 = vadd.f32 %v2670_v24, %v2608_v35 }
 0x3a7   : > { %v2672_v59 = vrot.slane %v2671_v51, 4 }
 0x3a9   : > { %v2673_v12 = vadd.f32 %v2672_v59, %v2671_v51  ;;  %v5255_v51 = vld [vmem:[%s5558_s3] ss:$0 sm:$0xff] }
 0x3ab   : > { %v2674_v7 = vrot.slane %v2673_v12, 2 }
 0x3ad   : > { %v2675_v43 = vadd.f32 %v2674_v7, %v2673_v12 }
 0x3af   : > { %v2676_v3 = vrot.slane %v2675_v43, 1 }
 0x3b1   : > { %v2677_v61 = vadd.f32 %v2676_v3, %v2675_v43 }
 0x3b3   : > { %v2678_v26 = vmul.f32 0.001953125, %v2677_v61 }
 0x3b5   : > { %v2680_v33 = vadd.f32 1e-05, %v2678_v26 }
 0x3b7   : > { %4127 = vrsqrt.f32 %v2680_v33 }
 0x3c1   : > { %v4128_v17 = vpop.eup %4127 }
 0x3c2   : > { %v2682_v41 = vmul.f32 %v4128_v17, %v2679_v23 }
 0x3c4   : > { %v5250_v16 = vrot.slane %v2682_v41, %v2686_v18 }
 0x3c6   : > { %v2689_v43 = vmul.f32 %v5250_v16, %v4941_v1  ;;  %v2690_v33 = vmul.f32 %v5250_v16, %v4945_v57  ;;  %v2691_v59 = vmul.f32 %v5250_v16, %v4949_v53  ;;  %v2692_v3 = vmul.f32 %v5250_v16, %v4953_v49 }
 0x3c7   : > { %v2693_v17 = vmul.f32 %v5250_v16, %v4961_v34  ;;  %v2694_v20 = vmul.f32 %v5250_v16, %v4967_v36  ;;  %v2695_v35 = vmul.f32 %v5250_v16, %v4973_v15  ;;  %v2696_v1 = vmul.f32 %v5250_v16, %v4979_v63 }
 0x3c8   : > { %v2760_v57 = vadd.f32 %v5255_v51, %v2689_v43  ;;  %v2761_v22 = vadd.f32 %v5255_v51, %v2690_v33  ;;  %v2762_v53 = vadd.f32 %v5255_v51, %v2691_v59  ;;  %v2763_v49 = vadd.f32 %v5255_v51, %v2692_v3 }
 0x3c9   : > { %v2764_v24 = vadd.f32 %v5255_v51, %v2693_v17  ;;  %v2765_v34 = vadd.f32 %v5255_v51, %v2694_v20  ;;  %v2766_v36 = vadd.f32 %v5255_v51, %v2695_v35  ;;  %v2767_v12 = vadd.f32 %v5255_v51, %v2696_v1 }
 0x3ca   : > { %vm2824_vm0 = vcmp.ge.f32.partialorder %v2760_v57, 0.0  ;;  %vm2825_vm1 = vcmp.ge.f32.partialorder %v2761_v22, 0.0  ;;  %v2888_v15 = vmul.f32 0.2, %v2760_v57  ;;  %v2889_v63 = vmul.f32 0.2, %v2761_v22 }
 0x3cb   : > { %vm2826_vm2 = vcmp.ge.f32.partialorder %v2762_v53, 0.0  ;;  %vm2827_vm3 = vcmp.ge.f32.partialorder %v2763_v49, 0.0  ;;  %v2890_v7 = vmul.f32 0.2, %v2762_v53  ;;  %v2891_v61 = vmul.f32 0.2, %v2763_v49 }
 0x3cc   : > { %v2952_v26 = vsel %vm2824_vm0, %v2760_v57, %v2888_v15  ;;  %v2953_v13 = vsel %vm2825_vm1, %v2761_v22, %v2889_v63  ;;  %vm2828_vm4 = vcmp.ge.f32.partialorder %v2764_v24, 0.0  ;;  %vm2829_vm5 = vcmp.ge.f32.partialorder %v2765_v34, 0.0 }
 0x3cd   : > { %v3689_v14 = vpack.c.bf16 %v2953_v13, %v2952_v26  ;;  %v2954_v23 = vsel %vm2826_vm2, %v2762_v53, %v2890_v7  ;;  %v2955_v18 = vsel %vm2827_vm3, %v2763_v49, %v2891_v61  ;;  %v2892_v41 = vmul.f32 0.2, %v2764_v24 }
 0x3ce   : > { %v3694_v43 = vpack.c.bf16 %v2955_v18, %v2954_v23  ;;  %v2893_v33 = vmul.f32 0.2, %v2765_v34  ;;  %vm2830_vm6 = vcmp.ge.f32.partialorder %v2766_v36, 0.0  ;;  %vm2831_vm7 = vcmp.ge.f32.partialorder %v2767_v12, 0.0 }
 0x3cf   : > { %3690 = vst [vmem:[%s5559_s4] sm:$0xff] %v3689_v14   ;;  %v2956_v59 = vsel %vm2828_vm4, %v2764_v24, %v2892_v41  ;;  %v2894_v3 = vmul.f32 0.2, %v2766_v36  ;;  %v2895_v17 = vmul.f32 0.2, %v2767_v12  ;;  %v2697_v20 = vmul.f32 %v5250_v16, %v4985_v9 }
 0x3d0   : > { %3846 = vst [vmem:[%s5559_s4 + $0x8] sm:$0xff] %v3694_v43   ;;  %v2957_v35 = vsel %vm2829_vm5, %v2765_v34, %v2893_v33  ;;  %v2698_v1 = vmul.f32 %v5250_v16, %v4991_v19  ;;  %v2699_v57 = vmul.f32 %v5250_v16, %v4997_v45  ;;  %v2700_v22 = vmul.f32 %v5250_v16, %v5003_v38 }
 0x3d1   : > { %v3699_v53 = vpack.c.bf16 %v2957_v35, %v2956_v59  ;;  %v2958_v49 = vsel %vm2830_vm6, %v2766_v36, %v2894_v3  ;;  %v2959_v24 = vsel %vm2831_vm7, %v2767_v12, %v2895_v17  ;;  %v2768_v15 = vadd.f32 %v5255_v51, %v2697_v20 }
 0x3d2   : > { %v3704_v9 = vpack.c.bf16 %v2959_v24, %v2958_v49  ;;  %v2769_v63 = vadd.f32 %v5255_v51, %v2698_v1  ;;  %v2770_v7 = vadd.f32 %v5255_v51, %v2699_v57  ;;  %v2771_v34 = vadd.f32 %v5255_v51, %v2700_v22 }
 0x3d3   : > { %3847 = vst [vmem:[%s5559_s4 + $0x10] sm:$0xff] %v3699_v53   ;;  %vm2832_vm8 = vcmp.ge.f32.partialorder %v2768_v15, 0.0  ;;  %v2896_v19 = vmul.f32 0.2, %v2768_v15  ;;  %v2701_v45 = vmul.f32 %v5250_v16, %v5009_v55  ;;  %v2702_v38 = vmul.f32 %v5250_v16, %v5015_v42 }
 0x3d4   : > { %3848 = vst [vmem:[%s5559_s4 + $0x18] sm:$0xff] %v3704_v9   ;;  %vm2833_vm9 = vcmp.ge.f32.partialorder %v2769_v63, 0.0  ;;  %v2897_v36 = vmul.f32 0.2, %v2769_v63  ;;  %vm2834_vm10 = vcmp.ge.f32.partialorder %v2770_v7, 0.0  ;;  %vm2835_vm11 = vcmp.ge.f32.partialorder %v2771_v34, 0.0 }
 0x3d5   : > { %v2960_v12 = vsel %vm2832_vm8, %v2768_v15, %v2896_v19  ;;  %v2898_v61 = vmul.f32 0.2, %v2770_v7  ;;  %v2899_v26 = vmul.f32 0.2, %v2771_v34  ;;  %v2772_v13 = vadd.f32 %v5255_v51, %v2701_v45 }
 0x3d6   : > { %v2961_v14 = vsel %vm2833_vm9, %v2769_v63, %v2897_v36  ;;  %v2773_v23 = vadd.f32 %v5255_v51, %v2702_v38  ;;  %v2703_v55 = vmul.f32 %v5250_v16, %v5021_v44  ;;  %v2704_v42 = vmul.f32 %v5250_v16, %v5027_v46 }
 0x3d7   : > { %v3709_v18 = vpack.c.bf16 %v2961_v14, %v2960_v12  ;;  %v2962_v41 = vsel %vm2834_vm10, %v2770_v7, %v2898_v61  ;;  %v2963_v43 = vsel %vm2835_vm11, %v2771_v34, %v2899_v26  ;;  %vm2836_vm12 = vcmp.ge.f32.partialorder %v2772_v13, 0.0 }
 0x3d8   : > { %v3714_v33 = vpack.c.bf16 %v2963_v43, %v2962_v41  ;;  %vm2837_vm13 = vcmp.ge.f32.partialorder %v2773_v23, 0.0  ;;  %v2900_v59 = vmul.f32 0.2, %v2772_v13  ;;  %v2901_v3 = vmul.f32 0.2, %v2773_v23 }
 0x3d9   : > { %3849 = vst [vmem:[%s5559_s4 + $0x20] sm:$0xff] %v3709_v18   ;;  %v2774_v17 = vadd.f32 %v5255_v51, %v2703_v55  ;;  %v2775_v20 = vadd.f32 %v5255_v51, %v2704_v42  ;;  %v2705_v44 = vmul.f32 %v5250_v16, %v5033_v48  ;;  %v2706_v46 = vmul.f32 %v5250_v16, %v5039_v50 }
 0x3da   : > { %3850 = vst [vmem:[%s5559_s4 + $0x28] sm:$0xff] %v3714_v33   ;;  %v2964_v35 = vsel %vm2836_vm12, %v2772_v13, %v2900_v59  ;;  %v2965_v1 = vsel %vm2837_vm13, %v2773_v23, %v2901_v3  ;;  %v2707_v57 = vmul.f32 %v5250_v16, %v5045_v52  ;;  %v2708_v22 = vmul.f32 %v5250_v16, %v5051_v54 }
 0x3db   : > { %v3719_v53 = vpack.c.bf16 %v2965_v1, %v2964_v35  ;;  %vm2838_vm14 = vcmp.ge.f32.partialorder %v2774_v17, 0.0  ;;  %vm2839_vm15 = vcmp.ge.f32.partialorder %v2775_v20, 0.0  ;;  %v2902_v49 = vmul.f32 0.2, %v2774_v17 }
 0x3dc   : > { %v2903_v48 = vmul.f32 0.2, %v2775_v20  ;;  %v2776_v24 = vadd.f32 %v5255_v51, %v2705_v44  ;;  %v2777_v50 = vadd.f32 %v5255_v51, %v2706_v46  ;;  %v2778_v15 = vadd.f32 %v5255_v51, %v2707_v57 }
 0x3dd   : > { %3851 = vst [vmem:[%s5559_s4 + $0x30] sm:$0xff] %v3719_v53   ;;  %v2966_v9 = vsel %vm2838_vm14, %v2774_v17, %v2902_v49  ;;  %v2779_v52 = vadd.f32 %v5255_v51, %v2708_v22  ;;  %v2709_v54 = vmul.f32 %v5250_v16, %v5057_v56  ;;  %v2710_v63 = vmul.f32 %v5250_v16, %v5063_v58  ;;  %v5646_v53 = vld [vmem:[#allocation26_spill] sm:$0xff] }
 0x3de   : > { %v2967_v7 = vsel %vm2839_vm15, %v2775_v20, %v2903_v48  ;;  %vm2840_vm0 = vcmp.ge.f32.partialorder %v2776_v24, 0.0  ;;  %vm2841_vm1 = vcmp.ge.f32.partialorder %v2777_v50, 0.0  ;;  %v2904_v34 = vmul.f32 0.2, %v2776_v24  ;;  %v5645_v20 = vld [vmem:[#allocation25_spill] sm:$0xff]  ;;  %v5647_v48 = vld [vmem:[#allocation27_spill] sm:$0xff] }
 0x3df   : > { %v3724_v19 = vpack.c.bf16 %v2967_v7, %v2966_v9  ;;  %v2905_v45 = vmul.f32 0.2, %v2777_v50  ;;  %vm2842_vm2 = vcmp.ge.f32.partialorder %v2778_v15, 0.0  ;;  %vm2843_vm3 = vcmp.ge.f32.partialorder %v2779_v52, 0.0 }
 0x3e0   : > { %v2968_v38 = vsel %vm2840_vm0, %v2776_v24, %v2904_v34  ;;  %v2906_v36 = vmul.f32 0.2, %v2778_v15  ;;  %v2907_v12 = vmul.f32 0.2, %v2779_v52  ;;  %v2780_v61 = vadd.f32 %v5255_v51, %v2709_v54 }
 0x3e1   : > { %3852 = vst [vmem:[%s5559_s4 + $0x38] sm:$0xff] %v3724_v19   ;;  %v2969_v56 = vsel %vm2841_vm1, %v2777_v50, %v2905_v45  ;;  %v2781_v58 = vadd.f32 %v5255_v51, %v2710_v63  ;;  %v2711_v26 = vmul.f32 %v5250_v16, %v5069_v60  ;;  %v2712_v13 = vmul.f32 %v5250_v16, %v5075_v62 }
 0x3e2   : > { %v3729_v14 = vpack.c.bf16 %v2969_v56, %v2968_v38  ;;  %v2970_v23 = vsel %vm2842_vm2, %v2778_v15, %v2906_v36  ;;  %v2971_v55 = vsel %vm2843_vm3, %v2779_v52, %v2907_v12  ;;  %vm2844_vm4 = vcmp.ge.f32.partialorder %v2780_v61, 0.0  ;;  %v5648_v38 = vld [vmem:[#allocation4_spill] sm:$0xff]  ;;  %v5649_v12 = vld [vmem:[#allocation5_spill] sm:$0xff] }
 0x3e3   : > { %v3734_v42 = vpack.c.bf16 %v2971_v55, %v2970_v23  ;;  %vm2845_vm5 = vcmp.ge.f32.partialorder %v2781_v58, 0.0  ;;  %v2908_v18 = vmul.f32 0.2, %v2780_v61  ;;  %v2909_v41 = vmul.f32 0.2, %v2781_v58 }
 0x3e4   : > { %3853 = vst [vmem:[%s5559_s4 + $0x40] sm:$0xff] %v3729_v14   ;;  %v2782_v43 = vadd.f32 %v5255_v51, %v2711_v26  ;;  %v2783_v33 = vadd.f32 %v5255_v51, %v2712_v13  ;;  %v2713_v60 = vmul.f32 %v5250_v16, %v5081_v0  ;;  %v2714_v62 = vmul.f32 %v5250_v16, %v5087_v2 }
 0x3e5   : > { %3854 = vst [vmem:[%s5559_s4 + $0x48] sm:$0xff] %v3734_v42   ;;  %v2972_v59 = vsel %vm2844_vm4, %v2780_v61, %v2908_v18  ;;  %v2973_v3 = vsel %vm2845_vm5, %v2781_v58, %v2909_v41  ;;  %v2715_v17 = vmul.f32 %v5250_v16, %v5093_v4  ;;  %v2716_v44 = vmul.f32 %v5250_v16, %v5645_v20  ;;  %v5650_v18 = vld [vmem:[#allocation6_spill] sm:$0xff] }
 0x3e6   : > { %v3739_v46 = vpack.c.bf16 %v2973_v3, %v2972_v59  ;;  %vm2846_vm6 = vcmp.ge.f32.partialorder %v2782_v43, 0.0  ;;  %vm2847_vm7 = vcmp.ge.f32.partialorder %v2783_v33, 0.0  ;;  %v2910_v35 = vmul.f32 0.2, %v2782_v43  ;;  %v5652_v59 = vld [vmem:[#allocation8_spill] sm:$0xff] }
 0x3e7   : > { %v2911_v0 = vmul.f32 0.2, %v2783_v33  ;;  %v2784_v1 = vadd.f32 %v5255_v51, %v2713_v60  ;;  %v2785_v2 = vadd.f32 %v5255_v51, %v2714_v62  ;;  %v2786_v57 = vadd.f32 %v5255_v51, %v2715_v17  ;;  %v5653_v17 = vld [vmem:[#allocation9_spill] sm:$0xff] }
 0x3e8   : > { %3855 = vst [vmem:[%s5559_s4 + $0x50] sm:$0xff] %v3739_v46   ;;  %v2974_v22 = vsel %vm2846_vm6, %v2782_v43, %v2910_v35  ;;  %v2787_v4 = vadd.f32 %v5255_v51, %v2716_v44  ;;  %v2717_v49 = vmul.f32 %v5250_v16, %v5646_v53  ;;  %v2718_v24 = vmul.f32 %v5250_v16, %v5647_v48  ;;  %v5651_v43 = vld [vmem:[#allocation7_spill] sm:$0xff] }
 0x3e9   : > { %v2975_v50 = vsel %vm2847_vm7, %v2783_v33, %v2911_v0  ;;  %vm2848_vm8 = vcmp.ge.f32.partialorder %v2784_v1, 0.0  ;;  %vm2849_vm9 = vcmp.ge.f32.partialorder %v2785_v2, 0.0  ;;  %v2912_v15 = vmul.f32 0.2, %v2784_v1 }
 0x3ea   : > { %v3744_v9 = vpack.c.bf16 %v2975_v50, %v2974_v22  ;;  %v2913_v52 = vmul.f32 0.2, %v2785_v2  ;;  %vm2850_vm10 = vcmp.ge.f32.partialorder %v2786_v57, 0.0  ;;  %vm2851_vm11 = vcmp.ge.f32.partialorder %v2787_v4, 0.0 }
 0x3eb   : > { %v2976_v54 = vsel %vm2848_vm8, %v2784_v1, %v2912_v15  ;;  %v2914_v63 = vmul.f32 0.2, %v2786_v57  ;;  %v2915_v7 = vmul.f32 0.2, %v2787_v4  ;;  %v2788_v34 = vadd.f32 %v5255_v51, %v2717_v49  ;;  %v5655_v49 = vld [vmem:[#allocation11_spill] sm:$0xff] }
 0x3ec   : > { %3856 = vst [vmem:[%s5559_s4 + $0x58] sm:$0xff] %v3744_v9   ;;  %v2977_v19 = vsel %vm2849_vm9, %v2785_v2, %v2913_v52  ;;  %v2789_v45 = vadd.f32 %v5255_v51, %v2718_v24  ;;  %v2719_v36 = vmul.f32 %v5250_v16, %v5648_v38  ;;  %v2720_v61 = vmul.f32 %v5250_v16, %v5649_v12 }
 0x3ed   : > { %v3749_v56 = vpack.c.bf16 %v2977_v19, %v2976_v54  ;;  %v2978_v58 = vsel %vm2850_vm10, %v2786_v57, %v2914_v63  ;;  %v2979_v26 = vsel %vm2851_vm11, %v2787_v4, %v2915_v7  ;;  %vm2852_vm12 = vcmp.ge.f32.partialorder %v2788_v34, 0.0  ;;  %v5654_v4 = vld [vmem:[#allocation10_spill] sm:$0xff] }
 0x3ee   : > { %v3754_v13 = vpack.c.bf16 %v2979_v26, %v2978_v58  ;;  %vm2853_vm13 = vcmp.ge.f32.partialorder %v2789_v45, 0.0  ;;  %v2916_v14 = vmul.f32 0.2, %v2788_v34  ;;  %v2917_v23 = vmul.f32 0.2, %v2789_v45 }
 0x3ef   : > { %3857 = vst [vmem:[%s5559_s4 + $0x60] sm:$0xff] %v3749_v56   ;;  %v2790_v55 = vadd.f32 %v5255_v51, %v2719_v36  ;;  %v2791_v42 = vadd.f32 %v5255_v51, %v2720_v61  ;;  %v2721_v41 = vmul.f32 %v5250_v16, %v5650_v18  ;;  %v2722_v33 = vmul.f32 %v5250_v16, %v5651_v43  ;;  %v5657_v36 = vld [vmem:[#allocation13_spill] sm:$0xff]  ;;  %v5658_v18 = vld [vmem:[#allocation14_spill] sm:$0xff] }
 0x3f0   : > { %3858 = vst [vmem:[%s5559_s4 + $0x68] sm:$0xff] %v3754_v13   ;;  %v2980_v60 = vsel %vm2852_vm12, %v2788_v34, %v2916_v14  ;;  %v2981_v62 = vsel %vm2853_vm13, %v2789_v45, %v2917_v23  ;;  %v2723_v3 = vmul.f32 %v5250_v16, %v5652_v59  ;;  %v2724_v20 = vmul.f32 %v5250_v16, %v5653_v17  ;;  %v5656_v45 = vld [vmem:[#allocation12_spill] sm:$0xff] }
 0x3f1   : > { %v3759_v44 = vpack.c.bf16 %v2981_v62, %v2980_v60  ;;  %vm2854_vm14 = vcmp.ge.f32.partialorder %v2790_v55, 0.0  ;;  %vm2855_vm15 = vcmp.ge.f32.partialorder %v2791_v42, 0.0  ;;  %v2918_v46 = vmul.f32 0.2, %v2790_v55 }
 0x3f2   : > { %v2919_v35 = vmul.f32 0.2, %v2791_v42  ;;  %v2792_v0 = vadd.f32 %v5255_v51, %v2721_v41  ;;  %v2793_v1 = vadd.f32 %v5255_v51, %v2722_v33  ;;  %v2794_v2 = vadd.f32 %v5255_v51, %v2723_v3 }
 0x3f3   : > { %3859 = vst [vmem:[%s5559_s4 + $0x70] sm:$0xff] %v3759_v44   ;;  %v2982_v57 = vsel %vm2854_vm14, %v2790_v55, %v2918_v46  ;;  %v2795_v22 = vadd.f32 %v5255_v51, %v2724_v20  ;;  %v2725_v53 = vmul.f32 %v5250_v16, %v5654_v4  ;;  %v2726_v48 = vmul.f32 %v5250_v16, %v5655_v49 }
 0x3f4   : > { %v2983_v24 = vsel %vm2855_vm15, %v2791_v42, %v2919_v35  ;;  %vm2856_vm0 = vcmp.ge.f32.partialorder %v2792_v0, 0.0  ;;  %vm2857_vm1 = vcmp.ge.f32.partialorder %v2793_v1, 0.0  ;;  %v2920_v50 = vmul.f32 0.2, %v2792_v0 }
 0x3f5   : > { %v3764_v15 = vpack.c.bf16 %v2983_v24, %v2982_v57  ;;  %v2921_v9 = vmul.f32 0.2, %v2793_v1  ;;  %vm2858_vm2 = vcmp.ge.f32.partialorder %v2794_v2, 0.0  ;;  %vm2859_vm3 = vcmp.ge.f32.partialorder %v2795_v22, 0.0 }
 0x3f6   : > { %v2984_v52 = vsel %vm2856_vm0, %v2792_v0, %v2920_v50  ;;  %v2922_v54 = vmul.f32 0.2, %v2794_v2  ;;  %v2923_v63 = vmul.f32 0.2, %v2795_v22  ;;  %v2796_v7 = vadd.f32 %v5255_v51, %v2725_v53 }
 0x3f7   : > { %3860 = vst [vmem:[%s5559_s4 + $0x78] sm:$0xff] %v3764_v15   ;;  %v2985_v34 = vsel %vm2857_vm1, %v2793_v1, %v2921_v9  ;;  %v2797_v19 = vadd.f32 %v5255_v51, %v2726_v48  ;;  %v2727_v38 = vmul.f32 %v5250_v16, %v5656_v45  ;;  %v2728_v12 = vmul.f32 %v5250_v16, %v5657_v36 }
 0x3f8   : > { %v3769_v61 = vpack.c.bf16 %v2985_v34, %v2984_v52  ;;  %v2986_v56 = vsel %vm2858_vm2, %v2794_v2, %v2922_v54  ;;  %v2987_v58 = vsel %vm2859_vm3, %v2795_v22, %v2923_v63  ;;  %vm2860_vm4 = vcmp.ge.f32.partialorder %v2796_v7, 0.0 }
 0x3f9   : > { %v3774_v26 = vpack.c.bf16 %v2987_v58, %v2986_v56  ;;  %vm2861_vm5 = vcmp.ge.f32.partialorder %v2797_v19, 0.0  ;;  %v2924_v13 = vmul.f32 0.2, %v2796_v7  ;;  %v2925_v14 = vmul.f32 0.2, %v2797_v19 }
 0x3fa   : > { %3861 = vst [vmem:[%s5559_s4 + $0x80] sm:$0xff] %v3769_v61   ;;  %v2798_v23 = vadd.f32 %v5255_v51, %v2727_v38  ;;  %v2799_v55 = vadd.f32 %v5255_v51, %v2728_v12  ;;  %v2729_v42 = vmul.f32 %v5250_v16, %v5177_v40  ;;  %v2730_v41 = vmul.f32 %v5250_v16, %v5658_v18 }
 0x3fb   : > { %3862 = vst [vmem:[%s5559_s4 + $0x88] sm:$0xff] %v3774_v26   ;;  %v2988_v43 = vsel %vm2860_vm4, %v2796_v7, %v2924_v13  ;;  %v2989_v33 = vsel %vm2861_vm5, %v2797_v19, %v2925_v14  ;;  %v2731_v60 = vmul.f32 %v5250_v16, %v5189_v6  ;;  %v2732_v62 = vmul.f32 %v5250_v16, %v5195_v8 }
 0x3fc   : > { %v3779_v59 = vpack.c.bf16 %v2989_v33, %v2988_v43  ;;  %vm2862_vm6 = vcmp.ge.f32.partialorder %v2798_v23, 0.0  ;;  %vm2863_vm7 = vcmp.ge.f32.partialorder %v2799_v55, 0.0  ;;  %v2926_v3 = vmul.f32 0.2, %v2798_v23 }
 0x3fd   : > { %v2927_v40 = vmul.f32 0.2, %v2799_v55  ;;  %v2800_v17 = vadd.f32 %v5255_v51, %v2729_v42  ;;  %v2801_v20 = vadd.f32 %v5255_v51, %v2730_v41  ;;  %v2802_v44 = vadd.f32 %v5255_v51, %v2731_v60 }
 0x3fe   : > { %3863 = vst [vmem:[%s5559_s4 + $0x90] sm:$0xff] %v3779_v59   ;;  %v2990_v46 = vsel %vm2862_vm6, %v2798_v23, %v2926_v3  ;;  %v2803_v6 = vadd.f32 %v5255_v51, %v2732_v62  ;;  %v2733_v8 = vmul.f32 %v5250_v16, %v5201_v10  ;;  %v2734_v35 = vmul.f32 %v5250_v16, %v4883_v27 }
 0x3ff   : > { %v2991_v0 = vsel %vm2863_vm7, %v2799_v55, %v2927_v40  ;;  %vm2864_vm8 = vcmp.ge.f32.partialorder %v2800_v17, 0.0  ;;  %vm2865_vm9 = vcmp.ge.f32.partialorder %v2801_v20, 0.0  ;;  %v2928_v1 = vmul.f32 0.2, %v2800_v17 }
 0x400   : > { %v3784_v2 = vpack.c.bf16 %v2991_v0, %v2990_v46  ;;  %v2929_v57 = vmul.f32 0.2, %v2801_v20  ;;  %vm2866_vm10 = vcmp.ge.f32.partialorder %v2802_v44, 0.0  ;;  %vm2867_vm11 = vcmp.ge.f32.partialorder %v2803_v6, 0.0 }
 0x401   : > { %v2992_v22 = vsel %vm2864_vm8, %v2800_v17, %v2928_v1  ;;  %v2930_v4 = vmul.f32 0.2, %v2802_v44  ;;  %v2931_v53 = vmul.f32 0.2, %v2803_v6  ;;  %v2804_v49 = vadd.f32 %v5255_v51, %v2733_v8 }
 0x402   : > { %3864 = vst [vmem:[%s5559_s4 + $0x98] sm:$0xff] %v3784_v2   ;;  %v2993_v10 = vsel %vm2865_vm9, %v2801_v20, %v2929_v57  ;;  %v2805_v27 = vadd.f32 %v5255_v51, %v2734_v35  ;;  %v2735_v48 = vmul.f32 %v5250_v16, %v4886_v31  ;;  %v2736_v24 = vmul.f32 %v5250_v16, %v4889_v39  ;;  %v5661_v2 = vld [vmem:[#allocation21_spill] sm:$0xff] }
 0x403   : > { %v3789_v50 = vpack.c.bf16 %v2993_v10, %v2992_v22  ;;  %v2994_v15 = vsel %vm2866_vm10, %v2802_v44, %v2930_v4  ;;  %v2995_v9 = vsel %vm2867_vm11, %v2803_v6, %v2931_v53  ;;  %vm2868_vm12 = vcmp.ge.f32.partialorder %v2804_v49, 0.0  ;;  %v5662_v22 = vld [vmem:[#allocation22_spill] sm:$0xff] }
 0x404   : > { %v3794_v52 = vpack.c.bf16 %v2995_v9, %v2994_v15  ;;  %vm2869_vm13 = vcmp.ge.f32.partialorder %v2805_v27, 0.0  ;;  %v2932_v54 = vmul.f32 0.2, %v2804_v49  ;;  %v2933_v63 = vmul.f32 0.2, %v2805_v27  ;;  %v5663_v9 = vld [vmem:[#allocation23_spill] sm:$0xff] }
 0x405   : > { %3865 = vst [vmem:[%s5559_s4 + $0xa0] sm:$0xff] %v3789_v50   ;;  %v2806_v7 = vadd.f32 %v5255_v51, %v2735_v48  ;;  %v2807_v34 = vadd.f32 %v5255_v51, %v2736_v24  ;;  %v2737_v31 = vmul.f32 %v5250_v16, %v4892_v47  ;;  %v2738_v39 = vmul.f32 %v5250_v16, %v4895_v37 }
 0x406   : > { %3866 = vst [vmem:[%s5559_s4 + $0xa8] sm:$0xff] %v3794_v52   ;;  %v2996_v19 = vsel %vm2868_vm12, %v2804_v49, %v2932_v54  ;;  %v2997_v45 = vsel %vm2869_vm13, %v2805_v27, %v2933_v63  ;;  %v2739_v38 = vmul.f32 %v5250_v16, %v4898_v32  ;;  %v2740_v36 = vmul.f32 %v5250_v16, %v4901_v28 }
 0x407   : > { %v3799_v12 = vpack.c.bf16 %v2997_v45, %v2996_v19  ;;  %vm2870_vm14 = vcmp.ge.f32.partialorder %v2806_v7, 0.0  ;;  %vm2871_vm15 = vcmp.ge.f32.partialorder %v2807_v34, 0.0  ;;  %v2934_v61 = vmul.f32 0.2, %v2806_v7 }
 0x408   : > { %v2935_v47 = vmul.f32 0.2, %v2807_v34  ;;  %v2808_v56 = vadd.f32 %v5255_v51, %v2737_v31  ;;  %v2809_v37 = vadd.f32 %v5255_v51, %v2738_v39  ;;  %v2810_v58 = vadd.f32 %v5255_v51, %v2739_v38 }
 0x409   : > { %3867 = vst [vmem:[%s5559_s4 + $0xb0] sm:$0xff] %v3799_v12   ;;  %v2998_v26 = vsel %vm2870_vm14, %v2806_v7, %v2934_v61  ;;  %v2811_v32 = vadd.f32 %v5255_v51, %v2740_v36  ;;  %v2741_v28 = vmul.f32 %v5250_v16, %v4904_v30  ;;  %v2742_v13 = vmul.f32 %v5250_v16, %v4907_v21  ;;  %v5664_v61 = vld [vmem:[#allocation24_spill] sm:$0xff] }
 0x40a   : > { %v2999_v14 = vsel %vm2871_vm15, %v2807_v34, %v2935_v47  ;;  %vm2872_vm0 = vcmp.ge.f32.partialorder %v2808_v56, 0.0  ;;  %vm2873_vm1 = vcmp.ge.f32.partialorder %v2809_v37, 0.0  ;;  %v2936_v23 = vmul.f32 0.2, %v2808_v56 }
 0x40b   : > { %v3804_v55 = vpack.c.bf16 %v2999_v14, %v2998_v26  ;;  %v2937_v42 = vmul.f32 0.2, %v2809_v37  ;;  %vm2874_vm2 = vcmp.ge.f32.partialorder %v2810_v58, 0.0  ;;  %vm2875_vm3 = vcmp.ge.f32.partialorder %v2811_v32, 0.0 }
 0x40c   : > { %v3000_v18 = vsel %vm2872_vm0, %v2808_v56, %v2936_v23  ;;  %v2938_v41 = vmul.f32 0.2, %v2810_v58  ;;  %v2939_v43 = vmul.f32 0.2, %v2811_v32  ;;  %v2812_v33 = vadd.f32 %v5255_v51, %v2741_v28 }
 0x40d   : > { %3868 = vst [vmem:[%s5559_s4 + $0xb8] sm:$0xff] %v3804_v55   ;;  %v3001_v30 = vsel %vm2873_vm1, %v2809_v37, %v2937_v42  ;;  %v2813_v21 = vadd.f32 %v5255_v51, %v2742_v13  ;;  %v2743_v60 = vmul.f32 %v5250_v16, %v4910_v25  ;;  %v2744_v62 = vmul.f32 %v5250_v16, %v4913_v29  ;;  %v5659_v25 = vld [vmem:[#allocation19_spill] sm:$0xff]  ;;  %v5660_v29 = vld [vmem:[#allocation20_spill] sm:$0xff] }
 0x40e   : > { %v3809_v59 = vpack.c.bf16 %v3001_v30, %v3000_v18  ;;  %v3002_v3 = vsel %vm2874_vm2, %v2810_v58, %v2938_v41  ;;  %v3003_v40 = vsel %vm2875_vm3, %v2811_v32, %v2939_v43  ;;  %vm2876_vm4 = vcmp.ge.f32.partialorder %v2812_v33, 0.0 }
 0x40f   : > { %v3814_v17 = vpack.c.bf16 %v3003_v40, %v3002_v3  ;;  %vm2877_vm5 = vcmp.ge.f32.partialorder %v2813_v21, 0.0  ;;  %v2940_v20 = vmul.f32 0.2, %v2812_v33  ;;  %v2941_v44 = vmul.f32 0.2, %v2813_v21 }
 0x410   : > { %3869 = vst [vmem:[%s5559_s4 + $0xc0] sm:$0xff] %v3809_v59   ;;  %v2814_v46 = vadd.f32 %v5255_v51, %v2743_v60  ;;  %v2815_v6 = vadd.f32 %v5255_v51, %v2744_v62  ;;  %v2745_v8 = vmul.f32 %v5250_v16, %v5659_v25  ;;  %v2746_v35 = vmul.f32 %v5250_v16, %v5660_v29 }
 0x411   : > { %3870 = vst [vmem:[%s5559_s4 + $0xc8] sm:$0xff] %v3814_v17   ;;  %v3004_v0 = vsel %vm2876_vm4, %v2812_v33, %v2940_v20  ;;  %v3005_v1 = vsel %vm2877_vm5, %v2813_v21, %v2941_v44  ;;  %v2747_v57 = vmul.f32 %v5250_v16, %v5661_v2  ;;  %v2748_v4 = vmul.f32 %v5250_v16, %v5662_v22 }
 0x412   : > { %v3819_v53 = vpack.c.bf16 %v3005_v1, %v3004_v0  ;;  %vm2878_vm6 = vcmp.ge.f32.partialorder %v2814_v46, 0.0  ;;  %vm2879_vm7 = vcmp.ge.f32.partialorder %v2815_v6, 0.0  ;;  %v2942_v49 = vmul.f32 0.2, %v2814_v46 }
 0x413   : > { %v2943_v10 = vmul.f32 0.2, %v2815_v6  ;;  %v2816_v27 = vadd.f32 %v5255_v51, %v2745_v8  ;;  %v2817_v48 = vadd.f32 %v5255_v51, %v2746_v35  ;;  %v2818_v24 = vadd.f32 %v5255_v51, %v2747_v57 }
 0x414   : > { %3871 = vst [vmem:[%s5559_s4 + $0xd0] sm:$0xff] %v3819_v53   ;;  %v3006_v50 = vsel %vm2878_vm6, %v2814_v46, %v2942_v49  ;;  %v2819_v15 = vadd.f32 %v5255_v51, %v2748_v4  ;;  %v2749_v52 = vmul.f32 %v5250_v16, %v5663_v9  ;;  %v2750_v54 = vmul.f32 %v5250_v16, %v4931_v11 }
 0x415   : > { %v3007_v63 = vsel %vm2879_vm7, %v2815_v6, %v2943_v10  ;;  %vm2880_vm8 = vcmp.ge.f32.partialorder %v2816_v27, 0.0  ;;  %vm2881_vm9 = vcmp.ge.f32.partialorder %v2817_v48, 0.0  ;;  %v2944_v7 = vmul.f32 0.2, %v2816_v27 }
 0x416   : > { %v3824_v34 = vpack.c.bf16 %v3007_v63, %v3006_v50  ;;  %v2945_v31 = vmul.f32 0.2, %v2817_v48  ;;  %vm2882_vm10 = vcmp.ge.f32.partialorder %v2818_v24, 0.0  ;;  %vm2883_vm11 = vcmp.ge.f32.partialorder %v2819_v15, 0.0 }
 0x417   : > { %v3008_v39 = vsel %vm2880_vm8, %v2816_v27, %v2944_v7  ;;  %v2946_v19 = vmul.f32 0.2, %v2818_v24  ;;  %v2947_v45 = vmul.f32 0.2, %v2819_v15  ;;  %v2820_v38 = vadd.f32 %v5255_v51, %v2749_v52 }
 0x418   : > { %3872 = vst [vmem:[%s5559_s4 + $0xd8] sm:$0xff] %v3824_v34   ;;  %v3009_v36 = vsel %vm2881_vm9, %v2817_v48, %v2945_v31  ;;  %v2821_v11 = vadd.f32 %v5255_v51, %v2750_v54  ;;  %v2751_v12 = vmul.f32 %v5250_v16, %v4934_v5  ;;  %v2752_v47 = vmul.f32 %v5250_v16, %v5664_v61 }
 0x419   : > { %v3829_v56 = vpack.c.bf16 %v3009_v36, %v3008_v39  ;;  %v3010_v37 = vsel %vm2882_vm10, %v2818_v24, %v2946_v19  ;;  %v3011_v58 = vsel %vm2883_vm11, %v2819_v15, %v2947_v45  ;;  %vm2884_vm12 = vcmp.ge.f32.partialorder %v2820_v38, 0.0 }
 0x41a   : > { %v3834_v26 = vpack.c.bf16 %v3011_v58, %v3010_v37  ;;  %vm2885_vm13 = vcmp.ge.f32.partialorder %v2821_v11, 0.0  ;;  %v2948_v32 = vmul.f32 0.2, %v2820_v38  ;;  %v2949_v28 = vmul.f32 0.2, %v2821_v11 }
 0x41b   : > { %3873 = vst [vmem:[%s5559_s4 + $0xe0] sm:$0xff] %v3829_v56   ;;  %v2822_v13 = vadd.f32 %v5255_v51, %v2751_v12  ;;  %v2823_v14 = vadd.f32 %v5255_v51, %v2752_v47 }
 0x41c   : > { %3874 = vst [vmem:[%s5559_s4 + $0xe8] sm:$0xff] %v3834_v26   ;;  %v3012_v5 = vsel %vm2884_vm12, %v2820_v38, %v2948_v32  ;;  %v3013_v16 = vsel %vm2885_vm13, %v2821_v11, %v2949_v28 }
 0x41d   : > { %v3839_v23 = vpack.c.bf16 %v3013_v16, %v3012_v5  ;;  %vm2886_vm14 = vcmp.ge.f32.partialorder %v2822_v13, 0.0  ;;  %vm2887_vm15 = vcmp.ge.f32.partialorder %v2823_v14, 0.0  ;;  %v2950_v55 = vmul.f32 0.2, %v2822_v13 }
 0x41e   : > { %v2951_v42 = vmul.f32 0.2, %v2823_v14 }
 0x41f   : > { %3875 = vst [vmem:[%s5559_s4 + $0xf0] sm:$0xff] %v3839_v23   ;;  %v3014_v18 = vsel %vm2886_vm14, %v2822_v13, %v2950_v55 }
 0x420   : > { %v3015_v41 = vsel %vm2887_vm15, %v2823_v14, %v2951_v42 }
 0x421   : > { %v3844_v43 = vpack.c.bf16 %v3015_v41, %v3014_v18 }
 0x423   : > { %3876 = vst [vmem:[%s5559_s4 + $0xf8] sm:$0xff] %v3844_v43  }
 0x424 PF: > { %p11_p11 = scmp.ge.s32.totalorder %s4199_s19, 4   ;;  %s5665_s15 = smov %s4147_s16 }
 0x425   : > { %s5666_s16 = smov %s4208_s22  ;;  %s5667_s17 = smov %s4199_s19 }
 0x426   :  { %13 = sbr.rel (!%p11_p11) target bundleno = 2 (0x2), region = 101 }

// kernel: discriminator_forward.6
= control target key start
LH: loop header
LB: loop body
LE: loop exit
PB: predicated region body
PF: predicated region fallthrough
CT: control target
= control target key end

     0   :  { %s3254_s15 = smov 0   ;;  %s3256_s16 = smov 0   ;;  %s4087_s0 = inlined_call_operand.vmem [shape: bf16[128,2048], index: 0, kind: input, shape index: {}]   ;;  %s4088_s1 = inlined_call_operand.vmem [shape: bf16[2048,256], index: 1, kind: input, shape index: {}]   ;;  %s4089_s2 = inlined_call_operand.vmem [shape: f32[1,256], index: 2, kind: input, shape index: {}]   ;;  %s4090_s3 = inlined_call_operand.vmem [shape: f32[1,256], index: 3, kind: input, shape index: {}]   ;;  %s4091_s4 = inlined_call_operand.vmem [shape: bf16[128,256], index: 4, kind: output, shape index: {}]  }
   0x1   :  { %s3258_s17 = smov 0  }
   0x2 LB: > { %s3270_s18 = sadd.s32 4294967295, %s3225_s17   ;;  %s3273_s19 = sadd.s32 1, %s3225_s17   ;;  %s3225_s17 = sphi %s3258_s17, %s4094_s17   ;;  %s3221_s16 = sphi %s3256_s16, %s4093_s16   ;;  %s3217_s15 = sphi %s3254_s15, %s4092_s15  }
   0x3   : > { %s18_s20 = ssub.s32 %s3225_s17, %s3273_s19  ;;  %s21_s21 = sadd.s32 1, %s3221_s16 }
   0x4   : > { %p19_p0 = scmp.eq.s32.totalorder %s18_s20, 0  ;;  %p28_p1 = scmp.ne.s32.totalorder %s3221_s16, %s3217_s15 }
   0x5   : > { %p29_p2 = scmp.eq.s32.totalorder %s3225_s17, 0  ;;  %p2646_p4 = scmp.ge.s32.totalorder %s3225_s17, 2 }
   0x6   : > { %s3282_s22 = scalar_select %p19_p0, %s3221_s16, %s21_s21  }
   0x7   : > { %p30_p3 = por %p29_p2, %p28_p1  ;;  %149 = sbr.rel (%p2646_p4) target bundleno = 50 (0x32), region = 24 }
   0xe   : > { %152 = sbr.rel (!%p30_p3) target bundleno = 50 (0x32), region = 28  ;;  %s154_s23 = sand.u32 (%p30_p3), 1, %s3221_s16  }
   0xf   : > { %s2867_s24 = sshll.u32 (%p30_p3), %s3225_s17, 5  ;;  %s2647_s25 = sshll.u32 (%p30_p3), %s154_s23, 9 }
  0x10   : > { %s3290_s28 = scalar_lea.vmem (%p30_p3), %s4087_s0, %s2867_s24  ;;  %s3295_s29 = scalar_lea.vmem (%p30_p3), [#allocation3], %s2647_s25 }
  0x11   : > { %v172_v0 = vld [vmem:[%s3290_s28] sm:$0xff] (%p30_p3)  ;;  %v174_v1 = vld [vmem:[%s3290_s28 + $0x8] sm:$0xff] (%p30_p3)  ;;  %v176_v2 = vld [vmem:[%s3290_s28 + $0x10] sm:$0xff] (%p30_p3) }
  0x12   : > { %173 = vst [vmem:[%s3295_s29] sm:$0xff] (%p30_p3), %v172_v0  ;;  %175 = vst [vmem:[%s3295_s29 + $0x8] sm:$0xff] (%p30_p3), %v174_v1  ;;  %v178_v3 = vld [vmem:[%s3290_s28 + $0x18] sm:$0xff] (%p30_p3)  ;;  %v180_v4 = vld [vmem:[%s3290_s28 + $0x40] sm:$0xff] (%p30_p3) }
  0x13   : > { %177 = vst [vmem:[%s3295_s29 + $0x10] sm:$0xff] (%p30_p3), %v176_v2  ;;  %v182_v5 = vld [vmem:[%s3290_s28 + $0x48] sm:$0xff] (%p30_p3)  ;;  %179 = vst [vmem:[%s3295_s29 + $0x18] sm:$0xff] (%p30_p3), %v178_v3  ;;  %v184_v6 = vld [vmem:[%s3290_s28 + $0x50] sm:$0xff] (%p30_p3) }
  0x14   : > { %181 = vst [vmem:[%s3295_s29 + $0x20] sm:$0xff] (%p30_p3), %v180_v4  ;;  %183 = vst [vmem:[%s3295_s29 + $0x28] sm:$0xff] (%p30_p3), %v182_v5  ;;  %v186_v7 = vld [vmem:[%s3290_s28 + $0x58] sm:$0xff] (%p30_p3)  ;;  %v188_v8 = vld [vmem:[%s3290_s28 + $0x80] sm:$0xff] (%p30_p3) }
  0x15   : > { %185 = vst [vmem:[%s3295_s29 + $0x30] sm:$0xff] %v184_v6  ;;  %187 = vst [vmem:[%s3295_s29 + $0x38] sm:$0xff] %v186_v7  ;;  %v190_v9 = vld [vmem:[%s3290_s28 + $0x88] sm:$0xff]  ;;  %v192_v10 = vld [vmem:[%s3290_s28 + $0x90] sm:$0xff] }
  0x16   : > { %189 = vst [vmem:[%s3295_s29 + $0x40] sm:$0xff] %v188_v8  ;;  %v194_v11 = vld [vmem:[%s3290_s28 + $0x98] sm:$0xff]  ;;  %191 = vst [vmem:[%s3295_s29 + $0x48] sm:$0xff] %v190_v9  ;;  %v196_v12 = vld [vmem:[%s3290_s28 + $0xc0] sm:$0xff] }
  0x17   : > { %193 = vst [vmem:[%s3295_s29 + $0x50] sm:$0xff] %v192_v10  ;;  %195 = vst [vmem:[%s3295_s29 + $0x58] sm:$0xff] %v194_v11  ;;  %v198_v13 = vld [vmem:[%s3290_s28 + $0xc8] sm:$0xff]  ;;  %v200_v14 = vld [vmem:[%s3290_s28 + $0xd0] sm:$0xff] }
  0x18   : > { %197 = vst [vmem:[%s3295_s29 + $0x60] sm:$0xff] %v196_v12  ;;  %199 = vst [vmem:[%s3295_s29 + $0x68] sm:$0xff] %v198_v13  ;;  %v202_v15 = vld [vmem:[%s3290_s28 + $0xd8] sm:$0xff]  ;;  %v204_v16 = vld [vmem:[%s3290_s28 + $0x100] sm:$0xff] }
  0x19   : > { %201 = vst [vmem:[%s3295_s29 + $0x70] sm:$0xff] %v200_v14  ;;  %v206_v17 = vld [vmem:[%s3290_s28 + $0x108] sm:$0xff]  ;;  %203 = vst [vmem:[%s3295_s29 + $0x78] sm:$0xff] %v202_v15  ;;  %v208_v18 = vld [vmem:[%s3290_s28 + $0x110] sm:$0xff] }
  0x1a   : > { %205 = vst [vmem:[%s3295_s29 + $0x80] sm:$0xff] %v204_v16  ;;  %207 = vst [vmem:[%s3295_s29 + $0x88] sm:$0xff] %v206_v17  ;;  %v210_v19 = vld [vmem:[%s3290_s28 + $0x118] sm:$0xff]  ;;  %v212_v20 = vld [vmem:[%s3290_s28 + $0x140] sm:$0xff] }
  0x1b   : > { %209 = vst [vmem:[%s3295_s29 + $0x90] sm:$0xff] %v208_v18  ;;  %211 = vst [vmem:[%s3295_s29 + $0x98] sm:$0xff] %v210_v19  ;;  %v214_v21 = vld [vmem:[%s3290_s28 + $0x148] sm:$0xff]  ;;  %v216_v22 = vld [vmem:[%s3290_s28 + $0x150] sm:$0xff] }
  0x1c   : > { %213 = vst [vmem:[%s3295_s29 + $0xa0] sm:$0xff] %v212_v20  ;;  %v218_v23 = vld [vmem:[%s3290_s28 + $0x158] sm:$0xff]  ;;  %215 = vst [vmem:[%s3295_s29 + $0xa8] sm:$0xff] %v214_v21  ;;  %v220_v24 = vld [vmem:[%s3290_s28 + $0x180] sm:$0xff] }
  0x1d   : > { %217 = vst [vmem:[%s3295_s29 + $0xb0] sm:$0xff] %v216_v22  ;;  %219 = vst [vmem:[%s3295_s29 + $0xb8] sm:$0xff] %v218_v23  ;;  %v222_v25 = vld [vmem:[%s3290_s28 + $0x188] sm:$0xff]  ;;  %v224_v26 = vld [vmem:[%s3290_s28 + $0x190] sm:$0xff] }
  0x1e   : > { %221 = vst [vmem:[%s3295_s29 + $0xc0] sm:$0xff] %v220_v24  ;;  %223 = vst [vmem:[%s3295_s29 + $0xc8] sm:$0xff] %v222_v25  ;;  %v226_v27 = vld [vmem:[%s3290_s28 + $0x198] sm:$0xff]  ;;  %v228_v28 = vld [vmem:[%s3290_s28 + $0x1c0] sm:$0xff] }
  0x1f   : > { %225 = vst [vmem:[%s3295_s29 + $0xd0] sm:$0xff] %v224_v26  ;;  %v230_v29 = vld [vmem:[%s3290_s28 + $0x1c8] sm:$0xff]  ;;  %227 = vst [vmem:[%s3295_s29 + $0xd8] sm:$0xff] %v226_v27  ;;  %v232_v30 = vld [vmem:[%s3290_s28 + $0x1d0] sm:$0xff] }
  0x20   : > { %229 = vst [vmem:[%s3295_s29 + $0xe0] sm:$0xff] %v228_v28  ;;  %231 = vst [vmem:[%s3295_s29 + $0xe8] sm:$0xff] %v230_v29  ;;  %v234_v31 = vld [vmem:[%s3290_s28 + $0x1d8] sm:$0xff]  ;;  %v236_v32 = vld [vmem:[%s3290_s28 + $0x200] sm:$0xff] }
  0x21   : > { %233 = vst [vmem:[%s3295_s29 + $0xf0] sm:$0xff] %v232_v30  ;;  %235 = vst [vmem:[%s3295_s29 + $0xf8] sm:$0xff] %v234_v31  ;;  %v238_v33 = vld [vmem:[%s3290_s28 + $0x208] sm:$0xff]  ;;  %v240_v34 = vld [vmem:[%s3290_s28 + $0x210] sm:$0xff] }
  0x22   : > { %237 = vst [vmem:[%s3295_s29 + $0x100] sm:$0xff] %v236_v32  ;;  %v242_v35 = vld [vmem:[%s3290_s28 + $0x218] sm:$0xff]  ;;  %239 = vst [vmem:[%s3295_s29 + $0x108] sm:$0xff] %v238_v33  ;;  %v244_v36 = vld [vmem:[%s3290_s28 + $0x240] sm:$0xff] }
  0x23   : > { %241 = vst [vmem:[%s3295_s29 + $0x110] sm:$0xff] %v240_v34  ;;  %243 = vst [vmem:[%s3295_s29 + $0x118] sm:$0xff] %v242_v35  ;;  %v246_v37 = vld [vmem:[%s3290_s28 + $0x248] sm:$0xff]  ;;  %v248_v38 = vld [vmem:[%s3290_s28 + $0x250] sm:$0xff] }
  0x24   : > { %245 = vst [vmem:[%s3295_s29 + $0x120] sm:$0xff] %v244_v36  ;;  %247 = vst [vmem:[%s3295_s29 + $0x128] sm:$0xff] %v246_v37  ;;  %v250_v39 = vld [vmem:[%s3290_s28 + $0x258] sm:$0xff]  ;;  %v252_v40 = vld [vmem:[%s3290_s28 + $0x280] sm:$0xff] }
  0x25   : > { %249 = vst [vmem:[%s3295_s29 + $0x130] sm:$0xff] %v248_v38  ;;  %v254_v41 = vld [vmem:[%s3290_s28 + $0x288] sm:$0xff]  ;;  %251 = vst [vmem:[%s3295_s29 + $0x138] sm:$0xff] %v250_v39  ;;  %v256_v42 = vld [vmem:[%s3290_s28 + $0x290] sm:$0xff] }
  0x26   : > { %253 = vst [vmem:[%s3295_s29 + $0x140] sm:$0xff] %v252_v40  ;;  %255 = vst [vmem:[%s3295_s29 + $0x148] sm:$0xff] %v254_v41  ;;  %v258_v43 = vld [vmem:[%s3290_s28 + $0x298] sm:$0xff]  ;;  %v260_v44 = vld [vmem:[%s3290_s28 + $0x2c0] sm:$0xff] }
  0x27   : > { %257 = vst [vmem:[%s3295_s29 + $0x150] sm:$0xff] %v256_v42  ;;  %259 = vst [vmem:[%s3295_s29 + $0x158] sm:$0xff] %v258_v43  ;;  %v262_v45 = vld [vmem:[%s3290_s28 + $0x2c8] sm:$0xff]  ;;  %v264_v46 = vld [vmem:[%s3290_s28 + $0x2d0] sm:$0xff] }
  0x28   : > { %261 = vst [vmem:[%s3295_s29 + $0x160] sm:$0xff] %v260_v44  ;;  %v266_v47 = vld [vmem:[%s3290_s28 + $0x2d8] sm:$0xff]  ;;  %263 = vst [vmem:[%s3295_s29 + $0x168] sm:$0xff] %v262_v45  ;;  %v268_v48 = vld [vmem:[%s3290_s28 + $0x300] sm:$0xff] }
  0x29   : > { %265 = vst [vmem:[%s3295_s29 + $0x170] sm:$0xff] %v264_v46  ;;  %267 = vst [vmem:[%s3295_s29 + $0x178] sm:$0xff] %v266_v47  ;;  %v270_v49 = vld [vmem:[%s3290_s28 + $0x308] sm:$0xff]  ;;  %v272_v50 = vld [vmem:[%s3290_s28 + $0x310] sm:$0xff] }
  0x2a   : > { %269 = vst [vmem:[%s3295_s29 + $0x180] sm:$0xff] %v268_v48  ;;  %271 = vst [vmem:[%s3295_s29 + $0x188] sm:$0xff] %v270_v49  ;;  %v274_v51 = vld [vmem:[%s3290_s28 + $0x318] sm:$0xff]  ;;  %v276_v52 = vld [vmem:[%s3290_s28 + $0x340] sm:$0xff] }
  0x2b   : > { %273 = vst [vmem:[%s3295_s29 + $0x190] sm:$0xff] %v272_v50  ;;  %v278_v53 = vld [vmem:[%s3290_s28 + $0x348] sm:$0xff]  ;;  %275 = vst [vmem:[%s3295_s29 + $0x198] sm:$0xff] %v274_v51  ;;  %v280_v54 = vld [vmem:[%s3290_s28 + $0x350] sm:$0xff] }
  0x2c   : > { %277 = vst [vmem:[%s3295_s29 + $0x1a0] sm:$0xff] %v276_v52  ;;  %279 = vst [vmem:[%s3295_s29 + $0x1a8] sm:$0xff] %v278_v53  ;;  %v282_v55 = vld [vmem:[%s3290_s28 + $0x358] sm:$0xff]  ;;  %v284_v56 = vld [vmem:[%s3290_s28 + $0x380] sm:$0xff] }
  0x2d   : > { %281 = vst [vmem:[%s3295_s29 + $0x1b0] sm:$0xff] %v280_v54  ;;  %283 = vst [vmem:[%s3295_s29 + $0x1b8] sm:$0xff] %v282_v55  ;;  %v286_v57 = vld [vmem:[%s3290_s28 + $0x388] sm:$0xff]  ;;  %v288_v58 = vld [vmem:[%s3290_s28 + $0x390] sm:$0xff] }
  0x2e   : > { %285 = vst [vmem:[%s3295_s29 + $0x1c0] sm:$0xff] %v284_v56  ;;  %v290_v59 = vld [vmem:[%s3290_s28 + $0x398] sm:$0xff]  ;;  %287 = vst [vmem:[%s3295_s29 + $0x1c8] sm:$0xff] %v286_v57  ;;  %v292_v60 = vld [vmem:[%s3290_s28 + $0x3c0] sm:$0xff] }
  0x2f   : > { %289 = vst [vmem:[%s3295_s29 + $0x1d0] sm:$0xff] %v288_v58  ;;  %291 = vst [vmem:[%s3295_s29 + $0x1d8] sm:$0xff] %v290_v59  ;;  %v294_v61 = vld [vmem:[%s3290_s28 + $0x3c8] sm:$0xff]  ;;  %v296_v62 = vld [vmem:[%s3290_s28 + $0x3d0] sm:$0xff] }
  0x30   : > { %293 = vst [vmem:[%s3295_s29 + $0x1e0] sm:$0xff] %v292_v60  ;;  %295 = vst [vmem:[%s3295_s29 + $0x1e8] sm:$0xff] %v294_v61  ;;  %v298_v63 = vld [vmem:[%s3290_s28 + $0x3d8] sm:$0xff] }
  0x31   : > { %297 = vst [vmem:[%s3295_s29 + $0x1f0] sm:$0xff] %v296_v62  ;;  %299 = vst [vmem:[%s3295_s29 + $0x1f8] sm:$0xff] %v298_v63 }
  0x32 PF: > { %p2650_p5 = scmp.ge.s32.totalorder %s3225_s17, 1  ;;  %p314_p6 = scmp.lt.s32.totalorder %s3225_s17, 3 }
  0x34   : > { %p315_p7 = pnand %p2650_p5, %p314_p6 }
  0x35   : > { %s321_s30 = sand.u32 (!%p315_p7), 1, %s3217_s15   ;;  %s2652_s5 = sshll.u32 (!%p315_p7), %s3270_s18, 7 }
  0x36   : > { %318 = sbr.rel (%p315_p7) target bundleno = 630 (0x276), region = 55  ;;  %s2651_s6 = sshll.u32 (!%p315_p7), %s321_s30, 9 }
  0x37   : > { %p349_p8 = scmp.lt.s32.totalorder (!%p315_p7), %s2652_s5, 255  ;;  %s3431_s11 = scalar_lea.vmem (!%p315_p7), [#allocation3], %s2651_s6 }
  0x38   : > { %p2655_p9 = scmp.ne.s32.totalorder (!%p315_p7), %s3270_s18, 0 }
  0x3d   : > { %s4096_s5 = smov (!%p349_p8, %s2652_s5), 255  ;;  %358 = sbr.rel (%p2655_p9) target bundleno = 79 (0x4f), region = 63 }
  0x3e   : > { %s2868_s7 = sshll.u32 %s4096_s5, 3  ;;  %v3227_v0 = vmov (!%p2655_p9), 0.0  }
  0x3f   : > { %s3429_s10 = scalar_lea.vmem %s4088_s1, %s2868_s7  ;;  %359 = vst [vmem:[#allocation2] sm:$0xff] (!%p2655_p9), %v3227_v0  ;;  %360 = vst [vmem:[#allocation2 + $0x8] sm:$0xff] (!%p2655_p9), %v3227_v0 }
  0x40   : > { %361 = vst [vmem:[#allocation2 + $0x10] sm:$0xff] (!%p2655_p9), %v3227_v0  ;;  %362 = vst [vmem:[#allocation2 + $0x18] sm:$0xff] (!%p2655_p9), %v3227_v0 }
  0x41   : > { %363 = vst [vmem:[#allocation2 + $0x20] sm:$0xff] (!%p2655_p9), %v3227_v0  ;;  %364 = vst [vmem:[#allocation2 + $0x28] sm:$0xff] (!%p2655_p9), %v3227_v0 }
  0x42   : > { %365 = vst [vmem:[#allocation2 + $0x30] sm:$0xff] (!%p2655_p9), %v3227_v0  ;;  %366 = vst [vmem:[#allocation2 + $0x38] sm:$0xff] (!%p2655_p9), %v3227_v0 }
  0x43   : > { %367 = vst [vmem:[#allocation2 + $0x40] sm:$0xff] (!%p2655_p9), %v3227_v0  ;;  %368 = vst [vmem:[#allocation2 + $0x48] sm:$0xff] (!%p2655_p9), %v3227_v0 }
  0x44   : > { %369 = vst [vmem:[#allocation2 + $0x50] sm:$0xff] %v3227_v0  ;;  %370 = vst [vmem:[#allocation2 + $0x58] sm:$0xff] %v3227_v0 }
  0x45   : > { %371 = vst [vmem:[#allocation2 + $0x60] sm:$0xff] %v3227_v0  ;;  %372 = vst [vmem:[#allocation2 + $0x68] sm:$0xff] %v3227_v0 }
  0x46   : > { %373 = vst [vmem:[#allocation2 + $0x70] sm:$0xff] %v3227_v0  ;;  %374 = vst [vmem:[#allocation2 + $0x78] sm:$0xff] %v3227_v0 }
  0x47   : > { %375 = vst [vmem:[#allocation2 + $0x80] sm:$0xff] %v3227_v0  ;;  %376 = vst [vmem:[#allocation2 + $0x88] sm:$0xff] %v3227_v0 }
  0x48   : > { %377 = vst [vmem:[#allocation2 + $0x90] sm:$0xff] %v3227_v0  ;;  %378 = vst [vmem:[#allocation2 + $0x98] sm:$0xff] %v3227_v0 }
  0x49   : > { %379 = vst [vmem:[#allocation2 + $0xa0] sm:$0xff] %v3227_v0  ;;  %380 = vst [vmem:[#allocation2 + $0xa8] sm:$0xff] %v3227_v0 }
  0x4a   : > { %381 = vst [vmem:[#allocation2 + $0xb0] sm:$0xff] %v3227_v0  ;;  %382 = vst [vmem:[#allocation2 + $0xb8] sm:$0xff] %v3227_v0 }
  0x4b   : > { %383 = vst [vmem:[#allocation2 + $0xc0] sm:$0xff] %v3227_v0  ;;  %384 = vst [vmem:[#allocation2 + $0xc8] sm:$0xff] %v3227_v0 }
  0x4c   : > { %385 = vst [vmem:[#allocation2 + $0xd0] sm:$0xff] %v3227_v0  ;;  %386 = vst [vmem:[#allocation2 + $0xd8] sm:$0xff] %v3227_v0 }
  0x4d   : > { %387 = vst [vmem:[#allocation2 + $0xe0] sm:$0xff] %v3227_v0  ;;  %388 = vst [vmem:[#allocation2 + $0xe8] sm:$0xff] %v3227_v0 }
  0x4e   : > { %389 = vst [vmem:[#allocation2 + $0xf0] sm:$0xff] %v3227_v0  ;;  %390 = vst [vmem:[#allocation2 + $0xf8] sm:$0xff] %v3227_v0 }
  0x4f PF: > { %v3007_v1 = vld [vmem:[%s3429_s10 + $0x4] ss:$8 sps:$4 sm:$0xff]   ;;  %v3011_v3 = vld [vmem:[%s3429_s10] ss:$8 sps:$4 sm:$0xff]   ;;  %v3013_v5 = vld [vmem:[%s3429_s10 + $0x14] ss:$8 sps:$4 sm:$0xff]  }
  0x50   : > { %v3009_v2 = vld [vmem:[%s3429_s10 + $0x204] ss:$8 sps:$4 sm:$0xff]   ;;  %1575 = vmatprep.subr.bf16.mxu1 %v3007_v1  ;;  %v3012_v4 = vld [vmem:[%s3429_s10 + $0x200] ss:$8 sps:$4 sm:$0xff]   ;;  %v3015_v6 = vld [vmem:[%s3429_s10 + $0x214] ss:$8 sps:$4 sm:$0xff]  }
  0x51   : > { %1801 = vmatprep.subr.bf16.mxu0 %v3009_v2  ;;  %1576 = vmatpush1.bf16.msra.mxu1 %v3011_v3  ;;  %v3017_v7 = vld [vmem:[%s3429_s10 + $0x10] ss:$8 sps:$4 sm:$0xff]   ;;  %v3019_v9 = vld [vmem:[%s3429_s10 + $0x24] ss:$8 sps:$4 sm:$0xff]   ;;  %v3023_v11 = vld [vmem:[%s3429_s10 + $0x20] ss:$8 sps:$4 sm:$0xff]  }
  0x52   : > { %1802 = vmatpush1.bf16.msra.mxu0 %v3012_v4  ;;  %1577 = vmatprep.subr.bf16.mxu1 %v3013_v5  ;;  %v3018_v8 = vld [vmem:[%s3429_s10 + $0x210] ss:$8 sps:$4 sm:$0xff]   ;;  %v3021_v10 = vld [vmem:[%s3429_s10 + $0x224] ss:$8 sps:$4 sm:$0xff]   ;;  %v3024_v12 = vld [vmem:[%s3429_s10 + $0x220] ss:$8 sps:$4 sm:$0xff]  }
  0x53   : > { %1803 = vmatprep.subr.bf16.mxu0 %v3015_v6  ;;  %v3025_v13 = vld [vmem:[%s3429_s10 + $0x34] ss:$8 sps:$4 sm:$0xff]   ;;  %v3029_v15 = vld [vmem:[%s3429_s10 + $0x30] ss:$8 sps:$4 sm:$0xff]   ;;  %v3031_v17 = vld [vmem:[%s3429_s10 + $0x44] ss:$8 sps:$4 sm:$0xff]  }
  0x54   : > { %v3027_v14 = vld [vmem:[%s3429_s10 + $0x234] ss:$8 sps:$4 sm:$0xff]   ;;  %v3030_v16 = vld [vmem:[%s3429_s10 + $0x230] ss:$8 sps:$4 sm:$0xff]   ;;  %v3033_v18 = vld [vmem:[%s3429_s10 + $0x244] ss:$8 sps:$4 sm:$0xff]  }
  0x55   : > { %1578 = vmatpush1.bf16.msra.mxu1 %v3017_v7  ;;  %v3035_v19 = vld [vmem:[%s3429_s10 + $0x40] ss:$8 sps:$4 sm:$0xff]   ;;  %v3037_v21 = vld [vmem:[%s3429_s10 + $0x54] ss:$8 sps:$4 sm:$0xff]   ;;  %v3041_v23 = vld [vmem:[%s3429_s10 + $0x50] ss:$8 sps:$4 sm:$0xff]  }
  0x56   : > { %1804 = vmatpush1.bf16.msra.mxu0 %v3018_v8  ;;  %1579 = vmatprep.subr.bf16.mxu1 %v3019_v9  ;;  %v3036_v20 = vld [vmem:[%s3429_s10 + $0x240] ss:$8 sps:$4 sm:$0xff]   ;;  %v3039_v22 = vld [vmem:[%s3429_s10 + $0x254] ss:$8 sps:$4 sm:$0xff]   ;;  %v3042_v24 = vld [vmem:[%s3429_s10 + $0x250] ss:$8 sps:$4 sm:$0xff]  }
  0x57   : > { %1805 = vmatprep.subr.bf16.mxu0 %v3021_v10  ;;  %v3043_v25 = vld [vmem:[%s3429_s10 + $0x64] ss:$8 sps:$4 sm:$0xff]   ;;  %v3047_v27 = vld [vmem:[%s3429_s10 + $0x60] ss:$8 sps:$4 sm:$0xff]   ;;  %v3049_v29 = vld [vmem:[%s3429_s10 + $0x74] ss:$8 sps:$4 sm:$0xff]  }
  0x58   : > { %v3045_v26 = vld [vmem:[%s3429_s10 + $0x264] ss:$8 sps:$4 sm:$0xff]   ;;  %v3048_v28 = vld [vmem:[%s3429_s10 + $0x260] ss:$8 sps:$4 sm:$0xff]   ;;  %v3051_v30 = vld [vmem:[%s3429_s10 + $0x274] ss:$8 sps:$4 sm:$0xff]  }
  0x59   : > { %1580 = vmatpush1.bf16.msra.mxu1 %v3023_v11  ;;  %v3053_v31 = vld [vmem:[%s3429_s10 + $0x70] ss:$8 sps:$4 sm:$0xff]   ;;  %v3055_v33 = vld [vmem:[%s3429_s10 + $0x84] ss:$8 sps:$4 sm:$0xff]   ;;  %v3059_v35 = vld [vmem:[%s3429_s10 + $0x80] ss:$8 sps:$4 sm:$0xff]  }
  0x5a   : > { %1806 = vmatpush1.bf16.msra.mxu0 %v3024_v12  ;;  %1581 = vmatprep.subr.bf16.mxu1 %v3025_v13  ;;  %v3054_v32 = vld [vmem:[%s3429_s10 + $0x270] ss:$8 sps:$4 sm:$0xff]   ;;  %v3057_v34 = vld [vmem:[%s3429_s10 + $0x284] ss:$8 sps:$4 sm:$0xff]   ;;  %v3060_v36 = vld [vmem:[%s3429_s10 + $0x280] ss:$8 sps:$4 sm:$0xff]  }
  0x5b   : > { %1807 = vmatprep.subr.bf16.mxu0 %v3027_v14  ;;  %v3061_v37 = vld [vmem:[%s3429_s10 + $0x94] ss:$8 sps:$4 sm:$0xff]   ;;  %v3065_v39 = vld [vmem:[%s3429_s10 + $0x90] ss:$8 sps:$4 sm:$0xff]   ;;  %v3067_v41 = vld [vmem:[%s3429_s10 + $0xa4] ss:$8 sps:$4 sm:$0xff]  }
  0x5c   : > { %v3063_v38 = vld [vmem:[%s3429_s10 + $0x294] ss:$8 sps:$4 sm:$0xff]   ;;  %v3066_v40 = vld [vmem:[%s3429_s10 + $0x290] ss:$8 sps:$4 sm:$0xff]   ;;  %v3069_v42 = vld [vmem:[%s3429_s10 + $0x2a4] ss:$8 sps:$4 sm:$0xff]  }
  0x5d   : > { %1582 = vmatpush1.bf16.msra.mxu1 %v3029_v15  ;;  %v3071_v43 = vld [vmem:[%s3429_s10 + $0xa0] ss:$8 sps:$4 sm:$0xff]   ;;  %v3073_v45 = vld [vmem:[%s3429_s10 + $0xb4] ss:$8 sps:$4 sm:$0xff]   ;;  %v3077_v47 = vld [vmem:[%s3429_s10 + $0xb0] ss:$8 sps:$4 sm:$0xff]  }
  0x5e   : > { %1808 = vmatpush1.bf16.msra.mxu0 %v3030_v16  ;;  %1583 = vmatprep.subr.bf16.mxu1 %v3031_v17  ;;  %v3072_v44 = vld [vmem:[%s3429_s10 + $0x2a0] ss:$8 sps:$4 sm:$0xff]   ;;  %v3075_v46 = vld [vmem:[%s3429_s10 + $0x2b4] ss:$8 sps:$4 sm:$0xff]   ;;  %v3078_v48 = vld [vmem:[%s3429_s10 + $0x2b0] ss:$8 sps:$4 sm:$0xff]  }
  0x5f   : > { %1809 = vmatprep.subr.bf16.mxu0 %v3033_v18  ;;  %v423_v49 = vld [vmem:[%s3431_s11] sm:$0xff]  ;;  %v425_v51 = vld [vmem:[%s3431_s11 + $0x10] sm:$0xff]  ;;  %p2848_p10 = scmp.ne.s32.totalorder %s3270_s18, 1 }
  0x60   : > { %v427_v50 = vld [vmem:[%s3431_s11 + $0x20] sm:$0xff]  ;;  %v429_v52 = vld [vmem:[%s3431_s11 + $0x30] sm:$0xff] }
  0x61   : > { %1584 = vmatpush1.bf16.msra.mxu1 %v3035_v19  ;;  %v3079_v53 = vld [vmem:[%s3429_s10 + $0xc4] ss:$8 sps:$4 sm:$0xff]   ;;  %v2657_v54 = vcombine.high %v423_v49, %v427_v50  ;;  %v2661_v56 = vcombine.high %v425_v51, %v429_v52  ;;  %v3083_v57 = vld [vmem:[%s3429_s10 + $0xc0] ss:$8 sps:$4 sm:$0xff]   ;;  %v3085_v59 = vld [vmem:[%s3429_s10 + $0xd4] ss:$8 sps:$4 sm:$0xff]   ;;  %v2656_v12 = vcombine.low %v423_v49, %v427_v50  ;;  %v2660_v13 = vcombine.low %v425_v51, %v429_v52 }
  0x62   : > { %1810 = vmatpush1.bf16.msra.mxu0 %v3036_v20  ;;  %1585 = vmatprep.subr.bf16.mxu1 %v3037_v21  ;;  %v3081_v55 = vld [vmem:[%s3429_s10 + $0x2c4] ss:$8 sps:$4 sm:$0xff]   ;;  %v3084_v58 = vld [vmem:[%s3429_s10 + $0x2c0] ss:$8 sps:$4 sm:$0xff]   ;;  %v3087_v60 = vld [vmem:[%s3429_s10 + $0x2d4] ss:$8 sps:$4 sm:$0xff]  }
  0x63   : > { %1811 = vmatprep.subr.bf16.mxu0 %v3039_v22  ;;  %1607 = vmatprep.mubr.bf16.mxu1 %v2657_v54  ;;  %v3089_v61 = vld [vmem:[%s3429_s10 + $0xd0] ss:$8 sps:$4 sm:$0xff]   ;;  %v3091_v63 = vld [vmem:[%s3429_s10 + $0xe4] ss:$8 sps:$4 sm:$0xff]   ;;  %v3095_v1 = vld [vmem:[%s3429_s10 + $0xe0] ss:$8 sps:$4 sm:$0xff]  }
  0x64   : > { %1833 = vmatprep.mubr.bf16.mxu0 %v2661_v56  ;;  %v3090_v62 = vld [vmem:[%s3429_s10 + $0x2d0] ss:$8 sps:$4 sm:$0xff]   ;;  %v3093_v0 = vld [vmem:[%s3429_s10 + $0x2e4] ss:$8 sps:$4 sm:$0xff]   ;;  %v3096_v2 = vld [vmem:[%s3429_s10 + $0x2e0] ss:$8 sps:$4 sm:$0xff]  }
  0x65   : > { %1586 = vmatpush1.bf16.msra.mxu1 %v3041_v23  ;;  %v3097_v3 = vld [vmem:[%s3429_s10 + $0xf4] ss:$8 sps:$4 sm:$0xff]   ;;  %v3101_v5 = vld [vmem:[%s3429_s10 + $0xf0] ss:$8 sps:$4 sm:$0xff]   ;;  %v3105_v7 = vld [vmem:[%s3429_s10 + $0x104] ss:$8 sps:$4 sm:$0xff]  }
  0x66   : > { %1812 = vmatpush1.bf16.msra.mxu0 %v3042_v24  ;;  %1587 = vmatprep.subr.bf16.mxu1 %v3043_v25  ;;  %v3099_v4 = vld [vmem:[%s3429_s10 + $0x2f4] ss:$8 sps:$4 sm:$0xff]   ;;  %v3102_v6 = vld [vmem:[%s3429_s10 + $0x2f0] ss:$8 sps:$4 sm:$0xff]   ;;  %v3108_v8 = vld [vmem:[%s3429_s10 + $0x304] ss:$8 sps:$4 sm:$0xff]  }
  0x67   : > { %1813 = vmatprep.subr.bf16.mxu0 %v3045_v26  ;;  %v3103_v9 = vld [vmem:[%s3429_s10 + $0x100] ss:$8 sps:$4 sm:$0xff]   ;;  %v433_v15 = vld [vmem:[%s3431_s11 + $0x50] sm:$0xff]  ;;  %v3117_v23 = vld [vmem:[%s3429_s10 + $0x124] ss:$8 sps:$4 sm:$0xff]  }
  0x68   : > { %v3106_v10 = vld [vmem:[%s3429_s10 + $0x300] ss:$8 sps:$4 sm:$0xff]   ;;  %v437_v16 = vld [vmem:[%s3431_s11 + $0x70] sm:$0xff]  ;;  %v3120_v24 = vld [vmem:[%s3429_s10 + $0x324] ss:$8 sps:$4 sm:$0xff]  }
  0x69   : > { %1588 = vmatpush1.bf16.msra.mxu1 %v3047_v27  ;;  %v431_v11 = vld [vmem:[%s3431_s11 + $0x40] sm:$0xff]  ;;  %v3111_v17 = vld [vmem:[%s3429_s10 + $0x114] ss:$8 sps:$4 sm:$0xff]   ;;  %v2669_v20 = vcombine.high %v433_v15, %v437_v16  ;;  %v3109_v21 = vld [vmem:[%s3429_s10 + $0x110] ss:$8 sps:$4 sm:$0xff]  }
  0x6a   : > { %1814 = vmatpush1.bf16.msra.mxu0 %v3048_v28  ;;  %1589 = vmatprep.subr.bf16.mxu1 %v3049_v29  ;;  %v435_v14 = vld [vmem:[%s3431_s11 + $0x60] sm:$0xff]  ;;  %v3114_v18 = vld [vmem:[%s3429_s10 + $0x314] ss:$8 sps:$4 sm:$0xff]   ;;  %v3112_v22 = vld [vmem:[%s3429_s10 + $0x310] ss:$8 sps:$4 sm:$0xff]  }
  0x6b   : > { %1815 = vmatprep.subr.bf16.mxu0 %v3051_v30  ;;  %v2665_v19 = vcombine.high %v431_v11, %v435_v14  ;;  %v3115_v25 = vld [vmem:[%s3429_s10 + $0x120] ss:$8 sps:$4 sm:$0xff]   ;;  %v2664_v29 = vcombine.low %v431_v11, %v435_v14  ;;  %v2668_v30 = vcombine.low %v433_v15, %v437_v16  ;;  %v3135_v49 = vld [vmem:[%s3429_s10 + $0x154] ss:$8 sps:$4 sm:$0xff]   ;;  %v3136_v54 = vld [vmem:[%s3429_s10 + $0x350] ss:$8 sps:$4 sm:$0xff]  }
  0x6c   : > { %v3118_v26 = vld [vmem:[%s3429_s10 + $0x320] ss:$8 sps:$4 sm:$0xff]   ;;  %v3138_v50 = vld [vmem:[%s3429_s10 + $0x354] ss:$8 sps:$4 sm:$0xff]   ;;  %v3144_v56 = vld [vmem:[%s3429_s10 + $0x364] ss:$8 sps:$4 sm:$0xff]  }
  0x6d   : > { %1590 = vmatpush1.bf16.msra.mxu1 %v3053_v31  ;;  %v439_v27 = vld [vmem:[%s3431_s11 + $0x80] sm:$0xff]  ;;  %v441_v31 = vld [vmem:[%s3431_s11 + $0x90] sm:$0xff] }
  0x6e   : > { %1816 = vmatpush1.bf16.msra.mxu0 %v3054_v32  ;;  %1591 = vmatprep.subr.bf16.mxu1 %v3055_v33  ;;  %v443_v28 = vld [vmem:[%s3431_s11 + $0xa0] sm:$0xff]  ;;  %v445_v32 = vld [vmem:[%s3431_s11 + $0xb0] sm:$0xff] }
  0x6f   : > { %1817 = vmatprep.subr.bf16.mxu0 %v3057_v34  ;;  %v3123_v33 = vld [vmem:[%s3429_s10 + $0x134] ss:$8 sps:$4 sm:$0xff]   ;;  %v3151_v15 = vld [vmem:[%s3429_s10 + $0x180] ss:$8 sps:$4 sm:$0xff]  }
  0x70   : > { %v3126_v34 = vld [vmem:[%s3429_s10 + $0x334] ss:$8 sps:$4 sm:$0xff]   ;;  %v3154_v16 = vld [vmem:[%s3429_s10 + $0x380] ss:$8 sps:$4 sm:$0xff]  }
  0x71   : > { %1592 = vmatpush1.bf16.msra.mxu1 %v3059_v35  ;;  %v2673_v35 = vcombine.high %v439_v27, %v443_v28  ;;  %v469_v14 = vld [vmem:[%s3431_s11 + $0x170] sm:$0xff] }
  0x72   : > { %1818 = vmatpush1.bf16.msra.mxu0 %v3060_v36  ;;  %1593 = vmatprep.subr.bf16.mxu1 %v3061_v37  ;;  %v2677_v36 = vcombine.high %v441_v31, %v445_v32  ;;  %v3121_v37 = vld [vmem:[%s3429_s10 + $0x130] ss:$8 sps:$4 sm:$0xff]  }
  0x73   : > { %1819 = vmatprep.subr.bf16.mxu0 %v3063_v38  ;;  %v3124_v38 = vld [vmem:[%s3429_s10 + $0x330] ss:$8 sps:$4 sm:$0xff]  }
  0x75   : > { %1594 = vmatpush1.bf16.msra.mxu1 %v3065_v39  ;;  %v3129_v39 = vld [vmem:[%s3429_s10 + $0x144] ss:$8 sps:$4 sm:$0xff]  }
  0x76   : > { %1820 = vmatpush1.bf16.msra.mxu0 %v3066_v40  ;;  %1595 = vmatprep.subr.bf16.mxu1 %v3067_v41  ;;  %v3132_v40 = vld [vmem:[%s3429_s10 + $0x344] ss:$8 sps:$4 sm:$0xff]   ;;  %v3127_v41 = vld [vmem:[%s3429_s10 + $0x140] ss:$8 sps:$4 sm:$0xff]  }
  0x77   : > { %1821 = vmatprep.subr.bf16.mxu0 %v3069_v42  ;;  %v3130_v42 = vld [vmem:[%s3429_s10 + $0x340] ss:$8 sps:$4 sm:$0xff]  }
  0x79   : > { %1596 = vmatpush1.bf16.msra.mxu1 %v3071_v43  ;;  %v447_v43 = vld [vmem:[%s3431_s11 + $0xc0] sm:$0xff] }
  0x7a   : > { %1822 = vmatpush1.bf16.msra.mxu0 %v3072_v44  ;;  %1597 = vmatprep.subr.bf16.mxu1 %v3073_v45  ;;  %v451_v44 = vld [vmem:[%s3431_s11 + $0xe0] sm:$0xff]  ;;  %v2672_v45 = vcombine.low %v439_v27, %v443_v28 }
  0x7b   : > { %1823 = vmatprep.subr.bf16.mxu0 %v3075_v46  ;;  %v2676_v46 = vcombine.low %v441_v31, %v445_v32  ;;  %v2681_v51 = vcombine.high %v447_v43, %v451_v44  ;;  %v475_v28 = vld [vmem:[%s3431_s11 + $0x1a0] sm:$0xff] }
  0x7c   : > { %v3163_v31 = vld [vmem:[%s3429_s10 + $0x1a0] ss:$8 sps:$4 sm:$0xff]  }
  0x7d   : > { %1598 = vmatpush1.bf16.msra.mxu1 %v3077_v47  ;;  %v449_v47 = vld [vmem:[%s3431_s11 + $0xd0] sm:$0xff]  ;;  %v3166_v32 = vld [vmem:[%s3429_s10 + $0x3a0] ss:$8 sps:$4 sm:$0xff]  }
  0x7e   : > { %1824 = vmatpush1.bf16.msra.mxu0 %v3078_v48  ;;  %1599 = vmatprep.subr.bf16.mxu1 %v3079_v53  ;;  %v453_v48 = vld [vmem:[%s3431_s11 + $0xf0] sm:$0xff] }
  0x7f   : > { %1825 = vmatprep.subr.bf16.mxu0 %v3081_v55  ;;  %v2685_v52 = vcombine.high %v449_v47, %v453_v48  ;;  %v3133_v53 = vld [vmem:[%s3429_s10 + $0x150] ss:$8 sps:$4 sm:$0xff]   ;;  %v3141_v55 = vld [vmem:[%s3429_s10 + $0x164] ss:$8 sps:$4 sm:$0xff]  }
  0x81   : > { %1600 = vmatpush1.bf16.msra.mxu1 %v3083_v57  ;;  %v3139_v57 = vld [vmem:[%s3429_s10 + $0x160] ss:$8 sps:$4 sm:$0xff]  }
  0x82   : > { %1826 = vmatpush1.bf16.msra.mxu0 %v3084_v58  ;;  %1601 = vmatprep.subr.bf16.mxu1 %v3085_v59  ;;  %v455_v58 = vld [vmem:[%s3431_s11 + $0x100] sm:$0xff] }
  0x83   : > { %1827 = vmatprep.subr.bf16.mxu0 %v3087_v60  ;;  %v459_v59 = vld [vmem:[%s3431_s11 + $0x120] sm:$0xff]  ;;  %v2680_v60 = vcombine.low %v447_v43, %v451_v44 }
  0x84   : > { %v2688_v11 = vcombine.low %v455_v58, %v459_v59  ;;  %v483_v44 = vld [vmem:[%s3431_s11 + $0x1e0] sm:$0xff] }
  0x85   : > { %1602 = vmatpush1.bf16.msra.mxu1 %v3089_v61  ;;  %v2684_v61 = vcombine.low %v449_v47, %v453_v48  ;;  %v3175_v47 = vld [vmem:[%s3429_s10 + $0x1c0] ss:$8 sps:$4 sm:$0xff]  }
  0x86   : > { %1828 = vmatpush1.bf16.msra.mxu0 %v3090_v62  ;;  %1603 = vmatprep.subr.bf16.mxu1 %v3091_v63  ;;  %v457_v62 = vld [vmem:[%s3431_s11 + $0x110] sm:$0xff]  ;;  %v3178_v48 = vld [vmem:[%s3429_s10 + $0x3c0] ss:$8 sps:$4 sm:$0xff]  }
  0x87   : > { %1829 = vmatprep.subr.bf16.mxu0 %v3093_v0  ;;  %v461_v63 = vld [vmem:[%s3431_s11 + $0x130] sm:$0xff]  ;;  %v3142_v0 = vld [vmem:[%s3429_s10 + $0x360] ss:$8 sps:$4 sm:$0xff]  }
  0x89   : > { %1604 = vmatpush1.bf16.msra.mxu1 %v3095_v1  ;;  %v3147_v1 = vld [vmem:[%s3429_s10 + $0x174] ss:$8 sps:$4 sm:$0xff]  }
  0x8a   : > { %1830 = vmatpush1.bf16.msra.mxu0 %v3096_v2  ;;  %1605 = vmatprep.subr.bf16.mxu1 %v3097_v3  ;;  %v3150_v2 = vld [vmem:[%s3429_s10 + $0x374] ss:$8 sps:$4 sm:$0xff]   ;;  %v2689_v3 = vcombine.high %v455_v58, %v459_v59 }
  0x8b   : > { %1831 = vmatprep.subr.bf16.mxu0 %v3099_v4  ;;  %v2693_v4 = vcombine.high %v457_v62, %v461_v63 }
  0x8d   : > { %1606 = vmatpush1.bf16.msra.mxu1 %v3101_v5  ;;  %v3145_v5 = vld [vmem:[%s3429_s10 + $0x170] ss:$8 sps:$4 sm:$0xff]  }
  0x8e   : > { %1832 = vmatpush1.bf16.msra.mxu0 %v3102_v6  ;;  %1688 = vmatprep.subr.bf16.mxu1 %v3105_v7  ;;  %v3148_v6 = vld [vmem:[%s3429_s10 + $0x370] ss:$8 sps:$4 sm:$0xff]   ;;  %v3153_v7 = vld [vmem:[%s3429_s10 + $0x184] ss:$8 sps:$4 sm:$0xff]  }
  0x8f   : > { %1914 = vmatprep.subr.bf16.mxu0 %v3108_v8  ;;  %v3156_v8 = vld [vmem:[%s3429_s10 + $0x384] ss:$8 sps:$4 sm:$0xff]  }
  0x90   : > { %1608 = vmatmul.mubr.bf16.vlgmr.msra.gmra.mrb[0].mxu1 %v2656_v12  ;;  %v2692_v12 = vcombine.low %v457_v62, %v461_v63  ;;  %v430_v62 = vld [vmem:[%s3431_s11 + $0x38] sm:$0xff]  ;;  %v3187_v63 = vld [vmem:[%s3429_s10 + $0x1e0] ss:$8 sps:$4 sm:$0xff]  }
  0x91   : > { %1834 = vmatmul.mubr.bf16.vlgmr.msra.gmra.mrb[0].mxu0 %v2660_v13  ;;  %1689 = vmatpush1.bf16.msra.mxu1 %v3103_v9  ;;  %v463_v9 = vld [vmem:[%s3431_s11 + $0x140] sm:$0xff]  ;;  %v465_v13 = vld [vmem:[%s3431_s11 + $0x150] sm:$0xff] }
  0x92   : > { %1915 = vmatpush1.bf16.msra.mxu0 %v3106_v10  ;;  %1690 = vmatprep.subr.bf16.mxu1 %v3111_v17  ;;  %v467_v10 = vld [vmem:[%s3431_s11 + $0x160] sm:$0xff]  ;;  %v3159_v17 = vld [vmem:[%s3429_s10 + $0x194] ss:$8 sps:$4 sm:$0xff]   ;;  %v2700_v27 = vcombine.low %v465_v13, %v469_v14 }
  0x93   : > { %1916 = vmatprep.subr.bf16.mxu0 %v3114_v18  ;;  %1617 = vmatprep.mubr.bf16.mxu1 %v2665_v19  ;;  %v3162_v18 = vld [vmem:[%s3429_s10 + $0x394] ss:$8 sps:$4 sm:$0xff]   ;;  %v2697_v19 = vcombine.high %v463_v9, %v467_v10 }
  0x94   : > { %1843 = vmatprep.mubr.bf16.mxu0 %v2669_v20  ;;  %v2701_v20 = vcombine.high %v465_v13, %v469_v14 }
  0x95   : > { %1691 = vmatpush1.bf16.msra.mxu1 %v3109_v21  ;;  %v3157_v21 = vld [vmem:[%s3429_s10 + $0x190] ss:$8 sps:$4 sm:$0xff]  }
  0x96   : > { %1917 = vmatpush1.bf16.msra.mxu0 %v3112_v22  ;;  %1692 = vmatprep.subr.bf16.mxu1 %v3117_v23  ;;  %v3160_v22 = vld [vmem:[%s3429_s10 + $0x390] ss:$8 sps:$4 sm:$0xff]   ;;  %v3165_v23 = vld [vmem:[%s3429_s10 + $0x1a4] ss:$8 sps:$4 sm:$0xff]  }
  0x97   : > { %1918 = vmatprep.subr.bf16.mxu0 %v3120_v24  ;;  %v3168_v24 = vld [vmem:[%s3429_s10 + $0x3a4] ss:$8 sps:$4 sm:$0xff]  }
  0x98   : > { %1618 = vmatmul.mubr.bf16.gmra.mrb[4].mxu1 %v2664_v29  ;;  %v473_v29 = vld [vmem:[%s3431_s11 + $0x190] sm:$0xff] }
  0x99   : > { %1844 = vmatmul.mubr.bf16.gmra.mrb[4].mxu0 %v2668_v30  ;;  %1693 = vmatpush1.bf16.msra.mxu1 %v3115_v25  ;;  %v471_v25 = vld [vmem:[%s3431_s11 + $0x180] sm:$0xff]  ;;  %v477_v30 = vld [vmem:[%s3431_s11 + $0x1b0] sm:$0xff] }
  0x9a   : > { %1919 = vmatpush1.bf16.msra.mxu0 %v3118_v26  ;;  %1694 = vmatprep.subr.bf16.mxu1 %v3123_v33  ;;  %v2696_v26 = vcombine.low %v463_v9, %v467_v10  ;;  %v3171_v33 = vld [vmem:[%s3429_s10 + $0x1b4] ss:$8 sps:$4 sm:$0xff]   ;;  %v2708_v43 = vcombine.low %v473_v29, %v477_v30 }
  0x9b   : > { %1920 = vmatprep.subr.bf16.mxu0 %v3126_v34  ;;  %1627 = vmatprep.mubr.bf16.mxu1 %v2673_v35  ;;  %v3174_v34 = vld [vmem:[%s3429_s10 + $0x3b4] ss:$8 sps:$4 sm:$0xff]   ;;  %v2705_v35 = vcombine.high %v471_v25, %v475_v28 }
  0x9c   : > { %1853 = vmatprep.mubr.bf16.mxu0 %v2677_v36  ;;  %v2709_v36 = vcombine.high %v473_v29, %v477_v30  ;;  %v434_v9 = vld [vmem:[%s3431_s11 + $0x58] sm:$0xff] }
  0x9d   : > { %1695 = vmatpush1.bf16.msra.mxu1 %v3121_v37  ;;  %v3169_v37 = vld [vmem:[%s3429_s10 + $0x1b0] ss:$8 sps:$4 sm:$0xff]  }
  0x9e   : > { %1921 = vmatpush1.bf16.msra.mxu0 %v3124_v38  ;;  %1696 = vmatprep.subr.bf16.mxu1 %v3129_v39  ;;  %v3172_v38 = vld [vmem:[%s3429_s10 + $0x3b0] ss:$8 sps:$4 sm:$0xff]   ;;  %v3177_v39 = vld [vmem:[%s3429_s10 + $0x1c4] ss:$8 sps:$4 sm:$0xff]  }
  0x9f   : > { %1922 = vmatprep.subr.bf16.mxu0 %v3132_v40  ;;  %v3180_v40 = vld [vmem:[%s3429_s10 + $0x3c4] ss:$8 sps:$4 sm:$0xff]   ;;  %v438_v10 = vld [vmem:[%s3431_s11 + $0x78] sm:$0xff] }
  0xa0   : > { %1628 = vmatmul.mubr.bf16.gmra.mrb[8].mxu1 %v2672_v45  ;;  %v481_v45 = vld [vmem:[%s3431_s11 + $0x1d0] sm:$0xff]  ;;  %v2671_v14 = vcombine.high %v434_v9, %v438_v10 }
  0xa1   : > { %1854 = vmatmul.mubr.bf16.gmra.mrb[8].mxu0 %v2676_v46  ;;  %1697 = vmatpush1.bf16.msra.mxu1 %v3127_v41  ;;  %v479_v41 = vld [vmem:[%s3431_s11 + $0x1c0] sm:$0xff]  ;;  %v485_v46 = vld [vmem:[%s3431_s11 + $0x1f0] sm:$0xff] }
  0xa2   : > { %1923 = vmatpush1.bf16.msra.mxu0 %v3130_v42  ;;  %1698 = vmatprep.subr.bf16.mxu1 %v3135_v49  ;;  %v2704_v42 = vcombine.low %v471_v25, %v475_v28  ;;  %v3183_v49 = vld [vmem:[%s3429_s10 + $0x1d4] ss:$8 sps:$4 sm:$0xff]   ;;  %v2712_v58 = vcombine.low %v479_v41, %v483_v44  ;;  %v2716_v59 = vcombine.low %v481_v45, %v485_v46 }
  0xa3   : > { %1924 = vmatprep.subr.bf16.mxu0 %v3138_v50  ;;  %1637 = vmatprep.mubr.bf16.mxu1 %v2681_v51  ;;  %v3186_v50 = vld [vmem:[%s3429_s10 + $0x3d4] ss:$8 sps:$4 sm:$0xff]   ;;  %v2713_v51 = vcombine.high %v479_v41, %v483_v44 }
  0xa4   : > { %1863 = vmatprep.mubr.bf16.mxu0 %v2685_v52  ;;  %v2717_v52 = vcombine.high %v481_v45, %v485_v46  ;;  %v450_v25 = vld [vmem:[%s3431_s11 + $0xd8] sm:$0xff] }
  0xa5   : > { %1699 = vmatpush1.bf16.msra.mxu1 %v3133_v53  ;;  %v3181_v53 = vld [vmem:[%s3429_s10 + $0x1d0] ss:$8 sps:$4 sm:$0xff]  }
  0xa6   : > { %1925 = vmatpush1.bf16.msra.mxu0 %v3136_v54  ;;  %1700 = vmatprep.subr.bf16.mxu1 %v3141_v55  ;;  %v3184_v54 = vld [vmem:[%s3429_s10 + $0x3d0] ss:$8 sps:$4 sm:$0xff]   ;;  %v3189_v55 = vld [vmem:[%s3429_s10 + $0x1e4] ss:$8 sps:$4 sm:$0xff]  }
  0xa7   : > { %1926 = vmatprep.subr.bf16.mxu0 %v3144_v56  ;;  %v3192_v56 = vld [vmem:[%s3429_s10 + $0x3e4] ss:$8 sps:$4 sm:$0xff]   ;;  %v466_v41 = vld [vmem:[%s3431_s11 + $0x158] sm:$0xff] }
  0xa8   : > { %1638 = vmatmul.mubr.bf16.gmra.mrb[12].mxu1 %v2680_v60  ;;  %v428_v60 = vld [vmem:[%s3431_s11 + $0x28] sm:$0xff] }
  0xa9   : > { %1864 = vmatmul.mubr.bf16.gmra.mrb[12].mxu0 %v2684_v61  ;;  %1701 = vmatpush1.bf16.msra.mxu1 %v3139_v57  ;;  %v424_v57 = vld [vmem:[%s3431_s11 + $0x8] sm:$0xff]  ;;  %v426_v61 = vld [vmem:[%s3431_s11 + $0x18] sm:$0xff] }
  0xaa   : > { %1927 = vmatpush1.bf16.msra.mxu0 %v3142_v0  ;;  %1702 = vmatprep.subr.bf16.mxu1 %v3147_v1  ;;  %v3190_v0 = vld [vmem:[%s3429_s10 + $0x3e0] ss:$8 sps:$4 sm:$0xff]   ;;  %v3195_v1 = vld [vmem:[%s3429_s10 + $0x1f4] ss:$8 sps:$4 sm:$0xff]  }
  0xab   : > { %1928 = vmatprep.subr.bf16.mxu0 %v3150_v2  ;;  %1647 = vmatprep.mubr.bf16.mxu1 %v2689_v3  ;;  %v3198_v2 = vld [vmem:[%s3429_s10 + $0x3f4] ss:$8 sps:$4 sm:$0xff]   ;;  %v2659_v3 = vcombine.high %v424_v57, %v428_v60 }
  0xac   : > { %1873 = vmatprep.mubr.bf16.mxu0 %v2693_v4  ;;  %v2663_v4 = vcombine.high %v426_v61, %v430_v62 }
  0xad   : > { %1703 = vmatpush1.bf16.msra.mxu1 %v3145_v5  ;;  %v3193_v5 = vld [vmem:[%s3429_s10 + $0x1f0] ss:$8 sps:$4 sm:$0xff]  }
  0xae   : > { %1929 = vmatpush1.bf16.msra.mxu0 %v3148_v6  ;;  %1704 = vmatprep.subr.bf16.mxu1 %v3153_v7  ;;  %v3196_v6 = vld [vmem:[%s3429_s10 + $0x3f0] ss:$8 sps:$4 sm:$0xff]   ;;  %v432_v7 = vld [vmem:[%s3431_s11 + $0x48] sm:$0xff] }
  0xaf   : > { %1930 = vmatprep.subr.bf16.mxu0 %v3156_v8  ;;  %v436_v8 = vld [vmem:[%s3431_s11 + $0x68] sm:$0xff] }
  0xb0   : > { %1648 = vmatmul.mubr.bf16.gmra.mrb[16].mxu1 %v2688_v11  ;;  %v2658_v11 = vcombine.low %v424_v57, %v428_v60  ;;  %v2667_v13 = vcombine.high %v432_v7, %v436_v8  ;;  %v482_v57 = vld [vmem:[%s3431_s11 + $0x1d8] sm:$0xff] }
  0xb1   : > { %1874 = vmatmul.mubr.bf16.gmra.mrb[16].mxu0 %v2692_v12  ;;  %1705 = vmatpush1.bf16.msra.mxu1 %v3151_v15  ;;  %v2662_v12 = vcombine.low %v426_v61, %v430_v62  ;;  %v440_v15 = vld [vmem:[%s3431_s11 + $0x88] sm:$0xff] }
  0xb2   : > { %1931 = vmatpush1.bf16.msra.mxu0 %v3154_v16  ;;  %1706 = vmatprep.subr.bf16.mxu1 %v3159_v17  ;;  %v444_v16 = vld [vmem:[%s3431_s11 + $0xa8] sm:$0xff]  ;;  %v442_v17 = vld [vmem:[%s3431_s11 + $0x98] sm:$0xff] }
  0xb3   : > { %1932 = vmatprep.subr.bf16.mxu0 %v3162_v18  ;;  %1657 = vmatprep.mubr.bf16.mxu1 %v2697_v19  ;;  %v446_v18 = vld [vmem:[%s3431_s11 + $0xb8] sm:$0xff]  ;;  %v2666_v19 = vcombine.low %v432_v7, %v436_v8 }
  0xb4   : > { %1883 = vmatprep.mubr.bf16.mxu0 %v2701_v20  ;;  %v2670_v20 = vcombine.low %v434_v9, %v438_v10  ;;  %v2678_v28 = vcombine.low %v442_v17, %v446_v18  ;;  %v393_v10 = vld [vmem:[#allocation2 + $0x10] sm:$0xff] }
  0xb5   : > { %1707 = vmatpush1.bf16.msra.mxu1 %v3157_v21  ;;  %v2675_v21 = vcombine.high %v440_v15, %v444_v16 }
  0xb6   : > { %1933 = vmatpush1.bf16.msra.mxu0 %v3160_v22  ;;  %1708 = vmatprep.subr.bf16.mxu1 %v3165_v23  ;;  %v2679_v22 = vcombine.high %v442_v17, %v446_v18  ;;  %v448_v23 = vld [vmem:[%s3431_s11 + $0xc8] sm:$0xff] }
  0xb7   : > { %1934 = vmatprep.subr.bf16.mxu0 %v3168_v24  ;;  %v452_v24 = vld [vmem:[%s3431_s11 + $0xe8] sm:$0xff] }
  0xb8   : > { %1658 = vmatmul.mubr.bf16.gmra.mrb[20].mxu1 %v2696_v26  ;;  %v454_v26 = vld [vmem:[%s3431_s11 + $0xf8] sm:$0xff]  ;;  %v2683_v29 = vcombine.high %v448_v23, %v452_v24 }
  0xb9   : > { %1884 = vmatmul.mubr.bf16.gmra.mrb[20].mxu0 %v2700_v27  ;;  %1709 = vmatpush1.bf16.msra.mxu1 %v3163_v31  ;;  %v2674_v27 = vcombine.low %v440_v15, %v444_v16  ;;  %v2687_v30 = vcombine.high %v450_v25, %v454_v26  ;;  %v456_v31 = vld [vmem:[%s3431_s11 + $0x108] sm:$0xff]  ;;  %v394_v15 = vld [vmem:[#allocation2 + $0x18] sm:$0xff] }
  0xba   : > { %1935 = vmatpush1.bf16.msra.mxu0 %v3166_v32  ;;  %1710 = vmatprep.subr.bf16.mxu1 %v3171_v33  ;;  %v460_v32 = vld [vmem:[%s3431_s11 + $0x128] sm:$0xff]  ;;  %v458_v33 = vld [vmem:[%s3431_s11 + $0x118] sm:$0xff] }
  0xbb   : > { %1936 = vmatprep.subr.bf16.mxu0 %v3174_v34  ;;  %1667 = vmatprep.mubr.bf16.mxu1 %v2705_v35  ;;  %v462_v34 = vld [vmem:[%s3431_s11 + $0x138] sm:$0xff]  ;;  %v2682_v35 = vcombine.low %v448_v23, %v452_v24 }
  0xbc   : > { %1893 = vmatprep.mubr.bf16.mxu0 %v2709_v36  ;;  %v2686_v36 = vcombine.low %v450_v25, %v454_v26  ;;  %v2694_v44 = vcombine.low %v458_v33, %v462_v34  ;;  %v396_v26 = vld [vmem:[#allocation2 + $0x28] sm:$0xff] }
  0xbd   : > { %1711 = vmatpush1.bf16.msra.mxu1 %v3169_v37  ;;  %v2691_v37 = vcombine.high %v456_v31, %v460_v32 }
  0xbe   : > { %1937 = vmatpush1.bf16.msra.mxu0 %v3172_v38  ;;  %1712 = vmatprep.subr.bf16.mxu1 %v3177_v39  ;;  %v2695_v38 = vcombine.high %v458_v33, %v462_v34  ;;  %v464_v39 = vld [vmem:[%s3431_s11 + $0x148] sm:$0xff] }
  0xbf   : > { %1938 = vmatprep.subr.bf16.mxu0 %v3180_v40  ;;  %v468_v40 = vld [vmem:[%s3431_s11 + $0x168] sm:$0xff] }
  0xc0   : > { %1668 = vmatmul.mubr.bf16.gmra.mrb[24].mxu1 %v2704_v42  ;;  %v470_v42 = vld [vmem:[%s3431_s11 + $0x178] sm:$0xff]  ;;  %v2699_v45 = vcombine.high %v464_v39, %v468_v40 }
  0xc1   : > { %1894 = vmatmul.mubr.bf16.gmra.mrb[24].mxu0 %v2708_v43  ;;  %1713 = vmatpush1.bf16.msra.mxu1 %v3175_v47  ;;  %v2690_v43 = vcombine.low %v456_v31, %v460_v32  ;;  %v2703_v46 = vcombine.high %v466_v41, %v470_v42  ;;  %v472_v47 = vld [vmem:[%s3431_s11 + $0x188] sm:$0xff] }
  0xc2   : > { %1939 = vmatpush1.bf16.msra.mxu0 %v3178_v48  ;;  %1714 = vmatprep.subr.bf16.mxu1 %v3183_v49  ;;  %v476_v48 = vld [vmem:[%s3431_s11 + $0x1a8] sm:$0xff]  ;;  %v474_v49 = vld [vmem:[%s3431_s11 + $0x198] sm:$0xff] }
  0xc3   : > { %1940 = vmatprep.subr.bf16.mxu0 %v3186_v50  ;;  %1677 = vmatprep.mubr.bf16.mxu1 %v2713_v51  ;;  %v478_v50 = vld [vmem:[%s3431_s11 + $0x1b8] sm:$0xff]  ;;  %v2698_v51 = vcombine.low %v464_v39, %v468_v40 }
  0xc4   : > { %1903 = vmatprep.mubr.bf16.mxu0 %v2717_v52  ;;  %v2702_v52 = vcombine.low %v466_v41, %v470_v42  ;;  %v2710_v60 = vcombine.low %v474_v49, %v478_v50  ;;  %v399_v42 = vld [vmem:[#allocation2 + $0x40] sm:$0xff] }
  0xc5   : > { %1715 = vmatpush1.bf16.msra.mxu1 %v3181_v53  ;;  %v2707_v53 = vcombine.high %v472_v47, %v476_v48 }
  0xc6   : > { %1941 = vmatpush1.bf16.msra.mxu0 %v3184_v54  ;;  %1716 = vmatprep.subr.bf16.mxu1 %v3189_v55  ;;  %v2711_v54 = vcombine.high %v474_v49, %v478_v50  ;;  %v480_v55 = vld [vmem:[%s3431_s11 + $0x1c8] sm:$0xff]  ;;  %v401_v50 = vld [vmem:[#allocation2 + $0x50] sm:$0xff] }
  0xc7   : > { %1942 = vmatprep.subr.bf16.mxu0 %v3192_v56  ;;  %v484_v56 = vld [vmem:[%s3431_s11 + $0x1e8] sm:$0xff] }
  0xc8   : > { %1678 = vmatmul.mubr.bf16.gmra.mrb[28].mxu1 %v2712_v58  ;;  %v486_v58 = vld [vmem:[%s3431_s11 + $0x1f8] sm:$0xff]  ;;  %v2715_v61 = vcombine.high %v480_v55, %v484_v56 }
  0xc9   : > { %1904 = vmatmul.mubr.bf16.gmra.mrb[28].mxu0 %v2716_v59  ;;  %1717 = vmatpush1.bf16.msra.mxu1 %v3187_v63  ;;  %v2706_v59 = vcombine.low %v472_v47, %v476_v48  ;;  %v2719_v62 = vcombine.high %v482_v57, %v486_v58  ;;  %v2714_v63 = vcombine.low %v480_v55, %v484_v56  ;;  %v402_v55 = vld [vmem:[#allocation2 + $0x58] sm:$0xff] }
  0xca   : > { %1943 = vmatpush1.bf16.msra.mxu0 %v3190_v0  ;;  %1718 = vmatprep.subr.bf16.mxu1 %v3195_v1  ;;  %v2718_v0 = vcombine.low %v482_v57, %v486_v58 }
  0xcb   : > { %1944 = vmatprep.subr.bf16.mxu0 %v3198_v2  ;;  %1720 = vmatprep.mubr.bf16.mxu1 %v2659_v3  ;;  %v391_v2 = vld [vmem:[#allocation2] sm:$0xff] }
  0xcc   : > { %1946 = vmatprep.mubr.bf16.mxu0 %v2663_v4 }
  0xcd   : > { %1719 = vmatpush1.bf16.msra.mxu1 %v3193_v5 }
  0xce   : > { %1945 = vmatpush1.bf16.msra.mxu0 %v3196_v6  ;;  %v392_v6 = vld [vmem:[#allocation2 + $0x8] sm:$0xff] }
  0xd0   : > { %1721 = vmatmul.mubr.bf16.vlgmr.msra.gmra.mrb[0].mxu1 %v2658_v11 }
  0xd1   : > { %1947 = vmatmul.mubr.bf16.vlgmr.msra.gmra.mrb[0].mxu0 %v2662_v12  ;;  %1730 = vmatprep.mubr.bf16.mxu1 %v2667_v13 }
  0xd2   : > { %1956 = vmatprep.mubr.bf16.mxu0 %v2671_v14 }
  0xd8   : > { %1731 = vmatmul.mubr.bf16.gmra.mrb[4].mxu1 %v2666_v19 }
  0xd9   : > { %1957 = vmatmul.mubr.bf16.gmra.mrb[4].mxu0 %v2670_v20  ;;  %1740 = vmatprep.mubr.bf16.mxu1 %v2675_v21 }
  0xda   : > { %1966 = vmatprep.mubr.bf16.mxu0 %v2679_v22  ;;  %v395_v22 = vld [vmem:[#allocation2 + $0x20] sm:$0xff] }
  0xe0   : > { %1741 = vmatmul.mubr.bf16.gmra.mrb[8].mxu1 %v2674_v27 }
  0xe1   : > { %1967 = vmatmul.mubr.bf16.gmra.mrb[8].mxu0 %v2678_v28  ;;  %1750 = vmatprep.mubr.bf16.mxu1 %v2683_v29 }
  0xe2   : > { %1976 = vmatprep.mubr.bf16.mxu0 %v2687_v30  ;;  %v397_v30 = vld [vmem:[#allocation2 + $0x30] sm:$0xff] }
  0xe8   : > { %1751 = vmatmul.mubr.bf16.gmra.mrb[12].mxu1 %v2682_v35  ;;  %v398_v35 = vld [vmem:[#allocation2 + $0x38] sm:$0xff] }
  0xe9   : > { %1977 = vmatmul.mubr.bf16.gmra.mrb[12].mxu0 %v2686_v36  ;;  %1760 = vmatprep.mubr.bf16.mxu1 %v2691_v37 }
  0xea   : > { %1986 = vmatprep.mubr.bf16.mxu0 %v2695_v38 }
  0xf0   : > { %1761 = vmatmul.mubr.bf16.gmra.mrb[16].mxu1 %v2690_v43 }
  0xf1   : > { %1987 = vmatmul.mubr.bf16.gmra.mrb[16].mxu0 %v2694_v44  ;;  %1770 = vmatprep.mubr.bf16.mxu1 %v2699_v45 }
  0xf2   : > { %1996 = vmatprep.mubr.bf16.mxu0 %v2703_v46  ;;  %v400_v46 = vld [vmem:[#allocation2 + $0x48] sm:$0xff] }
  0xf8   : > { %1771 = vmatmul.mubr.bf16.gmra.mrb[20].mxu1 %v2698_v51 }
  0xf9   : > { %1997 = vmatmul.mubr.bf16.gmra.mrb[20].mxu0 %v2702_v52  ;;  %1780 = vmatprep.mubr.bf16.mxu1 %v2707_v53 }
  0xfa   : > { %2006 = vmatprep.mubr.bf16.mxu0 %v2711_v54 }
 0x100   : > { %1781 = vmatmul.mubr.bf16.gmra.mrb[24].mxu1 %v2706_v59 }
 0x101   : > { %2007 = vmatmul.mubr.bf16.gmra.mrb[24].mxu0 %v2710_v60  ;;  %1790 = vmatprep.mubr.bf16.mxu1 %v2715_v61 }
 0x102   : > { %2016 = vmatprep.mubr.bf16.mxu0 %v2719_v62  ;;  %v403_v62 = vld [vmem:[#allocation2 + $0x60] sm:$0xff] }
 0x108   : > { %1791 = vmatmul.mubr.bf16.gmra.mrb[28].mxu1 %v2714_v63 }
 0x109   : > { %2017 = vmatmul.mubr.bf16.gmra.mrb[28].mxu0 %v2718_v0 }
 0x1a3   : > { %v1722_v1 = vpop.f32.mrb[0].mxu1 }
 0x1a4   : > { %v1948_v3 = vpop.f32.mrb[0].mxu0  ;;  %v1724_v5 = vpop.f32.mrb[1].mxu1 }
 0x1a5   : > { %v2885_v4 = vadd.f32 %v1948_v3, %v1722_v1  ;;  %v1950_v7 = vpop.f32.mrb[1].mxu0  ;;  %v1726_v9 = vpop.f32.mrb[2].mxu1 }
 0x1a6   : > { %v2886_v8 = vadd.f32 %v1950_v7, %v1724_v5  ;;  %v1952_v11 = vpop.f32.mrb[2].mxu0  ;;  %v1728_v14 = vpop.f32.mrb[3].mxu1 }
 0x1a7   : > { %v2027_v12 = vadd.f32 %v2885_v4, %v391_v2  ;;  %v2887_v13 = vadd.f32 %v1952_v11, %v1726_v9  ;;  %v1954_v16 = vpop.f32.mrb[3].mxu0  ;;  %v404_v2 = vld [vmem:[#allocation2 + $0x68] sm:$0xff]  ;;  %v406_v11 = vld [vmem:[#allocation2 + $0x78] sm:$0xff] }
 0x1a8   : > { %v2028_v17 = vadd.f32 %v2886_v8, %v392_v6  ;;  %v2888_v18 = vadd.f32 %v1954_v16, %v1728_v14  ;;  %v405_v6 = vld [vmem:[#allocation2 + $0x70] sm:$0xff] }
 0x1a9   : > { %2059 = vst [vmem:[#allocation2] sm:$0xff] %v2027_v12  ;;  %v2029_v19 = vadd.f32 %v2887_v13, %v393_v10 }
 0x1aa   : > { %2060 = vst [vmem:[#allocation2 + $0x8] sm:$0xff] %v2028_v17  ;;  %v2030_v20 = vadd.f32 %v2888_v18, %v394_v15  ;;  %v407_v18 = vld [vmem:[#allocation2 + $0x80] sm:$0xff] }
 0x1ab   : > { %2061 = vst [vmem:[#allocation2 + $0x10] sm:$0xff] %v2029_v19  ;;  %v1732_v21 = vpop.f32.mrb[4].mxu1 }
 0x1ac   : > { %2062 = vst [vmem:[#allocation2 + $0x18] sm:$0xff] %v2030_v20  ;;  %v1958_v23 = vpop.f32.mrb[4].mxu0  ;;  %v1734_v25 = vpop.f32.mrb[5].mxu1 }
 0x1ad   : > { %v2889_v24 = vadd.f32 %v1958_v23, %v1732_v21  ;;  %v1960_v27 = vpop.f32.mrb[5].mxu0  ;;  %v1736_v29 = vpop.f32.mrb[6].mxu1 }
 0x1ae   : > { %v2890_v28 = vadd.f32 %v1960_v27, %v1734_v25  ;;  %v1962_v31 = vpop.f32.mrb[6].mxu0  ;;  %v1738_v34 = vpop.f32.mrb[7].mxu1 }
 0x1af   : > { %v2031_v32 = vadd.f32 %v2889_v24, %v395_v22  ;;  %v2891_v33 = vadd.f32 %v1962_v31, %v1736_v29  ;;  %v1964_v36 = vpop.f32.mrb[7].mxu0  ;;  %v408_v22 = vld [vmem:[#allocation2 + $0x88] sm:$0xff]  ;;  %v410_v31 = vld [vmem:[#allocation2 + $0x98] sm:$0xff] }
 0x1b0   : > { %v2032_v37 = vadd.f32 %v2890_v28, %v396_v26  ;;  %v2892_v38 = vadd.f32 %v1964_v36, %v1738_v34  ;;  %v409_v26 = vld [vmem:[#allocation2 + $0x90] sm:$0xff] }
 0x1b1   : > { %2063 = vst [vmem:[#allocation2 + $0x20] sm:$0xff] %v2031_v32  ;;  %v2033_v39 = vadd.f32 %v2891_v33, %v397_v30 }
 0x1b2   : > { %2064 = vst [vmem:[#allocation2 + $0x28] sm:$0xff] %v2032_v37  ;;  %v2034_v40 = vadd.f32 %v2892_v38, %v398_v35  ;;  %v411_v38 = vld [vmem:[#allocation2 + $0xa0] sm:$0xff] }
 0x1b3   : > { %2065 = vst [vmem:[#allocation2 + $0x30] sm:$0xff] %v2033_v39  ;;  %v1742_v41 = vpop.f32.mrb[8].mxu1 }
 0x1b4   : > { %2066 = vst [vmem:[#allocation2 + $0x38] sm:$0xff] %v2034_v40  ;;  %v1968_v43 = vpop.f32.mrb[8].mxu0  ;;  %v1744_v45 = vpop.f32.mrb[9].mxu1 }
 0x1b5   : > { %v2893_v44 = vadd.f32 %v1968_v43, %v1742_v41  ;;  %v1970_v47 = vpop.f32.mrb[9].mxu0  ;;  %v1746_v49 = vpop.f32.mrb[10].mxu1 }
 0x1b6   : > { %v2894_v48 = vadd.f32 %v1970_v47, %v1744_v45  ;;  %v1972_v51 = vpop.f32.mrb[10].mxu0  ;;  %v1748_v54 = vpop.f32.mrb[11].mxu1 }
 0x1b7   : > { %v2035_v52 = vadd.f32 %v2893_v44, %v399_v42  ;;  %v2895_v53 = vadd.f32 %v1972_v51, %v1746_v49  ;;  %v1974_v56 = vpop.f32.mrb[11].mxu0  ;;  %v412_v42 = vld [vmem:[#allocation2 + $0xa8] sm:$0xff]  ;;  %v414_v51 = vld [vmem:[#allocation2 + $0xb8] sm:$0xff] }
 0x1b8   : > { %v2036_v57 = vadd.f32 %v2894_v48, %v400_v46  ;;  %v2896_v58 = vadd.f32 %v1974_v56, %v1748_v54  ;;  %v413_v46 = vld [vmem:[#allocation2 + $0xb0] sm:$0xff] }
 0x1b9   : > { %2067 = vst [vmem:[#allocation2 + $0x40] sm:$0xff] %v2035_v52  ;;  %v2037_v59 = vadd.f32 %v2895_v53, %v401_v50 }
 0x1ba   : > { %2068 = vst [vmem:[#allocation2 + $0x48] sm:$0xff] %v2036_v57  ;;  %v2038_v60 = vadd.f32 %v2896_v58, %v402_v55  ;;  %v415_v58 = vld [vmem:[#allocation2 + $0xc0] sm:$0xff] }
 0x1bb   : > { %2069 = vst [vmem:[#allocation2 + $0x50] sm:$0xff] %v2037_v59  ;;  %v1752_v61 = vpop.f32.mrb[12].mxu1 }
 0x1bc   : > { %2070 = vst [vmem:[#allocation2 + $0x58] sm:$0xff] %v2038_v60  ;;  %v1978_v63 = vpop.f32.mrb[12].mxu0  ;;  %v1754_v1 = vpop.f32.mrb[13].mxu1 }
 0x1bd   : > { %v2897_v0 = vadd.f32 %v1978_v63, %v1752_v61  ;;  %v1980_v3 = vpop.f32.mrb[13].mxu0  ;;  %v1756_v5 = vpop.f32.mrb[14].mxu1 }
 0x1be   : > { %v2898_v4 = vadd.f32 %v1980_v3, %v1754_v1  ;;  %v1982_v7 = vpop.f32.mrb[14].mxu0  ;;  %v1758_v10 = vpop.f32.mrb[15].mxu1 }
 0x1bf   : > { %v2039_v8 = vadd.f32 %v2897_v0, %v403_v62  ;;  %v2899_v9 = vadd.f32 %v1982_v7, %v1756_v5  ;;  %v1984_v12 = vpop.f32.mrb[15].mxu0  ;;  %v416_v62 = vld [vmem:[#allocation2 + $0xc8] sm:$0xff]  ;;  %v418_v7 = vld [vmem:[#allocation2 + $0xd8] sm:$0xff] }
 0x1c0   : > { %v2040_v13 = vadd.f32 %v2898_v4, %v404_v2  ;;  %v2900_v14 = vadd.f32 %v1984_v12, %v1758_v10  ;;  %v417_v2 = vld [vmem:[#allocation2 + $0xd0] sm:$0xff] }
 0x1c1   : > { %2071 = vst [vmem:[#allocation2 + $0x60] sm:$0xff] %v2039_v8  ;;  %v2041_v15 = vadd.f32 %v2899_v9, %v405_v6 }
 0x1c2   : > { %2072 = vst [vmem:[#allocation2 + $0x68] sm:$0xff] %v2040_v13  ;;  %v2042_v16 = vadd.f32 %v2900_v14, %v406_v11  ;;  %v419_v14 = vld [vmem:[#allocation2 + $0xe0] sm:$0xff] }
 0x1c3   : > { %2073 = vst [vmem:[#allocation2 + $0x70] sm:$0xff] %v2041_v15  ;;  %v1762_v17 = vpop.f32.mrb[16].mxu1 }
 0x1c4   : > { %2074 = vst [vmem:[#allocation2 + $0x78] sm:$0xff] %v2042_v16  ;;  %v1988_v19 = vpop.f32.mrb[16].mxu0  ;;  %v1764_v21 = vpop.f32.mrb[17].mxu1 }
 0x1c5   : > { %v2901_v20 = vadd.f32 %v1988_v19, %v1762_v17  ;;  %v1990_v23 = vpop.f32.mrb[17].mxu0  ;;  %v1766_v25 = vpop.f32.mrb[18].mxu1 }
 0x1c6   : > { %v2902_v24 = vadd.f32 %v1990_v23, %v1764_v21  ;;  %v1992_v27 = vpop.f32.mrb[18].mxu0  ;;  %v1768_v30 = vpop.f32.mrb[19].mxu1 }
 0x1c7   : > { %v2043_v28 = vadd.f32 %v2901_v20, %v407_v18  ;;  %v2903_v29 = vadd.f32 %v1992_v27, %v1766_v25  ;;  %v1994_v32 = vpop.f32.mrb[19].mxu0  ;;  %v420_v18 = vld [vmem:[#allocation2 + $0xe8] sm:$0xff]  ;;  %v422_v27 = vld [vmem:[#allocation2 + $0xf8] sm:$0xff] }
 0x1c8   : > { %v2044_v33 = vadd.f32 %v2902_v24, %v408_v22  ;;  %v2904_v34 = vadd.f32 %v1994_v32, %v1768_v30  ;;  %v421_v22 = vld [vmem:[#allocation2 + $0xf0] sm:$0xff] }
 0x1c9   : > { %2075 = vst [vmem:[#allocation2 + $0x80] sm:$0xff] %v2043_v28  ;;  %v2045_v35 = vadd.f32 %v2903_v29, %v409_v26 }
 0x1ca   : > { %2076 = vst [vmem:[#allocation2 + $0x88] sm:$0xff] %v2044_v33  ;;  %v2046_v36 = vadd.f32 %v2904_v34, %v410_v31  ;;  %v3627_v33 = vld [vmem:[#allocation2] sm:$0xff] (!%p2848_p10)  ;;  %v3629_v34 = vld [vmem:[#allocation2 + $0x8] sm:$0xff] (!%p2848_p10) }
 0x1cb   : > { %2077 = vst [vmem:[#allocation2 + $0x90] sm:$0xff] %v2045_v35  ;;  %v1772_v37 = vpop.f32.mrb[20].mxu1  ;;  %v3631_v35 = vld [vmem:[#allocation2 + $0x10] sm:$0xff] (!%p2848_p10) }
 0x1cc   : > { %2078 = vst [vmem:[#allocation2 + $0x98] sm:$0xff] %v2046_v36  ;;  %v1998_v39 = vpop.f32.mrb[20].mxu0  ;;  %v1774_v41 = vpop.f32.mrb[21].mxu1  ;;  %v3633_v36 = vld [vmem:[#allocation2 + $0x18] sm:$0xff] (!%p2848_p10) }
 0x1cd   : > { %v2905_v40 = vadd.f32 %v1998_v39, %v1772_v37  ;;  %v2000_v43 = vpop.f32.mrb[21].mxu0  ;;  %v1776_v45 = vpop.f32.mrb[22].mxu1  ;;  %v3635_v37 = vld [vmem:[#allocation2 + $0x20] sm:$0xff] (!%p2848_p10)  ;;  %v2127_v39 = vadd.f32 (!%p2848_p10), %v3631_v35, %v3627_v33 }
 0x1ce   : > { %v2906_v44 = vadd.f32 %v2000_v43, %v1774_v41  ;;  %v2002_v47 = vpop.f32.mrb[22].mxu0  ;;  %v1778_v50 = vpop.f32.mrb[23].mxu1  ;;  %v2148_v41 = vadd.f32 (!%p2848_p10), %v3633_v36, %v3629_v34 }
 0x1cf   : > { %v2047_v48 = vadd.f32 %v2905_v40, %v411_v38  ;;  %v2907_v49 = vadd.f32 %v2002_v47, %v1776_v45  ;;  %v2004_v52 = vpop.f32.mrb[23].mxu0  ;;  %v3637_v38 = vld [vmem:[#allocation2 + $0x28] sm:$0xff] (!%p2848_p10)  ;;  %v3641_v40 = vld [vmem:[#allocation2 + $0x30] sm:$0xff] (!%p2848_p10)  ;;  %v2128_v43 = vadd.f32 (!%p2848_p10), %v2127_v39, %v3635_v37 }
 0x1d0   : > { %v2048_v53 = vadd.f32 %v2906_v44, %v412_v42  ;;  %v2908_v54 = vadd.f32 %v2004_v52, %v1778_v50  ;;  %v3645_v42 = vld [vmem:[#allocation2 + $0x38] sm:$0xff] (!%p2848_p10)  ;;  %v3648_v44 = vld [vmem:[#allocation2 + $0x40] sm:$0xff] (!%p2848_p10)  ;;  %v2149_v45 = vadd.f32 (!%p2848_p10), %v2148_v41, %v3637_v38 }
 0x1d1   : > { %2079 = vst [vmem:[#allocation2 + $0xa0] sm:$0xff] %v2047_v48  ;;  %v2049_v55 = vadd.f32 %v2907_v49, %v413_v46  ;;  %v3651_v46 = vld [vmem:[#allocation2 + $0x48] sm:$0xff] (!%p2848_p10)  ;;  %v2129_v47 = vadd.f32 (!%p2848_p10), %v2128_v43, %v3641_v40  ;;  %v3654_v48 = vld [vmem:[#allocation2 + $0x50] sm:$0xff] (!%p2848_p10)  ;;  %v3657_v50 = vld [vmem:[#allocation2 + $0x58] sm:$0xff] (!%p2848_p10) }
 0x1d2   : > { %2080 = vst [vmem:[#allocation2 + $0xa8] sm:$0xff] %v2048_v53  ;;  %v2050_v56 = vadd.f32 %v2908_v54, %v414_v51  ;;  %v2150_v49 = vadd.f32 (!%p2848_p10), %v2149_v45, %v3645_v42  ;;  %v3660_v52 = vld [vmem:[#allocation2 + $0x60] sm:$0xff] (!%p2848_p10)  ;;  %v3663_v54 = vld [vmem:[#allocation2 + $0x68] sm:$0xff] (!%p2848_p10) }
 0x1d3   : > { %2081 = vst [vmem:[#allocation2 + $0xb0] sm:$0xff] %v2049_v55  ;;  %v1782_v57 = vpop.f32.mrb[24].mxu1  ;;  %v2130_v51 = vadd.f32 (!%p2848_p10), %v2129_v47, %v3648_v44 }
 0x1d4   : > { %2082 = vst [vmem:[#allocation2 + $0xb8] sm:$0xff] %v2050_v56  ;;  %v2008_v59 = vpop.f32.mrb[24].mxu0  ;;  %v1784_v61 = vpop.f32.mrb[25].mxu1  ;;  %v2151_v53 = vadd.f32 (!%p2848_p10), %v2150_v49, %v3651_v46  ;;  %v3666_v56 = vld [vmem:[#allocation2 + $0x70] sm:$0xff] (!%p2848_p10) }
 0x1d5   : > { %v2909_v60 = vadd.f32 %v2008_v59, %v1782_v57  ;;  %v2010_v63 = vpop.f32.mrb[25].mxu0  ;;  %v1786_v1 = vpop.f32.mrb[26].mxu1  ;;  %v2131_v55 = vadd.f32 (!%p2848_p10), %v2130_v51, %v3654_v48 }
 0x1d6   : > { %v2910_v0 = vadd.f32 %v2010_v63, %v1784_v61  ;;  %v2012_v3 = vpop.f32.mrb[26].mxu0  ;;  %v1788_v6 = vpop.f32.mrb[27].mxu1  ;;  %v2152_v57 = vadd.f32 (!%p2848_p10), %v2151_v53, %v3657_v50 }
 0x1d7   : > { %v2051_v4 = vadd.f32 %v2909_v60, %v415_v58  ;;  %v2911_v5 = vadd.f32 %v2012_v3, %v1786_v1  ;;  %v2014_v8 = vpop.f32.mrb[27].mxu0  ;;  %v3669_v58 = vld [vmem:[#allocation2 + $0x78] sm:$0xff] (!%p2848_p10)  ;;  %v2132_v59 = vadd.f32 (!%p2848_p10), %v2131_v55, %v3660_v52  ;;  %v3672_v60 = vld [vmem:[#allocation2 + $0x80] sm:$0xff] (!%p2848_p10) }
 0x1d8   : > { %v2052_v9 = vadd.f32 %v2910_v0, %v416_v62  ;;  %v2912_v10 = vadd.f32 %v2014_v8, %v1788_v6  ;;  %v2153_v61 = vadd.f32 (!%p2848_p10), %v2152_v57, %v3663_v54  ;;  %v3675_v62 = vld [vmem:[#allocation2 + $0x88] sm:$0xff] (!%p2848_p10)  ;;  %v3678_v0 = vld [vmem:[#allocation2 + $0x90] sm:$0xff] (!%p2848_p10) }
 0x1d9   : > { %2083 = vst [vmem:[#allocation2 + $0xc0] sm:$0xff] %v2051_v4  ;;  %v2053_v11 = vadd.f32 %v2911_v5, %v417_v2  ;;  %v2133_v63 = vadd.f32 (!%p2848_p10), %v2132_v59, %v3666_v56  ;;  %v3681_v2 = vld [vmem:[#allocation2 + $0x98] sm:$0xff] (!%p2848_p10)  ;;  %v3684_v4 = vld [vmem:[#allocation2 + $0xa0] sm:$0xff] (!%p2848_p10)  ;;  %v3687_v6 = vld [vmem:[#allocation2 + $0xa8] sm:$0xff] (!%p2848_p10) }
 0x1da   : > { %2084 = vst [vmem:[#allocation2 + $0xc8] sm:$0xff] %v2052_v9  ;;  %v2054_v12 = vadd.f32 %v2912_v10, %v418_v7  ;;  %v2154_v1 = vadd.f32 (!%p2848_p10), %v2153_v61, %v3669_v58  ;;  %v3690_v8 = vld [vmem:[#allocation2 + $0xb0] sm:$0xff] (!%p2848_p10) }
 0x1db   : > { %2085 = vst [vmem:[#allocation2 + $0xd0] sm:$0xff] %v2053_v11  ;;  %v1792_v13 = vpop.f32.mrb[28].mxu1  ;;  %v2134_v3 = vadd.f32 (!%p2848_p10), %v2133_v63, %v3672_v60  ;;  %v3693_v10 = vld [vmem:[#allocation2 + $0xb8] sm:$0xff] (!%p2848_p10) }
 0x1dc   : > { %2086 = vst [vmem:[#allocation2 + $0xd8] sm:$0xff] %v2054_v12  ;;  %v2018_v15 = vpop.f32.mrb[28].mxu0  ;;  %v1794_v17 = vpop.f32.mrb[29].mxu1  ;;  %v2155_v5 = vadd.f32 (!%p2848_p10), %v2154_v1, %v3675_v62 }
 0x1dd   : > { %v2913_v16 = vadd.f32 %v2018_v15, %v1792_v13  ;;  %v2020_v19 = vpop.f32.mrb[29].mxu0  ;;  %v1796_v21 = vpop.f32.mrb[30].mxu1  ;;  %v2135_v7 = vadd.f32 (!%p2848_p10), %v2134_v3, %v3678_v0 }
 0x1de   : > { %v2914_v20 = vadd.f32 %v2020_v19, %v1794_v17  ;;  %v2022_v23 = vpop.f32.mrb[30].mxu0  ;;  %v1798_v26 = vpop.f32.mrb[31].mxu1  ;;  %2094 = sbr.rel (%p2848_p10) target bundleno = 630 (0x276), region = 67  ;;  %v2156_v9 = vadd.f32 (!%p2848_p10), %v2155_v5, %v3681_v2 }
 0x1df   : > { %v2055_v24 = vadd.f32 %v2913_v16, %v419_v14  ;;  %v2915_v25 = vadd.f32 %v2022_v23, %v1796_v21  ;;  %v2024_v28 = vpop.f32.mrb[31].mxu0  ;;  %v2136_v11 = vadd.f32 (!%p2848_p10), %v2135_v7, %v3684_v4 }
 0x1e0   : > { %v2056_v29 = vadd.f32 %v2914_v20, %v420_v18  ;;  %v2916_v30 = vadd.f32 %v2024_v28, %v1798_v26  ;;  %v3696_v12 = vld [vmem:[#allocation2 + $0xc0] sm:$0xff] (!%p2848_p10)  ;;  %v2157_v13 = vadd.f32 (!%p2848_p10), %v2156_v9, %v3687_v6 }
 0x1e1   : > { %2087 = vst [vmem:[#allocation2 + $0xe0] sm:$0xff] %v2055_v24  ;;  %v2057_v31 = vadd.f32 %v2915_v25, %v421_v22  ;;  %v3699_v14 = vld [vmem:[#allocation2 + $0xc8] sm:$0xff] (!%p2848_p10)  ;;  %v2137_v15 = vadd.f32 (!%p2848_p10), %v2136_v11, %v3690_v8 }
 0x1e2   : > { %2088 = vst [vmem:[#allocation2 + $0xe8] sm:$0xff] %v2056_v29  ;;  %v2058_v32 = vadd.f32 %v2916_v30, %v422_v27  ;;  %v3702_v16 = vld [vmem:[#allocation2 + $0xd0] sm:$0xff] (!%p2848_p10)  ;;  %v2158_v17 = vadd.f32 (!%p2848_p10), %v2157_v13, %v3693_v10 }
 0x1e3   : > { %2089 = vst [vmem:[#allocation2 + $0xf0] sm:$0xff] %v2057_v31  ;;  %v3705_v18 = vld [vmem:[#allocation2 + $0xd8] sm:$0xff] (!%p2848_p10)  ;;  %v2138_v19 = vadd.f32 (!%p2848_p10), %v2137_v15, %v3696_v12 }
 0x1e4   : > { %2090 = vst [vmem:[#allocation2 + $0xf8] sm:$0xff] %v2058_v32  ;;  %v2159_v21 = vadd.f32 (!%p2848_p10), %v2158_v17, %v3699_v14 }
 0x1e5   : > { %v2139_v23 = vadd.f32 %v2138_v19, %v3702_v16 }
 0x1e6   : > { %v2160_v25 = vadd.f32 %v2159_v21, %v3705_v18 }
 0x1e8   : > { %v3708_v20 = vld [vmem:[#allocation2 + $0xe0] sm:$0xff] }
 0x1e9   : > { %v3711_v22 = vld [vmem:[#allocation2 + $0xe8] sm:$0xff]  ;;  %v2140_v27 = vadd.f32 %v2139_v23, %v3708_v20 }
 0x1ea   : > { %v3714_v24 = vld [vmem:[#allocation2 + $0xf0] sm:$0xff]  ;;  %v2161_v28 = vadd.f32 %v2160_v25, %v3711_v22 }
 0x1eb   : > { %v3717_v26 = vld [vmem:[#allocation2 + $0xf8] sm:$0xff]  ;;  %v2141_v29 = vadd.f32 %v2140_v27, %v3714_v24 }
 0x1ec   : > { %v2162_v30 = vadd.f32 %v2161_v28, %v3717_v26 }
 0x1ed   : > { %v2142_v31 = vrot.slane %v2141_v29, 4 }
 0x1ee   : > { %v2163_v32 = vrot.slane %v2162_v30, 4 }
 0x1ef   : > { %v2143_v39 = vadd.f32 %v2142_v31, %v2141_v29 }
 0x1f0   : > { %v2164_v41 = vadd.f32 %v2163_v32, %v2162_v30 }
 0x1f1   : > { %v2144_v43 = vrot.slane %v2143_v39, 2 }
 0x1f2   : > { %v2165_v45 = vrot.slane %v2164_v41, 2 }
 0x1f3   : > { %v2145_v47 = vadd.f32 %v2144_v43, %v2143_v39 }
 0x1f4   : > { %v2166_v49 = vadd.f32 %v2165_v45, %v2164_v41 }
 0x1f5   : > { %v2146_v51 = vrot.slane %v2145_v47, 1 }
 0x1f6   : > { %v2167_v53 = vrot.slane %v2166_v49, 1 }
 0x1f7   : > { %v2147_v55 = vadd.f32 %v2146_v51, %v2145_v47 }
 0x1f8   : > { %v2168_v57 = vadd.f32 %v2167_v53, %v2166_v49 }
 0x1f9   : > { %v3723_v59 = vmul.f32 0.0078125, %v2147_v55 }
 0x1fa   : > { %v3725_v61 = vmul.f32 0.0078125, %v2168_v57 }
 0x1fb   : > { %v3729_v63 = vsub.f32 %v3627_v33, %v3723_v59  ;;  %v3737_v3 = vsub.f32 %v3631_v35, %v3723_v59  ;;  %v3745_v7 = vsub.f32 %v3635_v37, %v3723_v59  ;;  %v3781_v15 = vsub.f32 %v3654_v48, %v3723_v59 }
 0x1fc   : > { %v3733_v1 = vsub.f32 %v3629_v34, %v3725_v61  ;;  %v3741_v5 = vsub.f32 %v3633_v36, %v3725_v61  ;;  %v3749_v33 = vsub.f32 %v3637_v38, %v3725_v61  ;;  %v3753_v34 = vsub.f32 %v3641_v40, %v3723_v59 }
 0x1fd   : > { %v3757_v35 = vsub.f32 %v3645_v42, %v3725_v61  ;;  %v2203_v36 = vmul.f32 %v3729_v63, %v3729_v63  ;;  %v2205_v37 = vmul.f32 %v3737_v3, %v3737_v3  ;;  %v3769_v40 = vsub.f32 %v3648_v44, %v3723_v59 }
 0x1fe   : > { %v2204_v9 = vmul.f32 %v3733_v1, %v3733_v1  ;;  %v2206_v38 = vmul.f32 %v3741_v5, %v3741_v5  ;;  %v3773_v42 = vsub.f32 %v3651_v46, %v3725_v61  ;;  %v2207_v11 = vmul.f32 %v3745_v7, %v3745_v7 }
 0x1ff   : > { %v2208_v13 = vmul.f32 %v3749_v33, %v3749_v33  ;;  %v3785_v17 = vsub.f32 %v3657_v50, %v3725_v61  ;;  %v2209_v44 = vmul.f32 %v3753_v34, %v3753_v34  ;;  %v2210_v46 = vmul.f32 %v3757_v35, %v3757_v35 }
 0x200   : > { %v2235_v19 = vadd.f32 %v2205_v37, %v2203_v36  ;;  %v2256_v21 = vadd.f32 %v2206_v38, %v2204_v9  ;;  %v3793_v23 = vsub.f32 %v3660_v52, %v3723_v59  ;;  %v3797_v48 = vsub.f32 %v3663_v54, %v3725_v61 }
 0x201   : > { %v2211_v50 = vmul.f32 %v3769_v40, %v3769_v40  ;;  %v2212_v25 = vmul.f32 %v3773_v42, %v3773_v42  ;;  %v3805_v29 = vsub.f32 %v3666_v56, %v3723_v59  ;;  %v3809_v52 = vsub.f32 %v3669_v58, %v3725_v61 }
 0x202   : > { %v2236_v27 = vadd.f32 %v2235_v19, %v2207_v11  ;;  %v2257_v28 = vadd.f32 %v2256_v21, %v2208_v13  ;;  %v2213_v54 = vmul.f32 %v3781_v15, %v3781_v15  ;;  %v2214_v30 = vmul.f32 %v3785_v17, %v3785_v17 }
 0x203   : > { %v3817_v39 = vsub.f32 %v3672_v60, %v3723_v59  ;;  %v3821_v56 = vsub.f32 %v3675_v62, %v3725_v61  ;;  %v2215_v58 = vmul.f32 %v3793_v23, %v3793_v23  ;;  %v2216_v41 = vmul.f32 %v3797_v48, %v3797_v48 }
 0x204   : > { %v2237_v31 = vadd.f32 %v2236_v27, %v2209_v44  ;;  %v2258_v32 = vadd.f32 %v2257_v28, %v2210_v46  ;;  %v3829_v47 = vsub.f32 %v3678_v0, %v3723_v59  ;;  %v3833_v60 = vsub.f32 %v3681_v2, %v3725_v61 }
 0x205   : > { %v2217_v62 = vmul.f32 %v3805_v29, %v3805_v29  ;;  %v2218_v49 = vmul.f32 %v3809_v52, %v3809_v52  ;;  %v3841_v55 = vsub.f32 %v3684_v4, %v3723_v59  ;;  %v3845_v0 = vsub.f32 %v3687_v6, %v3725_v61 }
 0x206   : > { %v2238_v43 = vadd.f32 %v2237_v31, %v2211_v50  ;;  %v2259_v45 = vadd.f32 %v2258_v32, %v2212_v25  ;;  %v2219_v2 = vmul.f32 %v3817_v39, %v3817_v39  ;;  %v2220_v57 = vmul.f32 %v3821_v56, %v3821_v56 }
 0x207   : > { %v3853_v37 = vsub.f32 %v3690_v8, %v3723_v59  ;;  %v3857_v4 = vsub.f32 %v3693_v10, %v3725_v61  ;;  %v2221_v6 = vmul.f32 %v3829_v47, %v3829_v47  ;;  %v2222_v38 = vmul.f32 %v3833_v60, %v3833_v60 }
 0x208   : > { %v2239_v51 = vadd.f32 %v2238_v43, %v2213_v54  ;;  %v2260_v53 = vadd.f32 %v2259_v45, %v2214_v30  ;;  %v3865_v44 = vsub.f32 %v3696_v12, %v3723_v59  ;;  %v3869_v8 = vsub.f32 %v3699_v14, %v3725_v61 }
 0x209   : > { %v2223_v10 = vmul.f32 %v3841_v55, %v3841_v55  ;;  %v2224_v46 = vmul.f32 %v3845_v0, %v3845_v0  ;;  %v3877_v50 = vsub.f32 %v3702_v16, %v3723_v59  ;;  %v3881_v12 = vsub.f32 %v3705_v18, %v3725_v61 }
 0x20a   : > { %v2240_v36 = vadd.f32 %v2239_v51, %v2215_v58  ;;  %v2261_v9 = vadd.f32 %v2260_v53, %v2216_v41  ;;  %v2225_v14 = vmul.f32 %v3853_v37, %v3853_v37  ;;  %v2226_v25 = vmul.f32 %v3857_v4, %v3857_v4 }
 0x20b   : > { %v3889_v54 = vsub.f32 %v3708_v20, %v3723_v59  ;;  %v3893_v16 = vsub.f32 %v3711_v22, %v3725_v61  ;;  %v2227_v18 = vmul.f32 %v3865_v44, %v3865_v44  ;;  %v2228_v30 = vmul.f32 %v3869_v8, %v3869_v8 }
 0x20c   : > { %v2241_v11 = vadd.f32 %v2240_v36, %v2217_v62  ;;  %v2262_v13 = vadd.f32 %v2261_v9, %v2218_v49  ;;  %v3901_v58 = vsub.f32 %v3714_v24, %v3723_v59  ;;  %v3905_v20 = vsub.f32 %v3717_v26, %v3725_v61 }
 0x20d   : > { %v2229_v22 = vmul.f32 %v3877_v50, %v3877_v50  ;;  %v2230_v41 = vmul.f32 %v3881_v12, %v3881_v12  ;;  %v2231_v62 = vmul.f32 %v3889_v54, %v3889_v54  ;;  %v2232_v49 = vmul.f32 %v3893_v16, %v3893_v16 }
 0x20e   : > { %v2242_v19 = vadd.f32 %v2241_v11, %v2219_v2  ;;  %v2263_v21 = vadd.f32 %v2262_v13, %v2220_v57  ;;  %v2233_v26 = vmul.f32 %v3901_v58, %v3901_v58  ;;  %v2234_v61 = vmul.f32 %v3905_v20, %v3905_v20 }
 0x210   : > { %v2243_v27 = vadd.f32 %v2242_v19, %v2221_v6  ;;  %v2264_v28 = vadd.f32 %v2263_v21, %v2222_v38 }
 0x212   : > { %v2244_v31 = vadd.f32 %v2243_v27, %v2223_v10  ;;  %v2265_v32 = vadd.f32 %v2264_v28, %v2224_v46 }
 0x214   : > { %v2245_v43 = vadd.f32 %v2244_v31, %v2225_v14  ;;  %v2266_v45 = vadd.f32 %v2265_v32, %v2226_v25 }
 0x216   : > { %v2246_v24 = vadd.f32 %v2245_v43, %v2227_v18  ;;  %v2267_v59 = vadd.f32 %v2266_v45, %v2228_v30  ;;  %v2290_v43 = vlaneseq }
 0x218   : > { %v2247_v51 = vadd.f32 %v2246_v24, %v2229_v22  ;;  %v2268_v53 = vadd.f32 %v2267_v59, %v2230_v41  ;;  %v3228_v22 = vmov 1966171168  }
 0x219   : > { %v2288_v41 = vunpack.c.l.s4 %v3228_v22 }
 0x21a   : > { %v2248_v2 = vadd.f32 %v2247_v51, %v2231_v62  ;;  %v2269_v57 = vadd.f32 %v2268_v53, %v2232_v49  ;;  %v2291_v62 = vshrl.u32 %v2290_v43, 7  ;;  %v2279_v51 = vld [vmem:[%s4089_s2] sm:$0x3] }
 0x21b   : > { %v2289_v45 = vunpack.c.0.s8 %v2288_v41 }
 0x21c   : > { %v2249_v36 = vadd.f32 %v2248_v2, %v2233_v26  ;;  %v2270_v9 = vadd.f32 %v2269_v57, %v2234_v61  ;;  %v2306_v2 = vsub.s32 0, %v2291_v62  ;;  %v2310_v57 = vsub.s32 1, %v2291_v62 }
 0x21d   : > { %v2292_v24 = vsub.s32 %v2289_v45, %v2291_v62 }
 0x21e   : > { %v2250_v6 = vrot.slane %v2249_v36, 4  ;;  %v2271_v38 = vrot.slane %v2270_v9, 4 }
 0x220   : > { %v2251_v11 = vadd.f32 %v2250_v6, %v2249_v36  ;;  %v2272_v13 = vadd.f32 %v2271_v38, %v2270_v9  ;;  %v2346_v36 = vld [vmem:[%s4090_s3] sm:$0x3] }
 0x222   : > { %v2252_v10 = vrot.slane %v2251_v11, 2  ;;  %v2273_v46 = vrot.slane %v2272_v13, 2 }
 0x224   : > { %v2253_v19 = vadd.f32 %v2252_v10, %v2251_v11  ;;  %v2274_v21 = vadd.f32 %v2273_v46, %v2272_v13  ;;  %v3929_v11 = vrot.slane %v2346_v36, %v2306_v2  ;;  %v3931_v13 = vrot.slane %v2346_v36, %v2310_v57 }
 0x226   : > { %v2254_v14 = vrot.slane %v2253_v19, 1  ;;  %v2275_v25 = vrot.slane %v2274_v21, 1 }
 0x228   : > { %v2255_v27 = vadd.f32 %v2254_v14, %v2253_v19  ;;  %v2276_v28 = vadd.f32 %v2275_v25, %v2274_v21 }
 0x22a   : > { %v2277_v18 = vmul.f32 0.0078125, %v2255_v27  ;;  %v2278_v30 = vmul.f32 0.0078125, %v2276_v28 }
 0x22c   : > { %v2280_v31 = vadd.f32 1e-05, %v2277_v18  ;;  %v2281_v32 = vadd.f32 1e-05, %v2278_v30 }
 0x22e   : > { %3199 = vrsqrt.f32 %v2280_v31 }
 0x22f   : > { %3201 = vrsqrt.f32 %v2281_v32 }
 0x238   : > { %v3200_v49 = vpop.eup %3199 }
 0x239   : > { %v3202_v59 = vpop.eup %3201 }
 0x23a   : > { %v2286_v26 = vcombine.low %v3200_v49, %v3202_v59 }
 0x23c   : > { %v2293_v61 = vrot.slane %v2286_v26, %v2292_v24 }
 0x23e   : > { %v2300_v53 = vrot.slane %v2293_v61, %v2292_v24 }
 0x240   : > { %v2302_v9 = vmul.f32 %v2300_v53, %v2279_v51 }
 0x242   : > { %v3925_v6 = vrot.slane %v2302_v9, %v2306_v2  ;;  %v3927_v38 = vrot.slane %v2302_v9, %v2310_v57 }
 0x244   : > { %v2314_v10 = vmul.f32 %v3925_v6, %v3729_v63  ;;  %v2315_v46 = vmul.f32 %v3927_v38, %v3733_v1  ;;  %v2316_v19 = vmul.f32 %v3925_v6, %v3737_v3  ;;  %v2317_v21 = vmul.f32 %v3927_v38, %v3741_v5 }
 0x245   : > { %v2318_v14 = vmul.f32 %v3925_v6, %v3745_v7  ;;  %v2319_v25 = vmul.f32 %v3927_v38, %v3749_v33  ;;  %v2320_v27 = vmul.f32 %v3925_v6, %v3753_v34  ;;  %v2321_v63 = vmul.f32 %v3927_v38, %v3757_v35 }
 0x246   : > { %v2358_v1 = vadd.f32 %v3929_v11, %v2314_v10  ;;  %v2359_v28 = vadd.f32 %v3931_v13, %v2315_v46  ;;  %v2360_v3 = vadd.f32 %v3929_v11, %v2316_v19  ;;  %v2361_v5 = vadd.f32 %v3931_v13, %v2317_v21 }
 0x247   : > { %v2362_v18 = vadd.f32 %v3929_v11, %v2318_v14  ;;  %v2363_v7 = vadd.f32 %v3931_v13, %v2319_v25  ;;  %v2364_v33 = vadd.f32 %v3929_v11, %v2320_v27  ;;  %v2365_v30 = vadd.f32 %v3931_v13, %v2321_v63 }
 0x248   : > { %vm2390_vm0 = vcmp.ge.f32.partialorder %v2358_v1, 0.0  ;;  %vm2391_vm1 = vcmp.ge.f32.partialorder %v2359_v28, 0.0  ;;  %v2422_v34 = vmul.f32 0.2, %v2358_v1  ;;  %v2423_v35 = vmul.f32 0.2, %v2359_v28 }
 0x249   : > { %vm2392_vm2 = vcmp.ge.f32.partialorder %v2360_v3, 0.0  ;;  %vm2393_vm3 = vcmp.ge.f32.partialorder %v2361_v5, 0.0  ;;  %v2424_v31 = vmul.f32 0.2, %v2360_v3  ;;  %v2425_v32 = vmul.f32 0.2, %v2361_v5 }
 0x24a   : > { %v2454_v22 = vsel %vm2390_vm0, %v2358_v1, %v2422_v34  ;;  %v2455_v41 = vsel %vm2391_vm1, %v2359_v28, %v2423_v35  ;;  %vm2394_vm4 = vcmp.ge.f32.partialorder %v2362_v18, 0.0  ;;  %vm2395_vm5 = vcmp.ge.f32.partialorder %v2363_v7, 0.0 }
 0x24b   : > { %v2869_v43 = vpack.c.bf16 %v2455_v41, %v2454_v22  ;;  %v2456_v45 = vsel %vm2392_vm2, %v2360_v3, %v2424_v31  ;;  %v2457_v62 = vsel %vm2393_vm3, %v2361_v5, %v2425_v32  ;;  %v2426_v49 = vmul.f32 0.2, %v2362_v18 }
 0x24c   : > { %v2870_v24 = vpack.c.bf16 %v2457_v62, %v2456_v45  ;;  %v2427_v59 = vmul.f32 0.2, %v2363_v7  ;;  %vm2396_vm6 = vcmp.ge.f32.partialorder %v2364_v33, 0.0  ;;  %vm2397_vm7 = vcmp.ge.f32.partialorder %v2365_v30, 0.0 }
 0x24d   : > { %2582 = vst [vmem:[%s4091_s4] sm:$0xff] %v2869_v43  ;;  %v2458_v26 = vsel %vm2394_vm4, %v2362_v18, %v2426_v49  ;;  %v2428_v61 = vmul.f32 0.2, %v2364_v33  ;;  %v2429_v51 = vmul.f32 0.2, %v2365_v30  ;;  %v2322_v53 = vmul.f32 %v3925_v6, %v3769_v40 }
 0x24e   : > { %2583 = vst [vmem:[%s4091_s4 + $0x8] sm:$0xff] %v2870_v24  ;;  %v2459_v2 = vsel %vm2395_vm5, %v2363_v7, %v2427_v59  ;;  %v2323_v57 = vmul.f32 %v3927_v38, %v3773_v42  ;;  %v2324_v36 = vmul.f32 %v3925_v6, %v3781_v15  ;;  %v2325_v9 = vmul.f32 %v3927_v38, %v3785_v17 }
 0x24f   : > { %v2871_v10 = vpack.c.bf16 %v2459_v2, %v2458_v26  ;;  %v2460_v46 = vsel %vm2396_vm6, %v2364_v33, %v2428_v61  ;;  %v2461_v19 = vsel %vm2397_vm7, %v2365_v30, %v2429_v51  ;;  %v2366_v21 = vadd.f32 %v3929_v11, %v2322_v53 }
 0x250   : > { %v2872_v40 = vpack.c.bf16 %v2461_v19, %v2460_v46  ;;  %v2367_v14 = vadd.f32 %v3931_v13, %v2323_v57  ;;  %v2368_v25 = vadd.f32 %v3929_v11, %v2324_v36  ;;  %v2369_v27 = vadd.f32 %v3931_v13, %v2325_v9 }
 0x251   : > { %2584 = vst [vmem:[%s4091_s4 + $0x10] sm:$0xff] %v2871_v10  ;;  %vm2398_vm8 = vcmp.ge.f32.partialorder %v2366_v21, 0.0  ;;  %v2430_v42 = vmul.f32 0.2, %v2366_v21  ;;  %v2326_v15 = vmul.f32 %v3925_v6, %v3793_v23  ;;  %v2327_v17 = vmul.f32 %v3927_v38, %v3797_v48 }
 0x252   : > { %2585 = vst [vmem:[%s4091_s4 + $0x18] sm:$0xff] %v2872_v40  ;;  %vm2399_vm9 = vcmp.ge.f32.partialorder %v2367_v14, 0.0  ;;  %v2431_v63 = vmul.f32 0.2, %v2367_v14  ;;  %vm2400_vm10 = vcmp.ge.f32.partialorder %v2368_v25, 0.0  ;;  %vm2401_vm11 = vcmp.ge.f32.partialorder %v2369_v27, 0.0 }
 0x253   : > { %v2462_v1 = vsel %vm2398_vm8, %v2366_v21, %v2430_v42  ;;  %v2432_v28 = vmul.f32 0.2, %v2368_v25  ;;  %v2433_v3 = vmul.f32 0.2, %v2369_v27  ;;  %v2370_v5 = vadd.f32 %v3929_v11, %v2326_v15 }
 0x254   : > { %v2463_v18 = vsel %vm2399_vm9, %v2367_v14, %v2431_v63  ;;  %v2371_v7 = vadd.f32 %v3931_v13, %v2327_v17  ;;  %v2328_v23 = vmul.f32 %v3925_v6, %v3805_v29  ;;  %v2329_v48 = vmul.f32 %v3927_v38, %v3809_v52 }
 0x255   : > { %v2873_v33 = vpack.c.bf16 %v2463_v18, %v2462_v1  ;;  %v2464_v30 = vsel %vm2400_vm10, %v2368_v25, %v2432_v28  ;;  %v2465_v34 = vsel %vm2401_vm11, %v2369_v27, %v2433_v3  ;;  %vm2402_vm12 = vcmp.ge.f32.partialorder %v2370_v5, 0.0 }
 0x256   : > { %v2874_v35 = vpack.c.bf16 %v2465_v34, %v2464_v30  ;;  %vm2403_vm13 = vcmp.ge.f32.partialorder %v2371_v7, 0.0  ;;  %v2434_v31 = vmul.f32 0.2, %v2370_v5  ;;  %v2435_v32 = vmul.f32 0.2, %v2371_v7 }
 0x257   : > { %2586 = vst [vmem:[%s4091_s4 + $0x20] sm:$0xff] %v2873_v33  ;;  %v2372_v22 = vadd.f32 %v3929_v11, %v2328_v23  ;;  %v2373_v41 = vadd.f32 %v3931_v13, %v2329_v48  ;;  %v2330_v29 = vmul.f32 %v3925_v6, %v3817_v39  ;;  %v2331_v52 = vmul.f32 %v3927_v38, %v3821_v56 }
 0x258   : > { %2587 = vst [vmem:[%s4091_s4 + $0x28] sm:$0xff] %v2874_v35  ;;  %v2466_v43 = vsel %vm2402_vm12, %v2370_v5, %v2434_v31  ;;  %v2467_v45 = vsel %vm2403_vm13, %v2371_v7, %v2435_v32  ;;  %v2332_v62 = vmul.f32 %v3925_v6, %v3829_v47  ;;  %v2333_v49 = vmul.f32 %v3927_v38, %v3833_v60 }
 0x259   : > { %v2875_v24 = vpack.c.bf16 %v2467_v45, %v2466_v43  ;;  %vm2404_vm14 = vcmp.ge.f32.partialorder %v2372_v22, 0.0  ;;  %vm2405_vm15 = vcmp.ge.f32.partialorder %v2373_v41, 0.0  ;;  %v2436_v59 = vmul.f32 0.2, %v2372_v22 }
 0x25a   : > { %v2437_v39 = vmul.f32 0.2, %v2373_v41  ;;  %v2374_v26 = vadd.f32 %v3929_v11, %v2330_v29  ;;  %v2375_v56 = vadd.f32 %v3931_v13, %v2331_v52  ;;  %v2376_v61 = vadd.f32 %v3929_v11, %v2332_v62 }
 0x25b   : > { %2588 = vst [vmem:[%s4091_s4 + $0x30] sm:$0xff] %v2875_v24  ;;  %v2468_v51 = vsel %vm2404_vm14, %v2372_v22, %v2436_v59  ;;  %v2377_v47 = vadd.f32 %v3931_v13, %v2333_v49  ;;  %v2334_v60 = vmul.f32 %v3925_v6, %v3841_v55  ;;  %v2335_v53 = vmul.f32 %v3927_v38, %v3845_v0 }
 0x25c   : > { %v2469_v2 = vsel %vm2405_vm15, %v2373_v41, %v2437_v39  ;;  %vm2406_vm0 = vcmp.ge.f32.partialorder %v2374_v26, 0.0  ;;  %vm2407_vm1 = vcmp.ge.f32.partialorder %v2375_v56, 0.0  ;;  %v2438_v57 = vmul.f32 0.2, %v2374_v26 }
 0x25d   : > { %v2876_v36 = vpack.c.bf16 %v2469_v2, %v2468_v51  ;;  %v2439_v9 = vmul.f32 0.2, %v2375_v56  ;;  %vm2408_vm2 = vcmp.ge.f32.partialorder %v2376_v61, 0.0  ;;  %vm2409_vm3 = vcmp.ge.f32.partialorder %v2377_v47, 0.0 }
 0x25e   : > { %v2470_v10 = vsel %vm2406_vm0, %v2374_v26, %v2438_v57  ;;  %v2440_v46 = vmul.f32 0.2, %v2376_v61  ;;  %v2441_v19 = vmul.f32 0.2, %v2377_v47  ;;  %v2378_v21 = vadd.f32 %v3929_v11, %v2334_v60 }
 0x25f   : > { %2589 = vst [vmem:[%s4091_s4 + $0x38] sm:$0xff] %v2876_v36  ;;  %v2471_v55 = vsel %vm2407_vm1, %v2375_v56, %v2439_v9  ;;  %v2379_v0 = vadd.f32 %v3931_v13, %v2335_v53  ;;  %v2336_v40 = vmul.f32 %v3925_v6, %v3853_v37  ;;  %v2337_v14 = vmul.f32 %v3927_v38, %v3857_v4 }
 0x260   : > { %v2877_v25 = vpack.c.bf16 %v2471_v55, %v2470_v10  ;;  %v2472_v27 = vsel %vm2408_vm2, %v2376_v61, %v2440_v46  ;;  %v2473_v42 = vsel %vm2409_vm3, %v2377_v47, %v2441_v19  ;;  %vm2410_vm4 = vcmp.ge.f32.partialorder %v2378_v21, 0.0 }
 0x261   : > { %v2878_v15 = vpack.c.bf16 %v2473_v42, %v2472_v27  ;;  %vm2411_vm5 = vcmp.ge.f32.partialorder %v2379_v0, 0.0  ;;  %v2442_v17 = vmul.f32 0.2, %v2378_v21  ;;  %v2443_v63 = vmul.f32 0.2, %v2379_v0 }
 0x262   : > { %2590 = vst [vmem:[%s4091_s4 + $0x40] sm:$0xff] %v2877_v25  ;;  %v2380_v1 = vadd.f32 %v3929_v11, %v2336_v40  ;;  %v2381_v28 = vadd.f32 %v3931_v13, %v2337_v14  ;;  %v2338_v37 = vmul.f32 %v3925_v6, %v3865_v44  ;;  %v2339_v4 = vmul.f32 %v3927_v38, %v3869_v8 }
 0x263   : > { %2591 = vst [vmem:[%s4091_s4 + $0x48] sm:$0xff] %v2878_v15  ;;  %v2474_v3 = vsel %vm2410_vm4, %v2378_v21, %v2442_v17  ;;  %v2475_v5 = vsel %vm2411_vm5, %v2379_v0, %v2443_v63  ;;  %v2340_v18 = vmul.f32 %v3925_v6, %v3877_v50  ;;  %v2341_v7 = vmul.f32 %v3927_v38, %v3881_v12 }
 0x264   : > { %v2879_v23 = vpack.c.bf16 %v2475_v5, %v2474_v3  ;;  %vm2412_vm6 = vcmp.ge.f32.partialorder %v2380_v1, 0.0  ;;  %vm2413_vm7 = vcmp.ge.f32.partialorder %v2381_v28, 0.0  ;;  %v2444_v48 = vmul.f32 0.2, %v2380_v1 }
 0x265   : > { %v2445_v44 = vmul.f32 0.2, %v2381_v28  ;;  %v2382_v33 = vadd.f32 %v3929_v11, %v2338_v37  ;;  %v2383_v8 = vadd.f32 %v3931_v13, %v2339_v4  ;;  %v2384_v30 = vadd.f32 %v3929_v11, %v2340_v18 }
 0x266   : > { %2592 = vst [vmem:[%s4091_s4 + $0x50] sm:$0xff] %v2879_v23  ;;  %v2476_v34 = vsel %vm2412_vm6, %v2380_v1, %v2444_v48  ;;  %v2385_v50 = vadd.f32 %v3931_v13, %v2341_v7  ;;  %v2342_v12 = vmul.f32 %v3925_v6, %v3889_v54  ;;  %v2343_v35 = vmul.f32 %v3927_v38, %v3893_v16 }
 0x267   : > { %v2477_v31 = vsel %vm2413_vm7, %v2381_v28, %v2445_v44  ;;  %vm2414_vm8 = vcmp.ge.f32.partialorder %v2382_v33, 0.0  ;;  %vm2415_vm9 = vcmp.ge.f32.partialorder %v2383_v8, 0.0  ;;  %v2446_v32 = vmul.f32 0.2, %v2382_v33 }
 0x268   : > { %v2880_v22 = vpack.c.bf16 %v2477_v31, %v2476_v34  ;;  %v2447_v41 = vmul.f32 0.2, %v2383_v8  ;;  %vm2416_vm10 = vcmp.ge.f32.partialorder %v2384_v30, 0.0  ;;  %vm2417_vm11 = vcmp.ge.f32.partialorder %v2385_v50, 0.0 }
 0x269   : > { %v2478_v29 = vsel %vm2414_vm8, %v2382_v33, %v2446_v32  ;;  %v2448_v52 = vmul.f32 0.2, %v2384_v30  ;;  %v2449_v43 = vmul.f32 0.2, %v2385_v50  ;;  %v2386_v45 = vadd.f32 %v3929_v11, %v2342_v12 }
 0x26a   : > { %2593 = vst [vmem:[%s4091_s4 + $0x58] sm:$0xff] %v2880_v22  ;;  %v2479_v54 = vsel %vm2415_vm9, %v2383_v8, %v2447_v41  ;;  %v2387_v16 = vadd.f32 %v3931_v13, %v2343_v35  ;;  %v2344_v62 = vmul.f32 %v3925_v6, %v3901_v58  ;;  %v2345_v49 = vmul.f32 %v3927_v38, %v3905_v20 }
 0x26b   : > { %v2881_v24 = vpack.c.bf16 %v2479_v54, %v2478_v29  ;;  %v2480_v59 = vsel %vm2416_vm10, %v2384_v30, %v2448_v52  ;;  %v2481_v39 = vsel %vm2417_vm11, %v2385_v50, %v2449_v43  ;;  %vm2418_vm12 = vcmp.ge.f32.partialorder %v2386_v45, 0.0 }
 0x26c   : > { %v2882_v26 = vpack.c.bf16 %v2481_v39, %v2480_v59  ;;  %vm2419_vm13 = vcmp.ge.f32.partialorder %v2387_v16, 0.0  ;;  %v2450_v56 = vmul.f32 0.2, %v2386_v45  ;;  %v2451_v61 = vmul.f32 0.2, %v2387_v16 }
 0x26d   : > { %2594 = vst [vmem:[%s4091_s4 + $0x60] sm:$0xff] %v2881_v24  ;;  %v2388_v51 = vadd.f32 %v3929_v11, %v2344_v62  ;;  %v2389_v47 = vadd.f32 %v3931_v13, %v2345_v49 }
 0x26e   : > { %2595 = vst [vmem:[%s4091_s4 + $0x68] sm:$0xff] %v2882_v26  ;;  %v2482_v58 = vsel %vm2418_vm12, %v2386_v45, %v2450_v56  ;;  %v2483_v20 = vsel %vm2419_vm13, %v2387_v16, %v2451_v61 }
 0x26f   : > { %v2883_v6 = vpack.c.bf16 %v2483_v20, %v2482_v58  ;;  %vm2420_vm14 = vcmp.ge.f32.partialorder %v2388_v51, 0.0  ;;  %vm2421_vm15 = vcmp.ge.f32.partialorder %v2389_v47, 0.0  ;;  %v2452_v38 = vmul.f32 0.2, %v2388_v51 }
 0x270   : > { %v2453_v60 = vmul.f32 0.2, %v2389_v47 }
 0x271   : > { %2596 = vst [vmem:[%s4091_s4 + $0x70] sm:$0xff] %v2883_v6  ;;  %v2484_v53 = vsel %vm2420_vm14, %v2388_v51, %v2452_v38 }
 0x272   : > { %v2485_v2 = vsel %vm2421_vm15, %v2389_v47, %v2453_v60 }
 0x273   : > { %v2884_v11 = vpack.c.bf16 %v2485_v2, %v2484_v53 }
 0x275   : > { %2597 = vst [vmem:[%s4091_s4 + $0x78] sm:$0xff] %v2884_v11 }
 0x276 PF: > { %p11_p11 = scmp.ge.s32.totalorder %s3273_s19, 4   ;;  %s4092_s15 = smov %s3221_s16 }
 0x277   : > { %s4093_s16 = smov %s3282_s22  ;;  %s4094_s17 = smov %s3273_s19 }
 0x278   :  { %13 = sbr.rel (!%p11_p11) target bundleno = 2 (0x2), region = 101 }

// kernel: discriminator_forward.7
= control target key start
LH: loop header
LB: loop body
LE: loop exit
PB: predicated region body
PF: predicated region fallthrough
CT: control target
= control target key end

     0   :  { %s6409_s15 = smov 0   ;;  %s6411_s16 = smov 0   ;;  %s7282_s0 = inlined_call_operand.vmem [shape: bf16[32,4096], index: 0, kind: input, shape index: {}]   ;;  %s7283_s1 = inlined_call_operand.vmem [shape: bf16[4096,512], index: 1, kind: input, shape index: {}]   ;;  %s7284_s2 = inlined_call_operand.vmem [shape: f32[1,512], index: 2, kind: input, shape index: {}]   ;;  %s7285_s3 = inlined_call_operand.vmem [shape: f32[1,512], index: 3, kind: input, shape index: {}]   ;;  %s7286_s4 = inlined_call_operand.vmem [shape: bf16[32,512], index: 4, kind: output, shape index: {}]  }
   0x1   :  { %s6413_s17 = smov 0  }
   0x2 LB: > { %s6425_s18 = sadd.s32 4294967295, %s6380_s17   ;;  %s6428_s19 = sadd.s32 1, %s6380_s17   ;;  %s6380_s17 = sphi %s6413_s17, %s7289_s17   ;;  %s6376_s16 = sphi %s6411_s16, %s7288_s16   ;;  %s6372_s15 = sphi %s6409_s15, %s7287_s15  }
   0x3   : > { %s18_s20 = ssub.s32 %s6380_s17, %s6428_s19  ;;  %s21_s21 = sadd.s32 1, %s6376_s16 }
   0x4   : > { %p19_p0 = scmp.eq.s32.totalorder %s18_s20, 0  ;;  %p28_p1 = scmp.ne.s32.totalorder %s6376_s16, %s6372_s15 }
   0x5   : > { %p29_p2 = scmp.eq.s32.totalorder %s6380_s17, 0  ;;  %p4869_p4 = scmp.ge.s32.totalorder %s6380_s17, 2 }
   0x6   : > { %s6437_s22 = scalar_select %p19_p0, %s6376_s16, %s21_s21  }
   0x7   : > { %p30_p3 = por %p29_p2, %p28_p1  ;;  %149 = sbr.rel (%p4869_p4) target bundleno = 34 (0x22), region = 24 }
   0xe   : > { %152 = sbr.rel (!%p30_p3) target bundleno = 34 (0x22), region = 28  ;;  %s154_s23 = sand.u32 (%p30_p3), 1, %s6376_s16  }
   0xf   : > { %s5434_s24 = sshll.u32 (%p30_p3), %s6380_s17, 6  ;;  %s4870_s25 = sshll.u32 (%p30_p3), %s154_s23, 8 }
  0x10   : > { %s6445_s28 = scalar_lea.vmem (%p30_p3), %s7282_s0, %s5434_s24  ;;  %s6450_s29 = scalar_lea.vmem (%p30_p3), [#allocation3], %s4870_s25 }
  0x11   : > { %v172_v0 = vld [vmem:[%s6445_s28] sm:$0xff] (%p30_p3)  ;;  %v174_v1 = vld [vmem:[%s6445_s28 + $0x8] sm:$0xff] (%p30_p3)  ;;  %v176_v2 = vld [vmem:[%s6445_s28 + $0x10] sm:$0xff] (%p30_p3) }
  0x12   : > { %173 = vst [vmem:[%s6450_s29] sm:$0xff] (%p30_p3), %v172_v0  ;;  %175 = vst [vmem:[%s6450_s29 + $0x8] sm:$0xff] (%p30_p3), %v174_v1  ;;  %v178_v3 = vld [vmem:[%s6445_s28 + $0x18] sm:$0xff] (%p30_p3)  ;;  %v180_v4 = vld [vmem:[%s6445_s28 + $0x20] sm:$0xff] (%p30_p3) }
  0x13   : > { %177 = vst [vmem:[%s6450_s29 + $0x10] sm:$0xff] (%p30_p3), %v176_v2  ;;  %v182_v5 = vld [vmem:[%s6445_s28 + $0x28] sm:$0xff] (%p30_p3)  ;;  %179 = vst [vmem:[%s6450_s29 + $0x18] sm:$0xff] (%p30_p3), %v178_v3  ;;  %v184_v6 = vld [vmem:[%s6445_s28 + $0x30] sm:$0xff] (%p30_p3) }
  0x14   : > { %181 = vst [vmem:[%s6450_s29 + $0x20] sm:$0xff] (%p30_p3), %v180_v4  ;;  %183 = vst [vmem:[%s6450_s29 + $0x28] sm:$0xff] (%p30_p3), %v182_v5  ;;  %v186_v7 = vld [vmem:[%s6445_s28 + $0x38] sm:$0xff] (%p30_p3)  ;;  %v188_v8 = vld [vmem:[%s6445_s28 + $0x80] sm:$0xff] (%p30_p3) }
  0x15   : > { %185 = vst [vmem:[%s6450_s29 + $0x30] sm:$0xff] %v184_v6  ;;  %187 = vst [vmem:[%s6450_s29 + $0x38] sm:$0xff] %v186_v7  ;;  %v190_v9 = vld [vmem:[%s6445_s28 + $0x88] sm:$0xff]  ;;  %v192_v10 = vld [vmem:[%s6445_s28 + $0x90] sm:$0xff] }
  0x16   : > { %189 = vst [vmem:[%s6450_s29 + $0x40] sm:$0xff] %v188_v8  ;;  %v194_v11 = vld [vmem:[%s6445_s28 + $0x98] sm:$0xff]  ;;  %191 = vst [vmem:[%s6450_s29 + $0x48] sm:$0xff] %v190_v9  ;;  %v196_v12 = vld [vmem:[%s6445_s28 + $0xa0] sm:$0xff] }
  0x17   : > { %193 = vst [vmem:[%s6450_s29 + $0x50] sm:$0xff] %v192_v10  ;;  %195 = vst [vmem:[%s6450_s29 + $0x58] sm:$0xff] %v194_v11  ;;  %v198_v13 = vld [vmem:[%s6445_s28 + $0xa8] sm:$0xff]  ;;  %v200_v14 = vld [vmem:[%s6445_s28 + $0xb0] sm:$0xff] }
  0x18   : > { %197 = vst [vmem:[%s6450_s29 + $0x60] sm:$0xff] %v196_v12  ;;  %199 = vst [vmem:[%s6450_s29 + $0x68] sm:$0xff] %v198_v13  ;;  %v202_v15 = vld [vmem:[%s6445_s28 + $0xb8] sm:$0xff]  ;;  %v204_v16 = vld [vmem:[%s6445_s28 + $0x100] sm:$0xff] }
  0x19   : > { %201 = vst [vmem:[%s6450_s29 + $0x70] sm:$0xff] %v200_v14  ;;  %v206_v17 = vld [vmem:[%s6445_s28 + $0x108] sm:$0xff]  ;;  %203 = vst [vmem:[%s6450_s29 + $0x78] sm:$0xff] %v202_v15  ;;  %v208_v18 = vld [vmem:[%s6445_s28 + $0x110] sm:$0xff] }
  0x1a   : > { %205 = vst [vmem:[%s6450_s29 + $0x80] sm:$0xff] %v204_v16  ;;  %207 = vst [vmem:[%s6450_s29 + $0x88] sm:$0xff] %v206_v17  ;;  %v210_v19 = vld [vmem:[%s6445_s28 + $0x118] sm:$0xff]  ;;  %v212_v20 = vld [vmem:[%s6445_s28 + $0x120] sm:$0xff] }
  0x1b   : > { %209 = vst [vmem:[%s6450_s29 + $0x90] sm:$0xff] %v208_v18  ;;  %211 = vst [vmem:[%s6450_s29 + $0x98] sm:$0xff] %v210_v19  ;;  %v214_v21 = vld [vmem:[%s6445_s28 + $0x128] sm:$0xff]  ;;  %v216_v22 = vld [vmem:[%s6445_s28 + $0x130] sm:$0xff] }
  0x1c   : > { %213 = vst [vmem:[%s6450_s29 + $0xa0] sm:$0xff] %v212_v20  ;;  %v218_v23 = vld [vmem:[%s6445_s28 + $0x138] sm:$0xff]  ;;  %215 = vst [vmem:[%s6450_s29 + $0xa8] sm:$0xff] %v214_v21  ;;  %v220_v24 = vld [vmem:[%s6445_s28 + $0x180] sm:$0xff] }
  0x1d   : > { %217 = vst [vmem:[%s6450_s29 + $0xb0] sm:$0xff] %v216_v22  ;;  %219 = vst [vmem:[%s6450_s29 + $0xb8] sm:$0xff] %v218_v23  ;;  %v222_v25 = vld [vmem:[%s6445_s28 + $0x188] sm:$0xff]  ;;  %v224_v26 = vld [vmem:[%s6445_s28 + $0x190] sm:$0xff] }
  0x1e   : > { %221 = vst [vmem:[%s6450_s29 + $0xc0] sm:$0xff] %v220_v24  ;;  %223 = vst [vmem:[%s6450_s29 + $0xc8] sm:$0xff] %v222_v25  ;;  %v226_v27 = vld [vmem:[%s6445_s28 + $0x198] sm:$0xff]  ;;  %v228_v28 = vld [vmem:[%s6445_s28 + $0x1a0] sm:$0xff] }
  0x1f   : > { %225 = vst [vmem:[%s6450_s29 + $0xd0] sm:$0xff] %v224_v26  ;;  %v230_v29 = vld [vmem:[%s6445_s28 + $0x1a8] sm:$0xff]  ;;  %227 = vst [vmem:[%s6450_s29 + $0xd8] sm:$0xff] %v226_v27  ;;  %v232_v30 = vld [vmem:[%s6445_s28 + $0x1b0] sm:$0xff] }
  0x20   : > { %229 = vst [vmem:[%s6450_s29 + $0xe0] sm:$0xff] %v228_v28  ;;  %231 = vst [vmem:[%s6450_s29 + $0xe8] sm:$0xff] %v230_v29  ;;  %v234_v31 = vld [vmem:[%s6445_s28 + $0x1b8] sm:$0xff] }
  0x21   : > { %233 = vst [vmem:[%s6450_s29 + $0xf0] sm:$0xff] %v232_v30  ;;  %235 = vst [vmem:[%s6450_s29 + $0xf8] sm:$0xff] %v234_v31 }
  0x22 PF: > { %p4873_p5 = scmp.ge.s32.totalorder %s6380_s17, 1  ;;  %p250_p6 = scmp.lt.s32.totalorder %s6380_s17, 3 }
  0x24   : > { %p251_p7 = pnand %p4873_p5, %p250_p6 }
  0x25   : > { %s257_s30 = sand.u32 (!%p251_p7), 1, %s6372_s15   ;;  %s4875_s5 = sshll.u32 (!%p251_p7), %s6425_s18, 8 }
  0x26   : > { %254 = sbr.rel (%p251_p7) target bundleno = 900 (0x384), region = 55  ;;  %s4874_s6 = sshll.u32 (!%p251_p7), %s257_s30, 8 }
  0x27   : > { %p285_p8 = scmp.lt.s32.totalorder (!%p251_p7), %s4875_s5, 511  ;;  %s6522_s11 = scalar_lea.vmem (!%p251_p7), [#allocation3], %s4874_s6 }
  0x28   : > { %p4878_p9 = scmp.ne.s32.totalorder (!%p251_p7), %s6425_s18, 0 }
  0x2d   : > { %s7291_s5 = smov (!%p285_p8, %s4875_s5), 511  ;;  %294 = sbr.rel (%p4878_p9) target bundleno = 55 (0x37), region = 63 }
  0x2e   : > { %s5435_s7 = sshll.u32 %s7291_s5, 4  ;;  %v6382_v32 = vmov (!%p4878_p9), 0.0  }
  0x2f   : > { %s6520_s10 = scalar_lea.vmem %s7283_s1, %s5435_s7  ;;  %295 = vst [vmem:[#allocation2] sm:$0xff] (!%p4878_p9), %v6382_v32  ;;  %296 = vst [vmem:[#allocation2 + $0x8] sm:$0xff] (!%p4878_p9), %v6382_v32 }
  0x30   : > { %297 = vst [vmem:[#allocation2 + $0x10] sm:$0xff] (!%p4878_p9), %v6382_v32  ;;  %298 = vst [vmem:[#allocation2 + $0x18] sm:$0xff] (!%p4878_p9), %v6382_v32 }
  0x31   : > { %299 = vst [vmem:[#allocation2 + $0x20] sm:$0xff] (!%p4878_p9), %v6382_v32  ;;  %300 = vst [vmem:[#allocation2 + $0x28] sm:$0xff] (!%p4878_p9), %v6382_v32 }
  0x32   : > { %301 = vst [vmem:[#allocation2 + $0x30] sm:$0xff] (!%p4878_p9), %v6382_v32  ;;  %302 = vst [vmem:[#allocation2 + $0x38] sm:$0xff] (!%p4878_p9), %v6382_v32 }
  0x33   : > { %303 = vst [vmem:[#allocation2 + $0x40] sm:$0xff] (!%p4878_p9), %v6382_v32  ;;  %304 = vst [vmem:[#allocation2 + $0x48] sm:$0xff] (!%p4878_p9), %v6382_v32 }
  0x34   : > { %305 = vst [vmem:[#allocation2 + $0x50] sm:$0xff] %v6382_v32  ;;  %306 = vst [vmem:[#allocation2 + $0x58] sm:$0xff] %v6382_v32 }
  0x35   : > { %307 = vst [vmem:[#allocation2 + $0x60] sm:$0xff] %v6382_v32  ;;  %308 = vst [vmem:[#allocation2 + $0x68] sm:$0xff] %v6382_v32 }
  0x36   : > { %309 = vst [vmem:[#allocation2 + $0x70] sm:$0xff] %v6382_v32  ;;  %310 = vst [vmem:[#allocation2 + $0x78] sm:$0xff] %v6382_v32 }
  0x37 PF: > { %v5582_v33 = vld [vmem:[%s6520_s10 + $0x4] ss:$16 sps:$4 sm:$0xff]   ;;  %v5584_v34 = vld [vmem:[%s6520_s10 + $0xc] ss:$16 sps:$4 sm:$0xff]   ;;  %v5586_v35 = vld [vmem:[%s6520_s10] ss:$16 sps:$4 sm:$0xff]  }
  0x38   : > { %3591 = vmatprep.subr.bf16.mxu0 %v5582_v33  ;;  %v5587_v36 = vld [vmem:[%s6520_s10 + $0x8] ss:$16 sps:$4 sm:$0xff]   ;;  %4015 = vmatprep.subr.bf16.mxu1 %v5584_v34  ;;  %v5588_v37 = vld [vmem:[%s6520_s10 + $0x24] ss:$16 sps:$4 sm:$0xff]   ;;  %v5590_v38 = vld [vmem:[%s6520_s10 + $0x2c] ss:$16 sps:$4 sm:$0xff]  }
  0x39   : > { %3592 = vmatpush1.bf16.msra.mxu0 %v5586_v35  ;;  %4016 = vmatpush1.bf16.msra.mxu1 %v5587_v36  ;;  %v5592_v39 = vld [vmem:[%s6520_s10 + $0x20] ss:$16 sps:$4 sm:$0xff]   ;;  %v5593_v40 = vld [vmem:[%s6520_s10 + $0x28] ss:$16 sps:$4 sm:$0xff]   ;;  %v5594_v41 = vld [vmem:[%s6520_s10 + $0x44] ss:$16 sps:$4 sm:$0xff]  }
  0x3a   : > { %3593 = vmatprep.subr.bf16.mxu0 %v5588_v37  ;;  %4017 = vmatprep.subr.bf16.mxu1 %v5590_v38  ;;  %v5596_v42 = vld [vmem:[%s6520_s10 + $0x4c] ss:$16 sps:$4 sm:$0xff]   ;;  %v5598_v43 = vld [vmem:[%s6520_s10 + $0x40] ss:$16 sps:$4 sm:$0xff]   ;;  %v5599_v44 = vld [vmem:[%s6520_s10 + $0x48] ss:$16 sps:$4 sm:$0xff]  }
  0x3b   : > { %v5600_v45 = vld [vmem:[%s6520_s10 + $0x64] ss:$16 sps:$4 sm:$0xff]   ;;  %v5602_v46 = vld [vmem:[%s6520_s10 + $0x6c] ss:$16 sps:$4 sm:$0xff]   ;;  %v5604_v47 = vld [vmem:[%s6520_s10 + $0x60] ss:$16 sps:$4 sm:$0xff]  }
  0x3c   : > { %v5605_v48 = vld [vmem:[%s6520_s10 + $0x68] ss:$16 sps:$4 sm:$0xff]   ;;  %v5606_v49 = vld [vmem:[%s6520_s10 + $0x84] ss:$16 sps:$4 sm:$0xff]   ;;  %v5608_v50 = vld [vmem:[%s6520_s10 + $0x8c] ss:$16 sps:$4 sm:$0xff]  }
  0x3d   : > { %3594 = vmatpush1.bf16.msra.mxu0 %v5592_v39  ;;  %4018 = vmatpush1.bf16.msra.mxu1 %v5593_v40  ;;  %v5610_v51 = vld [vmem:[%s6520_s10 + $0x80] ss:$16 sps:$4 sm:$0xff]   ;;  %v5611_v52 = vld [vmem:[%s6520_s10 + $0x88] ss:$16 sps:$4 sm:$0xff]   ;;  %v5612_v53 = vld [vmem:[%s6520_s10 + $0xa4] ss:$16 sps:$4 sm:$0xff]  }
  0x3e   : > { %3595 = vmatprep.subr.bf16.mxu0 %v5594_v41  ;;  %4019 = vmatprep.subr.bf16.mxu1 %v5596_v42  ;;  %v5614_v54 = vld [vmem:[%s6520_s10 + $0xac] ss:$16 sps:$4 sm:$0xff]   ;;  %v5616_v55 = vld [vmem:[%s6520_s10 + $0xa0] ss:$16 sps:$4 sm:$0xff]   ;;  %v5617_v56 = vld [vmem:[%s6520_s10 + $0xa8] ss:$16 sps:$4 sm:$0xff]  }
  0x3f   : > { %v5618_v57 = vld [vmem:[%s6520_s10 + $0xc4] ss:$16 sps:$4 sm:$0xff]   ;;  %v5620_v58 = vld [vmem:[%s6520_s10 + $0xcc] ss:$16 sps:$4 sm:$0xff]   ;;  %v5622_v59 = vld [vmem:[%s6520_s10 + $0xc0] ss:$16 sps:$4 sm:$0xff]  }
  0x40   : > { %v5623_v60 = vld [vmem:[%s6520_s10 + $0xc8] ss:$16 sps:$4 sm:$0xff]   ;;  %v5624_v61 = vld [vmem:[%s6520_s10 + $0xe4] ss:$16 sps:$4 sm:$0xff]   ;;  %v5626_v62 = vld [vmem:[%s6520_s10 + $0xec] ss:$16 sps:$4 sm:$0xff]  }
  0x41   : > { %3596 = vmatpush1.bf16.msra.mxu0 %v5598_v43  ;;  %4020 = vmatpush1.bf16.msra.mxu1 %v5599_v44  ;;  %v5628_v63 = vld [vmem:[%s6520_s10 + $0xe0] ss:$16 sps:$4 sm:$0xff]   ;;  %v5629_v0 = vld [vmem:[%s6520_s10 + $0xe8] ss:$16 sps:$4 sm:$0xff]   ;;  %v5630_v1 = vld [vmem:[%s6520_s10 + $0x104] ss:$16 sps:$4 sm:$0xff]  }
  0x42   : > { %3597 = vmatprep.subr.bf16.mxu0 %v5600_v45  ;;  %4021 = vmatprep.subr.bf16.mxu1 %v5602_v46  ;;  %v5632_v2 = vld [vmem:[%s6520_s10 + $0x10c] ss:$16 sps:$4 sm:$0xff]   ;;  %v5634_v3 = vld [vmem:[%s6520_s10 + $0x100] ss:$16 sps:$4 sm:$0xff]   ;;  %v5635_v4 = vld [vmem:[%s6520_s10 + $0x108] ss:$16 sps:$4 sm:$0xff]  }
  0x43   : > { %v5636_v5 = vld [vmem:[%s6520_s10 + $0x124] ss:$16 sps:$4 sm:$0xff]   ;;  %v5638_v6 = vld [vmem:[%s6520_s10 + $0x12c] ss:$16 sps:$4 sm:$0xff]   ;;  %v5640_v7 = vld [vmem:[%s6520_s10 + $0x120] ss:$16 sps:$4 sm:$0xff]  }
  0x44   : > { %v5641_v8 = vld [vmem:[%s6520_s10 + $0x128] ss:$16 sps:$4 sm:$0xff]   ;;  %v5642_v9 = vld [vmem:[%s6520_s10 + $0x144] ss:$16 sps:$4 sm:$0xff]   ;;  %v5644_v10 = vld [vmem:[%s6520_s10 + $0x14c] ss:$16 sps:$4 sm:$0xff]  }
  0x45   : > { %3598 = vmatpush1.bf16.msra.mxu0 %v5604_v47  ;;  %4022 = vmatpush1.bf16.msra.mxu1 %v5605_v48  ;;  %v5646_v11 = vld [vmem:[%s6520_s10 + $0x140] ss:$16 sps:$4 sm:$0xff]   ;;  %v5647_v12 = vld [vmem:[%s6520_s10 + $0x148] ss:$16 sps:$4 sm:$0xff]   ;;  %v5648_v13 = vld [vmem:[%s6520_s10 + $0x164] ss:$16 sps:$4 sm:$0xff]  }
  0x46   : > { %3599 = vmatprep.subr.bf16.mxu0 %v5606_v49  ;;  %4023 = vmatprep.subr.bf16.mxu1 %v5608_v50  ;;  %v5650_v14 = vld [vmem:[%s6520_s10 + $0x16c] ss:$16 sps:$4 sm:$0xff]   ;;  %v327_v15 = vld [vmem:[%s6522_s11] sm:$0xff]  ;;  %v5653_v18 = vld [vmem:[%s6520_s10 + $0x168] ss:$16 sps:$4 sm:$0xff]   ;;  %p5423_p10 = scmp.ne.s32.totalorder %s6425_s18, 1 }
  0x47   : > { %v335_v16 = vld [vmem:[%s6522_s11 + $0x40] sm:$0xff]  ;;  %v5656_v21 = vld [vmem:[%s6520_s10 + $0x18c] ss:$16 sps:$4 sm:$0xff]   ;;  %v5659_v23 = vld [vmem:[%s6520_s10 + $0x188] ss:$16 sps:$4 sm:$0xff]  }
  0x48   : > { %v5652_v17 = vld [vmem:[%s6520_s10 + $0x160] ss:$16 sps:$4 sm:$0xff]   ;;  %v4880_v19 = vcombine.high %v327_v15, %v335_v16  ;;  %v5654_v20 = vld [vmem:[%s6520_s10 + $0x184] ss:$16 sps:$4 sm:$0xff]   ;;  %v5662_v25 = vld [vmem:[%s6520_s10 + $0x1ac] ss:$16 sps:$4 sm:$0xff]   ;;  %v4879_v38 = vcombine.low %v327_v15, %v335_v16 }
  0x49   : > { %3600 = vmatpush1.bf16.msra.mxu0 %v5610_v51  ;;  %4024 = vmatpush1.bf16.msra.mxu1 %v5611_v52  ;;  %v5658_v22 = vld [vmem:[%s6520_s10 + $0x180] ss:$16 sps:$4 sm:$0xff]   ;;  %v5660_v24 = vld [vmem:[%s6520_s10 + $0x1a4] ss:$16 sps:$4 sm:$0xff]   ;;  %v5665_v27 = vld [vmem:[%s6520_s10 + $0x1a8] ss:$16 sps:$4 sm:$0xff]  }
  0x4a   : > { %3601 = vmatprep.subr.bf16.mxu0 %v5612_v53  ;;  %4025 = vmatprep.subr.bf16.mxu1 %v5614_v54  ;;  %v5664_v26 = vld [vmem:[%s6520_s10 + $0x1a0] ss:$16 sps:$4 sm:$0xff]   ;;  %v5666_v28 = vld [vmem:[%s6520_s10 + $0x1c4] ss:$16 sps:$4 sm:$0xff]   ;;  %v5668_v29 = vld [vmem:[%s6520_s10 + $0x1cc] ss:$16 sps:$4 sm:$0xff]  }
  0x4b   : > { %3623 = vmatprep.mubr.bf16.mxu0 %v4880_v19  ;;  %4047 = vmatprep.mubr.bf16.mxu1 %v4880_v19  ;;  %v5670_v30 = vld [vmem:[%s6520_s10 + $0x1c0] ss:$16 sps:$4 sm:$0xff]   ;;  %v5671_v31 = vld [vmem:[%s6520_s10 + $0x1c8] ss:$16 sps:$4 sm:$0xff]   ;;  %v5672_v32 = vld [vmem:[%s6520_s10 + $0x1e4] ss:$16 sps:$4 sm:$0xff]  }
  0x4c   : > { %v5674_v33 = vld [vmem:[%s6520_s10 + $0x1ec] ss:$16 sps:$4 sm:$0xff]   ;;  %v5676_v34 = vld [vmem:[%s6520_s10 + $0x1e0] ss:$16 sps:$4 sm:$0xff]   ;;  %v5677_v35 = vld [vmem:[%s6520_s10 + $0x1e8] ss:$16 sps:$4 sm:$0xff]  }
  0x4d   : > { %3602 = vmatpush1.bf16.msra.mxu0 %v5616_v55  ;;  %4026 = vmatpush1.bf16.msra.mxu1 %v5617_v56  ;;  %v5680_v36 = vld [vmem:[%s6520_s10 + $0x204] ss:$16 sps:$4 sm:$0xff]   ;;  %v5683_v37 = vld [vmem:[%s6520_s10 + $0x20c] ss:$16 sps:$4 sm:$0xff]   ;;  %v5678_v39 = vld [vmem:[%s6520_s10 + $0x200] ss:$16 sps:$4 sm:$0xff]  }
  0x4e   : > { %3603 = vmatprep.subr.bf16.mxu0 %v5618_v57  ;;  %4027 = vmatprep.subr.bf16.mxu1 %v5620_v58  ;;  %v5681_v40 = vld [vmem:[%s6520_s10 + $0x208] ss:$16 sps:$4 sm:$0xff]   ;;  %v5686_v41 = vld [vmem:[%s6520_s10 + $0x224] ss:$16 sps:$4 sm:$0xff]   ;;  %v5689_v42 = vld [vmem:[%s6520_s10 + $0x22c] ss:$16 sps:$4 sm:$0xff]  }
  0x4f   : > { %v5684_v43 = vld [vmem:[%s6520_s10 + $0x220] ss:$16 sps:$4 sm:$0xff]   ;;  %v5687_v44 = vld [vmem:[%s6520_s10 + $0x228] ss:$16 sps:$4 sm:$0xff]   ;;  %v5692_v45 = vld [vmem:[%s6520_s10 + $0x244] ss:$16 sps:$4 sm:$0xff]  }
  0x50   : > { %v5695_v46 = vld [vmem:[%s6520_s10 + $0x24c] ss:$16 sps:$4 sm:$0xff]   ;;  %v5690_v47 = vld [vmem:[%s6520_s10 + $0x240] ss:$16 sps:$4 sm:$0xff]   ;;  %v5693_v48 = vld [vmem:[%s6520_s10 + $0x248] ss:$16 sps:$4 sm:$0xff]  }
  0x51   : > { %3604 = vmatpush1.bf16.msra.mxu0 %v5622_v59  ;;  %4028 = vmatpush1.bf16.msra.mxu1 %v5623_v60  ;;  %v5698_v49 = vld [vmem:[%s6520_s10 + $0x264] ss:$16 sps:$4 sm:$0xff]   ;;  %v5701_v50 = vld [vmem:[%s6520_s10 + $0x26c] ss:$16 sps:$4 sm:$0xff]   ;;  %v5696_v51 = vld [vmem:[%s6520_s10 + $0x260] ss:$16 sps:$4 sm:$0xff]  }
  0x52   : > { %3605 = vmatprep.subr.bf16.mxu0 %v5624_v61  ;;  %4029 = vmatprep.subr.bf16.mxu1 %v5626_v62  ;;  %v5699_v52 = vld [vmem:[%s6520_s10 + $0x268] ss:$16 sps:$4 sm:$0xff]   ;;  %v5704_v53 = vld [vmem:[%s6520_s10 + $0x284] ss:$16 sps:$4 sm:$0xff]   ;;  %v5707_v54 = vld [vmem:[%s6520_s10 + $0x28c] ss:$16 sps:$4 sm:$0xff]  }
  0x53   : > { %v5702_v55 = vld [vmem:[%s6520_s10 + $0x280] ss:$16 sps:$4 sm:$0xff]   ;;  %v5705_v56 = vld [vmem:[%s6520_s10 + $0x288] ss:$16 sps:$4 sm:$0xff]   ;;  %v5710_v57 = vld [vmem:[%s6520_s10 + $0x2a4] ss:$16 sps:$4 sm:$0xff]  }
  0x54   : > { %v5713_v58 = vld [vmem:[%s6520_s10 + $0x2ac] ss:$16 sps:$4 sm:$0xff]   ;;  %v343_v59 = vld [vmem:[%s6522_s11 + $0x80] sm:$0xff]  ;;  %v5729_v15 = vld [vmem:[%s6520_s10 + $0x308] ss:$16 sps:$4 sm:$0xff]  }
  0x55   : > { %3606 = vmatpush1.bf16.msra.mxu0 %v5628_v63  ;;  %4030 = vmatpush1.bf16.msra.mxu1 %v5629_v0  ;;  %v351_v60 = vld [vmem:[%s6522_s11 + $0xc0] sm:$0xff]  ;;  %v5711_v63 = vld [vmem:[%s6520_s10 + $0x2a8] ss:$16 sps:$4 sm:$0xff]  }
  0x56   : > { %3607 = vmatprep.subr.bf16.mxu0 %v5630_v1  ;;  %4031 = vmatprep.subr.bf16.mxu1 %v5632_v2  ;;  %v4896_v61 = vcombine.high %v343_v59, %v351_v60  ;;  %v5708_v62 = vld [vmem:[%s6520_s10 + $0x2a0] ss:$16 sps:$4 sm:$0xff]   ;;  %v4895_v0 = vcombine.low %v343_v59, %v351_v60  ;;  %v5716_v1 = vld [vmem:[%s6520_s10 + $0x2c4] ss:$16 sps:$4 sm:$0xff]   ;;  %v5719_v2 = vld [vmem:[%s6520_s10 + $0x2cc] ss:$16 sps:$4 sm:$0xff]  }
  0x57   : > { %v5734_v16 = vld [vmem:[%s6520_s10 + $0x324] ss:$16 sps:$4 sm:$0xff]   ;;  %v5735_v19 = vld [vmem:[%s6520_s10 + $0x328] ss:$16 sps:$4 sm:$0xff]  }
  0x58   : > { %v6683_v60 = vld [vmem:[%s6522_s11 + $0x50] sm:$0xff] }
  0x59   : > { %3608 = vmatpush1.bf16.msra.mxu0 %v5634_v3  ;;  %4032 = vmatpush1.bf16.msra.mxu1 %v5635_v4  ;;  %v6620_v3 = vld [vmem:[%s6522_s11 + $0x8] sm:$0xff] }
  0x5a   : > { %3609 = vmatprep.subr.bf16.mxu0 %v5636_v5  ;;  %4033 = vmatprep.subr.bf16.mxu1 %v5638_v6  ;;  %v6623_v4 = vld [vmem:[%s6522_s11 + $0x48] sm:$0xff]  ;;  %v5714_v5 = vld [vmem:[%s6520_s10 + $0x2c0] ss:$16 sps:$4 sm:$0xff]  }
  0x5b   : > { %v5717_v6 = vld [vmem:[%s6520_s10 + $0x2c8] ss:$16 sps:$4 sm:$0xff]  }
  0x5d   : > { %3610 = vmatpush1.bf16.msra.mxu0 %v5640_v7  ;;  %4034 = vmatpush1.bf16.msra.mxu1 %v5641_v8  ;;  %v4882_v7 = vcombine.high %v6620_v3, %v6623_v4  ;;  %v5722_v8 = vld [vmem:[%s6520_s10 + $0x2e4] ss:$16 sps:$4 sm:$0xff]  }
  0x5e   : > { %3611 = vmatprep.subr.bf16.mxu0 %v5642_v9  ;;  %4035 = vmatprep.subr.bf16.mxu1 %v5644_v10  ;;  %v5725_v9 = vld [vmem:[%s6520_s10 + $0x2ec] ss:$16 sps:$4 sm:$0xff]   ;;  %v5720_v10 = vld [vmem:[%s6520_s10 + $0x2e0] ss:$16 sps:$4 sm:$0xff]  }
  0x61   : > { %3612 = vmatpush1.bf16.msra.mxu0 %v5646_v11  ;;  %4036 = vmatpush1.bf16.msra.mxu1 %v5647_v12  ;;  %v5723_v11 = vld [vmem:[%s6520_s10 + $0x2e8] ss:$16 sps:$4 sm:$0xff]   ;;  %v5728_v12 = vld [vmem:[%s6520_s10 + $0x304] ss:$16 sps:$4 sm:$0xff]  }
  0x62   : > { %3613 = vmatprep.subr.bf16.mxu0 %v5648_v13  ;;  %4037 = vmatprep.subr.bf16.mxu1 %v5650_v14  ;;  %v5731_v13 = vld [vmem:[%s6520_s10 + $0x30c] ss:$16 sps:$4 sm:$0xff]   ;;  %v5726_v14 = vld [vmem:[%s6520_s10 + $0x300] ss:$16 sps:$4 sm:$0xff]  }
  0x65   : > { %3614 = vmatpush1.bf16.msra.mxu0 %v5652_v17  ;;  %4038 = vmatpush1.bf16.msra.mxu1 %v5653_v18  ;;  %v5737_v17 = vld [vmem:[%s6520_s10 + $0x32c] ss:$16 sps:$4 sm:$0xff]   ;;  %v5732_v18 = vld [vmem:[%s6520_s10 + $0x320] ss:$16 sps:$4 sm:$0xff]  }
  0x66   : > { %3615 = vmatprep.subr.bf16.mxu0 %v5654_v20  ;;  %4039 = vmatprep.subr.bf16.mxu1 %v5656_v21  ;;  %v5740_v20 = vld [vmem:[%s6520_s10 + $0x344] ss:$16 sps:$4 sm:$0xff]   ;;  %v5743_v21 = vld [vmem:[%s6520_s10 + $0x34c] ss:$16 sps:$4 sm:$0xff]  }
  0x69   : > { %3616 = vmatpush1.bf16.msra.mxu0 %v5658_v22  ;;  %4040 = vmatpush1.bf16.msra.mxu1 %v5659_v23  ;;  %v5738_v22 = vld [vmem:[%s6520_s10 + $0x340] ss:$16 sps:$4 sm:$0xff]   ;;  %v5741_v23 = vld [vmem:[%s6520_s10 + $0x348] ss:$16 sps:$4 sm:$0xff]  }
  0x6a   : > { %3617 = vmatprep.subr.bf16.mxu0 %v5660_v24  ;;  %4041 = vmatprep.subr.bf16.mxu1 %v5662_v25  ;;  %v5746_v24 = vld [vmem:[%s6520_s10 + $0x364] ss:$16 sps:$4 sm:$0xff]   ;;  %v5749_v25 = vld [vmem:[%s6520_s10 + $0x36c] ss:$16 sps:$4 sm:$0xff]  }
  0x6d   : > { %3618 = vmatpush1.bf16.msra.mxu0 %v5664_v26  ;;  %4042 = vmatpush1.bf16.msra.mxu1 %v5665_v27  ;;  %v5744_v26 = vld [vmem:[%s6520_s10 + $0x360] ss:$16 sps:$4 sm:$0xff]   ;;  %v5747_v27 = vld [vmem:[%s6520_s10 + $0x368] ss:$16 sps:$4 sm:$0xff]  }
  0x6e   : > { %3619 = vmatprep.subr.bf16.mxu0 %v5666_v28  ;;  %4043 = vmatprep.subr.bf16.mxu1 %v5668_v29  ;;  %v5752_v28 = vld [vmem:[%s6520_s10 + $0x384] ss:$16 sps:$4 sm:$0xff]   ;;  %v5755_v29 = vld [vmem:[%s6520_s10 + $0x38c] ss:$16 sps:$4 sm:$0xff]  }
  0x71   : > { %3620 = vmatpush1.bf16.msra.mxu0 %v5670_v30  ;;  %4044 = vmatpush1.bf16.msra.mxu1 %v5671_v31  ;;  %v5750_v30 = vld [vmem:[%s6520_s10 + $0x380] ss:$16 sps:$4 sm:$0xff]   ;;  %v5753_v31 = vld [vmem:[%s6520_s10 + $0x388] ss:$16 sps:$4 sm:$0xff]  }
  0x72   : > { %3621 = vmatprep.subr.bf16.mxu0 %v5672_v32  ;;  %4045 = vmatprep.subr.bf16.mxu1 %v5674_v33  ;;  %v5758_v32 = vld [vmem:[%s6520_s10 + $0x3a4] ss:$16 sps:$4 sm:$0xff]   ;;  %v5761_v33 = vld [vmem:[%s6520_s10 + $0x3ac] ss:$16 sps:$4 sm:$0xff]  }
  0x75   : > { %3622 = vmatpush1.bf16.msra.mxu0 %v5676_v34  ;;  %4046 = vmatpush1.bf16.msra.mxu1 %v5677_v35  ;;  %v5756_v34 = vld [vmem:[%s6520_s10 + $0x3a0] ss:$16 sps:$4 sm:$0xff]   ;;  %v5759_v35 = vld [vmem:[%s6520_s10 + $0x3a8] ss:$16 sps:$4 sm:$0xff]  }
  0x76   : > { %3644 = vmatprep.subr.bf16.mxu0 %v5680_v36  ;;  %4068 = vmatprep.subr.bf16.mxu1 %v5683_v37  ;;  %v5764_v36 = vld [vmem:[%s6520_s10 + $0x3c4] ss:$16 sps:$4 sm:$0xff]   ;;  %v5767_v37 = vld [vmem:[%s6520_s10 + $0x3cc] ss:$16 sps:$4 sm:$0xff]  }
  0x78   : > { %3624 = vmatmul.mubr.bf16.vlgmr.msra.gmra.mrb[0].mxu0 %v4879_v38  ;;  %4048 = vmatmul.mubr.bf16.vlgmr.msra.gmra.mrb[0].mxu1 %v4879_v38  ;;  %v5762_v38 = vld [vmem:[%s6520_s10 + $0x3c0] ss:$16 sps:$4 sm:$0xff]  }
  0x79   : > { %3645 = vmatpush1.bf16.msra.mxu0 %v5678_v39  ;;  %4069 = vmatpush1.bf16.msra.mxu1 %v5681_v40  ;;  %v5765_v39 = vld [vmem:[%s6520_s10 + $0x3c8] ss:$16 sps:$4 sm:$0xff]   ;;  %v5770_v40 = vld [vmem:[%s6520_s10 + $0x3e4] ss:$16 sps:$4 sm:$0xff]  }
  0x7a   : > { %3646 = vmatprep.subr.bf16.mxu0 %v5686_v41  ;;  %4070 = vmatprep.subr.bf16.mxu1 %v5689_v42  ;;  %v5773_v41 = vld [vmem:[%s6520_s10 + $0x3ec] ss:$16 sps:$4 sm:$0xff]   ;;  %v5768_v42 = vld [vmem:[%s6520_s10 + $0x3e0] ss:$16 sps:$4 sm:$0xff]  }
  0x7b   : > { %3633 = vmatprep.mubr.bf16.mxu0 %v4896_v61  ;;  %4057 = vmatprep.mubr.bf16.mxu1 %v4896_v61  ;;  %v5786_v61 = vld [vmem:[%s6520_s10 + $0x440] ss:$16 sps:$4 sm:$0xff]  }
  0x7d   : > { %3647 = vmatpush1.bf16.msra.mxu0 %v5684_v43  ;;  %4071 = vmatpush1.bf16.msra.mxu1 %v5687_v44  ;;  %v5771_v43 = vld [vmem:[%s6520_s10 + $0x3e8] ss:$16 sps:$4 sm:$0xff]   ;;  %v5776_v44 = vld [vmem:[%s6520_s10 + $0x404] ss:$16 sps:$4 sm:$0xff]  }
  0x7e   : > { %3648 = vmatprep.subr.bf16.mxu0 %v5692_v45  ;;  %4072 = vmatprep.subr.bf16.mxu1 %v5695_v46  ;;  %v5779_v45 = vld [vmem:[%s6520_s10 + $0x40c] ss:$16 sps:$4 sm:$0xff]   ;;  %v5774_v46 = vld [vmem:[%s6520_s10 + $0x400] ss:$16 sps:$4 sm:$0xff]  }
  0x80   : > { %3634 = vmatmul.mubr.bf16.gmra.mrb[4].mxu0 %v4895_v0  ;;  %4058 = vmatmul.mubr.bf16.gmra.mrb[4].mxu1 %v4895_v0  ;;  %v5797_v0 = vld [vmem:[%s6520_s10 + $0x46c] ss:$16 sps:$4 sm:$0xff]  }
  0x81   : > { %3649 = vmatpush1.bf16.msra.mxu0 %v5690_v47  ;;  %4073 = vmatpush1.bf16.msra.mxu1 %v5693_v48  ;;  %v5777_v47 = vld [vmem:[%s6520_s10 + $0x408] ss:$16 sps:$4 sm:$0xff]   ;;  %v4881_v48 = vcombine.low %v6620_v3, %v6623_v4  ;;  %v5800_v4 = vld [vmem:[%s6520_s10 + $0x484] ss:$16 sps:$4 sm:$0xff]  }
  0x82   : > { %3650 = vmatprep.subr.bf16.mxu0 %v5698_v49  ;;  %4074 = vmatprep.subr.bf16.mxu1 %v5701_v50  ;;  %v344_v49 = vld [vmem:[%s6522_s11 + $0x88] sm:$0xff] }
  0x83   : > { %3676 = vmatprep.mubr.bf16.mxu0 %v4882_v7  ;;  %4100 = vmatprep.mubr.bf16.mxu1 %v4882_v7  ;;  %v352_v50 = vld [vmem:[%s6522_s11 + $0xc8] sm:$0xff] }
  0x84   : > { %v4897_v59 = vcombine.low %v344_v49, %v352_v50  ;;  %v5795_v3 = vld [vmem:[%s6520_s10 + $0x468] ss:$16 sps:$4 sm:$0xff]  }
  0x85   : > { %3651 = vmatpush1.bf16.msra.mxu0 %v5696_v51  ;;  %4075 = vmatpush1.bf16.msra.mxu1 %v5699_v52  ;;  %v5782_v51 = vld [vmem:[%s6520_s10 + $0x424] ss:$16 sps:$4 sm:$0xff]   ;;  %v5785_v52 = vld [vmem:[%s6520_s10 + $0x42c] ss:$16 sps:$4 sm:$0xff]   ;;  %v5801_v7 = vld [vmem:[%s6520_s10 + $0x488] ss:$16 sps:$4 sm:$0xff]  }
  0x86   : > { %3652 = vmatprep.subr.bf16.mxu0 %v5704_v53  ;;  %4076 = vmatprep.subr.bf16.mxu1 %v5707_v54  ;;  %v4898_v53 = vcombine.high %v344_v49, %v352_v50  ;;  %v5780_v54 = vld [vmem:[%s6520_s10 + $0x420] ss:$16 sps:$4 sm:$0xff]   ;;  %v5869_v49 = vld [vmem:[%s6520_s10 + $0x5ec] ss:$16 sps:$4 sm:$0xff]  }
  0x87   : > { %v5864_v50 = vld [vmem:[%s6520_s10 + $0x5e0] ss:$16 sps:$4 sm:$0xff]  }
  0x89   : > { %3653 = vmatpush1.bf16.msra.mxu0 %v5702_v55  ;;  %4077 = vmatpush1.bf16.msra.mxu1 %v5705_v56  ;;  %v5783_v55 = vld [vmem:[%s6520_s10 + $0x428] ss:$16 sps:$4 sm:$0xff]   ;;  %v5788_v56 = vld [vmem:[%s6520_s10 + $0x444] ss:$16 sps:$4 sm:$0xff]  }
  0x8a   : > { %3654 = vmatprep.subr.bf16.mxu0 %v5710_v57  ;;  %4078 = vmatprep.subr.bf16.mxu1 %v5713_v58  ;;  %v5791_v57 = vld [vmem:[%s6520_s10 + $0x44c] ss:$16 sps:$4 sm:$0xff]   ;;  %v6680_v58 = vld [vmem:[%s6522_s11 + $0x10] sm:$0xff] }
  0x8d   : > { %3655 = vmatpush1.bf16.msra.mxu0 %v5708_v62  ;;  %4079 = vmatpush1.bf16.msra.mxu1 %v5711_v63  ;;  %v5789_v62 = vld [vmem:[%s6520_s10 + $0x448] ss:$16 sps:$4 sm:$0xff]   ;;  %v5794_v63 = vld [vmem:[%s6520_s10 + $0x464] ss:$16 sps:$4 sm:$0xff]  }
  0x8e   : > { %3656 = vmatprep.subr.bf16.mxu0 %v5716_v1  ;;  %4080 = vmatprep.subr.bf16.mxu1 %v5719_v2  ;;  %v4884_v1 = vcombine.high %v6680_v58, %v6683_v60  ;;  %v5792_v2 = vld [vmem:[%s6520_s10 + $0x460] ss:$16 sps:$4 sm:$0xff]  }
  0x91   : > { %3657 = vmatpush1.bf16.msra.mxu0 %v5714_v5  ;;  %4081 = vmatpush1.bf16.msra.mxu1 %v5717_v6  ;;  %v5803_v5 = vld [vmem:[%s6520_s10 + $0x48c] ss:$16 sps:$4 sm:$0xff]   ;;  %v5798_v6 = vld [vmem:[%s6520_s10 + $0x480] ss:$16 sps:$4 sm:$0xff]  }
  0x92   : > { %3658 = vmatprep.subr.bf16.mxu0 %v5722_v8  ;;  %4082 = vmatprep.subr.bf16.mxu1 %v5725_v9  ;;  %v5806_v8 = vld [vmem:[%s6520_s10 + $0x4a4] ss:$16 sps:$4 sm:$0xff]   ;;  %v5809_v9 = vld [vmem:[%s6520_s10 + $0x4ac] ss:$16 sps:$4 sm:$0xff]  }
  0x95   : > { %3659 = vmatpush1.bf16.msra.mxu0 %v5720_v10  ;;  %4083 = vmatpush1.bf16.msra.mxu1 %v5723_v11  ;;  %v5804_v10 = vld [vmem:[%s6520_s10 + $0x4a0] ss:$16 sps:$4 sm:$0xff]   ;;  %v5807_v11 = vld [vmem:[%s6520_s10 + $0x4a8] ss:$16 sps:$4 sm:$0xff]  }
  0x96   : > { %3660 = vmatprep.subr.bf16.mxu0 %v5728_v12  ;;  %4084 = vmatprep.subr.bf16.mxu1 %v5731_v13  ;;  %v5812_v12 = vld [vmem:[%s6520_s10 + $0x4c4] ss:$16 sps:$4 sm:$0xff]   ;;  %v5815_v13 = vld [vmem:[%s6520_s10 + $0x4cc] ss:$16 sps:$4 sm:$0xff]  }
  0x99   : > { %3661 = vmatpush1.bf16.msra.mxu0 %v5726_v14  ;;  %4085 = vmatpush1.bf16.msra.mxu1 %v5729_v15  ;;  %v5810_v14 = vld [vmem:[%s6520_s10 + $0x4c0] ss:$16 sps:$4 sm:$0xff]   ;;  %v5813_v15 = vld [vmem:[%s6520_s10 + $0x4c8] ss:$16 sps:$4 sm:$0xff]  }
  0x9a   : > { %3662 = vmatprep.subr.bf16.mxu0 %v5734_v16  ;;  %4086 = vmatprep.subr.bf16.mxu1 %v5737_v17  ;;  %v5818_v16 = vld [vmem:[%s6520_s10 + $0x4e4] ss:$16 sps:$4 sm:$0xff]   ;;  %v5821_v17 = vld [vmem:[%s6520_s10 + $0x4ec] ss:$16 sps:$4 sm:$0xff]  }
  0x9d   : > { %3663 = vmatpush1.bf16.msra.mxu0 %v5732_v18  ;;  %4087 = vmatpush1.bf16.msra.mxu1 %v5735_v19  ;;  %v5816_v18 = vld [vmem:[%s6520_s10 + $0x4e0] ss:$16 sps:$4 sm:$0xff]   ;;  %v5819_v19 = vld [vmem:[%s6520_s10 + $0x4e8] ss:$16 sps:$4 sm:$0xff]  }
  0x9e   : > { %3664 = vmatprep.subr.bf16.mxu0 %v5740_v20  ;;  %4088 = vmatprep.subr.bf16.mxu1 %v5743_v21  ;;  %v5824_v20 = vld [vmem:[%s6520_s10 + $0x504] ss:$16 sps:$4 sm:$0xff]   ;;  %v5827_v21 = vld [vmem:[%s6520_s10 + $0x50c] ss:$16 sps:$4 sm:$0xff]  }
  0xa1   : > { %3665 = vmatpush1.bf16.msra.mxu0 %v5738_v22  ;;  %4089 = vmatpush1.bf16.msra.mxu1 %v5741_v23  ;;  %v5822_v22 = vld [vmem:[%s6520_s10 + $0x500] ss:$16 sps:$4 sm:$0xff]   ;;  %v5825_v23 = vld [vmem:[%s6520_s10 + $0x508] ss:$16 sps:$4 sm:$0xff]  }
  0xa2   : > { %3666 = vmatprep.subr.bf16.mxu0 %v5746_v24  ;;  %4090 = vmatprep.subr.bf16.mxu1 %v5749_v25  ;;  %v5830_v24 = vld [vmem:[%s6520_s10 + $0x524] ss:$16 sps:$4 sm:$0xff]   ;;  %v5833_v25 = vld [vmem:[%s6520_s10 + $0x52c] ss:$16 sps:$4 sm:$0xff]  }
  0xa5   : > { %3667 = vmatpush1.bf16.msra.mxu0 %v5744_v26  ;;  %4091 = vmatpush1.bf16.msra.mxu1 %v5747_v27  ;;  %v5828_v26 = vld [vmem:[%s6520_s10 + $0x520] ss:$16 sps:$4 sm:$0xff]   ;;  %v5831_v27 = vld [vmem:[%s6520_s10 + $0x528] ss:$16 sps:$4 sm:$0xff]  }
  0xa6   : > { %3668 = vmatprep.subr.bf16.mxu0 %v5752_v28  ;;  %4092 = vmatprep.subr.bf16.mxu1 %v5755_v29  ;;  %v5836_v28 = vld [vmem:[%s6520_s10 + $0x544] ss:$16 sps:$4 sm:$0xff]   ;;  %v5839_v29 = vld [vmem:[%s6520_s10 + $0x54c] ss:$16 sps:$4 sm:$0xff]  }
  0xa9   : > { %3669 = vmatpush1.bf16.msra.mxu0 %v5750_v30  ;;  %4093 = vmatpush1.bf16.msra.mxu1 %v5753_v31  ;;  %v5834_v30 = vld [vmem:[%s6520_s10 + $0x540] ss:$16 sps:$4 sm:$0xff]   ;;  %v5837_v31 = vld [vmem:[%s6520_s10 + $0x548] ss:$16 sps:$4 sm:$0xff]  }
  0xaa   : > { %3670 = vmatprep.subr.bf16.mxu0 %v5758_v32  ;;  %4094 = vmatprep.subr.bf16.mxu1 %v5761_v33  ;;  %v5842_v32 = vld [vmem:[%s6520_s10 + $0x564] ss:$16 sps:$4 sm:$0xff]   ;;  %v5845_v33 = vld [vmem:[%s6520_s10 + $0x56c] ss:$16 sps:$4 sm:$0xff]  }
  0xad   : > { %3671 = vmatpush1.bf16.msra.mxu0 %v5756_v34  ;;  %4095 = vmatpush1.bf16.msra.mxu1 %v5759_v35  ;;  %v5840_v34 = vld [vmem:[%s6520_s10 + $0x560] ss:$16 sps:$4 sm:$0xff]   ;;  %v5843_v35 = vld [vmem:[%s6520_s10 + $0x568] ss:$16 sps:$4 sm:$0xff]  }
  0xae   : > { %3672 = vmatprep.subr.bf16.mxu0 %v5764_v36  ;;  %4096 = vmatprep.subr.bf16.mxu1 %v5767_v37  ;;  %v5848_v36 = vld [vmem:[%s6520_s10 + $0x584] ss:$16 sps:$4 sm:$0xff]   ;;  %v5851_v37 = vld [vmem:[%s6520_s10 + $0x58c] ss:$16 sps:$4 sm:$0xff]  }
  0xb1   : > { %3673 = vmatpush1.bf16.msra.mxu0 %v5762_v38  ;;  %4097 = vmatpush1.bf16.msra.mxu1 %v5765_v39  ;;  %v5846_v38 = vld [vmem:[%s6520_s10 + $0x580] ss:$16 sps:$4 sm:$0xff]   ;;  %v5849_v39 = vld [vmem:[%s6520_s10 + $0x588] ss:$16 sps:$4 sm:$0xff]  }
  0xb2   : > { %3674 = vmatprep.subr.bf16.mxu0 %v5770_v40  ;;  %4098 = vmatprep.subr.bf16.mxu1 %v5773_v41  ;;  %v5854_v40 = vld [vmem:[%s6520_s10 + $0x5a4] ss:$16 sps:$4 sm:$0xff]   ;;  %v5857_v41 = vld [vmem:[%s6520_s10 + $0x5ac] ss:$16 sps:$4 sm:$0xff]  }
  0xb5   : > { %3675 = vmatpush1.bf16.msra.mxu0 %v5768_v42  ;;  %4099 = vmatpush1.bf16.msra.mxu1 %v5771_v43  ;;  %v5852_v42 = vld [vmem:[%s6520_s10 + $0x5a0] ss:$16 sps:$4 sm:$0xff]   ;;  %v5855_v43 = vld [vmem:[%s6520_s10 + $0x5a8] ss:$16 sps:$4 sm:$0xff]  }
  0xb6   : > { %3697 = vmatprep.subr.bf16.mxu0 %v5776_v44  ;;  %4121 = vmatprep.subr.bf16.mxu1 %v5779_v45  ;;  %v5860_v44 = vld [vmem:[%s6520_s10 + $0x5c4] ss:$16 sps:$4 sm:$0xff]   ;;  %v5863_v45 = vld [vmem:[%s6520_s10 + $0x5cc] ss:$16 sps:$4 sm:$0xff]  }
  0xb8   : > { %3677 = vmatmul.mubr.bf16.vlgmr.msra.gmra.mrb[0].mxu0 %v4881_v48  ;;  %4101 = vmatmul.mubr.bf16.vlgmr.msra.gmra.mrb[0].mxu1 %v4881_v48  ;;  %v5866_v48 = vld [vmem:[%s6520_s10 + $0x5e4] ss:$16 sps:$4 sm:$0xff]  }
  0xb9   : > { %3698 = vmatpush1.bf16.msra.mxu0 %v5774_v46  ;;  %4122 = vmatpush1.bf16.msra.mxu1 %v5777_v47  ;;  %v5858_v46 = vld [vmem:[%s6520_s10 + $0x5c0] ss:$16 sps:$4 sm:$0xff]   ;;  %v5861_v47 = vld [vmem:[%s6520_s10 + $0x5c8] ss:$16 sps:$4 sm:$0xff]  }
  0xba   : > { %3699 = vmatprep.subr.bf16.mxu0 %v5782_v51  ;;  %4123 = vmatprep.subr.bf16.mxu1 %v5785_v52  ;;  %v5867_v51 = vld [vmem:[%s6520_s10 + $0x5e8] ss:$16 sps:$4 sm:$0xff]   ;;  %v5872_v52 = vld [vmem:[%s6520_s10 + $0x604] ss:$16 sps:$4 sm:$0xff]  }
  0xbb   : > { %3686 = vmatprep.mubr.bf16.mxu0 %v4898_v53  ;;  %4110 = vmatprep.mubr.bf16.mxu1 %v4898_v53  ;;  %v5875_v53 = vld [vmem:[%s6520_s10 + $0x60c] ss:$16 sps:$4 sm:$0xff]  }
  0xbd   : > { %3700 = vmatpush1.bf16.msra.mxu0 %v5780_v54  ;;  %4124 = vmatpush1.bf16.msra.mxu1 %v5783_v55  ;;  %v345_v54 = vld [vmem:[%s6522_s11 + $0x90] sm:$0xff]  ;;  %v4883_v55 = vcombine.low %v6680_v58, %v6683_v60  ;;  %v5879_v60 = vld [vmem:[%s6520_s10 + $0x628] ss:$16 sps:$4 sm:$0xff]  }
  0xbe   : > { %3701 = vmatprep.subr.bf16.mxu0 %v5788_v56  ;;  %4125 = vmatprep.subr.bf16.mxu1 %v5791_v57  ;;  %v353_v56 = vld [vmem:[%s6522_s11 + $0xd0] sm:$0xff] }
  0xbf   : > { %v5870_v57 = vld [vmem:[%s6520_s10 + $0x600] ss:$16 sps:$4 sm:$0xff]  }
  0xc0   : > { %3687 = vmatmul.mubr.bf16.gmra.mrb[4].mxu0 %v4897_v59  ;;  %4111 = vmatmul.mubr.bf16.gmra.mrb[4].mxu1 %v4897_v59  ;;  %v5873_v59 = vld [vmem:[%s6520_s10 + $0x608] ss:$16 sps:$4 sm:$0xff]   ;;  %v5876_v58 = vld [vmem:[%s6520_s10 + $0x620] ss:$16 sps:$4 sm:$0xff]  }
  0xc1   : > { %3702 = vmatpush1.bf16.msra.mxu0 %v5786_v61  ;;  %4126 = vmatpush1.bf16.msra.mxu1 %v5789_v62  ;;  %v5878_v61 = vld [vmem:[%s6520_s10 + $0x624] ss:$16 sps:$4 sm:$0xff]   ;;  %v5881_v62 = vld [vmem:[%s6520_s10 + $0x62c] ss:$16 sps:$4 sm:$0xff]  }
  0xc2   : > { %3703 = vmatprep.subr.bf16.mxu0 %v5794_v63  ;;  %4127 = vmatprep.subr.bf16.mxu1 %v5797_v0  ;;  %v4900_v63 = vcombine.high %v345_v54, %v353_v56  ;;  %v5884_v0 = vld [vmem:[%s6520_s10 + $0x644] ss:$16 sps:$4 sm:$0xff]  }
  0xc3   : > { %3729 = vmatprep.mubr.bf16.mxu0 %v4884_v1  ;;  %4153 = vmatprep.mubr.bf16.mxu1 %v4884_v1  ;;  %v5887_v1 = vld [vmem:[%s6520_s10 + $0x64c] ss:$16 sps:$4 sm:$0xff]  }
  0xc5   : > { %3704 = vmatpush1.bf16.msra.mxu0 %v5792_v2  ;;  %4128 = vmatpush1.bf16.msra.mxu1 %v5795_v3  ;;  %v6756_v2 = vld [vmem:[%s6522_s11 + $0x18] sm:$0xff]  ;;  %v4899_v3 = vcombine.low %v345_v54, %v353_v56  ;;  %v5954_v54 = vld [vmem:[%s6520_s10 + $0x7c0] ss:$16 sps:$4 sm:$0xff]   ;;  %v5962_v56 = vld [vmem:[%s6520_s10 + $0x7e4] ss:$16 sps:$4 sm:$0xff]  }
  0xc6   : > { %3705 = vmatprep.subr.bf16.mxu0 %v5800_v4  ;;  %4129 = vmatprep.subr.bf16.mxu1 %v5803_v5  ;;  %v6759_v4 = vld [vmem:[%s6522_s11 + $0x58] sm:$0xff]  ;;  %v5882_v5 = vld [vmem:[%s6520_s10 + $0x640] ss:$16 sps:$4 sm:$0xff]  }
  0xc9   : > { %3706 = vmatpush1.bf16.msra.mxu0 %v5798_v6  ;;  %4130 = vmatpush1.bf16.msra.mxu1 %v5801_v7  ;;  %v5885_v6 = vld [vmem:[%s6520_s10 + $0x648] ss:$16 sps:$4 sm:$0xff]   ;;  %v5890_v7 = vld [vmem:[%s6520_s10 + $0x664] ss:$16 sps:$4 sm:$0xff]  }
  0xca   : > { %3707 = vmatprep.subr.bf16.mxu0 %v5806_v8  ;;  %4131 = vmatprep.subr.bf16.mxu1 %v5809_v9  ;;  %v5893_v8 = vld [vmem:[%s6520_s10 + $0x66c] ss:$16 sps:$4 sm:$0xff]   ;;  %v4886_v9 = vcombine.high %v6756_v2, %v6759_v4 }
  0xcd   : > { %3708 = vmatpush1.bf16.msra.mxu0 %v5804_v10  ;;  %4132 = vmatpush1.bf16.msra.mxu1 %v5807_v11  ;;  %v5888_v10 = vld [vmem:[%s6520_s10 + $0x660] ss:$16 sps:$4 sm:$0xff]   ;;  %v5891_v11 = vld [vmem:[%s6520_s10 + $0x668] ss:$16 sps:$4 sm:$0xff]  }
  0xce   : > { %3709 = vmatprep.subr.bf16.mxu0 %v5812_v12  ;;  %4133 = vmatprep.subr.bf16.mxu1 %v5815_v13  ;;  %v5896_v12 = vld [vmem:[%s6520_s10 + $0x684] ss:$16 sps:$4 sm:$0xff]   ;;  %v5899_v13 = vld [vmem:[%s6520_s10 + $0x68c] ss:$16 sps:$4 sm:$0xff]  }
  0xd1   : > { %3710 = vmatpush1.bf16.msra.mxu0 %v5810_v14  ;;  %4134 = vmatpush1.bf16.msra.mxu1 %v5813_v15  ;;  %v5894_v14 = vld [vmem:[%s6520_s10 + $0x680] ss:$16 sps:$4 sm:$0xff]   ;;  %v5897_v15 = vld [vmem:[%s6520_s10 + $0x688] ss:$16 sps:$4 sm:$0xff]  }
  0xd2   : > { %3711 = vmatprep.subr.bf16.mxu0 %v5818_v16  ;;  %4135 = vmatprep.subr.bf16.mxu1 %v5821_v17  ;;  %v5902_v16 = vld [vmem:[%s6520_s10 + $0x6a4] ss:$16 sps:$4 sm:$0xff]   ;;  %v5905_v17 = vld [vmem:[%s6520_s10 + $0x6ac] ss:$16 sps:$4 sm:$0xff]  }
  0xd5   : > { %3712 = vmatpush1.bf16.msra.mxu0 %v5816_v18  ;;  %4136 = vmatpush1.bf16.msra.mxu1 %v5819_v19  ;;  %v5900_v18 = vld [vmem:[%s6520_s10 + $0x6a0] ss:$16 sps:$4 sm:$0xff]   ;;  %v5903_v19 = vld [vmem:[%s6520_s10 + $0x6a8] ss:$16 sps:$4 sm:$0xff]  }
  0xd6   : > { %3713 = vmatprep.subr.bf16.mxu0 %v5824_v20  ;;  %4137 = vmatprep.subr.bf16.mxu1 %v5827_v21  ;;  %v5908_v20 = vld [vmem:[%s6520_s10 + $0x6c4] ss:$16 sps:$4 sm:$0xff]   ;;  %v5911_v21 = vld [vmem:[%s6520_s10 + $0x6cc] ss:$16 sps:$4 sm:$0xff]  }
  0xd9   : > { %3714 = vmatpush1.bf16.msra.mxu0 %v5822_v22  ;;  %4138 = vmatpush1.bf16.msra.mxu1 %v5825_v23  ;;  %v5906_v22 = vld [vmem:[%s6520_s10 + $0x6c0] ss:$16 sps:$4 sm:$0xff]   ;;  %v5909_v23 = vld [vmem:[%s6520_s10 + $0x6c8] ss:$16 sps:$4 sm:$0xff]  }
  0xda   : > { %3715 = vmatprep.subr.bf16.mxu0 %v5830_v24  ;;  %4139 = vmatprep.subr.bf16.mxu1 %v5833_v25  ;;  %v5914_v24 = vld [vmem:[%s6520_s10 + $0x6e4] ss:$16 sps:$4 sm:$0xff]   ;;  %v5917_v25 = vld [vmem:[%s6520_s10 + $0x6ec] ss:$16 sps:$4 sm:$0xff]  }
  0xdd   : > { %3716 = vmatpush1.bf16.msra.mxu0 %v5828_v26  ;;  %4140 = vmatpush1.bf16.msra.mxu1 %v5831_v27  ;;  %v5912_v26 = vld [vmem:[%s6520_s10 + $0x6e0] ss:$16 sps:$4 sm:$0xff]   ;;  %v5915_v27 = vld [vmem:[%s6520_s10 + $0x6e8] ss:$16 sps:$4 sm:$0xff]  }
  0xde   : > { %3717 = vmatprep.subr.bf16.mxu0 %v5836_v28  ;;  %4141 = vmatprep.subr.bf16.mxu1 %v5839_v29  ;;  %v5920_v28 = vld [vmem:[%s6520_s10 + $0x704] ss:$16 sps:$4 sm:$0xff]   ;;  %v5923_v29 = vld [vmem:[%s6520_s10 + $0x70c] ss:$16 sps:$4 sm:$0xff]  }
  0xe1   : > { %3718 = vmatpush1.bf16.msra.mxu0 %v5834_v30  ;;  %4142 = vmatpush1.bf16.msra.mxu1 %v5837_v31  ;;  %v5918_v30 = vld [vmem:[%s6520_s10 + $0x700] ss:$16 sps:$4 sm:$0xff]   ;;  %v5921_v31 = vld [vmem:[%s6520_s10 + $0x708] ss:$16 sps:$4 sm:$0xff]  }
  0xe2   : > { %3719 = vmatprep.subr.bf16.mxu0 %v5842_v32  ;;  %4143 = vmatprep.subr.bf16.mxu1 %v5845_v33  ;;  %v5926_v32 = vld [vmem:[%s6520_s10 + $0x724] ss:$16 sps:$4 sm:$0xff]   ;;  %v5929_v33 = vld [vmem:[%s6520_s10 + $0x72c] ss:$16 sps:$4 sm:$0xff]  }
  0xe5   : > { %3720 = vmatpush1.bf16.msra.mxu0 %v5840_v34  ;;  %4144 = vmatpush1.bf16.msra.mxu1 %v5843_v35  ;;  %v5924_v34 = vld [vmem:[%s6520_s10 + $0x720] ss:$16 sps:$4 sm:$0xff]   ;;  %v5927_v35 = vld [vmem:[%s6520_s10 + $0x728] ss:$16 sps:$4 sm:$0xff]  }
  0xe6   : > { %3721 = vmatprep.subr.bf16.mxu0 %v5848_v36  ;;  %4145 = vmatprep.subr.bf16.mxu1 %v5851_v37  ;;  %v5932_v36 = vld [vmem:[%s6520_s10 + $0x744] ss:$16 sps:$4 sm:$0xff]   ;;  %v5935_v37 = vld [vmem:[%s6520_s10 + $0x74c] ss:$16 sps:$4 sm:$0xff]  }
  0xe9   : > { %3722 = vmatpush1.bf16.msra.mxu0 %v5846_v38  ;;  %4146 = vmatpush1.bf16.msra.mxu1 %v5849_v39  ;;  %v5930_v38 = vld [vmem:[%s6520_s10 + $0x740] ss:$16 sps:$4 sm:$0xff]   ;;  %v5933_v39 = vld [vmem:[%s6520_s10 + $0x748] ss:$16 sps:$4 sm:$0xff]  }
  0xea   : > { %3723 = vmatprep.subr.bf16.mxu0 %v5854_v40  ;;  %4147 = vmatprep.subr.bf16.mxu1 %v5857_v41  ;;  %v5938_v40 = vld [vmem:[%s6520_s10 + $0x764] ss:$16 sps:$4 sm:$0xff]   ;;  %v5941_v41 = vld [vmem:[%s6520_s10 + $0x76c] ss:$16 sps:$4 sm:$0xff]  }
  0xed   : > { %3724 = vmatpush1.bf16.msra.mxu0 %v5852_v42  ;;  %4148 = vmatpush1.bf16.msra.mxu1 %v5855_v43  ;;  %v5936_v42 = vld [vmem:[%s6520_s10 + $0x760] ss:$16 sps:$4 sm:$0xff]   ;;  %v5939_v43 = vld [vmem:[%s6520_s10 + $0x768] ss:$16 sps:$4 sm:$0xff]  }
  0xee   : > { %3725 = vmatprep.subr.bf16.mxu0 %v5860_v44  ;;  %4149 = vmatprep.subr.bf16.mxu1 %v5863_v45  ;;  %v5944_v44 = vld [vmem:[%s6520_s10 + $0x784] ss:$16 sps:$4 sm:$0xff]   ;;  %v5947_v45 = vld [vmem:[%s6520_s10 + $0x78c] ss:$16 sps:$4 sm:$0xff]  }
  0xf1   : > { %3726 = vmatpush1.bf16.msra.mxu0 %v5858_v46  ;;  %4150 = vmatpush1.bf16.msra.mxu1 %v5861_v47  ;;  %v5942_v46 = vld [vmem:[%s6520_s10 + $0x780] ss:$16 sps:$4 sm:$0xff]   ;;  %v5945_v47 = vld [vmem:[%s6520_s10 + $0x788] ss:$16 sps:$4 sm:$0xff]  }
  0xf2   : > { %3727 = vmatprep.subr.bf16.mxu0 %v5866_v48  ;;  %4151 = vmatprep.subr.bf16.mxu1 %v5869_v49  ;;  %v5950_v48 = vld [vmem:[%s6520_s10 + $0x7a4] ss:$16 sps:$4 sm:$0xff]   ;;  %v5953_v49 = vld [vmem:[%s6520_s10 + $0x7ac] ss:$16 sps:$4 sm:$0xff]  }
  0xf5   : > { %3728 = vmatpush1.bf16.msra.mxu0 %v5864_v50  ;;  %4152 = vmatpush1.bf16.msra.mxu1 %v5867_v51  ;;  %v5948_v50 = vld [vmem:[%s6520_s10 + $0x7a0] ss:$16 sps:$4 sm:$0xff]   ;;  %v5951_v51 = vld [vmem:[%s6520_s10 + $0x7a8] ss:$16 sps:$4 sm:$0xff]  }
  0xf6   : > { %3750 = vmatprep.subr.bf16.mxu0 %v5872_v52  ;;  %4174 = vmatprep.subr.bf16.mxu1 %v5875_v53  ;;  %v5956_v52 = vld [vmem:[%s6520_s10 + $0x7c4] ss:$16 sps:$4 sm:$0xff]   ;;  %v5959_v53 = vld [vmem:[%s6520_s10 + $0x7cc] ss:$16 sps:$4 sm:$0xff]  }
  0xf8   : > { %3730 = vmatmul.mubr.bf16.vlgmr.msra.gmra.mrb[0].mxu0 %v4883_v55  ;;  %4154 = vmatmul.mubr.bf16.vlgmr.msra.gmra.mrb[0].mxu1 %v4883_v55  ;;  %v5957_v55 = vld [vmem:[%s6520_s10 + $0x7c8] ss:$16 sps:$4 sm:$0xff]  }
  0xf9   : > { %3751 = vmatpush1.bf16.msra.mxu0 %v5870_v57  ;;  %4175 = vmatpush1.bf16.msra.mxu1 %v5873_v59  ;;  %v5965_v57 = vld [vmem:[%s6520_s10 + $0x7ec] ss:$16 sps:$4 sm:$0xff]   ;;  %v5960_v59 = vld [vmem:[%s6520_s10 + $0x7e0] ss:$16 sps:$4 sm:$0xff]  }
  0xfa   : > { %3752 = vmatprep.subr.bf16.mxu0 %v5878_v61  ;;  %4176 = vmatprep.subr.bf16.mxu1 %v5881_v62  ;;  %v5963_v61 = vld [vmem:[%s6520_s10 + $0x7e8] ss:$16 sps:$4 sm:$0xff]   ;;  %v5968_v62 = vld [vmem:[%s6520_s10 + $0x804] ss:$16 sps:$4 sm:$0xff]  }
  0xfb   : > { %3739 = vmatprep.mubr.bf16.mxu0 %v4900_v63  ;;  %4163 = vmatprep.mubr.bf16.mxu1 %v4900_v63  ;;  %v5971_v63 = vld [vmem:[%s6520_s10 + $0x80c] ss:$16 sps:$4 sm:$0xff]  }
  0xfd   : > { %3753 = vmatpush1.bf16.msra.mxu0 %v5876_v58  ;;  %4177 = vmatpush1.bf16.msra.mxu1 %v5879_v60  ;;  %v346_v58 = vld [vmem:[%s6522_s11 + $0x98] sm:$0xff]  ;;  %v4885_v60 = vcombine.low %v6756_v2, %v6759_v4  ;;  %v5980_v4 = vld [vmem:[%s6520_s10 + $0x844] ss:$16 sps:$4 sm:$0xff]  }
  0xfe   : > { %3754 = vmatprep.subr.bf16.mxu0 %v5884_v0  ;;  %4178 = vmatprep.subr.bf16.mxu1 %v5887_v1  ;;  %v354_v0 = vld [vmem:[%s6522_s11 + $0xd8] sm:$0xff]  ;;  %v5966_v1 = vld [vmem:[%s6520_s10 + $0x800] ss:$16 sps:$4 sm:$0xff]  }
  0xff   : > { %v5975_v2 = vld [vmem:[%s6520_s10 + $0x828] ss:$16 sps:$4 sm:$0xff]  }
 0x100   : > { %3740 = vmatmul.mubr.bf16.gmra.mrb[4].mxu0 %v4899_v3  ;;  %4164 = vmatmul.mubr.bf16.gmra.mrb[4].mxu1 %v4899_v3  ;;  %v5969_v3 = vld [vmem:[%s6520_s10 + $0x808] ss:$16 sps:$4 sm:$0xff]  }
 0x101   : > { %3755 = vmatpush1.bf16.msra.mxu0 %v5882_v5  ;;  %4179 = vmatpush1.bf16.msra.mxu1 %v5885_v6  ;;  %v5974_v5 = vld [vmem:[%s6520_s10 + $0x824] ss:$16 sps:$4 sm:$0xff]   ;;  %v5977_v6 = vld [vmem:[%s6520_s10 + $0x82c] ss:$16 sps:$4 sm:$0xff]  }
 0x102   : > { %3756 = vmatprep.subr.bf16.mxu0 %v5890_v7  ;;  %4180 = vmatprep.subr.bf16.mxu1 %v5893_v8  ;;  %v4902_v7 = vcombine.high %v346_v58, %v354_v0  ;;  %v5972_v8 = vld [vmem:[%s6520_s10 + $0x820] ss:$16 sps:$4 sm:$0xff]  }
 0x103   : > { %3782 = vmatprep.mubr.bf16.mxu0 %v4886_v9  ;;  %4206 = vmatprep.mubr.bf16.mxu1 %v4886_v9  ;;  %v5983_v9 = vld [vmem:[%s6520_s10 + $0x84c] ss:$16 sps:$4 sm:$0xff]  }
 0x105   : > { %3757 = vmatpush1.bf16.msra.mxu0 %v5888_v10  ;;  %4181 = vmatpush1.bf16.msra.mxu1 %v5891_v11  ;;  %v6832_v10 = vld [vmem:[%s6522_s11 + $0x20] sm:$0xff]  ;;  %v4901_v11 = vcombine.low %v346_v58, %v354_v0 }
 0x106   : > { %3758 = vmatprep.subr.bf16.mxu0 %v5896_v12  ;;  %4182 = vmatprep.subr.bf16.mxu1 %v5899_v13  ;;  %v6835_v12 = vld [vmem:[%s6522_s11 + $0x60] sm:$0xff] }
 0x107   : > { %v5978_v13 = vld [vmem:[%s6520_s10 + $0x840] ss:$16 sps:$4 sm:$0xff]   ;;  %v6058_v0 = vld [vmem:[%s6520_s10 + $0x9e4] ss:$16 sps:$4 sm:$0xff]  }
 0x108   : > { %v6050_v58 = vld [vmem:[%s6520_s10 + $0x9c0] ss:$16 sps:$4 sm:$0xff]  }
 0x109   : > { %3759 = vmatpush1.bf16.msra.mxu0 %v5894_v14  ;;  %4183 = vmatpush1.bf16.msra.mxu1 %v5897_v15  ;;  %v5981_v14 = vld [vmem:[%s6520_s10 + $0x848] ss:$16 sps:$4 sm:$0xff]   ;;  %v5986_v15 = vld [vmem:[%s6520_s10 + $0x864] ss:$16 sps:$4 sm:$0xff]  }
 0x10a   : > { %3760 = vmatprep.subr.bf16.mxu0 %v5902_v16  ;;  %4184 = vmatprep.subr.bf16.mxu1 %v5905_v17  ;;  %v5989_v16 = vld [vmem:[%s6520_s10 + $0x86c] ss:$16 sps:$4 sm:$0xff]   ;;  %v4888_v17 = vcombine.high %v6832_v10, %v6835_v12 }
 0x10d   : > { %3761 = vmatpush1.bf16.msra.mxu0 %v5900_v18  ;;  %4185 = vmatpush1.bf16.msra.mxu1 %v5903_v19  ;;  %v5984_v18 = vld [vmem:[%s6520_s10 + $0x860] ss:$16 sps:$4 sm:$0xff]   ;;  %v5987_v19 = vld [vmem:[%s6520_s10 + $0x868] ss:$16 sps:$4 sm:$0xff]  }
 0x10e   : > { %3762 = vmatprep.subr.bf16.mxu0 %v5908_v20  ;;  %4186 = vmatprep.subr.bf16.mxu1 %v5911_v21  ;;  %v5992_v20 = vld [vmem:[%s6520_s10 + $0x884] ss:$16 sps:$4 sm:$0xff]   ;;  %v5995_v21 = vld [vmem:[%s6520_s10 + $0x88c] ss:$16 sps:$4 sm:$0xff]  }
 0x111   : > { %3763 = vmatpush1.bf16.msra.mxu0 %v5906_v22  ;;  %4187 = vmatpush1.bf16.msra.mxu1 %v5909_v23  ;;  %v5990_v22 = vld [vmem:[%s6520_s10 + $0x880] ss:$16 sps:$4 sm:$0xff]   ;;  %v5993_v23 = vld [vmem:[%s6520_s10 + $0x888] ss:$16 sps:$4 sm:$0xff]  }
 0x112   : > { %3764 = vmatprep.subr.bf16.mxu0 %v5914_v24  ;;  %4188 = vmatprep.subr.bf16.mxu1 %v5917_v25  ;;  %v5998_v24 = vld [vmem:[%s6520_s10 + $0x8a4] ss:$16 sps:$4 sm:$0xff]   ;;  %v6001_v25 = vld [vmem:[%s6520_s10 + $0x8ac] ss:$16 sps:$4 sm:$0xff]  }
 0x115   : > { %3765 = vmatpush1.bf16.msra.mxu0 %v5912_v26  ;;  %4189 = vmatpush1.bf16.msra.mxu1 %v5915_v27  ;;  %v5996_v26 = vld [vmem:[%s6520_s10 + $0x8a0] ss:$16 sps:$4 sm:$0xff]   ;;  %v5999_v27 = vld [vmem:[%s6520_s10 + $0x8a8] ss:$16 sps:$4 sm:$0xff]  }
 0x116   : > { %3766 = vmatprep.subr.bf16.mxu0 %v5920_v28  ;;  %4190 = vmatprep.subr.bf16.mxu1 %v5923_v29  ;;  %v6004_v28 = vld [vmem:[%s6520_s10 + $0x8c4] ss:$16 sps:$4 sm:$0xff]   ;;  %v6007_v29 = vld [vmem:[%s6520_s10 + $0x8cc] ss:$16 sps:$4 sm:$0xff]  }
 0x119   : > { %3767 = vmatpush1.bf16.msra.mxu0 %v5918_v30  ;;  %4191 = vmatpush1.bf16.msra.mxu1 %v5921_v31  ;;  %v6002_v30 = vld [vmem:[%s6520_s10 + $0x8c0] ss:$16 sps:$4 sm:$0xff]   ;;  %v6005_v31 = vld [vmem:[%s6520_s10 + $0x8c8] ss:$16 sps:$4 sm:$0xff]  }
 0x11a   : > { %3768 = vmatprep.subr.bf16.mxu0 %v5926_v32  ;;  %4192 = vmatprep.subr.bf16.mxu1 %v5929_v33  ;;  %v6010_v32 = vld [vmem:[%s6520_s10 + $0x8e4] ss:$16 sps:$4 sm:$0xff]   ;;  %v6013_v33 = vld [vmem:[%s6520_s10 + $0x8ec] ss:$16 sps:$4 sm:$0xff]  }
 0x11d   : > { %3769 = vmatpush1.bf16.msra.mxu0 %v5924_v34  ;;  %4193 = vmatpush1.bf16.msra.mxu1 %v5927_v35  ;;  %v6008_v34 = vld [vmem:[%s6520_s10 + $0x8e0] ss:$16 sps:$4 sm:$0xff]   ;;  %v6011_v35 = vld [vmem:[%s6520_s10 + $0x8e8] ss:$16 sps:$4 sm:$0xff]  }
 0x11e   : > { %3770 = vmatprep.subr.bf16.mxu0 %v5932_v36  ;;  %4194 = vmatprep.subr.bf16.mxu1 %v5935_v37  ;;  %v6016_v36 = vld [vmem:[%s6520_s10 + $0x904] ss:$16 sps:$4 sm:$0xff]   ;;  %v6019_v37 = vld [vmem:[%s6520_s10 + $0x90c] ss:$16 sps:$4 sm:$0xff]  }
 0x121   : > { %3771 = vmatpush1.bf16.msra.mxu0 %v5930_v38  ;;  %4195 = vmatpush1.bf16.msra.mxu1 %v5933_v39  ;;  %v6014_v38 = vld [vmem:[%s6520_s10 + $0x900] ss:$16 sps:$4 sm:$0xff]   ;;  %v6017_v39 = vld [vmem:[%s6520_s10 + $0x908] ss:$16 sps:$4 sm:$0xff]  }
 0x122   : > { %3772 = vmatprep.subr.bf16.mxu0 %v5938_v40  ;;  %4196 = vmatprep.subr.bf16.mxu1 %v5941_v41  ;;  %v6022_v40 = vld [vmem:[%s6520_s10 + $0x924] ss:$16 sps:$4 sm:$0xff]   ;;  %v6025_v41 = vld [vmem:[%s6520_s10 + $0x92c] ss:$16 sps:$4 sm:$0xff]  }
 0x125   : > { %3773 = vmatpush1.bf16.msra.mxu0 %v5936_v42  ;;  %4197 = vmatpush1.bf16.msra.mxu1 %v5939_v43  ;;  %v6020_v42 = vld [vmem:[%s6520_s10 + $0x920] ss:$16 sps:$4 sm:$0xff]   ;;  %v6023_v43 = vld [vmem:[%s6520_s10 + $0x928] ss:$16 sps:$4 sm:$0xff]  }
 0x126   : > { %3774 = vmatprep.subr.bf16.mxu0 %v5944_v44  ;;  %4198 = vmatprep.subr.bf16.mxu1 %v5947_v45  ;;  %v6028_v44 = vld [vmem:[%s6520_s10 + $0x944] ss:$16 sps:$4 sm:$0xff]   ;;  %v6031_v45 = vld [vmem:[%s6520_s10 + $0x94c] ss:$16 sps:$4 sm:$0xff]  }
 0x129   : > { %3775 = vmatpush1.bf16.msra.mxu0 %v5942_v46  ;;  %4199 = vmatpush1.bf16.msra.mxu1 %v5945_v47  ;;  %v6026_v46 = vld [vmem:[%s6520_s10 + $0x940] ss:$16 sps:$4 sm:$0xff]   ;;  %v6029_v47 = vld [vmem:[%s6520_s10 + $0x948] ss:$16 sps:$4 sm:$0xff]  }
 0x12a   : > { %3776 = vmatprep.subr.bf16.mxu0 %v5950_v48  ;;  %4200 = vmatprep.subr.bf16.mxu1 %v5953_v49  ;;  %v6034_v48 = vld [vmem:[%s6520_s10 + $0x964] ss:$16 sps:$4 sm:$0xff]   ;;  %v6037_v49 = vld [vmem:[%s6520_s10 + $0x96c] ss:$16 sps:$4 sm:$0xff]  }
 0x12d   : > { %3777 = vmatpush1.bf16.msra.mxu0 %v5948_v50  ;;  %4201 = vmatpush1.bf16.msra.mxu1 %v5951_v51  ;;  %v6032_v50 = vld [vmem:[%s6520_s10 + $0x960] ss:$16 sps:$4 sm:$0xff]   ;;  %v6035_v51 = vld [vmem:[%s6520_s10 + $0x968] ss:$16 sps:$4 sm:$0xff]  }
 0x12e   : > { %3778 = vmatprep.subr.bf16.mxu0 %v5956_v52  ;;  %4202 = vmatprep.subr.bf16.mxu1 %v5959_v53  ;;  %v6040_v52 = vld [vmem:[%s6520_s10 + $0x984] ss:$16 sps:$4 sm:$0xff]   ;;  %v6043_v53 = vld [vmem:[%s6520_s10 + $0x98c] ss:$16 sps:$4 sm:$0xff]  }
 0x131   : > { %3779 = vmatpush1.bf16.msra.mxu0 %v5954_v54  ;;  %4203 = vmatpush1.bf16.msra.mxu1 %v5957_v55  ;;  %v6038_v54 = vld [vmem:[%s6520_s10 + $0x980] ss:$16 sps:$4 sm:$0xff]   ;;  %v6041_v55 = vld [vmem:[%s6520_s10 + $0x988] ss:$16 sps:$4 sm:$0xff]  }
 0x132   : > { %3780 = vmatprep.subr.bf16.mxu0 %v5962_v56  ;;  %4204 = vmatprep.subr.bf16.mxu1 %v5965_v57  ;;  %v6046_v56 = vld [vmem:[%s6520_s10 + $0x9a4] ss:$16 sps:$4 sm:$0xff]   ;;  %v6049_v57 = vld [vmem:[%s6520_s10 + $0x9ac] ss:$16 sps:$4 sm:$0xff]  }
 0x135   : > { %3781 = vmatpush1.bf16.msra.mxu0 %v5960_v59  ;;  %4205 = vmatpush1.bf16.msra.mxu1 %v5963_v61  ;;  %v6044_v59 = vld [vmem:[%s6520_s10 + $0x9a0] ss:$16 sps:$4 sm:$0xff]   ;;  %v6047_v61 = vld [vmem:[%s6520_s10 + $0x9a8] ss:$16 sps:$4 sm:$0xff]  }
 0x136   : > { %3803 = vmatprep.subr.bf16.mxu0 %v5968_v62  ;;  %4227 = vmatprep.subr.bf16.mxu1 %v5971_v63  ;;  %v6052_v62 = vld [vmem:[%s6520_s10 + $0x9c4] ss:$16 sps:$4 sm:$0xff]   ;;  %v6055_v63 = vld [vmem:[%s6520_s10 + $0x9cc] ss:$16 sps:$4 sm:$0xff]  }
 0x138   : > { %3783 = vmatmul.mubr.bf16.vlgmr.msra.gmra.mrb[0].mxu0 %v4885_v60  ;;  %4207 = vmatmul.mubr.bf16.vlgmr.msra.gmra.mrb[0].mxu1 %v4885_v60  ;;  %v6053_v60 = vld [vmem:[%s6520_s10 + $0x9c8] ss:$16 sps:$4 sm:$0xff]  }
 0x139   : > { %3804 = vmatpush1.bf16.msra.mxu0 %v5966_v1  ;;  %4228 = vmatpush1.bf16.msra.mxu1 %v5969_v3  ;;  %v6061_v1 = vld [vmem:[%s6520_s10 + $0x9ec] ss:$16 sps:$4 sm:$0xff]   ;;  %v6056_v3 = vld [vmem:[%s6520_s10 + $0x9e0] ss:$16 sps:$4 sm:$0xff]  }
 0x13a   : > { %3805 = vmatprep.subr.bf16.mxu0 %v5974_v5  ;;  %4229 = vmatprep.subr.bf16.mxu1 %v5977_v6  ;;  %v6059_v5 = vld [vmem:[%s6520_s10 + $0x9e8] ss:$16 sps:$4 sm:$0xff]   ;;  %v6064_v6 = vld [vmem:[%s6520_s10 + $0xa04] ss:$16 sps:$4 sm:$0xff]  }
 0x13b   : > { %3792 = vmatprep.mubr.bf16.mxu0 %v4902_v7  ;;  %4216 = vmatprep.mubr.bf16.mxu1 %v4902_v7  ;;  %v6067_v7 = vld [vmem:[%s6520_s10 + $0xa0c] ss:$16 sps:$4 sm:$0xff]  }
 0x13d   : > { %3806 = vmatpush1.bf16.msra.mxu0 %v5972_v8  ;;  %4230 = vmatpush1.bf16.msra.mxu1 %v5975_v2  ;;  %v347_v8 = vld [vmem:[%s6522_s11 + $0xa0] sm:$0xff] }
 0x13e   : > { %3807 = vmatprep.subr.bf16.mxu0 %v5980_v4  ;;  %4231 = vmatprep.subr.bf16.mxu1 %v5983_v9  ;;  %v355_v2 = vld [vmem:[%s6522_s11 + $0xe0] sm:$0xff]  ;;  %v4887_v4 = vcombine.low %v6832_v10, %v6835_v12  ;;  %v6079_v12 = vld [vmem:[%s6520_s10 + $0xa4c] ss:$16 sps:$4 sm:$0xff]  }
 0x13f   : > { %v6062_v9 = vld [vmem:[%s6520_s10 + $0xa00] ss:$16 sps:$4 sm:$0xff]   ;;  %v6076_v10 = vld [vmem:[%s6520_s10 + $0xa44] ss:$16 sps:$4 sm:$0xff]  }
 0x140   : > { %3793 = vmatmul.mubr.bf16.gmra.mrb[4].mxu0 %v4901_v11  ;;  %4217 = vmatmul.mubr.bf16.gmra.mrb[4].mxu1 %v4901_v11  ;;  %v6065_v11 = vld [vmem:[%s6520_s10 + $0xa08] ss:$16 sps:$4 sm:$0xff]  }
 0x141   : > { %3808 = vmatpush1.bf16.msra.mxu0 %v5978_v13  ;;  %4232 = vmatpush1.bf16.msra.mxu1 %v5981_v14  ;;  %v6070_v13 = vld [vmem:[%s6520_s10 + $0xa24] ss:$16 sps:$4 sm:$0xff]   ;;  %v6073_v14 = vld [vmem:[%s6520_s10 + $0xa2c] ss:$16 sps:$4 sm:$0xff]  }
 0x142   : > { %3809 = vmatprep.subr.bf16.mxu0 %v5986_v15  ;;  %4233 = vmatprep.subr.bf16.mxu1 %v5989_v16  ;;  %v6068_v15 = vld [vmem:[%s6520_s10 + $0xa20] ss:$16 sps:$4 sm:$0xff]   ;;  %v6071_v16 = vld [vmem:[%s6520_s10 + $0xa28] ss:$16 sps:$4 sm:$0xff]  }
 0x143   : > { %3835 = vmatprep.mubr.bf16.mxu0 %v4888_v17  ;;  %4259 = vmatprep.mubr.bf16.mxu1 %v4888_v17  ;;  %v4904_v17 = vcombine.high %v347_v8, %v355_v2 }
 0x145   : > { %3810 = vmatpush1.bf16.msra.mxu0 %v5984_v18  ;;  %4234 = vmatpush1.bf16.msra.mxu1 %v5987_v19  ;;  %v6908_v18 = vld [vmem:[%s6522_s11 + $0x28] sm:$0xff] }
 0x146   : > { %3811 = vmatprep.subr.bf16.mxu0 %v5992_v20  ;;  %4235 = vmatprep.subr.bf16.mxu1 %v5995_v21  ;;  %v6911_v19 = vld [vmem:[%s6522_s11 + $0x68] sm:$0xff]  ;;  %v4903_v20 = vcombine.low %v347_v8, %v355_v2  ;;  %v6074_v21 = vld [vmem:[%s6520_s10 + $0xa40] ss:$16 sps:$4 sm:$0xff]  }
 0x147   : > { %v6146_v8 = vld [vmem:[%s6520_s10 + $0xbc0] ss:$16 sps:$4 sm:$0xff]   ;;  %v6149_v2 = vld [vmem:[%s6520_s10 + $0xbc8] ss:$16 sps:$4 sm:$0xff]  }
 0x149   : > { %3812 = vmatpush1.bf16.msra.mxu0 %v5990_v22  ;;  %4236 = vmatpush1.bf16.msra.mxu1 %v5993_v23  ;;  %v6077_v22 = vld [vmem:[%s6520_s10 + $0xa48] ss:$16 sps:$4 sm:$0xff]   ;;  %v6082_v23 = vld [vmem:[%s6520_s10 + $0xa64] ss:$16 sps:$4 sm:$0xff]  }
 0x14a   : > { %3813 = vmatprep.subr.bf16.mxu0 %v5998_v24  ;;  %4237 = vmatprep.subr.bf16.mxu1 %v6001_v25  ;;  %v6085_v24 = vld [vmem:[%s6520_s10 + $0xa6c] ss:$16 sps:$4 sm:$0xff]   ;;  %v4890_v25 = vcombine.high %v6908_v18, %v6911_v19 }
 0x14d   : > { %3814 = vmatpush1.bf16.msra.mxu0 %v5996_v26  ;;  %4238 = vmatpush1.bf16.msra.mxu1 %v5999_v27  ;;  %v6080_v26 = vld [vmem:[%s6520_s10 + $0xa60] ss:$16 sps:$4 sm:$0xff]   ;;  %v6083_v27 = vld [vmem:[%s6520_s10 + $0xa68] ss:$16 sps:$4 sm:$0xff]  }
 0x14e   : > { %3815 = vmatprep.subr.bf16.mxu0 %v6004_v28  ;;  %4239 = vmatprep.subr.bf16.mxu1 %v6007_v29  ;;  %v6088_v28 = vld [vmem:[%s6520_s10 + $0xa84] ss:$16 sps:$4 sm:$0xff]   ;;  %v6091_v29 = vld [vmem:[%s6520_s10 + $0xa8c] ss:$16 sps:$4 sm:$0xff]  }
 0x151   : > { %3816 = vmatpush1.bf16.msra.mxu0 %v6002_v30  ;;  %4240 = vmatpush1.bf16.msra.mxu1 %v6005_v31  ;;  %v6086_v30 = vld [vmem:[%s6520_s10 + $0xa80] ss:$16 sps:$4 sm:$0xff]   ;;  %v6089_v31 = vld [vmem:[%s6520_s10 + $0xa88] ss:$16 sps:$4 sm:$0xff]  }
 0x152   : > { %3817 = vmatprep.subr.bf16.mxu0 %v6010_v32  ;;  %4241 = vmatprep.subr.bf16.mxu1 %v6013_v33  ;;  %v6094_v32 = vld [vmem:[%s6520_s10 + $0xaa4] ss:$16 sps:$4 sm:$0xff]   ;;  %v6097_v33 = vld [vmem:[%s6520_s10 + $0xaac] ss:$16 sps:$4 sm:$0xff]  }
 0x155   : > { %3818 = vmatpush1.bf16.msra.mxu0 %v6008_v34  ;;  %4242 = vmatpush1.bf16.msra.mxu1 %v6011_v35  ;;  %v6092_v34 = vld [vmem:[%s6520_s10 + $0xaa0] ss:$16 sps:$4 sm:$0xff]   ;;  %v6095_v35 = vld [vmem:[%s6520_s10 + $0xaa8] ss:$16 sps:$4 sm:$0xff]  }
 0x156   : > { %3819 = vmatprep.subr.bf16.mxu0 %v6016_v36  ;;  %4243 = vmatprep.subr.bf16.mxu1 %v6019_v37  ;;  %v6100_v36 = vld [vmem:[%s6520_s10 + $0xac4] ss:$16 sps:$4 sm:$0xff]   ;;  %v6103_v37 = vld [vmem:[%s6520_s10 + $0xacc] ss:$16 sps:$4 sm:$0xff]  }
 0x159   : > { %3820 = vmatpush1.bf16.msra.mxu0 %v6014_v38  ;;  %4244 = vmatpush1.bf16.msra.mxu1 %v6017_v39  ;;  %v6098_v38 = vld [vmem:[%s6520_s10 + $0xac0] ss:$16 sps:$4 sm:$0xff]   ;;  %v6101_v39 = vld [vmem:[%s6520_s10 + $0xac8] ss:$16 sps:$4 sm:$0xff]  }
 0x15a   : > { %3821 = vmatprep.subr.bf16.mxu0 %v6022_v40  ;;  %4245 = vmatprep.subr.bf16.mxu1 %v6025_v41  ;;  %v6106_v40 = vld [vmem:[%s6520_s10 + $0xae4] ss:$16 sps:$4 sm:$0xff]   ;;  %v6109_v41 = vld [vmem:[%s6520_s10 + $0xaec] ss:$16 sps:$4 sm:$0xff]  }
 0x15d   : > { %3822 = vmatpush1.bf16.msra.mxu0 %v6020_v42  ;;  %4246 = vmatpush1.bf16.msra.mxu1 %v6023_v43  ;;  %v6104_v42 = vld [vmem:[%s6520_s10 + $0xae0] ss:$16 sps:$4 sm:$0xff]   ;;  %v6107_v43 = vld [vmem:[%s6520_s10 + $0xae8] ss:$16 sps:$4 sm:$0xff]  }
 0x15e   : > { %3823 = vmatprep.subr.bf16.mxu0 %v6028_v44  ;;  %4247 = vmatprep.subr.bf16.mxu1 %v6031_v45  ;;  %v6112_v44 = vld [vmem:[%s6520_s10 + $0xb04] ss:$16 sps:$4 sm:$0xff]   ;;  %v6115_v45 = vld [vmem:[%s6520_s10 + $0xb0c] ss:$16 sps:$4 sm:$0xff]  }
 0x161   : > { %3824 = vmatpush1.bf16.msra.mxu0 %v6026_v46  ;;  %4248 = vmatpush1.bf16.msra.mxu1 %v6029_v47  ;;  %v6110_v46 = vld [vmem:[%s6520_s10 + $0xb00] ss:$16 sps:$4 sm:$0xff]   ;;  %v6113_v47 = vld [vmem:[%s6520_s10 + $0xb08] ss:$16 sps:$4 sm:$0xff]  }
 0x162   : > { %3825 = vmatprep.subr.bf16.mxu0 %v6034_v48  ;;  %4249 = vmatprep.subr.bf16.mxu1 %v6037_v49  ;;  %v6118_v48 = vld [vmem:[%s6520_s10 + $0xb24] ss:$16 sps:$4 sm:$0xff]   ;;  %v6121_v49 = vld [vmem:[%s6520_s10 + $0xb2c] ss:$16 sps:$4 sm:$0xff]  }
 0x165   : > { %3826 = vmatpush1.bf16.msra.mxu0 %v6032_v50  ;;  %4250 = vmatpush1.bf16.msra.mxu1 %v6035_v51  ;;  %v6116_v50 = vld [vmem:[%s6520_s10 + $0xb20] ss:$16 sps:$4 sm:$0xff]   ;;  %v6119_v51 = vld [vmem:[%s6520_s10 + $0xb28] ss:$16 sps:$4 sm:$0xff]  }
 0x166   : > { %3827 = vmatprep.subr.bf16.mxu0 %v6040_v52  ;;  %4251 = vmatprep.subr.bf16.mxu1 %v6043_v53  ;;  %v6124_v52 = vld [vmem:[%s6520_s10 + $0xb44] ss:$16 sps:$4 sm:$0xff]   ;;  %v6127_v53 = vld [vmem:[%s6520_s10 + $0xb4c] ss:$16 sps:$4 sm:$0xff]  }
 0x169   : > { %3828 = vmatpush1.bf16.msra.mxu0 %v6038_v54  ;;  %4252 = vmatpush1.bf16.msra.mxu1 %v6041_v55  ;;  %v6122_v54 = vld [vmem:[%s6520_s10 + $0xb40] ss:$16 sps:$4 sm:$0xff]   ;;  %v6125_v55 = vld [vmem:[%s6520_s10 + $0xb48] ss:$16 sps:$4 sm:$0xff]  }
 0x16a   : > { %3829 = vmatprep.subr.bf16.mxu0 %v6046_v56  ;;  %4253 = vmatprep.subr.bf16.mxu1 %v6049_v57  ;;  %v6130_v56 = vld [vmem:[%s6520_s10 + $0xb64] ss:$16 sps:$4 sm:$0xff]   ;;  %v6133_v57 = vld [vmem:[%s6520_s10 + $0xb6c] ss:$16 sps:$4 sm:$0xff]  }
 0x16d   : > { %3830 = vmatpush1.bf16.msra.mxu0 %v6044_v59  ;;  %4254 = vmatpush1.bf16.msra.mxu1 %v6047_v61  ;;  %v6128_v59 = vld [vmem:[%s6520_s10 + $0xb60] ss:$16 sps:$4 sm:$0xff]   ;;  %v6131_v61 = vld [vmem:[%s6520_s10 + $0xb68] ss:$16 sps:$4 sm:$0xff]  }
 0x16e   : > { %3831 = vmatprep.subr.bf16.mxu0 %v6052_v62  ;;  %4255 = vmatprep.subr.bf16.mxu1 %v6055_v63  ;;  %v6136_v62 = vld [vmem:[%s6520_s10 + $0xb84] ss:$16 sps:$4 sm:$0xff]   ;;  %v6139_v63 = vld [vmem:[%s6520_s10 + $0xb8c] ss:$16 sps:$4 sm:$0xff]  }
 0x171   : > { %3832 = vmatpush1.bf16.msra.mxu0 %v6050_v58  ;;  %4256 = vmatpush1.bf16.msra.mxu1 %v6053_v60  ;;  %v6134_v58 = vld [vmem:[%s6520_s10 + $0xb80] ss:$16 sps:$4 sm:$0xff]   ;;  %v6137_v60 = vld [vmem:[%s6520_s10 + $0xb88] ss:$16 sps:$4 sm:$0xff]  }
 0x172   : > { %3833 = vmatprep.subr.bf16.mxu0 %v6058_v0  ;;  %4257 = vmatprep.subr.bf16.mxu1 %v6061_v1  ;;  %v6142_v0 = vld [vmem:[%s6520_s10 + $0xba4] ss:$16 sps:$4 sm:$0xff]   ;;  %v6145_v1 = vld [vmem:[%s6520_s10 + $0xbac] ss:$16 sps:$4 sm:$0xff]  }
 0x175   : > { %3834 = vmatpush1.bf16.msra.mxu0 %v6056_v3  ;;  %4258 = vmatpush1.bf16.msra.mxu1 %v6059_v5  ;;  %v6140_v3 = vld [vmem:[%s6520_s10 + $0xba0] ss:$16 sps:$4 sm:$0xff]   ;;  %v6143_v5 = vld [vmem:[%s6520_s10 + $0xba8] ss:$16 sps:$4 sm:$0xff]  }
 0x176   : > { %3856 = vmatprep.subr.bf16.mxu0 %v6064_v6  ;;  %4280 = vmatprep.subr.bf16.mxu1 %v6067_v7  ;;  %v6148_v6 = vld [vmem:[%s6520_s10 + $0xbc4] ss:$16 sps:$4 sm:$0xff]   ;;  %v6151_v7 = vld [vmem:[%s6520_s10 + $0xbcc] ss:$16 sps:$4 sm:$0xff]  }
 0x178   : > { %3836 = vmatmul.mubr.bf16.vlgmr.msra.gmra.mrb[0].mxu0 %v4887_v4  ;;  %4260 = vmatmul.mubr.bf16.vlgmr.msra.gmra.mrb[0].mxu1 %v4887_v4  ;;  %v6154_v4 = vld [vmem:[%s6520_s10 + $0xbe4] ss:$16 sps:$4 sm:$0xff]  }
 0x179   : > { %3857 = vmatpush1.bf16.msra.mxu0 %v6062_v9  ;;  %4281 = vmatpush1.bf16.msra.mxu1 %v6065_v11  ;;  %v6157_v9 = vld [vmem:[%s6520_s10 + $0xbec] ss:$16 sps:$4 sm:$0xff]   ;;  %v6152_v11 = vld [vmem:[%s6520_s10 + $0xbe0] ss:$16 sps:$4 sm:$0xff]  }
 0x17a   : > { %3858 = vmatprep.subr.bf16.mxu0 %v6070_v13  ;;  %4282 = vmatprep.subr.bf16.mxu1 %v6073_v14  ;;  %v6155_v13 = vld [vmem:[%s6520_s10 + $0xbe8] ss:$16 sps:$4 sm:$0xff]   ;;  %v6160_v14 = vld [vmem:[%s6520_s10 + $0xc04] ss:$16 sps:$4 sm:$0xff]  }
 0x17b   : > { %3845 = vmatprep.mubr.bf16.mxu0 %v4904_v17  ;;  %4269 = vmatprep.mubr.bf16.mxu1 %v4904_v17  ;;  %v348_v17 = vld [vmem:[%s6522_s11 + $0xa8] sm:$0xff] }
 0x17d   : > { %3859 = vmatpush1.bf16.msra.mxu0 %v6068_v15  ;;  %4283 = vmatpush1.bf16.msra.mxu1 %v6071_v16  ;;  %v6163_v15 = vld [vmem:[%s6520_s10 + $0xc0c] ss:$16 sps:$4 sm:$0xff]   ;;  %v4889_v16 = vcombine.low %v6908_v18, %v6911_v19  ;;  %v6164_v18 = vld [vmem:[%s6520_s10 + $0xc20] ss:$16 sps:$4 sm:$0xff]   ;;  %v6167_v19 = vld [vmem:[%s6520_s10 + $0xc28] ss:$16 sps:$4 sm:$0xff]  }
 0x17e   : > { %3860 = vmatprep.subr.bf16.mxu0 %v6076_v10  ;;  %4284 = vmatprep.subr.bf16.mxu1 %v6079_v12  ;;  %v356_v10 = vld [vmem:[%s6522_s11 + $0xe8] sm:$0xff]  ;;  %v6158_v12 = vld [vmem:[%s6520_s10 + $0xc00] ss:$16 sps:$4 sm:$0xff]  }
 0x180   : > { %3846 = vmatmul.mubr.bf16.gmra.mrb[4].mxu0 %v4903_v20  ;;  %4270 = vmatmul.mubr.bf16.gmra.mrb[4].mxu1 %v4903_v20  ;;  %v6161_v20 = vld [vmem:[%s6520_s10 + $0xc08] ss:$16 sps:$4 sm:$0xff]  }
 0x181   : > { %3861 = vmatpush1.bf16.msra.mxu0 %v6074_v21  ;;  %4285 = vmatpush1.bf16.msra.mxu1 %v6077_v22  ;;  %v6166_v21 = vld [vmem:[%s6520_s10 + $0xc24] ss:$16 sps:$4 sm:$0xff]   ;;  %v6169_v22 = vld [vmem:[%s6520_s10 + $0xc2c] ss:$16 sps:$4 sm:$0xff]  }
 0x182   : > { %3862 = vmatprep.subr.bf16.mxu0 %v6082_v23  ;;  %4286 = vmatprep.subr.bf16.mxu1 %v6085_v24  ;;  %v4906_v23 = vcombine.high %v348_v17, %v356_v10  ;;  %v6172_v24 = vld [vmem:[%s6520_s10 + $0xc44] ss:$16 sps:$4 sm:$0xff]  }
 0x183   : > { %3888 = vmatprep.mubr.bf16.mxu0 %v4890_v25  ;;  %4312 = vmatprep.mubr.bf16.mxu1 %v4890_v25  ;;  %v6175_v25 = vld [vmem:[%s6520_s10 + $0xc4c] ss:$16 sps:$4 sm:$0xff]  }
 0x185   : > { %3863 = vmatpush1.bf16.msra.mxu0 %v6080_v26  ;;  %4287 = vmatpush1.bf16.msra.mxu1 %v6083_v27  ;;  %v4905_v26 = vcombine.low %v348_v17, %v356_v10  ;;  %v6984_v27 = vld [vmem:[%s6522_s11 + $0x30] sm:$0xff]  ;;  %v6245_v17 = vld [vmem:[%s6520_s10 + $0xdc8] ss:$16 sps:$4 sm:$0xff]  }
 0x186   : > { %3864 = vmatprep.subr.bf16.mxu0 %v6088_v28  ;;  %4288 = vmatprep.subr.bf16.mxu1 %v6091_v29  ;;  %v6987_v28 = vld [vmem:[%s6522_s11 + $0x70] sm:$0xff] }
 0x187   : > { %v6170_v29 = vld [vmem:[%s6520_s10 + $0xc40] ss:$16 sps:$4 sm:$0xff]   ;;  %v6250_v10 = vld [vmem:[%s6520_s10 + $0xde4] ss:$16 sps:$4 sm:$0xff]  }
 0x189   : > { %3865 = vmatpush1.bf16.msra.mxu0 %v6086_v30  ;;  %4289 = vmatpush1.bf16.msra.mxu1 %v6089_v31  ;;  %v6173_v30 = vld [vmem:[%s6520_s10 + $0xc48] ss:$16 sps:$4 sm:$0xff]   ;;  %v6178_v31 = vld [vmem:[%s6520_s10 + $0xc64] ss:$16 sps:$4 sm:$0xff]  }
 0x18a   : > { %3866 = vmatprep.subr.bf16.mxu0 %v6094_v32  ;;  %4290 = vmatprep.subr.bf16.mxu1 %v6097_v33  ;;  %v6181_v32 = vld [vmem:[%s6520_s10 + $0xc6c] ss:$16 sps:$4 sm:$0xff]   ;;  %v4892_v33 = vcombine.high %v6984_v27, %v6987_v28 }
 0x18d   : > { %3867 = vmatpush1.bf16.msra.mxu0 %v6092_v34  ;;  %4291 = vmatpush1.bf16.msra.mxu1 %v6095_v35  ;;  %v6176_v34 = vld [vmem:[%s6520_s10 + $0xc60] ss:$16 sps:$4 sm:$0xff]   ;;  %v6179_v35 = vld [vmem:[%s6520_s10 + $0xc68] ss:$16 sps:$4 sm:$0xff]  }
 0x18e   : > { %3868 = vmatprep.subr.bf16.mxu0 %v6100_v36  ;;  %4292 = vmatprep.subr.bf16.mxu1 %v6103_v37  ;;  %v6184_v36 = vld [vmem:[%s6520_s10 + $0xc84] ss:$16 sps:$4 sm:$0xff]   ;;  %v6187_v37 = vld [vmem:[%s6520_s10 + $0xc8c] ss:$16 sps:$4 sm:$0xff]  }
 0x191   : > { %3869 = vmatpush1.bf16.msra.mxu0 %v6098_v38  ;;  %4293 = vmatpush1.bf16.msra.mxu1 %v6101_v39  ;;  %v6182_v38 = vld [vmem:[%s6520_s10 + $0xc80] ss:$16 sps:$4 sm:$0xff]   ;;  %v6185_v39 = vld [vmem:[%s6520_s10 + $0xc88] ss:$16 sps:$4 sm:$0xff]  }
 0x192   : > { %3870 = vmatprep.subr.bf16.mxu0 %v6106_v40  ;;  %4294 = vmatprep.subr.bf16.mxu1 %v6109_v41  ;;  %v6190_v40 = vld [vmem:[%s6520_s10 + $0xca4] ss:$16 sps:$4 sm:$0xff]   ;;  %v6193_v41 = vld [vmem:[%s6520_s10 + $0xcac] ss:$16 sps:$4 sm:$0xff]  }
 0x195   : > { %3871 = vmatpush1.bf16.msra.mxu0 %v6104_v42  ;;  %4295 = vmatpush1.bf16.msra.mxu1 %v6107_v43  ;;  %v6188_v42 = vld [vmem:[%s6520_s10 + $0xca0] ss:$16 sps:$4 sm:$0xff]   ;;  %v6191_v43 = vld [vmem:[%s6520_s10 + $0xca8] ss:$16 sps:$4 sm:$0xff]  }
 0x196   : > { %3872 = vmatprep.subr.bf16.mxu0 %v6112_v44  ;;  %4296 = vmatprep.subr.bf16.mxu1 %v6115_v45  ;;  %v6196_v44 = vld [vmem:[%s6520_s10 + $0xcc4] ss:$16 sps:$4 sm:$0xff]   ;;  %v6199_v45 = vld [vmem:[%s6520_s10 + $0xccc] ss:$16 sps:$4 sm:$0xff]  }
 0x199   : > { %3873 = vmatpush1.bf16.msra.mxu0 %v6110_v46  ;;  %4297 = vmatpush1.bf16.msra.mxu1 %v6113_v47  ;;  %v6194_v46 = vld [vmem:[%s6520_s10 + $0xcc0] ss:$16 sps:$4 sm:$0xff]   ;;  %v6197_v47 = vld [vmem:[%s6520_s10 + $0xcc8] ss:$16 sps:$4 sm:$0xff]  }
 0x19a   : > { %3874 = vmatprep.subr.bf16.mxu0 %v6118_v48  ;;  %4298 = vmatprep.subr.bf16.mxu1 %v6121_v49  ;;  %v6202_v48 = vld [vmem:[%s6520_s10 + $0xce4] ss:$16 sps:$4 sm:$0xff]   ;;  %v6205_v49 = vld [vmem:[%s6520_s10 + $0xcec] ss:$16 sps:$4 sm:$0xff]  }
 0x19d   : > { %3875 = vmatpush1.bf16.msra.mxu0 %v6116_v50  ;;  %4299 = vmatpush1.bf16.msra.mxu1 %v6119_v51  ;;  %v6200_v50 = vld [vmem:[%s6520_s10 + $0xce0] ss:$16 sps:$4 sm:$0xff]   ;;  %v6203_v51 = vld [vmem:[%s6520_s10 + $0xce8] ss:$16 sps:$4 sm:$0xff]  }
 0x19e   : > { %3876 = vmatprep.subr.bf16.mxu0 %v6124_v52  ;;  %4300 = vmatprep.subr.bf16.mxu1 %v6127_v53  ;;  %v6208_v52 = vld [vmem:[%s6520_s10 + $0xd04] ss:$16 sps:$4 sm:$0xff]   ;;  %v6211_v53 = vld [vmem:[%s6520_s10 + $0xd0c] ss:$16 sps:$4 sm:$0xff]  }
 0x1a1   : > { %3877 = vmatpush1.bf16.msra.mxu0 %v6122_v54  ;;  %4301 = vmatpush1.bf16.msra.mxu1 %v6125_v55  ;;  %v6206_v54 = vld [vmem:[%s6520_s10 + $0xd00] ss:$16 sps:$4 sm:$0xff]   ;;  %v6209_v55 = vld [vmem:[%s6520_s10 + $0xd08] ss:$16 sps:$4 sm:$0xff]  }
 0x1a2   : > { %3878 = vmatprep.subr.bf16.mxu0 %v6130_v56  ;;  %4302 = vmatprep.subr.bf16.mxu1 %v6133_v57  ;;  %v6214_v56 = vld [vmem:[%s6520_s10 + $0xd24] ss:$16 sps:$4 sm:$0xff]   ;;  %v6217_v57 = vld [vmem:[%s6520_s10 + $0xd2c] ss:$16 sps:$4 sm:$0xff]  }
 0x1a5   : > { %3879 = vmatpush1.bf16.msra.mxu0 %v6128_v59  ;;  %4303 = vmatpush1.bf16.msra.mxu1 %v6131_v61  ;;  %v6212_v59 = vld [vmem:[%s6520_s10 + $0xd20] ss:$16 sps:$4 sm:$0xff]   ;;  %v6215_v61 = vld [vmem:[%s6520_s10 + $0xd28] ss:$16 sps:$4 sm:$0xff]  }
 0x1a6   : > { %3880 = vmatprep.subr.bf16.mxu0 %v6136_v62  ;;  %4304 = vmatprep.subr.bf16.mxu1 %v6139_v63  ;;  %v6220_v62 = vld [vmem:[%s6520_s10 + $0xd44] ss:$16 sps:$4 sm:$0xff]   ;;  %v6223_v63 = vld [vmem:[%s6520_s10 + $0xd4c] ss:$16 sps:$4 sm:$0xff]  }
 0x1a9   : > { %3881 = vmatpush1.bf16.msra.mxu0 %v6134_v58  ;;  %4305 = vmatpush1.bf16.msra.mxu1 %v6137_v60  ;;  %v6218_v58 = vld [vmem:[%s6520_s10 + $0xd40] ss:$16 sps:$4 sm:$0xff]   ;;  %v6221_v60 = vld [vmem:[%s6520_s10 + $0xd48] ss:$16 sps:$4 sm:$0xff]  }
 0x1aa   : > { %3882 = vmatprep.subr.bf16.mxu0 %v6142_v0  ;;  %4306 = vmatprep.subr.bf16.mxu1 %v6145_v1  ;;  %v6226_v0 = vld [vmem:[%s6520_s10 + $0xd64] ss:$16 sps:$4 sm:$0xff]   ;;  %v6229_v1 = vld [vmem:[%s6520_s10 + $0xd6c] ss:$16 sps:$4 sm:$0xff]  }
 0x1ad   : > { %3883 = vmatpush1.bf16.msra.mxu0 %v6140_v3  ;;  %4307 = vmatpush1.bf16.msra.mxu1 %v6143_v5  ;;  %v6224_v3 = vld [vmem:[%s6520_s10 + $0xd60] ss:$16 sps:$4 sm:$0xff]   ;;  %v6227_v5 = vld [vmem:[%s6520_s10 + $0xd68] ss:$16 sps:$4 sm:$0xff]  }
 0x1ae   : > { %3884 = vmatprep.subr.bf16.mxu0 %v6148_v6  ;;  %4308 = vmatprep.subr.bf16.mxu1 %v6151_v7  ;;  %v6232_v6 = vld [vmem:[%s6520_s10 + $0xd84] ss:$16 sps:$4 sm:$0xff]   ;;  %v6235_v7 = vld [vmem:[%s6520_s10 + $0xd8c] ss:$16 sps:$4 sm:$0xff]  }
 0x1b1   : > { %3885 = vmatpush1.bf16.msra.mxu0 %v6146_v8  ;;  %4309 = vmatpush1.bf16.msra.mxu1 %v6149_v2  ;;  %v6230_v8 = vld [vmem:[%s6520_s10 + $0xd80] ss:$16 sps:$4 sm:$0xff]   ;;  %v6233_v2 = vld [vmem:[%s6520_s10 + $0xd88] ss:$16 sps:$4 sm:$0xff]  }
 0x1b2   : > { %3886 = vmatprep.subr.bf16.mxu0 %v6154_v4  ;;  %4310 = vmatprep.subr.bf16.mxu1 %v6157_v9  ;;  %v6238_v4 = vld [vmem:[%s6520_s10 + $0xda4] ss:$16 sps:$4 sm:$0xff]   ;;  %v6241_v9 = vld [vmem:[%s6520_s10 + $0xdac] ss:$16 sps:$4 sm:$0xff]  }
 0x1b5   : > { %3887 = vmatpush1.bf16.msra.mxu0 %v6152_v11  ;;  %4311 = vmatpush1.bf16.msra.mxu1 %v6155_v13  ;;  %v6236_v11 = vld [vmem:[%s6520_s10 + $0xda0] ss:$16 sps:$4 sm:$0xff]   ;;  %v6239_v13 = vld [vmem:[%s6520_s10 + $0xda8] ss:$16 sps:$4 sm:$0xff]  }
 0x1b6   : > { %3909 = vmatprep.subr.bf16.mxu0 %v6160_v14  ;;  %4333 = vmatprep.subr.bf16.mxu1 %v6163_v15  ;;  %v6244_v14 = vld [vmem:[%s6520_s10 + $0xdc4] ss:$16 sps:$4 sm:$0xff]   ;;  %v6247_v15 = vld [vmem:[%s6520_s10 + $0xdcc] ss:$16 sps:$4 sm:$0xff]  }
 0x1b8   : > { %3889 = vmatmul.mubr.bf16.vlgmr.msra.gmra.mrb[0].mxu0 %v4889_v16  ;;  %4313 = vmatmul.mubr.bf16.vlgmr.msra.gmra.mrb[0].mxu1 %v4889_v16  ;;  %v6242_v16 = vld [vmem:[%s6520_s10 + $0xdc0] ss:$16 sps:$4 sm:$0xff]  }
 0x1b9   : > { %3910 = vmatpush1.bf16.msra.mxu0 %v6158_v12  ;;  %4334 = vmatpush1.bf16.msra.mxu1 %v6161_v20  ;;  %v6253_v12 = vld [vmem:[%s6520_s10 + $0xdec] ss:$16 sps:$4 sm:$0xff]   ;;  %v6248_v20 = vld [vmem:[%s6520_s10 + $0xde0] ss:$16 sps:$4 sm:$0xff]  }
 0x1ba   : > { %3911 = vmatprep.subr.bf16.mxu0 %v6166_v21  ;;  %4335 = vmatprep.subr.bf16.mxu1 %v6169_v22  ;;  %v6251_v21 = vld [vmem:[%s6520_s10 + $0xde8] ss:$16 sps:$4 sm:$0xff]   ;;  %v6256_v22 = vld [vmem:[%s6520_s10 + $0xe04] ss:$16 sps:$4 sm:$0xff]  }
 0x1bb   : > { %3898 = vmatprep.mubr.bf16.mxu0 %v4906_v23  ;;  %4322 = vmatprep.mubr.bf16.mxu1 %v4906_v23  ;;  %v6259_v23 = vld [vmem:[%s6520_s10 + $0xe0c] ss:$16 sps:$4 sm:$0xff]  }
 0x1bd   : > { %3912 = vmatpush1.bf16.msra.mxu0 %v6164_v18  ;;  %4336 = vmatpush1.bf16.msra.mxu1 %v6167_v19  ;;  %v4891_v18 = vcombine.low %v6984_v27, %v6987_v28  ;;  %v349_v19 = vld [vmem:[%s6522_s11 + $0xb0] sm:$0xff]  ;;  %v6263_v28 = vld [vmem:[%s6520_s10 + $0xe28] ss:$16 sps:$4 sm:$0xff]  }
 0x1be   : > { %3913 = vmatprep.subr.bf16.mxu0 %v6172_v24  ;;  %4337 = vmatprep.subr.bf16.mxu1 %v6175_v25  ;;  %v357_v24 = vld [vmem:[%s6522_s11 + $0xf0] sm:$0xff] }
 0x1bf   : > { %v6254_v25 = vld [vmem:[%s6520_s10 + $0xe00] ss:$16 sps:$4 sm:$0xff]  }
 0x1c0   : > { %3899 = vmatmul.mubr.bf16.gmra.mrb[4].mxu0 %v4905_v26  ;;  %4323 = vmatmul.mubr.bf16.gmra.mrb[4].mxu1 %v4905_v26  ;;  %v6257_v26 = vld [vmem:[%s6520_s10 + $0xe08] ss:$16 sps:$4 sm:$0xff]   ;;  %v6260_v27 = vld [vmem:[%s6520_s10 + $0xe20] ss:$16 sps:$4 sm:$0xff]  }
 0x1c1   : > { %3914 = vmatpush1.bf16.msra.mxu0 %v6170_v29  ;;  %4338 = vmatpush1.bf16.msra.mxu1 %v6173_v30  ;;  %v6262_v29 = vld [vmem:[%s6520_s10 + $0xe24] ss:$16 sps:$4 sm:$0xff]   ;;  %v6265_v30 = vld [vmem:[%s6520_s10 + $0xe2c] ss:$16 sps:$4 sm:$0xff]  }
 0x1c2   : > { %3915 = vmatprep.subr.bf16.mxu0 %v6178_v31  ;;  %4339 = vmatprep.subr.bf16.mxu1 %v6181_v32  ;;  %v4908_v31 = vcombine.high %v349_v19, %v357_v24  ;;  %v6268_v32 = vld [vmem:[%s6520_s10 + $0xe44] ss:$16 sps:$4 sm:$0xff]  }
 0x1c3   : > { %3941 = vmatprep.mubr.bf16.mxu0 %v4892_v33  ;;  %4365 = vmatprep.mubr.bf16.mxu1 %v4892_v33  ;;  %v6271_v33 = vld [vmem:[%s6520_s10 + $0xe4c] ss:$16 sps:$4 sm:$0xff]  }
 0x1c5   : > { %3916 = vmatpush1.bf16.msra.mxu0 %v6176_v34  ;;  %4340 = vmatpush1.bf16.msra.mxu1 %v6179_v35  ;;  %v4907_v34 = vcombine.low %v349_v19, %v357_v24  ;;  %v7060_v35 = vld [vmem:[%s6522_s11 + $0x38] sm:$0xff]  ;;  %v6346_v24 = vld [vmem:[%s6520_s10 + $0xfe4] ss:$16 sps:$4 sm:$0xff]  }
 0x1c6   : > { %3917 = vmatprep.subr.bf16.mxu0 %v6184_v36  ;;  %4341 = vmatprep.subr.bf16.mxu1 %v6187_v37  ;;  %v7063_v36 = vld [vmem:[%s6522_s11 + $0x78] sm:$0xff]  ;;  %v6266_v37 = vld [vmem:[%s6520_s10 + $0xe40] ss:$16 sps:$4 sm:$0xff]  }
 0x1c7   : > { %v6341_v19 = vld [vmem:[%s6520_s10 + $0xfc8] ss:$16 sps:$4 sm:$0xff]  }
 0x1c9   : > { %3918 = vmatpush1.bf16.msra.mxu0 %v6182_v38  ;;  %4342 = vmatpush1.bf16.msra.mxu1 %v6185_v39  ;;  %v6269_v38 = vld [vmem:[%s6520_s10 + $0xe48] ss:$16 sps:$4 sm:$0xff]   ;;  %v6274_v39 = vld [vmem:[%s6520_s10 + $0xe64] ss:$16 sps:$4 sm:$0xff]  }
 0x1ca   : > { %3919 = vmatprep.subr.bf16.mxu0 %v6190_v40  ;;  %4343 = vmatprep.subr.bf16.mxu1 %v6193_v41  ;;  %v6277_v40 = vld [vmem:[%s6520_s10 + $0xe6c] ss:$16 sps:$4 sm:$0xff]   ;;  %v4894_v41 = vcombine.high %v7060_v35, %v7063_v36 }
 0x1cd   : > { %3920 = vmatpush1.bf16.msra.mxu0 %v6188_v42  ;;  %4344 = vmatpush1.bf16.msra.mxu1 %v6191_v43  ;;  %v6272_v42 = vld [vmem:[%s6520_s10 + $0xe60] ss:$16 sps:$4 sm:$0xff]   ;;  %v6275_v43 = vld [vmem:[%s6520_s10 + $0xe68] ss:$16 sps:$4 sm:$0xff]  }
 0x1ce   : > { %3921 = vmatprep.subr.bf16.mxu0 %v6196_v44  ;;  %4345 = vmatprep.subr.bf16.mxu1 %v6199_v45  ;;  %v6280_v44 = vld [vmem:[%s6520_s10 + $0xe84] ss:$16 sps:$4 sm:$0xff]   ;;  %v6283_v45 = vld [vmem:[%s6520_s10 + $0xe8c] ss:$16 sps:$4 sm:$0xff]  }
 0x1d1   : > { %3922 = vmatpush1.bf16.msra.mxu0 %v6194_v46  ;;  %4346 = vmatpush1.bf16.msra.mxu1 %v6197_v47  ;;  %v6278_v46 = vld [vmem:[%s6520_s10 + $0xe80] ss:$16 sps:$4 sm:$0xff]   ;;  %v6281_v47 = vld [vmem:[%s6520_s10 + $0xe88] ss:$16 sps:$4 sm:$0xff]  }
 0x1d2   : > { %3923 = vmatprep.subr.bf16.mxu0 %v6202_v48  ;;  %4347 = vmatprep.subr.bf16.mxu1 %v6205_v49  ;;  %v6286_v48 = vld [vmem:[%s6520_s10 + $0xea4] ss:$16 sps:$4 sm:$0xff]   ;;  %v6289_v49 = vld [vmem:[%s6520_s10 + $0xeac] ss:$16 sps:$4 sm:$0xff]  }
 0x1d5   : > { %3924 = vmatpush1.bf16.msra.mxu0 %v6200_v50  ;;  %4348 = vmatpush1.bf16.msra.mxu1 %v6203_v51  ;;  %v6284_v50 = vld [vmem:[%s6520_s10 + $0xea0] ss:$16 sps:$4 sm:$0xff]   ;;  %v6287_v51 = vld [vmem:[%s6520_s10 + $0xea8] ss:$16 sps:$4 sm:$0xff]  }
 0x1d6   : > { %3925 = vmatprep.subr.bf16.mxu0 %v6208_v52  ;;  %4349 = vmatprep.subr.bf16.mxu1 %v6211_v53  ;;  %v6292_v52 = vld [vmem:[%s6520_s10 + $0xec4] ss:$16 sps:$4 sm:$0xff]   ;;  %v6295_v53 = vld [vmem:[%s6520_s10 + $0xecc] ss:$16 sps:$4 sm:$0xff]  }
 0x1d9   : > { %3926 = vmatpush1.bf16.msra.mxu0 %v6206_v54  ;;  %4350 = vmatpush1.bf16.msra.mxu1 %v6209_v55  ;;  %v6290_v54 = vld [vmem:[%s6520_s10 + $0xec0] ss:$16 sps:$4 sm:$0xff]   ;;  %v6293_v55 = vld [vmem:[%s6520_s10 + $0xec8] ss:$16 sps:$4 sm:$0xff]  }
 0x1da   : > { %3927 = vmatprep.subr.bf16.mxu0 %v6214_v56  ;;  %4351 = vmatprep.subr.bf16.mxu1 %v6217_v57  ;;  %v6298_v56 = vld [vmem:[%s6520_s10 + $0xee4] ss:$16 sps:$4 sm:$0xff]   ;;  %v6301_v57 = vld [vmem:[%s6520_s10 + $0xeec] ss:$16 sps:$4 sm:$0xff]  }
 0x1dd   : > { %3928 = vmatpush1.bf16.msra.mxu0 %v6212_v59  ;;  %4352 = vmatpush1.bf16.msra.mxu1 %v6215_v61  ;;  %v6296_v59 = vld [vmem:[%s6520_s10 + $0xee0] ss:$16 sps:$4 sm:$0xff]   ;;  %v6299_v61 = vld [vmem:[%s6520_s10 + $0xee8] ss:$16 sps:$4 sm:$0xff]  }
 0x1de   : > { %3929 = vmatprep.subr.bf16.mxu0 %v6220_v62  ;;  %4353 = vmatprep.subr.bf16.mxu1 %v6223_v63  ;;  %v6304_v62 = vld [vmem:[%s6520_s10 + $0xf04] ss:$16 sps:$4 sm:$0xff]   ;;  %v6307_v63 = vld [vmem:[%s6520_s10 + $0xf0c] ss:$16 sps:$4 sm:$0xff]  }
 0x1e1   : > { %3930 = vmatpush1.bf16.msra.mxu0 %v6218_v58  ;;  %4354 = vmatpush1.bf16.msra.mxu1 %v6221_v60  ;;  %v6302_v58 = vld [vmem:[%s6520_s10 + $0xf00] ss:$16 sps:$4 sm:$0xff]   ;;  %v6305_v60 = vld [vmem:[%s6520_s10 + $0xf08] ss:$16 sps:$4 sm:$0xff]  }
 0x1e2   : > { %3931 = vmatprep.subr.bf16.mxu0 %v6226_v0  ;;  %4355 = vmatprep.subr.bf16.mxu1 %v6229_v1  ;;  %v6310_v0 = vld [vmem:[%s6520_s10 + $0xf24] ss:$16 sps:$4 sm:$0xff]   ;;  %v6313_v1 = vld [vmem:[%s6520_s10 + $0xf2c] ss:$16 sps:$4 sm:$0xff]  }
 0x1e5   : > { %3932 = vmatpush1.bf16.msra.mxu0 %v6224_v3  ;;  %4356 = vmatpush1.bf16.msra.mxu1 %v6227_v5  ;;  %v6308_v3 = vld [vmem:[%s6520_s10 + $0xf20] ss:$16 sps:$4 sm:$0xff]   ;;  %v6311_v5 = vld [vmem:[%s6520_s10 + $0xf28] ss:$16 sps:$4 sm:$0xff]  }
 0x1e6   : > { %3933 = vmatprep.subr.bf16.mxu0 %v6232_v6  ;;  %4357 = vmatprep.subr.bf16.mxu1 %v6235_v7  ;;  %v6316_v6 = vld [vmem:[%s6520_s10 + $0xf44] ss:$16 sps:$4 sm:$0xff]   ;;  %v6319_v7 = vld [vmem:[%s6520_s10 + $0xf4c] ss:$16 sps:$4 sm:$0xff]  }
 0x1e9   : > { %3934 = vmatpush1.bf16.msra.mxu0 %v6230_v8  ;;  %4358 = vmatpush1.bf16.msra.mxu1 %v6233_v2  ;;  %v6314_v8 = vld [vmem:[%s6520_s10 + $0xf40] ss:$16 sps:$4 sm:$0xff]   ;;  %v6317_v2 = vld [vmem:[%s6520_s10 + $0xf48] ss:$16 sps:$4 sm:$0xff]  }
 0x1ea   : > { %3935 = vmatprep.subr.bf16.mxu0 %v6238_v4  ;;  %4359 = vmatprep.subr.bf16.mxu1 %v6241_v9  ;;  %v6322_v4 = vld [vmem:[%s6520_s10 + $0xf64] ss:$16 sps:$4 sm:$0xff]   ;;  %v6325_v9 = vld [vmem:[%s6520_s10 + $0xf6c] ss:$16 sps:$4 sm:$0xff]  }
 0x1ed   : > { %3936 = vmatpush1.bf16.msra.mxu0 %v6236_v11  ;;  %4360 = vmatpush1.bf16.msra.mxu1 %v6239_v13  ;;  %v6320_v11 = vld [vmem:[%s6520_s10 + $0xf60] ss:$16 sps:$4 sm:$0xff]   ;;  %v6323_v13 = vld [vmem:[%s6520_s10 + $0xf68] ss:$16 sps:$4 sm:$0xff]  }
 0x1ee   : > { %3937 = vmatprep.subr.bf16.mxu0 %v6244_v14  ;;  %4361 = vmatprep.subr.bf16.mxu1 %v6247_v15  ;;  %v6328_v14 = vld [vmem:[%s6520_s10 + $0xf84] ss:$16 sps:$4 sm:$0xff]   ;;  %v6331_v15 = vld [vmem:[%s6520_s10 + $0xf8c] ss:$16 sps:$4 sm:$0xff]  }
 0x1f1   : > { %3938 = vmatpush1.bf16.msra.mxu0 %v6242_v16  ;;  %4362 = vmatpush1.bf16.msra.mxu1 %v6245_v17  ;;  %v6326_v16 = vld [vmem:[%s6520_s10 + $0xf80] ss:$16 sps:$4 sm:$0xff]   ;;  %v6329_v17 = vld [vmem:[%s6520_s10 + $0xf88] ss:$16 sps:$4 sm:$0xff]  }
 0x1f2   : > { %3939 = vmatprep.subr.bf16.mxu0 %v6250_v10  ;;  %4363 = vmatprep.subr.bf16.mxu1 %v6253_v12  ;;  %v6334_v10 = vld [vmem:[%s6520_s10 + $0xfa4] ss:$16 sps:$4 sm:$0xff]   ;;  %v6337_v12 = vld [vmem:[%s6520_s10 + $0xfac] ss:$16 sps:$4 sm:$0xff]  }
 0x1f5   : > { %3940 = vmatpush1.bf16.msra.mxu0 %v6248_v20  ;;  %4364 = vmatpush1.bf16.msra.mxu1 %v6251_v21  ;;  %v6332_v20 = vld [vmem:[%s6520_s10 + $0xfa0] ss:$16 sps:$4 sm:$0xff]   ;;  %v6335_v21 = vld [vmem:[%s6520_s10 + $0xfa8] ss:$16 sps:$4 sm:$0xff]  }
 0x1f6   : > { %3962 = vmatprep.subr.bf16.mxu0 %v6256_v22  ;;  %4386 = vmatprep.subr.bf16.mxu1 %v6259_v23  ;;  %v6340_v22 = vld [vmem:[%s6520_s10 + $0xfc4] ss:$16 sps:$4 sm:$0xff]   ;;  %v6343_v23 = vld [vmem:[%s6520_s10 + $0xfcc] ss:$16 sps:$4 sm:$0xff]  }
 0x1f8   : > { %3942 = vmatmul.mubr.bf16.vlgmr.msra.gmra.mrb[0].mxu0 %v4891_v18  ;;  %4366 = vmatmul.mubr.bf16.vlgmr.msra.gmra.mrb[0].mxu1 %v4891_v18  ;;  %v6338_v18 = vld [vmem:[%s6520_s10 + $0xfc0] ss:$16 sps:$4 sm:$0xff]  }
 0x1f9   : > { %3963 = vmatpush1.bf16.msra.mxu0 %v6254_v25  ;;  %4387 = vmatpush1.bf16.msra.mxu1 %v6257_v26  ;;  %v6349_v25 = vld [vmem:[%s6520_s10 + $0xfec] ss:$16 sps:$4 sm:$0xff]   ;;  %v6344_v26 = vld [vmem:[%s6520_s10 + $0xfe0] ss:$16 sps:$4 sm:$0xff]  }
 0x1fa   : > { %3964 = vmatprep.subr.bf16.mxu0 %v6262_v29  ;;  %4388 = vmatprep.subr.bf16.mxu1 %v6265_v30  ;;  %v6347_v29 = vld [vmem:[%s6520_s10 + $0xfe8] ss:$16 sps:$4 sm:$0xff]  }
 0x1fb   : > { %3951 = vmatprep.mubr.bf16.mxu0 %v4908_v31  ;;  %4375 = vmatprep.mubr.bf16.mxu1 %v4908_v31  ;;  %v350_v30 = vld [vmem:[%s6522_s11 + $0xb8] sm:$0xff] }
 0x1fc   : > { %v358_v31 = vld [vmem:[%s6522_s11 + $0xf8] sm:$0xff] }
 0x1fd   : > { %3965 = vmatpush1.bf16.msra.mxu0 %v6260_v27  ;;  %4389 = vmatpush1.bf16.msra.mxu1 %v6263_v28  ;;  %v4893_v27 = vcombine.low %v7060_v35, %v7063_v36  ;;  %v4910_v28 = vcombine.high %v350_v30, %v358_v31 }
 0x1fe   : > { %3966 = vmatprep.subr.bf16.mxu0 %v6268_v32  ;;  %4390 = vmatprep.subr.bf16.mxu1 %v6271_v33  ;;  %v4909_v32 = vcombine.low %v350_v30, %v358_v31  ;;  %v311_v33 = vld [vmem:[#allocation2] sm:$0xff] }
 0x200   : > { %3952 = vmatmul.mubr.bf16.gmra.mrb[4].mxu0 %v4907_v34  ;;  %4376 = vmatmul.mubr.bf16.gmra.mrb[4].mxu1 %v4907_v34  ;;  %v313_v34 = vld [vmem:[#allocation2 + $0x10] sm:$0xff] }
 0x201   : > { %3967 = vmatpush1.bf16.msra.mxu0 %v6266_v37  ;;  %4391 = vmatpush1.bf16.msra.mxu1 %v6269_v38  ;;  %v312_v37 = vld [vmem:[#allocation2 + $0x8] sm:$0xff]  ;;  %v314_v38 = vld [vmem:[#allocation2 + $0x18] sm:$0xff] }
 0x202   : > { %3968 = vmatprep.subr.bf16.mxu0 %v6274_v39  ;;  %4392 = vmatprep.subr.bf16.mxu1 %v6277_v40 }
 0x203   : > { %3994 = vmatprep.mubr.bf16.mxu0 %v4894_v41  ;;  %4418 = vmatprep.mubr.bf16.mxu1 %v4894_v41  ;;  %v315_v41 = vld [vmem:[#allocation2 + $0x20] sm:$0xff] }
 0x205   : > { %3969 = vmatpush1.bf16.msra.mxu0 %v6272_v42  ;;  %4393 = vmatpush1.bf16.msra.mxu1 %v6275_v43  ;;  %v317_v42 = vld [vmem:[#allocation2 + $0x30] sm:$0xff] }
 0x206   : > { %3970 = vmatprep.subr.bf16.mxu0 %v6280_v44  ;;  %4394 = vmatprep.subr.bf16.mxu1 %v6283_v45  ;;  %v316_v45 = vld [vmem:[#allocation2 + $0x28] sm:$0xff] }
 0x209   : > { %3971 = vmatpush1.bf16.msra.mxu0 %v6278_v46  ;;  %4395 = vmatpush1.bf16.msra.mxu1 %v6281_v47  ;;  %v318_v46 = vld [vmem:[#allocation2 + $0x38] sm:$0xff] }
 0x20a   : > { %3972 = vmatprep.subr.bf16.mxu0 %v6286_v48  ;;  %4396 = vmatprep.subr.bf16.mxu1 %v6289_v49 }
 0x20d   : > { %3973 = vmatpush1.bf16.msra.mxu0 %v6284_v50  ;;  %4397 = vmatpush1.bf16.msra.mxu1 %v6287_v51 }
 0x20e   : > { %3974 = vmatprep.subr.bf16.mxu0 %v6292_v52  ;;  %4398 = vmatprep.subr.bf16.mxu1 %v6295_v53 }
 0x211   : > { %3975 = vmatpush1.bf16.msra.mxu0 %v6290_v54  ;;  %4399 = vmatpush1.bf16.msra.mxu1 %v6293_v55 }
 0x212   : > { %3976 = vmatprep.subr.bf16.mxu0 %v6298_v56  ;;  %4400 = vmatprep.subr.bf16.mxu1 %v6301_v57  ;;  %v319_v57 = vld [vmem:[#allocation2 + $0x40] sm:$0xff] }
 0x215   : > { %3977 = vmatpush1.bf16.msra.mxu0 %v6296_v59  ;;  %4401 = vmatpush1.bf16.msra.mxu1 %v6299_v61  ;;  %v321_v59 = vld [vmem:[#allocation2 + $0x50] sm:$0xff]  ;;  %v320_v61 = vld [vmem:[#allocation2 + $0x48] sm:$0xff] }
 0x216   : > { %3978 = vmatprep.subr.bf16.mxu0 %v6304_v62  ;;  %4402 = vmatprep.subr.bf16.mxu1 %v6307_v63  ;;  %v322_v62 = vld [vmem:[#allocation2 + $0x58] sm:$0xff] }
 0x219   : > { %3979 = vmatpush1.bf16.msra.mxu0 %v6302_v58  ;;  %4403 = vmatpush1.bf16.msra.mxu1 %v6305_v60  ;;  %v323_v60 = vld [vmem:[#allocation2 + $0x60] sm:$0xff] }
 0x21a   : > { %3980 = vmatprep.subr.bf16.mxu0 %v6310_v0  ;;  %4404 = vmatprep.subr.bf16.mxu1 %v6313_v1  ;;  %v325_v0 = vld [vmem:[#allocation2 + $0x70] sm:$0xff] }
 0x21d   : > { %3981 = vmatpush1.bf16.msra.mxu0 %v6308_v3  ;;  %4405 = vmatpush1.bf16.msra.mxu1 %v6311_v5 }
 0x21e   : > { %3982 = vmatprep.subr.bf16.mxu0 %v6316_v6  ;;  %4406 = vmatprep.subr.bf16.mxu1 %v6319_v7  ;;  %v324_v7 = vld [vmem:[#allocation2 + $0x68] sm:$0xff] }
 0x221   : > { %3983 = vmatpush1.bf16.msra.mxu0 %v6314_v8  ;;  %4407 = vmatpush1.bf16.msra.mxu1 %v6317_v2  ;;  %v326_v8 = vld [vmem:[#allocation2 + $0x78] sm:$0xff] }
 0x222   : > { %3984 = vmatprep.subr.bf16.mxu0 %v6322_v4  ;;  %4408 = vmatprep.subr.bf16.mxu1 %v6325_v9 }
 0x225   : > { %3985 = vmatpush1.bf16.msra.mxu0 %v6320_v11  ;;  %4409 = vmatpush1.bf16.msra.mxu1 %v6323_v13 }
 0x226   : > { %3986 = vmatprep.subr.bf16.mxu0 %v6328_v14  ;;  %4410 = vmatprep.subr.bf16.mxu1 %v6331_v15 }
 0x229   : > { %3987 = vmatpush1.bf16.msra.mxu0 %v6326_v16  ;;  %4411 = vmatpush1.bf16.msra.mxu1 %v6329_v17 }
 0x22a   : > { %3988 = vmatprep.subr.bf16.mxu0 %v6334_v10  ;;  %4412 = vmatprep.subr.bf16.mxu1 %v6337_v12 }
 0x22d   : > { %3989 = vmatpush1.bf16.msra.mxu0 %v6332_v20  ;;  %4413 = vmatpush1.bf16.msra.mxu1 %v6335_v21 }
 0x22e   : > { %3990 = vmatprep.subr.bf16.mxu0 %v6340_v22  ;;  %4414 = vmatprep.subr.bf16.mxu1 %v6343_v23 }
 0x231   : > { %3991 = vmatpush1.bf16.msra.mxu0 %v6338_v18  ;;  %4415 = vmatpush1.bf16.msra.mxu1 %v6341_v19 }
 0x232   : > { %3992 = vmatprep.subr.bf16.mxu0 %v6346_v24  ;;  %4416 = vmatprep.subr.bf16.mxu1 %v6349_v25 }
 0x235   : > { %3993 = vmatpush1.bf16.msra.mxu0 %v6344_v26  ;;  %4417 = vmatpush1.bf16.msra.mxu1 %v6347_v29 }
 0x238   : > { %3995 = vmatmul.mubr.bf16.vlgmr.msra.gmra.mrb[0].mxu0 %v4893_v27  ;;  %4419 = vmatmul.mubr.bf16.vlgmr.msra.gmra.mrb[0].mxu1 %v4893_v27 }
 0x239   : > { %4004 = vmatprep.mubr.bf16.mxu0 %v4910_v28  ;;  %4428 = vmatprep.mubr.bf16.mxu1 %v4910_v28 }
 0x240   : > { %4005 = vmatmul.mubr.bf16.gmra.mrb[4].mxu0 %v4909_v32  ;;  %4429 = vmatmul.mubr.bf16.gmra.mrb[4].mxu1 %v4909_v32 }
 0x30b   : > { %v3996_v39 = vpop.f32.mrb[0].mxu0  ;;  %v4420_v40 = vpop.f32.mrb[0].mxu1 }
 0x30c   : > { %v4439_v43 = vadd.f32 %v3996_v39, %v311_v33  ;;  %v4441_v35 = vadd.f32 %v4420_v40, %v313_v34  ;;  %v3998_v36 = vpop.f32.mrb[1].mxu0  ;;  %v4422_v44 = vpop.f32.mrb[1].mxu1 }
 0x30d   : > { %v4440_v47 = vadd.f32 %v3998_v36, %v312_v37  ;;  %v4442_v48 = vadd.f32 %v4422_v44, %v314_v38  ;;  %v4000_v49 = vpop.f32.mrb[2].mxu0  ;;  %v4424_v50 = vpop.f32.mrb[2].mxu1 }
 0x30e   : > { %4455 = vst [vmem:[#allocation2] sm:$0xff] %v4439_v43  ;;  %4457 = vst [vmem:[#allocation2 + $0x10] sm:$0xff] %v4441_v35  ;;  %v4443_v51 = vadd.f32 %v4000_v49, %v315_v41  ;;  %v4445_v52 = vadd.f32 %v4424_v50, %v317_v42  ;;  %v4002_v53 = vpop.f32.mrb[3].mxu0  ;;  %v4426_v54 = vpop.f32.mrb[3].mxu1 }
 0x30f   : > { %4456 = vst [vmem:[#allocation2 + $0x8] sm:$0xff] %v4440_v47  ;;  %4458 = vst [vmem:[#allocation2 + $0x18] sm:$0xff] %v4442_v48  ;;  %v4444_v55 = vadd.f32 %v4002_v53, %v316_v45  ;;  %v4446_v56 = vadd.f32 %v4426_v54, %v318_v46 }
 0x310   : > { %4459 = vst [vmem:[#allocation2 + $0x20] sm:$0xff] %v4443_v51  ;;  %4461 = vst [vmem:[#allocation2 + $0x30] sm:$0xff] %v4445_v52 }
 0x311   : > { %4460 = vst [vmem:[#allocation2 + $0x28] sm:$0xff] %v4444_v55  ;;  %4462 = vst [vmem:[#allocation2 + $0x38] sm:$0xff] %v4446_v56 }
 0x313   : > { %v4006_v63 = vpop.f32.mrb[4].mxu0  ;;  %v4430_v58 = vpop.f32.mrb[4].mxu1  ;;  %4474 = sbr.rel (%p5423_p10) target bundleno = 900 (0x384), region = 67 }
 0x314   : > { %v4447_v1 = vadd.f32 %v4006_v63, %v319_v57  ;;  %v4449_v3 = vadd.f32 %v4430_v58, %v321_v59  ;;  %v4008_v5 = vpop.f32.mrb[5].mxu0  ;;  %v4432_v6 = vpop.f32.mrb[5].mxu1 }
 0x315   : > { %v4448_v2 = vadd.f32 %v4008_v5, %v320_v61  ;;  %v4450_v4 = vadd.f32 %v4432_v6, %v322_v62  ;;  %v4010_v9 = vpop.f32.mrb[6].mxu0  ;;  %v4434_v11 = vpop.f32.mrb[6].mxu1  ;;  %v4475_v12 = vld [vmem:[#allocation2] sm:$0xff] (!%p5423_p10)  ;;  %v4477_v21 = vld [vmem:[#allocation2 + $0x10] sm:$0xff] (!%p5423_p10) }
 0x316   : > { %4463 = vst [vmem:[#allocation2 + $0x40] sm:$0xff] %v4447_v1  ;;  %4465 = vst [vmem:[#allocation2 + $0x50] sm:$0xff] %v4449_v3  ;;  %v4451_v13 = vadd.f32 %v4010_v9, %v323_v60  ;;  %v4453_v14 = vadd.f32 %v4434_v11, %v325_v0  ;;  %v4012_v15 = vpop.f32.mrb[7].mxu0  ;;  %v4436_v16 = vpop.f32.mrb[7].mxu1  ;;  %v4476_v20 = vld [vmem:[#allocation2 + $0x8] sm:$0xff] (!%p5423_p10)  ;;  %v4478_v22 = vld [vmem:[#allocation2 + $0x18] sm:$0xff] (!%p5423_p10) }
 0x317   : > { %4464 = vst [vmem:[#allocation2 + $0x48] sm:$0xff] %v4448_v2  ;;  %4466 = vst [vmem:[#allocation2 + $0x58] sm:$0xff] %v4450_v4  ;;  %v4452_v17 = vadd.f32 %v4012_v15, %v324_v7  ;;  %v4454_v10 = vadd.f32 %v4436_v16, %v326_v8  ;;  %v4479_v23 = vld [vmem:[#allocation2 + $0x20] sm:$0xff] (!%p5423_p10)  ;;  %v4481_v19 = vld [vmem:[#allocation2 + $0x30] sm:$0xff] (!%p5423_p10) }
 0x318   : > { %4467 = vst [vmem:[#allocation2 + $0x60] sm:$0xff] %v4451_v13  ;;  %4469 = vst [vmem:[#allocation2 + $0x70] sm:$0xff] %v4453_v14  ;;  %v4480_v18 = vld [vmem:[#allocation2 + $0x28] sm:$0xff] (!%p5423_p10)  ;;  %v4482_v24 = vld [vmem:[#allocation2 + $0x38] sm:$0xff] (!%p5423_p10)  ;;  %v4491_v26 = vadd.f32 (!%p5423_p10), %v4479_v23, %v4475_v12  ;;  %v4509_v28 = vadd.f32 (!%p5423_p10), %v4481_v19, %v4477_v21 }
 0x319   : > { %4468 = vst [vmem:[#allocation2 + $0x68] sm:$0xff] %v4452_v17  ;;  %4470 = vst [vmem:[#allocation2 + $0x78] sm:$0xff] %v4454_v10  ;;  %v4500_v29 = vadd.f32 (!%p5423_p10), %v4480_v18, %v4476_v20  ;;  %v4518_v32 = vadd.f32 (!%p5423_p10), %v4482_v24, %v4478_v22 }
 0x31d   : > { %v4483_v25 = vld [vmem:[#allocation2 + $0x40] sm:$0xff]  ;;  %v4485_v31 = vld [vmem:[#allocation2 + $0x50] sm:$0xff] }
 0x31e   : > { %v4484_v30 = vld [vmem:[#allocation2 + $0x48] sm:$0xff]  ;;  %v4486_v27 = vld [vmem:[#allocation2 + $0x58] sm:$0xff]  ;;  %v4492_v38 = vadd.f32 %v4491_v26, %v4483_v25  ;;  %v4510_v41 = vadd.f32 %v4509_v28, %v4485_v31 }
 0x31f   : > { %v4487_v33 = vld [vmem:[#allocation2 + $0x60] sm:$0xff]  ;;  %v4489_v37 = vld [vmem:[#allocation2 + $0x70] sm:$0xff]  ;;  %v4501_v39 = vadd.f32 %v4500_v29, %v4484_v30  ;;  %v4519_v42 = vadd.f32 %v4518_v32, %v4486_v27 }
 0x320   : > { %v4488_v34 = vld [vmem:[#allocation2 + $0x68] sm:$0xff]  ;;  %v4490_v40 = vld [vmem:[#allocation2 + $0x78] sm:$0xff]  ;;  %v4493_v43 = vadd.f32 %v4492_v38, %v4487_v33  ;;  %v4511_v36 = vadd.f32 %v4510_v41, %v4489_v37 }
 0x321   : > { %v4502_v35 = vadd.f32 %v4501_v39, %v4488_v34  ;;  %v4520_v44 = vadd.f32 %v4519_v42, %v4490_v40 }
 0x322   : > { %v4494_v45 = vrot.slane %v4493_v43, 4  ;;  %v4512_v47 = vrot.slane %v4511_v36, 4 }
 0x323   : > { %v4503_v46 = vrot.slane %v4502_v35, 4  ;;  %v4521_v48 = vrot.slane %v4520_v44, 4 }
 0x324   : > { %v4495_v49 = vadd.f32 %v4494_v45, %v4493_v43  ;;  %v4513_v51 = vadd.f32 %v4512_v47, %v4511_v36 }
 0x325   : > { %v4504_v50 = vadd.f32 %v4503_v46, %v4502_v35  ;;  %v4522_v52 = vadd.f32 %v4521_v48, %v4520_v44 }
 0x326   : > { %v4496_v53 = vrot.slane %v4495_v49, 2  ;;  %v4514_v55 = vrot.slane %v4513_v51, 2 }
 0x327   : > { %v4505_v54 = vrot.slane %v4504_v50, 2  ;;  %v4523_v56 = vrot.slane %v4522_v52, 2 }
 0x328   : > { %v4497_v57 = vadd.f32 %v4496_v53, %v4495_v49  ;;  %v4515_v61 = vadd.f32 %v4514_v55, %v4513_v51 }
 0x329   : > { %v4506_v59 = vadd.f32 %v4505_v54, %v4504_v50  ;;  %v4524_v62 = vadd.f32 %v4523_v56, %v4522_v52 }
 0x32a   : > { %v4498_v63 = vrot.slane %v4497_v57, 1  ;;  %v4516_v60 = vrot.slane %v4515_v61, 1 }
 0x32b   : > { %v4507_v58 = vrot.slane %v4506_v59, 1  ;;  %v4525_v0 = vrot.slane %v4524_v62, 1 }
 0x32c   : > { %v4499_v1 = vadd.f32 %v4498_v63, %v4497_v57  ;;  %v4517_v5 = vadd.f32 %v4516_v60, %v4515_v61 }
 0x32d   : > { %v4508_v3 = vadd.f32 %v4507_v58, %v4506_v59  ;;  %v4526_v6 = vadd.f32 %v4525_v0, %v4524_v62 }
 0x32e   : > { %v4527_v7 = vmul.f32 0.03125, %v4499_v1  ;;  %v4529_v2 = vmul.f32 0.03125, %v4517_v5 }
 0x32f   : > { %v4528_v8 = vmul.f32 0.03125, %v4508_v3  ;;  %v4530_v4 = vmul.f32 0.03125, %v4526_v6 }
 0x330   : > { %v7126_v9 = vsub.f32 %v4475_v12, %v4527_v7  ;;  %v7130_v13 = vsub.f32 %v4479_v23, %v4527_v7  ;;  %v7134_v15 = vsub.f32 %v4477_v21, %v4529_v2  ;;  %v7138_v17 = vsub.f32 %v4481_v19, %v4529_v2 }
 0x331   : > { %v7128_v11 = vsub.f32 %v4476_v20, %v4528_v8  ;;  %v7132_v14 = vsub.f32 %v4480_v18, %v4528_v8  ;;  %v7136_v16 = vsub.f32 %v4478_v22, %v4530_v4  ;;  %v7140_v10 = vsub.f32 %v4482_v24, %v4530_v4 }
 0x332   : > { %v7142_v26 = vsub.f32 %v4483_v25, %v4527_v7  ;;  %v7144_v29 = vsub.f32 %v4484_v30, %v4528_v8  ;;  %v7146_v12 = vsub.f32 %v4485_v31, %v4529_v2  ;;  %v7148_v20 = vsub.f32 %v4486_v27, %v4530_v4 }
 0x333   : > { %v7150_v23 = vsub.f32 %v4487_v33, %v4527_v7  ;;  %v7152_v18 = vsub.f32 %v4488_v34, %v4528_v8  ;;  %v7154_v21 = vsub.f32 %v4489_v37, %v4529_v2  ;;  %v7156_v22 = vsub.f32 %v4490_v40, %v4530_v4 }
 0x334   : > { %v4547_v19 = vmul.f32 %v7126_v9, %v7126_v9  ;;  %v4548_v24 = vmul.f32 %v7128_v11, %v7128_v11  ;;  %v4549_v25 = vmul.f32 %v7134_v15, %v7134_v15  ;;  %v4550_v30 = vmul.f32 %v7136_v16, %v7136_v16 }
 0x335   : > { %v4551_v31 = vmul.f32 %v7130_v13, %v7130_v13  ;;  %v4552_v27 = vmul.f32 %v7132_v14, %v7132_v14  ;;  %v4553_v28 = vmul.f32 %v7138_v17, %v7138_v17  ;;  %v4554_v32 = vmul.f32 %v7140_v10, %v7140_v10 }
 0x336   : > { %v4555_v33 = vmul.f32 %v7142_v26, %v7142_v26  ;;  %v4556_v34 = vmul.f32 %v7144_v29, %v7144_v29  ;;  %v4557_v37 = vmul.f32 %v7146_v12, %v7146_v12  ;;  %v4558_v38 = vmul.f32 %v7148_v20, %v7148_v20 }
 0x337   : > { %v4559_v39 = vmul.f32 %v7150_v23, %v7150_v23  ;;  %v4560_v40 = vmul.f32 %v7152_v18, %v7152_v18  ;;  %v4561_v41 = vmul.f32 %v7154_v21, %v7154_v21  ;;  %v4562_v42 = vmul.f32 %v7156_v22, %v7156_v22 }
 0x338   : > { %v4563_v43 = vadd.f32 %v4551_v31, %v4547_v19  ;;  %v4572_v35 = vadd.f32 %v4552_v27, %v4548_v24  ;;  %v4581_v36 = vadd.f32 %v4553_v28, %v4549_v25  ;;  %v4590_v44 = vadd.f32 %v4554_v32, %v4550_v30 }
 0x33a   : > { %v4564_v45 = vadd.f32 %v4563_v43, %v4555_v33  ;;  %v4573_v46 = vadd.f32 %v4572_v35, %v4556_v34  ;;  %v4582_v47 = vadd.f32 %v4581_v36, %v4557_v37  ;;  %v4591_v48 = vadd.f32 %v4590_v44, %v4558_v38 }
 0x33c   : > { %v4565_v49 = vadd.f32 %v4564_v45, %v4559_v39  ;;  %v4574_v50 = vadd.f32 %v4573_v46, %v4560_v40  ;;  %v4583_v51 = vadd.f32 %v4582_v47, %v4561_v41  ;;  %v4592_v52 = vadd.f32 %v4591_v48, %v4562_v42 }
 0x33d   : > { %v6383_v39 = vmov 1966171168   ;;  %v4621_v41 = vlaneseq }
 0x33e   : > { %v4566_v53 = vrot.slane %v4565_v49, 4  ;;  %v4575_v54 = vrot.slane %v4574_v50, 4  ;;  %v4584_v55 = vrot.slane %v4583_v51, 4  ;;  %v4593_v56 = vrot.slane %v4592_v52, 4 }
 0x33f   : > { %v4619_v40 = vunpack.c.l.s4 %v6383_v39  ;;  %v4622_v43 = vshrl.u32 %v4621_v41, 7 }
 0x340   : > { %v4567_v57 = vadd.f32 %v4566_v53, %v4565_v49  ;;  %v4576_v59 = vadd.f32 %v4575_v54, %v4574_v50  ;;  %v4585_v61 = vadd.f32 %v4584_v55, %v4583_v51  ;;  %v4594_v62 = vadd.f32 %v4593_v56, %v4592_v52  ;;  %v4603_v52 = vld [vmem:[%s7284_s2] sm:$0xf] }
 0x341   : > { %v4620_v42 = vunpack.c.0.s8 %v4619_v40  ;;  %v4645_v53 = vsub.s32 0, %v4622_v43  ;;  %v4649_v55 = vsub.s32 1, %v4622_v43  ;;  %v4679_v56 = vld [vmem:[%s7285_s3] sm:$0xf] }
 0x342   : > { %v4568_v63 = vrot.slane %v4567_v57, 2  ;;  %v4577_v58 = vrot.slane %v4576_v59, 2  ;;  %v4586_v60 = vrot.slane %v4585_v61, 2  ;;  %v4595_v0 = vrot.slane %v4594_v62, 2 }
 0x343   : > { %v4623_v36 = vsub.s32 %v4620_v42, %v4622_v43 }
 0x344   : > { %v4569_v1 = vadd.f32 %v4568_v63, %v4567_v57  ;;  %v4578_v3 = vadd.f32 %v4577_v58, %v4576_v59  ;;  %v4587_v5 = vadd.f32 %v4586_v60, %v4585_v61  ;;  %v4596_v6 = vadd.f32 %v4595_v0, %v4594_v62 }
 0x345   : > { %v4653_v57 = vsub.s32 2, %v4622_v43  ;;  %v4657_v59 = vsub.s32 3, %v4622_v43  ;;  %v7196_v62 = vrot.slane %v4679_v56, %v4645_v53  ;;  %v7198_v63 = vrot.slane %v4679_v56, %v4649_v55 }
 0x346   : > { %v4570_v7 = vrot.slane %v4569_v1, 1  ;;  %v4579_v8 = vrot.slane %v4578_v3, 1  ;;  %v4588_v2 = vrot.slane %v4587_v5, 1  ;;  %v4597_v4 = vrot.slane %v4596_v6, 1 }
 0x347   : > { %v7200_v58 = vrot.slane %v4679_v56, %v4653_v57  ;;  %v7202_v60 = vrot.slane %v4679_v56, %v4657_v59 }
 0x348   : > { %v4571_v19 = vadd.f32 %v4570_v7, %v4569_v1  ;;  %v4580_v24 = vadd.f32 %v4579_v8, %v4578_v3  ;;  %v4589_v25 = vadd.f32 %v4588_v2, %v4587_v5  ;;  %v4598_v30 = vadd.f32 %v4597_v4, %v4596_v6 }
 0x34a   : > { %v4599_v31 = vmul.f32 0.03125, %v4571_v19  ;;  %v4600_v27 = vmul.f32 0.03125, %v4580_v24  ;;  %v4601_v28 = vmul.f32 0.03125, %v4589_v25  ;;  %v4602_v32 = vmul.f32 0.03125, %v4598_v30 }
 0x34c   : > { %v4604_v33 = vadd.f32 1e-05, %v4599_v31  ;;  %v4605_v34 = vadd.f32 1e-05, %v4600_v27  ;;  %v4606_v37 = vadd.f32 1e-05, %v4601_v28 }
 0x34d   : > { %v4607_v38 = vadd.f32 1e-05, %v4602_v32 }
 0x34e   : > { %6350 = vrsqrt.f32 %v4604_v33 }
 0x34f   : > { %6352 = vrsqrt.f32 %v4605_v34 }
 0x350   : > { %6354 = vrsqrt.f32 %v4606_v37 }
 0x351   : > { %6356 = vrsqrt.f32 %v4607_v38 }
 0x358   : > { %v6351_v35 = vpop.eup %6350 }
 0x359   : > { %v6353_v44 = vpop.eup %6352 }
 0x35a   : > { %v6355_v45 = vpop.eup %6354  ;;  %v4616_v46 = vcombine.low %v6351_v35, %v6353_v44 }
 0x35b   : > { %v6357_v47 = vpop.eup %6356 }
 0x35c   : > { %v4617_v48 = vcombine.low %v6355_v45, %v6357_v47  ;;  %v4624_v49 = vrot.slane %v4616_v46, %v4623_v36 }
 0x35e   : > { %v4631_v50 = vrot.slane %v4617_v48, %v4623_v36 }
 0x360   : > { %v4632_v51 = vcombine.low %v4624_v49, %v4631_v50 }
 0x362   : > { %v4639_v54 = vrot.slane %v4632_v51, %v4623_v36 }
 0x364   : > { %v4641_v61 = vmul.f32 %v4639_v54, %v4603_v52 }
 0x366   : > { %v4646_v0 = vrot.slane %v4641_v61, %v4645_v53  ;;  %v4650_v1 = vrot.slane %v4641_v61, %v4649_v55  ;;  %v7204_v3 = vrot.slane %v4641_v61, %v4653_v57  ;;  %v7206_v5 = vrot.slane %v4641_v61, %v4657_v59 }
 0x368   : > { %v4663_v6 = vmul.f32 %v4646_v0, %v7126_v9  ;;  %v4664_v7 = vmul.f32 %v4650_v1, %v7128_v11  ;;  %v4665_v8 = vmul.f32 %v7204_v3, %v7134_v15  ;;  %v4666_v2 = vmul.f32 %v7206_v5, %v7136_v16 }
 0x369   : > { %v4667_v4 = vmul.f32 %v4646_v0, %v7130_v13  ;;  %v4668_v19 = vmul.f32 %v4650_v1, %v7132_v14  ;;  %v4669_v24 = vmul.f32 %v7204_v3, %v7138_v17  ;;  %v4670_v25 = vmul.f32 %v7206_v5, %v7140_v10 }
 0x36a   : > { %v4701_v9 = vadd.f32 %v7196_v62, %v4663_v6  ;;  %v4702_v11 = vadd.f32 %v7198_v63, %v4664_v7  ;;  %v4703_v30 = vadd.f32 %v7200_v58, %v4665_v8  ;;  %v4704_v15 = vadd.f32 %v7202_v60, %v4666_v2 }
 0x36b   : > { %v4705_v16 = vadd.f32 %v7196_v62, %v4667_v4  ;;  %v4706_v13 = vadd.f32 %v7198_v63, %v4668_v19  ;;  %v4707_v14 = vadd.f32 %v7200_v58, %v4669_v24  ;;  %v4708_v31 = vadd.f32 %v7202_v60, %v4670_v25 }
 0x36c   : > { %vm4717_vm0 = vcmp.ge.f32.partialorder %v4701_v9, 0.0  ;;  %vm4718_vm1 = vcmp.ge.f32.partialorder %v4702_v11, 0.0  ;;  %v4733_v17 = vmul.f32 0.2, %v4701_v9  ;;  %v4734_v10 = vmul.f32 0.2, %v4702_v11 }
 0x36d   : > { %vm4719_vm2 = vcmp.ge.f32.partialorder %v4703_v30, 0.0  ;;  %vm4720_vm3 = vcmp.ge.f32.partialorder %v4704_v15, 0.0  ;;  %v4735_v27 = vmul.f32 0.2, %v4703_v30  ;;  %v4736_v28 = vmul.f32 0.2, %v4704_v15 }
 0x36e   : > { %v4749_v32 = vsel %vm4717_vm0, %v4701_v9, %v4733_v17  ;;  %v4750_v33 = vsel %vm4718_vm1, %v4702_v11, %v4734_v10  ;;  %vm4721_vm4 = vcmp.ge.f32.partialorder %v4705_v16, 0.0  ;;  %vm4722_vm5 = vcmp.ge.f32.partialorder %v4706_v13, 0.0 }
 0x36f   : > { %v5436_v34 = vpack.c.bf16 %v4750_v33, %v4749_v32  ;;  %v4751_v37 = vsel %vm4719_vm2, %v4703_v30, %v4735_v27  ;;  %v4752_v38 = vsel %vm4720_vm3, %v4704_v15, %v4736_v28  ;;  %v4737_v39 = vmul.f32 0.2, %v4705_v16 }
 0x370   : > { %v5437_v40 = vpack.c.bf16 %v4752_v38, %v4751_v37  ;;  %v4738_v41 = vmul.f32 0.2, %v4706_v13  ;;  %vm4723_vm6 = vcmp.ge.f32.partialorder %v4707_v14, 0.0  ;;  %vm4724_vm7 = vcmp.ge.f32.partialorder %v4708_v31, 0.0 }
 0x371   : > { %4813 = vst [vmem:[%s7286_s4] sm:$0xff] %v5436_v34  ;;  %v4753_v42 = vsel %vm4721_vm4, %v4705_v16, %v4737_v39  ;;  %v4739_v43 = vmul.f32 0.2, %v4707_v14  ;;  %v4740_v35 = vmul.f32 0.2, %v4708_v31  ;;  %v4671_v36 = vmul.f32 %v4646_v0, %v7142_v26 }
 0x372   : > { %4814 = vst [vmem:[%s7286_s4 + $0x8] sm:$0xff] %v5437_v40  ;;  %v4754_v44 = vsel %vm4722_vm5, %v4706_v13, %v4738_v41  ;;  %v4672_v45 = vmul.f32 %v4650_v1, %v7144_v29  ;;  %v4673_v46 = vmul.f32 %v7204_v3, %v7146_v12  ;;  %v4674_v47 = vmul.f32 %v7206_v5, %v7148_v20 }
 0x373   : > { %v5438_v48 = vpack.c.bf16 %v4754_v44, %v4753_v42  ;;  %v4755_v49 = vsel %vm4723_vm6, %v4707_v14, %v4739_v43  ;;  %v4756_v50 = vsel %vm4724_vm7, %v4708_v31, %v4740_v35  ;;  %v4709_v51 = vadd.f32 %v7196_v62, %v4671_v36 }
 0x374   : > { %v5439_v52 = vpack.c.bf16 %v4756_v50, %v4755_v49  ;;  %v4710_v26 = vadd.f32 %v7198_v63, %v4672_v45  ;;  %v4711_v53 = vadd.f32 %v7200_v58, %v4673_v46  ;;  %v4712_v54 = vadd.f32 %v7202_v60, %v4674_v47 }
 0x375   : > { %4815 = vst [vmem:[%s7286_s4 + $0x10] sm:$0xff] %v5438_v48  ;;  %vm4725_vm8 = vcmp.ge.f32.partialorder %v4709_v51, 0.0  ;;  %v4741_v29 = vmul.f32 0.2, %v4709_v51  ;;  %v4675_v12 = vmul.f32 %v4646_v0, %v7150_v23  ;;  %v4676_v20 = vmul.f32 %v4650_v1, %v7152_v18 }
 0x376   : > { %4816 = vst [vmem:[%s7286_s4 + $0x18] sm:$0xff] %v5439_v52  ;;  %vm4726_vm9 = vcmp.ge.f32.partialorder %v4710_v26, 0.0  ;;  %v4742_v55 = vmul.f32 0.2, %v4710_v26  ;;  %vm4727_vm10 = vcmp.ge.f32.partialorder %v4711_v53, 0.0  ;;  %vm4728_vm11 = vcmp.ge.f32.partialorder %v4712_v54, 0.0 }
 0x377   : > { %v4757_v56 = vsel %vm4725_vm8, %v4709_v51, %v4741_v29  ;;  %v4743_v57 = vmul.f32 0.2, %v4711_v53  ;;  %v4744_v59 = vmul.f32 0.2, %v4712_v54  ;;  %v4713_v61 = vadd.f32 %v7196_v62, %v4675_v12 }
 0x378   : > { %v4758_v6 = vsel %vm4726_vm9, %v4710_v26, %v4742_v55  ;;  %v4714_v7 = vadd.f32 %v7198_v63, %v4676_v20  ;;  %v4677_v23 = vmul.f32 %v7204_v3, %v7154_v21  ;;  %v4678_v18 = vmul.f32 %v7206_v5, %v7156_v22 }
 0x379   : > { %v5440_v0 = vpack.c.bf16 %v4758_v6, %v4757_v56  ;;  %v4759_v1 = vsel %vm4727_vm10, %v4711_v53, %v4743_v57  ;;  %v4760_v8 = vsel %vm4728_vm11, %v4712_v54, %v4744_v59  ;;  %vm4729_vm12 = vcmp.ge.f32.partialorder %v4713_v61, 0.0 }
 0x37a   : > { %v5441_v2 = vpack.c.bf16 %v4760_v8, %v4759_v1  ;;  %vm4730_vm13 = vcmp.ge.f32.partialorder %v4714_v7, 0.0  ;;  %v4745_v4 = vmul.f32 0.2, %v4713_v61  ;;  %v4746_v19 = vmul.f32 0.2, %v4714_v7 }
 0x37b   : > { %4817 = vst [vmem:[%s7286_s4 + $0x20] sm:$0xff] %v5440_v0  ;;  %v4715_v62 = vadd.f32 %v7200_v58, %v4677_v23  ;;  %v4716_v63 = vadd.f32 %v7202_v60, %v4678_v18 }
 0x37c   : > { %4818 = vst [vmem:[%s7286_s4 + $0x28] sm:$0xff] %v5441_v2  ;;  %v4761_v21 = vsel %vm4729_vm12, %v4713_v61, %v4745_v4  ;;  %v4762_v22 = vsel %vm4730_vm13, %v4714_v7, %v4746_v19 }
 0x37d   : > { %v5442_v3 = vpack.c.bf16 %v4762_v22, %v4761_v21  ;;  %vm4731_vm14 = vcmp.ge.f32.partialorder %v4715_v62, 0.0  ;;  %vm4732_vm15 = vcmp.ge.f32.partialorder %v4716_v63, 0.0  ;;  %v4747_v5 = vmul.f32 0.2, %v4715_v62 }
 0x37e   : > { %v4748_v24 = vmul.f32 0.2, %v4716_v63 }
 0x37f   : > { %4819 = vst [vmem:[%s7286_s4 + $0x30] sm:$0xff] %v5442_v3  ;;  %v4763_v25 = vsel %vm4731_vm14, %v4715_v62, %v4747_v5 }
 0x380   : > { %v4764_v9 = vsel %vm4732_vm15, %v4716_v63, %v4748_v24 }
 0x381   : > { %v5443_v58 = vpack.c.bf16 %v4764_v9, %v4763_v25 }
 0x383   : > { %4820 = vst [vmem:[%s7286_s4 + $0x38] sm:$0xff] %v5443_v58 }
 0x384 PF: > { %p11_p11 = scmp.ge.s32.totalorder %s6428_s19, 4   ;;  %s7287_s15 = smov %s6376_s16 }
 0x385   : > { %s7288_s16 = smov %s6437_s22  ;;  %s7289_s17 = smov %s6428_s19 }
 0x386   :  { %13 = sbr.rel (!%p11_p11) target bundleno = 2 (0x2), region = 101 }

</bundles_post_ra>
